<compile_context>
chip_gen: v7x
topology: tpu7x:2x2x1
jax: 0.10.0
libtpu: 0.0.40
codegen_flags: <defaults>
</compile_context>

<pallas_src>
import functools

import jax
import jax.numpy as jnp
from jax import lax
from jax.experimental import pallas as pl
from jax.experimental.pallas import tpu as pltpu

START_TAG = '<START>'
STOP_TAG = '<STOP>'


def _round_up(x, m):
    return -(-x // m) * m


def bilstm_crf_kernel(emb_ref, len_ref, wih_cat_ref, bias_cat_ref,
                      whh_f_ref, whh_b_ref, wtag_f_ref, wtag_b_ref, btag_ref,
                      trans_ref, score_ref,
                      gxf_ref, gxb_ref, out_f, out_b, feats_ref,
                      *, L, B, E, HP, NT, start_idx, stop_idx):
    G = 4 * HP
    lengths = len_ref[...]                                    # (B, 1) int32

    # ---- hoisted input projection: ONE big MXU matmul, biases pre-folded.
    #      fwd|bwd split offset G is a multiple of 128 -> lane-aligned slice.
    emb2d = emb_ref[...].reshape(L * B, E)
    gx2d = (jnp.dot(emb2d, wih_cat_ref[...], preferred_element_type=jnp.float32)
            + bias_cat_ref[...])                              # (L*B, 2*G)
    gxf_ref[...] = gx2d[:, 0:G].reshape(L, B, G)
    gxb_ref[...] = gx2d[:, G:2 * G].reshape(L, B, G)

    whh_f = whh_f_ref[...]                                    # (HP, 4*HP)
    whh_b = whh_b_ref[...]

    def cell(gates, c):
        # PyTorch LSTM gate order [i, f, g, o]; each gate is a 128-lane block.
        i_g = jax.nn.sigmoid(gates[:, 0 * HP:1 * HP])
        f_g = jax.nn.sigmoid(gates[:, 1 * HP:2 * HP])
        g_g = jnp.tanh(gates[:, 2 * HP:3 * HP])
        o_g = jax.nn.sigmoid(gates[:, 3 * HP:4 * HP])
        c_new = f_g * c + i_g * g_g
        h_new = o_g * jnp.tanh(c_new)
        return h_new, c_new

    h0 = jnp.zeros((B, HP), jnp.float32)

    # ---- merged fwd/bwd LSTM recurrence: two independent dep chains per iter ----
    def lstm_body(i, carry):
        h_f, c_f, h_b, c_b = carry
        tf = i
        tb = L - 1 - i
        gates_f = gxf_ref[tf] + jnp.dot(h_f, whh_f, preferred_element_type=jnp.float32)
        gates_b = gxb_ref[tb] + jnp.dot(h_b, whh_b, preferred_element_type=jnp.float32)
        hf_new, cf_new = cell(gates_f, c_f)
        hb_new, cb_new = cell(gates_b, c_b)
        valid_f = tf < lengths                                # (B, 1)
        valid_b = tb < lengths
        # pad_packed_sequence semantics: outputs zero for t >= len (lane-dense stores)
        out_f[pl.ds(tf, 1)] = jnp.where(valid_f, hf_new, 0.0)[None]
        out_b[pl.ds(tb, 1)] = jnp.where(valid_b, hb_new, 0.0)[None]
        # fwd state frozen past len; bwd state starts fresh at t = len-1
        return (jnp.where(valid_f, hf_new, h_f), jnp.where(valid_f, cf_new, c_f),
                jnp.where(valid_b, hb_new, h_b), jnp.where(valid_b, cb_new, c_b))

    lax.fori_loop(0, L, lstm_body, (h0, h0, h0, h0),
                  unroll=(True if L <= 16 else 8))

    # ---- hidden2tag linear: split matmul (padded rows of wtag are zero),
    #      feats stays in VMEM (never DMA'd to HBM) ----
    outf2d = out_f[...].reshape(L * B, HP)
    outb2d = out_b[...].reshape(L * B, HP)
    feats2d = (jnp.dot(outf2d, wtag_f_ref[...], preferred_element_type=jnp.float32)
               + jnp.dot(outb2d, wtag_b_ref[...], preferred_element_type=jnp.float32)
               + btag_ref[...])                               # (L*B, NT)
    feats_ref[...] = feats2d.reshape(L, B, NT)

    # ---- Viterbi recursion (max-product); loop-invariant broadcast hoisted ----
    trans = trans_ref[...]                                    # (NT, NT)
    trans_b = jnp.broadcast_to(trans[None, :, :], (B, NT, NT))
    col = lax.broadcasted_iota(jnp.int32, (B, NT), 1)
    fv0 = jnp.where(col == start_idx, 0.0, -10000.0).astype(jnp.float32)
    fin0 = jnp.zeros((B, NT), jnp.float32)

    def vit_body(t, carry):
        fv, fin = carry
        feat = feats_ref[t]                                   # (B, NT)
        scores = fv[:, None, :] + trans_b                     # (B, next_tag, prev_tag)
        new_fv = jnp.max(scores, axis=2) + feat               # (B, NT)
        fin = jnp.where(t == lengths - 1, new_fv, fin)        # capture at len-1
        return (new_fv, fin)

    _, final_var = lax.fori_loop(0, L, vit_body, (fv0, fin0),
                                 unroll=(True if L <= 8 else 4))
    terminal = final_var + trans[stop_idx:stop_idx + 1, :]    # (B, NT)
    score_ref[...] = jnp.max(terminal, axis=1, keepdims=True)


def init_params(key, vocab_size, embedding_dim, hidden_dim, tag_to_ix):
    NT = len(tag_to_ix) - 1
    H2 = hidden_dim // 2
    ks = jax.random.split(key, 12)
    s = 0.1
    p = {
        'embedding': jax.random.normal(ks[0], (vocab_size, embedding_dim), jnp.float32),
        'w_ih_f': s * jax.random.normal(ks[1], (4 * H2, embedding_dim), jnp.float32),
        'w_hh_f': s * jax.random.normal(ks[2], (4 * H2, H2), jnp.float32),
        'b_ih_f': s * jax.random.normal(ks[3], (4 * H2,), jnp.float32),
        'b_hh_f': s * jax.random.normal(ks[4], (4 * H2,), jnp.float32),
        'w_ih_b': s * jax.random.normal(ks[5], (4 * H2, embedding_dim), jnp.float32),
        'w_hh_b': s * jax.random.normal(ks[6], (4 * H2, H2), jnp.float32),
        'b_ih_b': s * jax.random.normal(ks[7], (4 * H2,), jnp.float32),
        'b_hh_b': s * jax.random.normal(ks[8], (4 * H2,), jnp.float32),
        'w_tag': s * jax.random.normal(ks[9], (NT, hidden_dim), jnp.float32),
        'b_tag': s * jax.random.normal(ks[10], (NT,), jnp.float32),
    }
    trans = jax.random.normal(ks[11], (NT, NT), jnp.float32)
    trans = trans.at[tag_to_ix[START_TAG], :].set(-10000.0)
    trans = trans.at[:, tag_to_ix[STOP_TAG]].set(-10000.0)
    p['transitions'] = trans
    return p


def _pad_gates_T(w, H2, HP):
    """(4*H2, K) gate-stacked PyTorch weight -> (K, 4*HP) transposed layout where
    each gate occupies a 128-aligned lane block (columns H2..HP-1 are zero)."""
    K = w.shape[1]
    out = jnp.zeros((K, 4 * HP), jnp.float32)
    for k in range(4):
        out = out.at[:, k * HP:k * HP + H2].set(w[k * H2:(k + 1) * H2, :].T)
    return out


def _pad_gate_bias(b, H2, HP):
    out = jnp.zeros((4 * HP,), jnp.float32)
    for k in range(4):
        out = out.at[k * HP:k * HP + H2].set(b[k * H2:(k + 1) * H2])
    return out


def _vmem_limit_bytes(L, B_blk, E, HP, NT):
    """Per-block VMEM estimate (scratch + double-buffered blocks + matmul temps)."""
    f32 = 4
    ntl = _round_up(NT, 128)
    el = _round_up(E, 128)
    scratch = f32 * L * B_blk * (2 * 4 * HP + 2 * HP + ntl)
    blocks = f32 * (L * B_blk * el + B_blk * 128              # embeds, lens
                    + E * 8 * HP + 8 * HP                     # wih_cat, bias_cat
                    + 2 * HP * 4 * HP                         # whh f/b
                    + 2 * HP * ntl + ntl                      # wtag f/b, btag
                    + ntl * ntl + B_blk * 128)                # trans, score
    temps = f32 * 2 * L * B_blk * 8 * HP                      # gx2d + feats2d etc.
    est = scratch + 2 * blocks + temps
    return int(max(32 * 1024 * 1024, min(100 * 1024 * 1024, 2 * est)))


def bilstm_crf_forward(params, sentence, lengths, tag_to_ix, hidden_dim,
                       mode=None, batch_block=8):
    B, L = sentence.shape
    H2 = hidden_dim // 2
    HP = _round_up(H2, 128)          # lane-aligned gate / hidden width
    NT = len(tag_to_ix) - 1
    E = params['embedding'].shape[1]
    start_idx = tag_to_ix[START_TAG]
    stop_idx = tag_to_ix[STOP_TAG]

    B_blk = _round_up(batch_block, 8)          # batch tile (sublane multiple)
    B_pad = _round_up(B, B_blk)
    n_blocks = B_pad // B_blk

    # glue: embedding lookup + layout transpose to time-major
    embeds = jnp.take(params['embedding'], sentence, axis=0)            # (B, L, E)
    embeds_t = jnp.transpose(embeds, (1, 0, 2)).astype(jnp.float32)     # (L, B, E)
    lens = jnp.asarray(lengths, jnp.int32).reshape(B, 1)
    if B_pad != B:
        embeds_t = jnp.pad(embeds_t, ((0, 0), (0, B_pad - B), (0, 0)))
        lens = jnp.pad(lens, ((0, B_pad - B), (0, 0)), constant_values=1)

    # pre-fold weights: per-gate 128-lane padding, transpose, concat directions
    # (fwd|bwd split offset 4*HP is 128-aligned), merge ih+hh biases.
    wih_f = _pad_gates_T(params['w_ih_f'], H2, HP)                      # (E, 4*HP)
    wih_b = _pad_gates_T(params['w_ih_b'], H2, HP)
    wih_cat = jnp.concatenate([wih_f, wih_b], axis=1)                   # (E, 8*HP)
    bias_cat = jnp.concatenate(
        [_pad_gate_bias(params['b_ih_f'] + params['b_hh_f'], H2, HP),
         _pad_gate_bias(params['b_ih_b'] + params['b_hh_b'], H2, HP)]).reshape(1, -1)
    whh_f = jnp.zeros((HP, 4 * HP), jnp.float32).at[:H2].set(
        _pad_gates_T(params['w_hh_f'], H2, HP))                         # (HP, 4*HP)
    whh_b = jnp.zeros((HP, 4 * HP), jnp.float32).at[:H2].set(
        _pad_gates_T(params['w_hh_b'], H2, HP))
    wtag_f = jnp.zeros((HP, NT), jnp.float32).at[:H2].set(params['w_tag'][:, :H2].T)
    wtag_b = jnp.zeros((HP, NT), jnp.float32).at[:H2].set(params['w_tag'][:, H2:].T)
    btag = params['b_tag'].reshape(1, -1)

    kernel = functools.partial(bilstm_crf_kernel, L=L, B=B_blk, E=E, HP=HP, NT=NT,
                               start_idx=start_idx, stop_idx=stop_idx)

    def full(shape):
        return pl.BlockSpec(shape, lambda b: (0,) * len(shape))

    grid_spec = pltpu.PrefetchScalarGridSpec(
        num_scalar_prefetch=0,
        grid=(n_blocks,),                                      # batch-parallel grid
        in_specs=[
            pl.BlockSpec((L, B_blk, E), lambda b: (0, b, 0)),  # embeds (batch-tiled)
            pl.BlockSpec((B_blk, 1), lambda b: (b, 0)),        # lengths
            full((E, 8 * HP)),                                 # wih_cat
            full((1, 8 * HP)),                                 # bias_cat
            full((HP, 4 * HP)), full((HP, 4 * HP)),            # whh f/b
            full((HP, NT)), full((HP, NT)), full((1, NT)),     # wtag f/b, btag
            full((NT, NT)),                                    # transitions
        ],
        out_specs=pl.BlockSpec((B_blk, 1), lambda b: (b, 0)),
        scratch_shapes=[
            pltpu.VMEM((L, B_blk, 4 * HP), jnp.float32),       # gx fwd
            pltpu.VMEM((L, B_blk, 4 * HP), jnp.float32),       # gx bwd
            pltpu.VMEM((L, B_blk, HP), jnp.float32),           # fwd hidden
            pltpu.VMEM((L, B_blk, HP), jnp.float32),           # bwd hidden
            pltpu.VMEM((L, B_blk, NT), jnp.float32),           # feats (VMEM only)
        ],
    )

    score = pl.pallas_call(
        kernel,
        out_shape=jax.ShapeDtypeStruct((B_pad, 1), jnp.float32),
        grid_spec=grid_spec,
        compiler_params=pltpu.CompilerParams(
            dimension_semantics=("parallel",),
            vmem_limit_bytes=_vmem_limit_bytes(L, B_blk, E, HP, NT)),
    )(embeds_t, lens, wih_cat, bias_cat, whh_f, whh_b, wtag_f, wtag_b, btag,
      params['transitions'])

    # TODO(synk): mode='decode' backtrace returns ragged per-sample Python lists
    #             of tags (data-dependent lengths); not expressible as a fixed-shape
    #             kernel output, so only the mode=None path (score, []) is provided.
    return score[:B], []


if __name__ == "__main__":
    vocab_size, embedding_dim, hidden_dim = 20, 32, 32
    tag_to_ix = {'B': 0, 'I': 1, 'O': 2, START_TAG: 3, STOP_TAG: 4, '<PAD>': 5}
    B, L = 2, 8

    key = jax.random.PRNGKey(0)
    pkey, skey = jax.random.split(key)
    params = init_params(pkey, vocab_size, embedding_dim, hidden_dim, tag_to_ix)
    sentence = jax.random.randint(skey, (B, L), 0, vocab_size, dtype=jnp.int32)
    lengths = [8, 5]   # sorted descending, as pack_padded_sequence requires

    score, tag_seq = bilstm_crf_forward(params, sentence, lengths, tag_to_ix, hidden_dim)
    score = jax.block_until_ready(score)
    assert score.shape == (B, 1)
    assert bool(jnp.all(jnp.isfinite(score)))
    assert tag_seq == []
    print("KERNEL_OK")
</pallas_src>

<mosaic_0001>
module attributes {stable_mosaic.version = 11 : i64} {
  func.func @bilstm_crf_kernel(%arg0: i32, %arg1: memref<8x8x32xf32, #tpu.memory_space<vmem>>, %arg2: memref<8x1xi32, #tpu.memory_space<vmem>>, %arg3: memref<32x1024xf32, #tpu.memory_space<vmem>>, %arg4: memref<1x1024xf32, #tpu.memory_space<vmem>>, %arg5: memref<128x512xf32, #tpu.memory_space<vmem>>, %arg6: memref<128x512xf32, #tpu.memory_space<vmem>>, %arg7: memref<128x5xf32, #tpu.memory_space<vmem>>, %arg8: memref<128x5xf32, #tpu.memory_space<vmem>>, %arg9: memref<1x5xf32, #tpu.memory_space<vmem>>, %arg10: memref<5x5xf32, #tpu.memory_space<vmem>>, %arg11: memref<8x1xf32, #tpu.memory_space<vmem>>, %arg12: memref<8x8x512xf32, #tpu.memory_space<vmem>>, %arg13: memref<8x8x512xf32, #tpu.memory_space<vmem>>, %arg14: memref<8x8x128xf32, #tpu.memory_space<vmem>>, %arg15: memref<8x8x128xf32, #tpu.memory_space<vmem>>, %arg16: memref<8x8x5xf32, #tpu.memory_space<vmem>>) attributes {dimension_semantics = [#tpu.dimension_semantics<parallel>], iteration_bounds = array<i64: 1>, scalar_prefetch = 0 : i64, scratch_operands = 5 : i64, tpu.core_type = #tpu.core_type<tc>, window_params = [{transform_indices = @transform_0, window_bounds = array<i64: 8, 8, 32>}, {transform_indices = @transform_1, window_bounds = array<i64: 8, 1>}, {pipeline_mode = #tpu.pipeline_mode<synchronous>, transform_indices = @transform_2, window_bounds = array<i64: 32, 1024>}, {pipeline_mode = #tpu.pipeline_mode<synchronous>, transform_indices = @transform_3, window_bounds = array<i64: 1, 1024>}, {pipeline_mode = #tpu.pipeline_mode<synchronous>, transform_indices = @transform_4, window_bounds = array<i64: 128, 512>}, {pipeline_mode = #tpu.pipeline_mode<synchronous>, transform_indices = @transform_5, window_bounds = array<i64: 128, 512>}, {pipeline_mode = #tpu.pipeline_mode<synchronous>, transform_indices = @transform_6, window_bounds = array<i64: 128, 5>}, {pipeline_mode = #tpu.pipeline_mode<synchronous>, transform_indices = @transform_7, window_bounds = array<i64: 128, 5>}, {pipeline_mode = #tpu.pipeline_mode<synchronous>, transform_indices = @transform_8, window_bounds = array<i64: 1, 5>}, {pipeline_mode = #tpu.pipeline_mode<synchronous>, transform_indices = @transform_9, window_bounds = array<i64: 5, 5>}, {transform_indices = @transform_10, window_bounds = array<i64: 8, 1>}]} {
    %c0 = arith.constant 0 : index
    %c0_0 = arith.constant 0 : index
    %0 = vector.load %arg2[%c0, %c0_0] : memref<8x1xi32, #tpu.memory_space<vmem>>, vector<8x1xi32>
    %c0_1 = arith.constant 0 : index
    %c0_2 = arith.constant 0 : index
    %c0_3 = arith.constant 0 : index
    %1 = vector.load %arg1[%c0_1, %c0_2, %c0_3] : memref<8x8x32xf32, #tpu.memory_space<vmem>>, vector<8x8x32xf32>
    %2 = vector.shape_cast %1 : vector<8x8x32xf32> to vector<64x32xf32>
    %c0_4 = arith.constant 0 : index
    %c0_5 = arith.constant 0 : index
    %3 = vector.load %arg3[%c0_4, %c0_5] : memref<32x1024xf32, #tpu.memory_space<vmem>>, vector<32x1024xf32>
    %cst = arith.constant dense<0.000000e+00> : vector<64x1024xf32>
    %4 = tpu.matmul %2, %3, %cst {dimension_numbers = #tpu.dot_dimension_numbers<[1], [0], [0], [1], [0, 0, 1, 1], [], []>} : vector<64x32xf32>, vector<32x1024xf32>, vector<64x1024xf32> -> vector<64x1024xf32>
    %c0_6 = arith.constant 0 : index
    %c0_7 = arith.constant 0 : index
    %5 = vector.load %arg4[%c0_6, %c0_7] : memref<1x1024xf32, #tpu.memory_space<vmem>>, vector<1x1024xf32>
    %6 = vector.broadcast %5 : vector<1x1024xf32> to vector<64x1024xf32>
    %7 = arith.addf %4, %6 : vector<64x1024xf32>
    %8 = vector.extract_strided_slice %7 {offsets = [0, 0], sizes = [64, 512], strides = [1, 1]} : vector<64x1024xf32> to vector<64x512xf32>
    %9 = vector.shape_cast %8 : vector<64x512xf32> to vector<8x8x512xf32>
    %c0_8 = arith.constant 0 : index
    %c0_9 = arith.constant 0 : index
    %c0_10 = arith.constant 0 : index
    %10 = vector.load %arg12[%c0_8, %c0_9, %c0_10] : memref<8x8x512xf32, #tpu.memory_space<vmem>>, vector<8x8x512xf32>
    tpu.vector_store %arg12[%c0_8, %c0_9, %c0_10], %9 {strides = array<i32>} : memref<8x8x512xf32, #tpu.memory_space<vmem>>, vector<8x8x512xf32>,
    %11 = vector.extract_strided_slice %7 {offsets = [0, 512], sizes = [64, 512], strides = [1, 1]} : vector<64x1024xf32> to vector<64x512xf32>
    %12 = vector.shape_cast %11 : vector<64x512xf32> to vector<8x8x512xf32>
    %c0_11 = arith.constant 0 : index
    %c0_12 = arith.constant 0 : index
    %c0_13 = arith.constant 0 : index
    %13 = vector.load %arg13[%c0_11, %c0_12, %c0_13] : memref<8x8x512xf32, #tpu.memory_space<vmem>>, vector<8x8x512xf32>
    tpu.vector_store %arg13[%c0_11, %c0_12, %c0_13], %12 {strides = array<i32>} : memref<8x8x512xf32, #tpu.memory_space<vmem>>, vector<8x8x512xf32>,
    %c0_14 = arith.constant 0 : index
    %c0_15 = arith.constant 0 : index
    %14 = vector.load %arg5[%c0_14, %c0_15] : memref<128x512xf32, #tpu.memory_space<vmem>>, vector<128x512xf32>
    %c0_16 = arith.constant 0 : index
    %c0_17 = arith.constant 0 : index
    %15 = vector.load %arg6[%c0_16, %c0_17] : memref<128x512xf32, #tpu.memory_space<vmem>>, vector<128x512xf32>
    %cst_18 = arith.constant 0.000000e+00 : f32
    %16 = vector.broadcast %cst_18 : f32 to vector<8x128xf32>
    %c0_i32 = arith.constant 0 : i32
    %c7_i32 = arith.constant 7 : i32
    %17 = arith.subi %c7_i32, %c0_i32 : i32
    %18 = arith.index_cast %c0_i32 : i32 to index
    %c0_19 = arith.constant 0 : index
    %c0_20 = arith.constant 0 : index
    %19 = vector.load %arg12[%18, %c0_19, %c0_20] : memref<8x8x512xf32, #tpu.memory_space<vmem>>, vector<1x8x512xf32>
    %20 = vector.shape_cast %19 : vector<1x8x512xf32> to vector<8x512xf32>
    %cst_21 = arith.constant dense<0.000000e+00> : vector<8x512xf32>
    %21 = tpu.matmul %16, %14, %cst_21 {dimension_numbers = #tpu.dot_dimension_numbers<[1], [0], [0], [1], [0, 0, 1, 1], [], []>} : vector<8x128xf32>, vector<128x512xf32>, vector<8x512xf32> -> vector<8x512xf32>
    %22 = arith.addf %20, %21 : vector<8x512xf32>
    %23 = arith.index_cast %17 : i32 to index
    %c0_22 = arith.constant 0 : index
    %c0_23 = arith.constant 0 : index
    %24 = vector.load %arg13[%23, %c0_22, %c0_23] : memref<8x8x512xf32, #tpu.memory_space<vmem>>, vector<1x8x512xf32>
    %25 = vector.shape_cast %24 : vector<1x8x512xf32> to vector<8x512xf32>
    %cst_24 = arith.constant dense<0.000000e+00> : vector<8x512xf32>
    %26 = tpu.matmul %16, %15, %cst_24 {dimension_numbers = #tpu.dot_dimension_numbers<[1], [0], [0], [1], [0, 0, 1, 1], [], []>} : vector<8x128xf32>, vector<128x512xf32>, vector<8x512xf32> -> vector<8x512xf32>
    %27 = arith.addf %25, %26 : vector<8x512xf32>
    %28 = vector.extract_strided_slice %22 {offsets = [0, 0], sizes = [8, 128], strides = [1, 1]} : vector<8x512xf32> to vector<8x128xf32>
    %29 = arith.negf %28 : vector<8x128xf32>
    %30 = math.exp %29 : vector<8x128xf32>
    %cst_25 = arith.constant 1.000000e+00 : f32
    %31 = vector.broadcast %cst_25 : f32 to vector<8x128xf32>
    %32 = arith.addf %31, %30 : vector<8x128xf32>
    %33 = arith.divf %31, %32 : vector<8x128xf32>
    %34 = vector.extract_strided_slice %22 {offsets = [0, 128], sizes = [8, 128], strides = [1, 1]} : vector<8x512xf32> to vector<8x128xf32>
    %35 = arith.negf %34 : vector<8x128xf32>
    %36 = math.exp %35 : vector<8x128xf32>
    %cst_26 = arith.constant 1.000000e+00 : f32
    %37 = vector.broadcast %cst_26 : f32 to vector<8x128xf32>
    %38 = arith.addf %37, %36 : vector<8x128xf32>
    %39 = arith.divf %37, %38 : vector<8x128xf32>
    %40 = vector.extract_strided_slice %22 {offsets = [0, 256], sizes = [8, 128], strides = [1, 1]} : vector<8x512xf32> to vector<8x128xf32>
    %41 = math.tanh %40 : vector<8x128xf32>
    %42 = vector.extract_strided_slice %22 {offsets = [0, 384], sizes = [8, 128], strides = [1, 1]} : vector<8x512xf32> to vector<8x128xf32>
    %43 = arith.negf %42 : vector<8x128xf32>
    %44 = math.exp %43 : vector<8x128xf32>
    %cst_27 = arith.constant 1.000000e+00 : f32
    %45 = vector.broadcast %cst_27 : f32 to vector<8x128xf32>
    %46 = arith.addf %45, %44 : vector<8x128xf32>
    %47 = arith.divf %45, %46 : vector<8x128xf32>
    %48 = arith.mulf %39, %16 : vector<8x128xf32>
    %49 = arith.mulf %33, %41 : vector<8x128xf32>
    %50 = arith.addf %48, %49 : vector<8x128xf32>
    %51 = math.tanh %50 : vector<8x128xf32>
    %52 = arith.mulf %47, %51 : vector<8x128xf32>
    %53 = vector.extract_strided_slice %27 {offsets = [0, 0], sizes = [8, 128], strides = [1, 1]} : vector<8x512xf32> to vector<8x128xf32>
    %54 = arith.negf %53 : vector<8x128xf32>
    %55 = math.exp %54 : vector<8x128xf32>
    %cst_28 = arith.constant 1.000000e+00 : f32
    %56 = vector.broadcast %cst_28 : f32 to vector<8x128xf32>
    %57 = arith.addf %56, %55 : vector<8x128xf32>
    %58 = arith.divf %56, %57 : vector<8x128xf32>
    %59 = vector.extract_strided_slice %27 {offsets = [0, 128], sizes = [8, 128], strides = [1, 1]} : vector<8x512xf32> to vector<8x128xf32>
    %60 = arith.negf %59 : vector<8x128xf32>
    %61 = math.exp %60 : vector<8x128xf32>
    %cst_29 = arith.constant 1.000000e+00 : f32
    %62 = vector.broadcast %cst_29 : f32 to vector<8x128xf32>
    %63 = arith.addf %62, %61 : vector<8x128xf32>
    %64 = arith.divf %62, %63 : vector<8x128xf32>
    %65 = vector.extract_strided_slice %27 {offsets = [0, 256], sizes = [8, 128], strides = [1, 1]} : vector<8x512xf32> to vector<8x128xf32>
    %66 = math.tanh %65 : vector<8x128xf32>
    %67 = vector.extract_strided_slice %27 {offsets = [0, 384], sizes = [8, 128], strides = [1, 1]} : vector<8x512xf32> to vector<8x128xf32>
    %68 = arith.negf %67 : vector<8x128xf32>
    %69 = math.exp %68 : vector<8x128xf32>
    %cst_30 = arith.constant 1.000000e+00 : f32
    %70 = vector.broadcast %cst_30 : f32 to vector<8x128xf32>
    %71 = arith.addf %70, %69 : vector<8x128xf32>
    %72 = arith.divf %70, %71 : vector<8x128xf32>
    %73 = arith.mulf %64, %16 : vector<8x128xf32>
    %74 = arith.mulf %58, %66 : vector<8x128xf32>
    %75 = arith.addf %73, %74 : vector<8x128xf32>
    %76 = math.tanh %75 : vector<8x128xf32>
    %77 = arith.mulf %72, %76 : vector<8x128xf32>
    %78 = vector.broadcast %c0_i32 : i32 to vector<8x1xi32>
    %79 = arith.cmpi slt, %78, %0 : vector<8x1xi32>
    %80 = vector.broadcast %17 : i32 to vector<8x1xi32>
    %81 = arith.cmpi slt, %80, %0 : vector<8x1xi32>
    %cst_31 = arith.constant 0.000000e+00 : f32
    %82 = vector.shape_cast %79 : vector<8x1xi1> to vector<8x1xi1>
    %83 = vector.broadcast %82 : vector<8x1xi1> to vector<8x128xi1>
    %84 = vector.broadcast %cst_31 : f32 to vector<8x128xf32>
    %85 = arith.select %83, %52, %84 : vector<8x128xi1>, vector<8x128xf32>
    %86 = vector.shape_cast %85 : vector<8x128xf32> to vector<1x8x128xf32>
    %87 = arith.index_cast %c0_i32 : i32 to index
    %c0_32 = arith.constant 0 : index
    %c0_33 = arith.constant 0 : index
    %88 = vector.load %arg14[%87, %c0_32, %c0_33] : memref<8x8x128xf32, #tpu.memory_space<vmem>>, vector<1x8x128xf32>
    tpu.vector_store %arg14[%87, %c0_32, %c0_33], %86 {strides = array<i32>} : memref<8x8x128xf32, #tpu.memory_space<vmem>>, vector<1x8x128xf32>,
    %cst_34 = arith.constant 0.000000e+00 : f32
    %89 = vector.shape_cast %81 : vector<8x1xi1> to vector<8x1xi1>
    %90 = vector.broadcast %89 : vector<8x1xi1> to vector<8x128xi1>
    %91 = vector.broadcast %cst_34 : f32 to vector<8x128xf32>
    %92 = arith.select %90, %77, %91 : vector<8x128xi1>, vector<8x128xf32>
    %93 = vector.shape_cast %92 : vector<8x128xf32> to vector<1x8x128xf32>
    %94 = arith.index_cast %17 : i32 to index
    %c0_35 = arith.constant 0 : index
    %c0_36 = arith.constant 0 : index
    %95 = vector.load %arg15[%94, %c0_35, %c0_36] : memref<8x8x128xf32, #tpu.memory_space<vmem>>, vector<1x8x128xf32>
    tpu.vector_store %arg15[%94, %c0_35, %c0_36], %93 {strides = array<i32>} : memref<8x8x128xf32, #tpu.memory_space<vmem>>, vector<1x8x128xf32>,
    %96 = vector.shape_cast %79 : vector<8x1xi1> to vector<8x1xi1>
    %97 = vector.broadcast %96 : vector<8x1xi1> to vector<8x128xi1>
    %98 = arith.select %97, %52, %16 : vector<8x128xi1>, vector<8x128xf32>
    %99 = vector.shape_cast %79 : vector<8x1xi1> to vector<8x1xi1>
    %100 = vector.broadcast %99 : vector<8x1xi1> to vector<8x128xi1>
    %101 = arith.select %100, %50, %16 : vector<8x128xi1>, vector<8x128xf32>
    %102 = vector.shape_cast %81 : vector<8x1xi1> to vector<8x1xi1>
    %103 = vector.broadcast %102 : vector<8x1xi1> to vector<8x128xi1>
    %104 = arith.select %103, %77, %16 : vector<8x128xi1>, vector<8x128xf32>
    %105 = vector.shape_cast %81 : vector<8x1xi1> to vector<8x1xi1>
    %106 = vector.broadcast %105 : vector<8x1xi1> to vector<8x128xi1>
    %107 = arith.select %106, %75, %16 : vector<8x128xi1>, vector<8x128xf32>
    %c1_i32 = arith.constant 1 : i32
    %c7_i32_37 = arith.constant 7 : i32
    %108 = arith.subi %c7_i32_37, %c1_i32 : i32
    %109 = arith.index_cast %c1_i32 : i32 to index
    %c0_38 = arith.constant 0 : index
    %c0_39 = arith.constant 0 : index
    %110 = vector.load %arg12[%109, %c0_38, %c0_39] : memref<8x8x512xf32, #tpu.memory_space<vmem>>, vector<1x8x512xf32>
    %111 = vector.shape_cast %110 : vector<1x8x512xf32> to vector<8x512xf32>
    %cst_40 = arith.constant dense<0.000000e+00> : vector<8x512xf32>
    %112 = tpu.matmul %98, %14, %cst_40 {dimension_numbers = #tpu.dot_dimension_numbers<[1], [0], [0], [1], [0, 0, 1, 1], [], []>} : vector<8x128xf32>, vector<128x512xf32>, vector<8x512xf32> -> vector<8x512xf32>
    %113 = arith.addf %111, %112 : vector<8x512xf32>
    %114 = arith.index_cast %108 : i32 to index
    %c0_41 = arith.constant 0 : index
    %c0_42 = arith.constant 0 : index
    %115 = vector.load %arg13[%114, %c0_41, %c0_42] : memref<8x8x512xf32, #tpu.memory_space<vmem>>, vector<1x8x512xf32>
    %116 = vector.shape_cast %115 : vector<1x8x512xf32> to vector<8x512xf32>
    %cst_43 = arith.constant dense<0.000000e+00> : vector<8x512xf32>
    %117 = tpu.matmul %104, %15, %cst_43 {dimension_numbers = #tpu.dot_dimension_numbers<[1], [0], [0], [1], [0, 0, 1, 1], [], []>} : vector<8x128xf32>, vector<128x512xf32>, vector<8x512xf32> -> vector<8x512xf32>
    %118 = arith.addf %116, %117 : vector<8x512xf32>
    %119 = vector.extract_strided_slice %113 {offsets = [0, 0], sizes = [8, 128], strides = [1, 1]} : vector<8x512xf32> to vector<8x128xf32>
    %120 = arith.negf %119 : vector<8x128xf32>
    %121 = math.exp %120 : vector<8x128xf32>
    %cst_44 = arith.constant 1.000000e+00 : f32
    %122 = vector.broadcast %cst_44 : f32 to vector<8x128xf32>
    %123 = arith.addf %122, %121 : vector<8x128xf32>
    %124 = arith.divf %122, %123 : vector<8x128xf32>
    %125 = vector.extract_strided_slice %113 {offsets = [0, 128], sizes = [8, 128], strides = [1, 1]} : vector<8x512xf32> to vector<8x128xf32>
    %126 = arith.negf %125 : vector<8x128xf32>
    %127 = math.exp %126 : vector<8x128xf32>
    %cst_45 = arith.constant 1.000000e+00 : f32
    %128 = vector.broadcast %cst_45 : f32 to vector<8x128xf32>
    %129 = arith.addf %128, %127 : vector<8x128xf32>
    %130 = arith.divf %128, %129 : vector<8x128xf32>
    %131 = vector.extract_strided_slice %113 {offsets = [0, 256], sizes = [8, 128], strides = [1, 1]} : vector<8x512xf32> to vector<8x128xf32>
    %132 = math.tanh %131 : vector<8x128xf32>
    %133 = vector.extract_strided_slice %113 {offsets = [0, 384], sizes = [8, 128], strides = [1, 1]} : vector<8x512xf32> to vector<8x128xf32>
    %134 = arith.negf %133 : vector<8x128xf32>
    %135 = math.exp %134 : vector<8x128xf32>
    %cst_46 = arith.constant 1.000000e+00 : f32
    %136 = vector.broadcast %cst_46 : f32 to vector<8x128xf32>
    %137 = arith.addf %136, %135 : vector<8x128xf32>
    %138 = arith.divf %136, %137 : vector<8x128xf32>
    %139 = arith.mulf %130, %101 : vector<8x128xf32>
    %140 = arith.mulf %124, %132 : vector<8x128xf32>
    %141 = arith.addf %139, %140 : vector<8x128xf32>
    %142 = math.tanh %141 : vector<8x128xf32>
    %143 = arith.mulf %138, %142 : vector<8x128xf32>
    %144 = vector.extract_strided_slice %118 {offsets = [0, 0], sizes = [8, 128], strides = [1, 1]} : vector<8x512xf32> to vector<8x128xf32>
    %145 = arith.negf %144 : vector<8x128xf32>
    %146 = math.exp %145 : vector<8x128xf32>
    %cst_47 = arith.constant 1.000000e+00 : f32
    %147 = vector.broadcast %cst_47 : f32 to vector<8x128xf32>
    %148 = arith.addf %147, %146 : vector<8x128xf32>
    %149 = arith.divf %147, %148 : vector<8x128xf32>
    %150 = vector.extract_strided_slice %118 {offsets = [0, 128], sizes = [8, 128], strides = [1, 1]} : vector<8x512xf32> to vector<8x128xf32>
    %151 = arith.negf %150 : vector<8x128xf32>
    %152 = math.exp %151 : vector<8x128xf32>
    %cst_48 = arith.constant 1.000000e+00 : f32
    %153 = vector.broadcast %cst_48 : f32 to vector<8x128xf32>
    %154 = arith.addf %153, %152 : vector<8x128xf32>
    %155 = arith.divf %153, %154 : vector<8x128xf32>
    %156 = vector.extract_strided_slice %118 {offsets = [0, 256], sizes = [8, 128], strides = [1, 1]} : vector<8x512xf32> to vector<8x128xf32>
    %157 = math.tanh %156 : vector<8x128xf32>
    %158 = vector.extract_strided_slice %118 {offsets = [0, 384], sizes = [8, 128], strides = [1, 1]} : vector<8x512xf32> to vector<8x128xf32>
    %159 = arith.negf %158 : vector<8x128xf32>
    %160 = math.exp %159 : vector<8x128xf32>
    %cst_49 = arith.constant 1.000000e+00 : f32
    %161 = vector.broadcast %cst_49 : f32 to vector<8x128xf32>
    %162 = arith.addf %161, %160 : vector<8x128xf32>
    %163 = arith.divf %161, %162 : vector<8x128xf32>
    %164 = arith.mulf %155, %107 : vector<8x128xf32>
    %165 = arith.mulf %149, %157 : vector<8x128xf32>
    %166 = arith.addf %164, %165 : vector<8x128xf32>
    %167 = math.tanh %166 : vector<8x128xf32>
    %168 = arith.mulf %163, %167 : vector<8x128xf32>
    %169 = vector.broadcast %c1_i32 : i32 to vector<8x1xi32>
    %170 = arith.cmpi slt, %169, %0 : vector<8x1xi32>
    %171 = vector.broadcast %108 : i32 to vector<8x1xi32>
    %172 = arith.cmpi slt, %171, %0 : vector<8x1xi32>
    %cst_50 = arith.constant 0.000000e+00 : f32
    %173 = vector.shape_cast %170 : vector<8x1xi1> to vector<8x1xi1>
    %174 = vector.broadcast %173 : vector<8x1xi1> to vector<8x128xi1>
    %175 = vector.broadcast %cst_50 : f32 to vector<8x128xf32>
    %176 = arith.select %174, %143, %175 : vector<8x128xi1>, vector<8x128xf32>
    %177 = vector.shape_cast %176 : vector<8x128xf32> to vector<1x8x128xf32>
    %178 = arith.index_cast %c1_i32 : i32 to index
    %c0_51 = arith.constant 0 : index
    %c0_52 = arith.constant 0 : index
    %179 = vector.load %arg14[%178, %c0_51, %c0_52] : memref<8x8x128xf32, #tpu.memory_space<vmem>>, vector<1x8x128xf32>
    tpu.vector_store %arg14[%178, %c0_51, %c0_52], %177 {strides = array<i32>} : memref<8x8x128xf32, #tpu.memory_space<vmem>>, vector<1x8x128xf32>,
    %cst_53 = arith.constant 0.000000e+00 : f32
    %180 = vector.shape_cast %172 : vector<8x1xi1> to vector<8x1xi1>
    %181 = vector.broadcast %180 : vector<8x1xi1> to vector<8x128xi1>
    %182 = vector.broadcast %cst_53 : f32 to vector<8x128xf32>
    %183 = arith.select %181, %168, %182 : vector<8x128xi1>, vector<8x128xf32>
    %184 = vector.shape_cast %183 : vector<8x128xf32> to vector<1x8x128xf32>
    %185 = arith.index_cast %108 : i32 to index
    %c0_54 = arith.constant 0 : index
    %c0_55 = arith.constant 0 : index
    %186 = vector.load %arg15[%185, %c0_54, %c0_55] : memref<8x8x128xf32, #tpu.memory_space<vmem>>, vector<1x8x128xf32>
    tpu.vector_store %arg15[%185, %c0_54, %c0_55], %184 {strides = array<i32>} : memref<8x8x128xf32, #tpu.memory_space<vmem>>, vector<1x8x128xf32>,
    %187 = vector.shape_cast %170 : vector<8x1xi1> to vector<8x1xi1>
    %188 = vector.broadcast %187 : vector<8x1xi1> to vector<8x128xi1>
    %189 = arith.select %188, %143, %98 : vector<8x128xi1>, vector<8x128xf32>
    %190 = vector.shape_cast %170 : vector<8x1xi1> to vector<8x1xi1>
    %191 = vector.broadcast %190 : vector<8x1xi1> to vector<8x128xi1>
    %192 = arith.select %191, %141, %101 : vector<8x128xi1>, vector<8x128xf32>
    %193 = vector.shape_cast %172 : vector<8x1xi1> to vector<8x1xi1>
    %194 = vector.broadcast %193 : vector<8x1xi1> to vector<8x128xi1>
    %195 = arith.select %194, %168, %104 : vector<8x128xi1>, vector<8x128xf32>
    %196 = vector.shape_cast %172 : vector<8x1xi1> to vector<8x1xi1>
    %197 = vector.broadcast %196 : vector<8x1xi1> to vector<8x128xi1>
    %198 = arith.select %197, %166, %107 : vector<8x128xi1>, vector<8x128xf32>
    %c2_i32 = arith.constant 2 : i32
    %c7_i32_56 = arith.constant 7 : i32
    %199 = arith.subi %c7_i32_56, %c2_i32 : i32
    %200 = arith.index_cast %c2_i32 : i32 to index
    %c0_57 = arith.constant 0 : index
    %c0_58 = arith.constant 0 : index
    %201 = vector.load %arg12[%200, %c0_57, %c0_58] : memref<8x8x512xf32, #tpu.memory_space<vmem>>, vector<1x8x512xf32>
    %202 = vector.shape_cast %201 : vector<1x8x512xf32> to vector<8x512xf32>
    %cst_59 = arith.constant dense<0.000000e+00> : vector<8x512xf32>
    %203 = tpu.matmul %189, %14, %cst_59 {dimension_numbers = #tpu.dot_dimension_numbers<[1], [0], [0], [1], [0, 0, 1, 1], [], []>} : vector<8x128xf32>, vector<128x512xf32>, vector<8x512xf32> -> vector<8x512xf32>
    %204 = arith.addf %202, %203 : vector<8x512xf32>
    %205 = arith.index_cast %199 : i32 to index
    %c0_60 = arith.constant 0 : index
    %c0_61 = arith.constant 0 : index
    %206 = vector.load %arg13[%205, %c0_60, %c0_61] : memref<8x8x512xf32, #tpu.memory_space<vmem>>, vector<1x8x512xf32>
    %207 = vector.shape_cast %206 : vector<1x8x512xf32> to vector<8x512xf32>
    %cst_62 = arith.constant dense<0.000000e+00> : vector<8x512xf32>
    %208 = tpu.matmul %195, %15, %cst_62 {dimension_numbers = #tpu.dot_dimension_numbers<[1], [0], [0], [1], [0, 0, 1, 1], [], []>} : vector<8x128xf32>, vector<128x512xf32>, vector<8x512xf32> -> vector<8x512xf32>
    %209 = arith.addf %207, %208 : vector<8x512xf32>
    %210 = vector.extract_strided_slice %204 {offsets = [0, 0], sizes = [8, 128], strides = [1, 1]} : vector<8x512xf32> to vector<8x128xf32>
    %211 = arith.negf %210 : vector<8x128xf32>
    %212 = math.exp %211 : vector<8x128xf32>
    %cst_63 = arith.constant 1.000000e+00 : f32
    %213 = vector.broadcast %cst_63 : f32 to vector<8x128xf32>
    %214 = arith.addf %213, %212 : vector<8x128xf32>
    %215 = arith.divf %213, %214 : vector<8x128xf32>
    %216 = vector.extract_strided_slice %204 {offsets = [0, 128], sizes = [8, 128], strides = [1, 1]} : vector<8x512xf32> to vector<8x128xf32>
    %217 = arith.negf %216 : vector<8x128xf32>
    %218 = math.exp %217 : vector<8x128xf32>
    %cst_64 = arith.constant 1.000000e+00 : f32
    %219 = vector.broadcast %cst_64 : f32 to vector<8x128xf32>
    %220 = arith.addf %219, %218 : vector<8x128xf32>
    %221 = arith.divf %219, %220 : vector<8x128xf32>
    %222 = vector.extract_strided_slice %204 {offsets = [0, 256], sizes = [8, 128], strides = [1, 1]} : vector<8x512xf32> to vector<8x128xf32>
    %223 = math.tanh %222 : vector<8x128xf32>
    %224 = vector.extract_strided_slice %204 {offsets = [0, 384], sizes = [8, 128], strides = [1, 1]} : vector<8x512xf32> to vector<8x128xf32>
    %225 = arith.negf %224 : vector<8x128xf32>
    %226 = math.exp %225 : vector<8x128xf32>
    %cst_65 = arith.constant 1.000000e+00 : f32
    %227 = vector.broadcast %cst_65 : f32 to vector<8x128xf32>
    %228 = arith.addf %227, %226 : vector<8x128xf32>
    %229 = arith.divf %227, %228 : vector<8x128xf32>
    %230 = arith.mulf %221, %192 : vector<8x128xf32>
    %231 = arith.mulf %215, %223 : vector<8x128xf32>
    %232 = arith.addf %230, %231 : vector<8x128xf32>
    %233 = math.tanh %232 : vector<8x128xf32>
    %234 = arith.mulf %229, %233 : vector<8x128xf32>
    %235 = vector.extract_strided_slice %209 {offsets = [0, 0], sizes = [8, 128], strides = [1, 1]} : vector<8x512xf32> to vector<8x128xf32>
    %236 = arith.negf %235 : vector<8x128xf32>
    %237 = math.exp %236 : vector<8x128xf32>
    %cst_66 = arith.constant 1.000000e+00 : f32
    %238 = vector.broadcast %cst_66 : f32 to vector<8x128xf32>
    %239 = arith.addf %238, %237 : vector<8x128xf32>
    %240 = arith.divf %238, %239 : vector<8x128xf32>
    %241 = vector.extract_strided_slice %209 {offsets = [0, 128], sizes = [8, 128], strides = [1, 1]} : vector<8x512xf32> to vector<8x128xf32>
    %242 = arith.negf %241 : vector<8x128xf32>
    %243 = math.exp %242 : vector<8x128xf32>
    %cst_67 = arith.constant 1.000000e+00 : f32
    %244 = vector.broadcast %cst_67 : f32 to vector<8x128xf32>
    %245 = arith.addf %244, %243 : vector<8x128xf32>
    %246 = arith.divf %244, %245 : vector<8x128xf32>
    %247 = vector.extract_strided_slice %209 {offsets = [0, 256], sizes = [8, 128], strides = [1, 1]} : vector<8x512xf32> to vector<8x128xf32>
    %248 = math.tanh %247 : vector<8x128xf32>
    %249 = vector.extract_strided_slice %209 {offsets = [0, 384], sizes = [8, 128], strides = [1, 1]} : vector<8x512xf32> to vector<8x128xf32>
    %250 = arith.negf %249 : vector<8x128xf32>
    %251 = math.exp %250 : vector<8x128xf32>
    %cst_68 = arith.constant 1.000000e+00 : f32
    %252 = vector.broadcast %cst_68 : f32 to vector<8x128xf32>
    %253 = arith.addf %252, %251 : vector<8x128xf32>
    %254 = arith.divf %252, %253 : vector<8x128xf32>
    %255 = arith.mulf %246, %198 : vector<8x128xf32>
    %256 = arith.mulf %240, %248 : vector<8x128xf32>
    %257 = arith.addf %255, %256 : vector<8x128xf32>
    %258 = math.tanh %257 : vector<8x128xf32>
    %259 = arith.mulf %254, %258 : vector<8x128xf32>
    %260 = vector.broadcast %c2_i32 : i32 to vector<8x1xi32>
    %261 = arith.cmpi slt, %260, %0 : vector<8x1xi32>
    %262 = vector.broadcast %199 : i32 to vector<8x1xi32>
    %263 = arith.cmpi slt, %262, %0 : vector<8x1xi32>
    %cst_69 = arith.constant 0.000000e+00 : f32
    %264 = vector.shape_cast %261 : vector<8x1xi1> to vector<8x1xi1>
    %265 = vector.broadcast %264 : vector<8x1xi1> to vector<8x128xi1>
    %266 = vector.broadcast %cst_69 : f32 to vector<8x128xf32>
    %267 = arith.select %265, %234, %266 : vector<8x128xi1>, vector<8x128xf32>
    %268 = vector.shape_cast %267 : vector<8x128xf32> to vector<1x8x128xf32>
    %269 = arith.index_cast %c2_i32 : i32 to index
    %c0_70 = arith.constant 0 : index
    %c0_71 = arith.constant 0 : index
    %270 = vector.load %arg14[%269, %c0_70, %c0_71] : memref<8x8x128xf32, #tpu.memory_space<vmem>>, vector<1x8x128xf32>
    tpu.vector_store %arg14[%269, %c0_70, %c0_71], %268 {strides = array<i32>} : memref<8x8x128xf32, #tpu.memory_space<vmem>>, vector<1x8x128xf32>,
    %cst_72 = arith.constant 0.000000e+00 : f32
    %271 = vector.shape_cast %263 : vector<8x1xi1> to vector<8x1xi1>
    %272 = vector.broadcast %271 : vector<8x1xi1> to vector<8x128xi1>
    %273 = vector.broadcast %cst_72 : f32 to vector<8x128xf32>
    %274 = arith.select %272, %259, %273 : vector<8x128xi1>, vector<8x128xf32>
    %275 = vector.shape_cast %274 : vector<8x128xf32> to vector<1x8x128xf32>
    %276 = arith.index_cast %199 : i32 to index
    %c0_73 = arith.constant 0 : index
    %c0_74 = arith.constant 0 : index
    %277 = vector.load %arg15[%276, %c0_73, %c0_74] : memref<8x8x128xf32, #tpu.memory_space<vmem>>, vector<1x8x128xf32>
    tpu.vector_store %arg15[%276, %c0_73, %c0_74], %275 {strides = array<i32>} : memref<8x8x128xf32, #tpu.memory_space<vmem>>, vector<1x8x128xf32>,
    %278 = vector.shape_cast %261 : vector<8x1xi1> to vector<8x1xi1>
    %279 = vector.broadcast %278 : vector<8x1xi1> to vector<8x128xi1>
    %280 = arith.select %279, %234, %189 : vector<8x128xi1>, vector<8x128xf32>
    %281 = vector.shape_cast %261 : vector<8x1xi1> to vector<8x1xi1>
    %282 = vector.broadcast %281 : vector<8x1xi1> to vector<8x128xi1>
    %283 = arith.select %282, %232, %192 : vector<8x128xi1>, vector<8x128xf32>
    %284 = vector.shape_cast %263 : vector<8x1xi1> to vector<8x1xi1>
    %285 = vector.broadcast %284 : vector<8x1xi1> to vector<8x128xi1>
    %286 = arith.select %285, %259, %195 : vector<8x128xi1>, vector<8x128xf32>
    %287 = vector.shape_cast %263 : vector<8x1xi1> to vector<8x1xi1>
    %288 = vector.broadcast %287 : vector<8x1xi1> to vector<8x128xi1>
    %289 = arith.select %288, %257, %198 : vector<8x128xi1>, vector<8x128xf32>
    %c3_i32 = arith.constant 3 : i32
    %c7_i32_75 = arith.constant 7 : i32
    %290 = arith.subi %c7_i32_75, %c3_i32 : i32
    %291 = arith.index_cast %c3_i32 : i32 to index
    %c0_76 = arith.constant 0 : index
    %c0_77 = arith.constant 0 : index
    %292 = vector.load %arg12[%291, %c0_76, %c0_77] : memref<8x8x512xf32, #tpu.memory_space<vmem>>, vector<1x8x512xf32>
    %293 = vector.shape_cast %292 : vector<1x8x512xf32> to vector<8x512xf32>
    %cst_78 = arith.constant dense<0.000000e+00> : vector<8x512xf32>
    %294 = tpu.matmul %280, %14, %cst_78 {dimension_numbers = #tpu.dot_dimension_numbers<[1], [0], [0], [1], [0, 0, 1, 1], [], []>} : vector<8x128xf32>, vector<128x512xf32>, vector<8x512xf32> -> vector<8x512xf32>
    %295 = arith.addf %293, %294 : vector<8x512xf32>
    %296 = arith.index_cast %290 : i32 to index
    %c0_79 = arith.constant 0 : index
    %c0_80 = arith.constant 0 : index
    %297 = vector.load %arg13[%296, %c0_79, %c0_80] : memref<8x8x512xf32, #tpu.memory_space<vmem>>, vector<1x8x512xf32>
    %298 = vector.shape_cast %297 : vector<1x8x512xf32> to vector<8x512xf32>
    %cst_81 = arith.constant dense<0.000000e+00> : vector<8x512xf32>
    %299 = tpu.matmul %286, %15, %cst_81 {dimension_numbers = #tpu.dot_dimension_numbers<[1], [0], [0], [1], [0, 0, 1, 1], [], []>} : vector<8x128xf32>, vector<128x512xf32>, vector<8x512xf32> -> vector<8x512xf32>
    %300 = arith.addf %298, %299 : vector<8x512xf32>
    %301 = vector.extract_strided_slice %295 {offsets = [0, 0], sizes = [8, 128], strides = [1, 1]} : vector<8x512xf32> to vector<8x128xf32>
    %302 = arith.negf %301 : vector<8x128xf32>
    %303 = math.exp %302 : vector<8x128xf32>
    %cst_82 = arith.constant 1.000000e+00 : f32
    %304 = vector.broadcast %cst_82 : f32 to vector<8x128xf32>
    %305 = arith.addf %304, %303 : vector<8x128xf32>
    %306 = arith.divf %304, %305 : vector<8x128xf32>
    %307 = vector.extract_strided_slice %295 {offsets = [0, 128], sizes = [8, 128], strides = [1, 1]} : vector<8x512xf32> to vector<8x128xf32>
    %308 = arith.negf %307 : vector<8x128xf32>
    %309 = math.exp %308 : vector<8x128xf32>
    %cst_83 = arith.constant 1.000000e+00 : f32
    %310 = vector.broadcast %cst_83 : f32 to vector<8x128xf32>
    %311 = arith.addf %310, %309 : vector<8x128xf32>
    %312 = arith.divf %310, %311 : vector<8x128xf32>
    %313 = vector.extract_strided_slice %295 {offsets = [0, 256], sizes = [8, 128], strides = [1, 1]} : vector<8x512xf32> to vector<8x128xf32>
    %314 = math.tanh %313 : vector<8x128xf32>
    %315 = vector.extract_strided_slice %295 {offsets = [0, 384], sizes = [8, 128], strides = [1, 1]} : vector<8x512xf32> to vector<8x128xf32>
    %316 = arith.negf %315 : vector<8x128xf32>
    %317 = math.exp %316 : vector<8x128xf32>
    %cst_84 = arith.constant 1.000000e+00 : f32
    %318 = vector.broadcast %cst_84 : f32 to vector<8x128xf32>
    %319 = arith.addf %318, %317 : vector<8x128xf32>
    %320 = arith.divf %318, %319 : vector<8x128xf32>
    %321 = arith.mulf %312, %283 : vector<8x128xf32>
    %322 = arith.mulf %306, %314 : vector<8x128xf32>
    %323 = arith.addf %321, %322 : vector<8x128xf32>
    %324 = math.tanh %323 : vector<8x128xf32>
    %325 = arith.mulf %320, %324 : vector<8x128xf32>
    %326 = vector.extract_strided_slice %300 {offsets = [0, 0], sizes = [8, 128], strides = [1, 1]} : vector<8x512xf32> to vector<8x128xf32>
    %327 = arith.negf %326 : vector<8x128xf32>
    %328 = math.exp %327 : vector<8x128xf32>
    %cst_85 = arith.constant 1.000000e+00 : f32
    %329 = vector.broadcast %cst_85 : f32 to vector<8x128xf32>
    %330 = arith.addf %329, %328 : vector<8x128xf32>
    %331 = arith.divf %329, %330 : vector<8x128xf32>
    %332 = vector.extract_strided_slice %300 {offsets = [0, 128], sizes = [8, 128], strides = [1, 1]} : vector<8x512xf32> to vector<8x128xf32>
    %333 = arith.negf %332 : vector<8x128xf32>
    %334 = math.exp %333 : vector<8x128xf32>
    %cst_86 = arith.constant 1.000000e+00 : f32
    %335 = vector.broadcast %cst_86 : f32 to vector<8x128xf32>
    %336 = arith.addf %335, %334 : vector<8x128xf32>
    %337 = arith.divf %335, %336 : vector<8x128xf32>
    %338 = vector.extract_strided_slice %300 {offsets = [0, 256], sizes = [8, 128], strides = [1, 1]} : vector<8x512xf32> to vector<8x128xf32>
    %339 = math.tanh %338 : vector<8x128xf32>
    %340 = vector.extract_strided_slice %300 {offsets = [0, 384], sizes = [8, 128], strides = [1, 1]} : vector<8x512xf32> to vector<8x128xf32>
    %341 = arith.negf %340 : vector<8x128xf32>
    %342 = math.exp %341 : vector<8x128xf32>
    %cst_87 = arith.constant 1.000000e+00 : f32
    %343 = vector.broadcast %cst_87 : f32 to vector<8x128xf32>
    %344 = arith.addf %343, %342 : vector<8x128xf32>
    %345 = arith.divf %343, %344 : vector<8x128xf32>
    %346 = arith.mulf %337, %289 : vector<8x128xf32>
    %347 = arith.mulf %331, %339 : vector<8x128xf32>
    %348 = arith.addf %346, %347 : vector<8x128xf32>
    %349 = math.tanh %348 : vector<8x128xf32>
    %350 = arith.mulf %345, %349 : vector<8x128xf32>
    %351 = vector.broadcast %c3_i32 : i32 to vector<8x1xi32>
    %352 = arith.cmpi slt, %351, %0 : vector<8x1xi32>
    %353 = vector.broadcast %290 : i32 to vector<8x1xi32>
    %354 = arith.cmpi slt, %353, %0 : vector<8x1xi32>
    %cst_88 = arith.constant 0.000000e+00 : f32
    %355 = vector.shape_cast %352 : vector<8x1xi1> to vector<8x1xi1>
    %356 = vector.broadcast %355 : vector<8x1xi1> to vector<8x128xi1>
    %357 = vector.broadcast %cst_88 : f32 to vector<8x128xf32>
    %358 = arith.select %356, %325, %357 : vector<8x128xi1>, vector<8x128xf32>
    %359 = vector.shape_cast %358 : vector<8x128xf32> to vector<1x8x128xf32>
    %360 = arith.index_cast %c3_i32 : i32 to index
    %c0_89 = arith.constant 0 : index
    %c0_90 = arith.constant 0 : index
    %361 = vector.load %arg14[%360, %c0_89, %c0_90] : memref<8x8x128xf32, #tpu.memory_space<vmem>>, vector<1x8x128xf32>
    tpu.vector_store %arg14[%360, %c0_89, %c0_90], %359 {strides = array<i32>} : memref<8x8x128xf32, #tpu.memory_space<vmem>>, vector<1x8x128xf32>,
    %cst_91 = arith.constant 0.000000e+00 : f32
    %362 = vector.shape_cast %354 : vector<8x1xi1> to vector<8x1xi1>
    %363 = vector.broadcast %362 : vector<8x1xi1> to vector<8x128xi1>
    %364 = vector.broadcast %cst_91 : f32 to vector<8x128xf32>
    %365 = arith.select %363, %350, %364 : vector<8x128xi1>, vector<8x128xf32>
    %366 = vector.shape_cast %365 : vector<8x128xf32> to vector<1x8x128xf32>
    %367 = arith.index_cast %290 : i32 to index
    %c0_92 = arith.constant 0 : index
    %c0_93 = arith.constant 0 : index
    %368 = vector.load %arg15[%367, %c0_92, %c0_93] : memref<8x8x128xf32, #tpu.memory_space<vmem>>, vector<1x8x128xf32>
    tpu.vector_store %arg15[%367, %c0_92, %c0_93], %366 {strides = array<i32>} : memref<8x8x128xf32, #tpu.memory_space<vmem>>, vector<1x8x128xf32>,
    %369 = vector.shape_cast %352 : vector<8x1xi1> to vector<8x1xi1>
    %370 = vector.broadcast %369 : vector<8x1xi1> to vector<8x128xi1>
    %371 = arith.select %370, %325, %280 : vector<8x128xi1>, vector<8x128xf32>
    %372 = vector.shape_cast %352 : vector<8x1xi1> to vector<8x1xi1>
    %373 = vector.broadcast %372 : vector<8x1xi1> to vector<8x128xi1>
    %374 = arith.select %373, %323, %283 : vector<8x128xi1>, vector<8x128xf32>
    %375 = vector.shape_cast %354 : vector<8x1xi1> to vector<8x1xi1>
    %376 = vector.broadcast %375 : vector<8x1xi1> to vector<8x128xi1>
    %377 = arith.select %376, %350, %286 : vector<8x128xi1>, vector<8x128xf32>
    %378 = vector.shape_cast %354 : vector<8x1xi1> to vector<8x1xi1>
    %379 = vector.broadcast %378 : vector<8x1xi1> to vector<8x128xi1>
    %380 = arith.select %379, %348, %289 : vector<8x128xi1>, vector<8x128xf32>
    %c4_i32 = arith.constant 4 : i32
    %c7_i32_94 = arith.constant 7 : i32
    %381 = arith.subi %c7_i32_94, %c4_i32 : i32
    %382 = arith.index_cast %c4_i32 : i32 to index
    %c0_95 = arith.constant 0 : index
    %c0_96 = arith.constant 0 : index
    %383 = vector.load %arg12[%382, %c0_95, %c0_96] : memref<8x8x512xf32, #tpu.memory_space<vmem>>, vector<1x8x512xf32>
    %384 = vector.shape_cast %383 : vector<1x8x512xf32> to vector<8x512xf32>
    %cst_97 = arith.constant dense<0.000000e+00> : vector<8x512xf32>
    %385 = tpu.matmul %371, %14, %cst_97 {dimension_numbers = #tpu.dot_dimension_numbers<[1], [0], [0], [1], [0, 0, 1, 1], [], []>} : vector<8x128xf32>, vector<128x512xf32>, vector<8x512xf32> -> vector<8x512xf32>
    %386 = arith.addf %384, %385 : vector<8x512xf32>
    %387 = arith.index_cast %381 : i32 to index
    %c0_98 = arith.constant 0 : index
    %c0_99 = arith.constant 0 : index
    %388 = vector.load %arg13[%387, %c0_98, %c0_99] : memref<8x8x512xf32, #tpu.memory_space<vmem>>, vector<1x8x512xf32>
    %389 = vector.shape_cast %388 : vector<1x8x512xf32> to vector<8x512xf32>
    %cst_100 = arith.constant dense<0.000000e+00> : vector<8x512xf32>
    %390 = tpu.matmul %377, %15, %cst_100 {dimension_numbers = #tpu.dot_dimension_numbers<[1], [0], [0], [1], [0, 0, 1, 1], [], []>} : vector<8x128xf32>, vector<128x512xf32>, vector<8x512xf32> -> vector<8x512xf32>
    %391 = arith.addf %389, %390 : vector<8x512xf32>
    %392 = vector.extract_strided_slice %386 {offsets = [0, 0], sizes = [8, 128], strides = [1, 1]} : vector<8x512xf32> to vector<8x128xf32>
    %393 = arith.negf %392 : vector<8x128xf32>
    %394 = math.exp %393 : vector<8x128xf32>
    %cst_101 = arith.constant 1.000000e+00 : f32
    %395 = vector.broadcast %cst_101 : f32 to vector<8x128xf32>
    %396 = arith.addf %395, %394 : vector<8x128xf32>
    %397 = arith.divf %395, %396 : vector<8x128xf32>
    %398 = vector.extract_strided_slice %386 {offsets = [0, 128], sizes = [8, 128], strides = [1, 1]} : vector<8x512xf32> to vector<8x128xf32>
    %399 = arith.negf %398 : vector<8x128xf32>
    %400 = math.exp %399 : vector<8x128xf32>
    %cst_102 = arith.constant 1.000000e+00 : f32
    %401 = vector.broadcast %cst_102 : f32 to vector<8x128xf32>
    %402 = arith.addf %401, %400 : vector<8x128xf32>
    %403 = arith.divf %401, %402 : vector<8x128xf32>
    %404 = vector.extract_strided_slice %386 {offsets = [0, 256], sizes = [8, 128], strides = [1, 1]} : vector<8x512xf32> to vector<8x128xf32>
    %405 = math.tanh %404 : vector<8x128xf32>
    %406 = vector.extract_strided_slice %386 {offsets = [0, 384], sizes = [8, 128], strides = [1, 1]} : vector<8x512xf32> to vector<8x128xf32>
    %407 = arith.negf %406 : vector<8x128xf32>
    %408 = math.exp %407 : vector<8x128xf32>
    %cst_103 = arith.constant 1.000000e+00 : f32
    %409 = vector.broadcast %cst_103 : f32 to vector<8x128xf32>
    %410 = arith.addf %409, %408 : vector<8x128xf32>
    %411 = arith.divf %409, %410 : vector<8x128xf32>
    %412 = arith.mulf %403, %374 : vector<8x128xf32>
    %413 = arith.mulf %397, %405 : vector<8x128xf32>
    %414 = arith.addf %412, %413 : vector<8x128xf32>
    %415 = math.tanh %414 : vector<8x128xf32>
    %416 = arith.mulf %411, %415 : vector<8x128xf32>
    %417 = vector.extract_strided_slice %391 {offsets = [0, 0], sizes = [8, 128], strides = [1, 1]} : vector<8x512xf32> to vector<8x128xf32>
    %418 = arith.negf %417 : vector<8x128xf32>
    %419 = math.exp %418 : vector<8x128xf32>
    %cst_104 = arith.constant 1.000000e+00 : f32
    %420 = vector.broadcast %cst_104 : f32 to vector<8x128xf32>
    %421 = arith.addf %420, %419 : vector<8x128xf32>
    %422 = arith.divf %420, %421 : vector<8x128xf32>
    %423 = vector.extract_strided_slice %391 {offsets = [0, 128], sizes = [8, 128], strides = [1, 1]} : vector<8x512xf32> to vector<8x128xf32>
    %424 = arith.negf %423 : vector<8x128xf32>
    %425 = math.exp %424 : vector<8x128xf32>
    %cst_105 = arith.constant 1.000000e+00 : f32
    %426 = vector.broadcast %cst_105 : f32 to vector<8x128xf32>
    %427 = arith.addf %426, %425 : vector<8x128xf32>
    %428 = arith.divf %426, %427 : vector<8x128xf32>
    %429 = vector.extract_strided_slice %391 {offsets = [0, 256], sizes = [8, 128], strides = [1, 1]} : vector<8x512xf32> to vector<8x128xf32>
    %430 = math.tanh %429 : vector<8x128xf32>
    %431 = vector.extract_strided_slice %391 {offsets = [0, 384], sizes = [8, 128], strides = [1, 1]} : vector<8x512xf32> to vector<8x128xf32>
    %432 = arith.negf %431 : vector<8x128xf32>
    %433 = math.exp %432 : vector<8x128xf32>
    %cst_106 = arith.constant 1.000000e+00 : f32
    %434 = vector.broadcast %cst_106 : f32 to vector<8x128xf32>
    %435 = arith.addf %434, %433 : vector<8x128xf32>
    %436 = arith.divf %434, %435 : vector<8x128xf32>
    %437 = arith.mulf %428, %380 : vector<8x128xf32>
    %438 = arith.mulf %422, %430 : vector<8x128xf32>
    %439 = arith.addf %437, %438 : vector<8x128xf32>
    %440 = math.tanh %439 : vector<8x128xf32>
    %441 = arith.mulf %436, %440 : vector<8x128xf32>
    %442 = vector.broadcast %c4_i32 : i32 to vector<8x1xi32>
    %443 = arith.cmpi slt, %442, %0 : vector<8x1xi32>
    %444 = vector.broadcast %381 : i32 to vector<8x1xi32>
    %445 = arith.cmpi slt, %444, %0 : vector<8x1xi32>
    %cst_107 = arith.constant 0.000000e+00 : f32
    %446 = vector.shape_cast %443 : vector<8x1xi1> to vector<8x1xi1>
    %447 = vector.broadcast %446 : vector<8x1xi1> to vector<8x128xi1>
    %448 = vector.broadcast %cst_107 : f32 to vector<8x128xf32>
    %449 = arith.select %447, %416, %448 : vector<8x128xi1>, vector<8x128xf32>
    %450 = vector.shape_cast %449 : vector<8x128xf32> to vector<1x8x128xf32>
    %451 = arith.index_cast %c4_i32 : i32 to index
    %c0_108 = arith.constant 0 : index
    %c0_109 = arith.constant 0 : index
    %452 = vector.load %arg14[%451, %c0_108, %c0_109] : memref<8x8x128xf32, #tpu.memory_space<vmem>>, vector<1x8x128xf32>
    tpu.vector_store %arg14[%451, %c0_108, %c0_109], %450 {strides = array<i32>} : memref<8x8x128xf32, #tpu.memory_space<vmem>>, vector<1x8x128xf32>,
    %cst_110 = arith.constant 0.000000e+00 : f32
    %453 = vector.shape_cast %445 : vector<8x1xi1> to vector<8x1xi1>
    %454 = vector.broadcast %453 : vector<8x1xi1> to vector<8x128xi1>
    %455 = vector.broadcast %cst_110 : f32 to vector<8x128xf32>
    %456 = arith.select %454, %441, %455 : vector<8x128xi1>, vector<8x128xf32>
    %457 = vector.shape_cast %456 : vector<8x128xf32> to vector<1x8x128xf32>
    %458 = arith.index_cast %381 : i32 to index
    %c0_111 = arith.constant 0 : index
    %c0_112 = arith.constant 0 : index
    %459 = vector.load %arg15[%458, %c0_111, %c0_112] : memref<8x8x128xf32, #tpu.memory_space<vmem>>, vector<1x8x128xf32>
    tpu.vector_store %arg15[%458, %c0_111, %c0_112], %457 {strides = array<i32>} : memref<8x8x128xf32, #tpu.memory_space<vmem>>, vector<1x8x128xf32>,
    %460 = vector.shape_cast %443 : vector<8x1xi1> to vector<8x1xi1>
    %461 = vector.broadcast %460 : vector<8x1xi1> to vector<8x128xi1>
    %462 = arith.select %461, %416, %371 : vector<8x128xi1>, vector<8x128xf32>
    %463 = vector.shape_cast %443 : vector<8x1xi1> to vector<8x1xi1>
    %464 = vector.broadcast %463 : vector<8x1xi1> to vector<8x128xi1>
    %465 = arith.select %464, %414, %374 : vector<8x128xi1>, vector<8x128xf32>
    %466 = vector.shape_cast %445 : vector<8x1xi1> to vector<8x1xi1>
    %467 = vector.broadcast %466 : vector<8x1xi1> to vector<8x128xi1>
    %468 = arith.select %467, %441, %377 : vector<8x128xi1>, vector<8x128xf32>
    %469 = vector.shape_cast %445 : vector<8x1xi1> to vector<8x1xi1>
    %470 = vector.broadcast %469 : vector<8x1xi1> to vector<8x128xi1>
    %471 = arith.select %470, %439, %380 : vector<8x128xi1>, vector<8x128xf32>
    %c5_i32 = arith.constant 5 : i32
    %c7_i32_113 = arith.constant 7 : i32
    %472 = arith.subi %c7_i32_113, %c5_i32 : i32
    %473 = arith.index_cast %c5_i32 : i32 to index
    %c0_114 = arith.constant 0 : index
    %c0_115 = arith.constant 0 : index
    %474 = vector.load %arg12[%473, %c0_114, %c0_115] : memref<8x8x512xf32, #tpu.memory_space<vmem>>, vector<1x8x512xf32>
    %475 = vector.shape_cast %474 : vector<1x8x512xf32> to vector<8x512xf32>
    %cst_116 = arith.constant dense<0.000000e+00> : vector<8x512xf32>
    %476 = tpu.matmul %462, %14, %cst_116 {dimension_numbers = #tpu.dot_dimension_numbers<[1], [0], [0], [1], [0, 0, 1, 1], [], []>} : vector<8x128xf32>, vector<128x512xf32>, vector<8x512xf32> -> vector<8x512xf32>
    %477 = arith.addf %475, %476 : vector<8x512xf32>
    %478 = arith.index_cast %472 : i32 to index
    %c0_117 = arith.constant 0 : index
    %c0_118 = arith.constant 0 : index
    %479 = vector.load %arg13[%478, %c0_117, %c0_118] : memref<8x8x512xf32, #tpu.memory_space<vmem>>, vector<1x8x512xf32>
    %480 = vector.shape_cast %479 : vector<1x8x512xf32> to vector<8x512xf32>
    %cst_119 = arith.constant dense<0.000000e+00> : vector<8x512xf32>
    %481 = tpu.matmul %468, %15, %cst_119 {dimension_numbers = #tpu.dot_dimension_numbers<[1], [0], [0], [1], [0, 0, 1, 1], [], []>} : vector<8x128xf32>, vector<128x512xf32>, vector<8x512xf32> -> vector<8x512xf32>
    %482 = arith.addf %480, %481 : vector<8x512xf32>
    %483 = vector.extract_strided_slice %477 {offsets = [0, 0], sizes = [8, 128], strides = [1, 1]} : vector<8x512xf32> to vector<8x128xf32>
    %484 = arith.negf %483 : vector<8x128xf32>
    %485 = math.exp %484 : vector<8x128xf32>
    %cst_120 = arith.constant 1.000000e+00 : f32
    %486 = vector.broadcast %cst_120 : f32 to vector<8x128xf32>
    %487 = arith.addf %486, %485 : vector<8x128xf32>
    %488 = arith.divf %486, %487 : vector<8x128xf32>
    %489 = vector.extract_strided_slice %477 {offsets = [0, 128], sizes = [8, 128], strides = [1, 1]} : vector<8x512xf32> to vector<8x128xf32>
    %490 = arith.negf %489 : vector<8x128xf32>
    %491 = math.exp %490 : vector<8x128xf32>
    %cst_121 = arith.constant 1.000000e+00 : f32
    %492 = vector.broadcast %cst_121 : f32 to vector<8x128xf32>
    %493 = arith.addf %492, %491 : vector<8x128xf32>
    %494 = arith.divf %492, %493 : vector<8x128xf32>
    %495 = vector.extract_strided_slice %477 {offsets = [0, 256], sizes = [8, 128], strides = [1, 1]} : vector<8x512xf32> to vector<8x128xf32>
    %496 = math.tanh %495 : vector<8x128xf32>
    %497 = vector.extract_strided_slice %477 {offsets = [0, 384], sizes = [8, 128], strides = [1, 1]} : vector<8x512xf32> to vector<8x128xf32>
    %498 = arith.negf %497 : vector<8x128xf32>
    %499 = math.exp %498 : vector<8x128xf32>
    %cst_122 = arith.constant 1.000000e+00 : f32
    %500 = vector.broadcast %cst_122 : f32 to vector<8x128xf32>
    %501 = arith.addf %500, %499 : vector<8x128xf32>
    %502 = arith.divf %500, %501 : vector<8x128xf32>
    %503 = arith.mulf %494, %465 : vector<8x128xf32>
    %504 = arith.mulf %488, %496 : vector<8x128xf32>
    %505 = arith.addf %503, %504 : vector<8x128xf32>
    %506 = math.tanh %505 : vector<8x128xf32>
    %507 = arith.mulf %502, %506 : vector<8x128xf32>
    %508 = vector.extract_strided_slice %482 {offsets = [0, 0], sizes = [8, 128], strides = [1, 1]} : vector<8x512xf32> to vector<8x128xf32>
    %509 = arith.negf %508 : vector<8x128xf32>
    %510 = math.exp %509 : vector<8x128xf32>
    %cst_123 = arith.constant 1.000000e+00 : f32
    %511 = vector.broadcast %cst_123 : f32 to vector<8x128xf32>
    %512 = arith.addf %511, %510 : vector<8x128xf32>
    %513 = arith.divf %511, %512 : vector<8x128xf32>
    %514 = vector.extract_strided_slice %482 {offsets = [0, 128], sizes = [8, 128], strides = [1, 1]} : vector<8x512xf32> to vector<8x128xf32>
    %515 = arith.negf %514 : vector<8x128xf32>
    %516 = math.exp %515 : vector<8x128xf32>
    %cst_124 = arith.constant 1.000000e+00 : f32
    %517 = vector.broadcast %cst_124 : f32 to vector<8x128xf32>
    %518 = arith.addf %517, %516 : vector<8x128xf32>
    %519 = arith.divf %517, %518 : vector<8x128xf32>
    %520 = vector.extract_strided_slice %482 {offsets = [0, 256], sizes = [8, 128], strides = [1, 1]} : vector<8x512xf32> to vector<8x128xf32>
    %521 = math.tanh %520 : vector<8x128xf32>
    %522 = vector.extract_strided_slice %482 {offsets = [0, 384], sizes = [8, 128], strides = [1, 1]} : vector<8x512xf32> to vector<8x128xf32>
    %523 = arith.negf %522 : vector<8x128xf32>
    %524 = math.exp %523 : vector<8x128xf32>
    %cst_125 = arith.constant 1.000000e+00 : f32
    %525 = vector.broadcast %cst_125 : f32 to vector<8x128xf32>
    %526 = arith.addf %525, %524 : vector<8x128xf32>
    %527 = arith.divf %525, %526 : vector<8x128xf32>
    %528 = arith.mulf %519, %471 : vector<8x128xf32>
    %529 = arith.mulf %513, %521 : vector<8x128xf32>
    %530 = arith.addf %528, %529 : vector<8x128xf32>
    %531 = math.tanh %530 : vector<8x128xf32>
    %532 = arith.mulf %527, %531 : vector<8x128xf32>
    %533 = vector.broadcast %c5_i32 : i32 to vector<8x1xi32>
    %534 = arith.cmpi slt, %533, %0 : vector<8x1xi32>
    %535 = vector.broadcast %472 : i32 to vector<8x1xi32>
    %536 = arith.cmpi slt, %535, %0 : vector<8x1xi32>
    %cst_126 = arith.constant 0.000000e+00 : f32
    %537 = vector.shape_cast %534 : vector<8x1xi1> to vector<8x1xi1>
    %538 = vector.broadcast %537 : vector<8x1xi1> to vector<8x128xi1>
    %539 = vector.broadcast %cst_126 : f32 to vector<8x128xf32>
    %540 = arith.select %538, %507, %539 : vector<8x128xi1>, vector<8x128xf32>
    %541 = vector.shape_cast %540 : vector<8x128xf32> to vector<1x8x128xf32>
    %542 = arith.index_cast %c5_i32 : i32 to index
    %c0_127 = arith.constant 0 : index
    %c0_128 = arith.constant 0 : index
    %543 = vector.load %arg14[%542, %c0_127, %c0_128] : memref<8x8x128xf32, #tpu.memory_space<vmem>>, vector<1x8x128xf32>
    tpu.vector_store %arg14[%542, %c0_127, %c0_128], %541 {strides = array<i32>} : memref<8x8x128xf32, #tpu.memory_space<vmem>>, vector<1x8x128xf32>,
    %cst_129 = arith.constant 0.000000e+00 : f32
    %544 = vector.shape_cast %536 : vector<8x1xi1> to vector<8x1xi1>
    %545 = vector.broadcast %544 : vector<8x1xi1> to vector<8x128xi1>
    %546 = vector.broadcast %cst_129 : f32 to vector<8x128xf32>
    %547 = arith.select %545, %532, %546 : vector<8x128xi1>, vector<8x128xf32>
    %548 = vector.shape_cast %547 : vector<8x128xf32> to vector<1x8x128xf32>
    %549 = arith.index_cast %472 : i32 to index
    %c0_130 = arith.constant 0 : index
    %c0_131 = arith.constant 0 : index
    %550 = vector.load %arg15[%549, %c0_130, %c0_131] : memref<8x8x128xf32, #tpu.memory_space<vmem>>, vector<1x8x128xf32>
    tpu.vector_store %arg15[%549, %c0_130, %c0_131], %548 {strides = array<i32>} : memref<8x8x128xf32, #tpu.memory_space<vmem>>, vector<1x8x128xf32>,
    %551 = vector.shape_cast %534 : vector<8x1xi1> to vector<8x1xi1>
    %552 = vector.broadcast %551 : vector<8x1xi1> to vector<8x128xi1>
    %553 = arith.select %552, %507, %462 : vector<8x128xi1>, vector<8x128xf32>
    %554 = vector.shape_cast %534 : vector<8x1xi1> to vector<8x1xi1>
    %555 = vector.broadcast %554 : vector<8x1xi1> to vector<8x128xi1>
    %556 = arith.select %555, %505, %465 : vector<8x128xi1>, vector<8x128xf32>
    %557 = vector.shape_cast %536 : vector<8x1xi1> to vector<8x1xi1>
    %558 = vector.broadcast %557 : vector<8x1xi1> to vector<8x128xi1>
    %559 = arith.select %558, %532, %468 : vector<8x128xi1>, vector<8x128xf32>
    %560 = vector.shape_cast %536 : vector<8x1xi1> to vector<8x1xi1>
    %561 = vector.broadcast %560 : vector<8x1xi1> to vector<8x128xi1>
    %562 = arith.select %561, %530, %471 : vector<8x128xi1>, vector<8x128xf32>
    %c6_i32 = arith.constant 6 : i32
    %c7_i32_132 = arith.constant 7 : i32
    %563 = arith.subi %c7_i32_132, %c6_i32 : i32
    %564 = arith.index_cast %c6_i32 : i32 to index
    %c0_133 = arith.constant 0 : index
    %c0_134 = arith.constant 0 : index
    %565 = vector.load %arg12[%564, %c0_133, %c0_134] : memref<8x8x512xf32, #tpu.memory_space<vmem>>, vector<1x8x512xf32>
    %566 = vector.shape_cast %565 : vector<1x8x512xf32> to vector<8x512xf32>
    %cst_135 = arith.constant dense<0.000000e+00> : vector<8x512xf32>
    %567 = tpu.matmul %553, %14, %cst_135 {dimension_numbers = #tpu.dot_dimension_numbers<[1], [0], [0], [1], [0, 0, 1, 1], [], []>} : vector<8x128xf32>, vector<128x512xf32>, vector<8x512xf32> -> vector<8x512xf32>
    %568 = arith.addf %566, %567 : vector<8x512xf32>
    %569 = arith.index_cast %563 : i32 to index
    %c0_136 = arith.constant 0 : index
    %c0_137 = arith.constant 0 : index
    %570 = vector.load %arg13[%569, %c0_136, %c0_137] : memref<8x8x512xf32, #tpu.memory_space<vmem>>, vector<1x8x512xf32>
    %571 = vector.shape_cast %570 : vector<1x8x512xf32> to vector<8x512xf32>
    %cst_138 = arith.constant dense<0.000000e+00> : vector<8x512xf32>
    %572 = tpu.matmul %559, %15, %cst_138 {dimension_numbers = #tpu.dot_dimension_numbers<[1], [0], [0], [1], [0, 0, 1, 1], [], []>} : vector<8x128xf32>, vector<128x512xf32>, vector<8x512xf32> -> vector<8x512xf32>
    %573 = arith.addf %571, %572 : vector<8x512xf32>
    %574 = vector.extract_strided_slice %568 {offsets = [0, 0], sizes = [8, 128], strides = [1, 1]} : vector<8x512xf32> to vector<8x128xf32>
    %575 = arith.negf %574 : vector<8x128xf32>
    %576 = math.exp %575 : vector<8x128xf32>
    %cst_139 = arith.constant 1.000000e+00 : f32
    %577 = vector.broadcast %cst_139 : f32 to vector<8x128xf32>
    %578 = arith.addf %577, %576 : vector<8x128xf32>
    %579 = arith.divf %577, %578 : vector<8x128xf32>
    %580 = vector.extract_strided_slice %568 {offsets = [0, 128], sizes = [8, 128], strides = [1, 1]} : vector<8x512xf32> to vector<8x128xf32>
    %581 = arith.negf %580 : vector<8x128xf32>
    %582 = math.exp %581 : vector<8x128xf32>
    %cst_140 = arith.constant 1.000000e+00 : f32
    %583 = vector.broadcast %cst_140 : f32 to vector<8x128xf32>
    %584 = arith.addf %583, %582 : vector<8x128xf32>
    %585 = arith.divf %583, %584 : vector<8x128xf32>
    %586 = vector.extract_strided_slice %568 {offsets = [0, 256], sizes = [8, 128], strides = [1, 1]} : vector<8x512xf32> to vector<8x128xf32>
    %587 = math.tanh %586 : vector<8x128xf32>
    %588 = vector.extract_strided_slice %568 {offsets = [0, 384], sizes = [8, 128], strides = [1, 1]} : vector<8x512xf32> to vector<8x128xf32>
    %589 = arith.negf %588 : vector<8x128xf32>
    %590 = math.exp %589 : vector<8x128xf32>
    %cst_141 = arith.constant 1.000000e+00 : f32
    %591 = vector.broadcast %cst_141 : f32 to vector<8x128xf32>
    %592 = arith.addf %591, %590 : vector<8x128xf32>
    %593 = arith.divf %591, %592 : vector<8x128xf32>
    %594 = arith.mulf %585, %556 : vector<8x128xf32>
    %595 = arith.mulf %579, %587 : vector<8x128xf32>
    %596 = arith.addf %594, %595 : vector<8x128xf32>
    %597 = math.tanh %596 : vector<8x128xf32>
    %598 = arith.mulf %593, %597 : vector<8x128xf32>
    %599 = vector.extract_strided_slice %573 {offsets = [0, 0], sizes = [8, 128], strides = [1, 1]} : vector<8x512xf32> to vector<8x128xf32>
    %600 = arith.negf %599 : vector<8x128xf32>
    %601 = math.exp %600 : vector<8x128xf32>
    %cst_142 = arith.constant 1.000000e+00 : f32
    %602 = vector.broadcast %cst_142 : f32 to vector<8x128xf32>
    %603 = arith.addf %602, %601 : vector<8x128xf32>
    %604 = arith.divf %602, %603 : vector<8x128xf32>
    %605 = vector.extract_strided_slice %573 {offsets = [0, 128], sizes = [8, 128], strides = [1, 1]} : vector<8x512xf32> to vector<8x128xf32>
    %606 = arith.negf %605 : vector<8x128xf32>
    %607 = math.exp %606 : vector<8x128xf32>
    %cst_143 = arith.constant 1.000000e+00 : f32
    %608 = vector.broadcast %cst_143 : f32 to vector<8x128xf32>
    %609 = arith.addf %608, %607 : vector<8x128xf32>
    %610 = arith.divf %608, %609 : vector<8x128xf32>
    %611 = vector.extract_strided_slice %573 {offsets = [0, 256], sizes = [8, 128], strides = [1, 1]} : vector<8x512xf32> to vector<8x128xf32>
    %612 = math.tanh %611 : vector<8x128xf32>
    %613 = vector.extract_strided_slice %573 {offsets = [0, 384], sizes = [8, 128], strides = [1, 1]} : vector<8x512xf32> to vector<8x128xf32>
    %614 = arith.negf %613 : vector<8x128xf32>
    %615 = math.exp %614 : vector<8x128xf32>
    %cst_144 = arith.constant 1.000000e+00 : f32
    %616 = vector.broadcast %cst_144 : f32 to vector<8x128xf32>
    %617 = arith.addf %616, %615 : vector<8x128xf32>
    %618 = arith.divf %616, %617 : vector<8x128xf32>
    %619 = arith.mulf %610, %562 : vector<8x128xf32>
    %620 = arith.mulf %604, %612 : vector<8x128xf32>
    %621 = arith.addf %619, %620 : vector<8x128xf32>
    %622 = math.tanh %621 : vector<8x128xf32>
    %623 = arith.mulf %618, %622 : vector<8x128xf32>
    %624 = vector.broadcast %c6_i32 : i32 to vector<8x1xi32>
    %625 = arith.cmpi slt, %624, %0 : vector<8x1xi32>
    %626 = vector.broadcast %563 : i32 to vector<8x1xi32>
    %627 = arith.cmpi slt, %626, %0 : vector<8x1xi32>
    %cst_145 = arith.constant 0.000000e+00 : f32
    %628 = vector.shape_cast %625 : vector<8x1xi1> to vector<8x1xi1>
    %629 = vector.broadcast %628 : vector<8x1xi1> to vector<8x128xi1>
    %630 = vector.broadcast %cst_145 : f32 to vector<8x128xf32>
    %631 = arith.select %629, %598, %630 : vector<8x128xi1>, vector<8x128xf32>
    %632 = vector.shape_cast %631 : vector<8x128xf32> to vector<1x8x128xf32>
    %633 = arith.index_cast %c6_i32 : i32 to index
    %c0_146 = arith.constant 0 : index
    %c0_147 = arith.constant 0 : index
    %634 = vector.load %arg14[%633, %c0_146, %c0_147] : memref<8x8x128xf32, #tpu.memory_space<vmem>>, vector<1x8x128xf32>
    tpu.vector_store %arg14[%633, %c0_146, %c0_147], %632 {strides = array<i32>} : memref<8x8x128xf32, #tpu.memory_space<vmem>>, vector<1x8x128xf32>,
    %cst_148 = arith.constant 0.000000e+00 : f32
    %635 = vector.shape_cast %627 : vector<8x1xi1> to vector<8x1xi1>
    %636 = vector.broadcast %635 : vector<8x1xi1> to vector<8x128xi1>
    %637 = vector.broadcast %cst_148 : f32 to vector<8x128xf32>
    %638 = arith.select %636, %623, %637 : vector<8x128xi1>, vector<8x128xf32>
    %639 = vector.shape_cast %638 : vector<8x128xf32> to vector<1x8x128xf32>
    %640 = arith.index_cast %563 : i32 to index
    %c0_149 = arith.constant 0 : index
    %c0_150 = arith.constant 0 : index
    %641 = vector.load %arg15[%640, %c0_149, %c0_150] : memref<8x8x128xf32, #tpu.memory_space<vmem>>, vector<1x8x128xf32>
    tpu.vector_store %arg15[%640, %c0_149, %c0_150], %639 {strides = array<i32>} : memref<8x8x128xf32, #tpu.memory_space<vmem>>, vector<1x8x128xf32>,
    %642 = vector.shape_cast %625 : vector<8x1xi1> to vector<8x1xi1>
    %643 = vector.broadcast %642 : vector<8x1xi1> to vector<8x128xi1>
    %644 = arith.select %643, %598, %553 : vector<8x128xi1>, vector<8x128xf32>
    %645 = vector.shape_cast %625 : vector<8x1xi1> to vector<8x1xi1>
    %646 = vector.broadcast %645 : vector<8x1xi1> to vector<8x128xi1>
    %647 = arith.select %646, %596, %556 : vector<8x128xi1>, vector<8x128xf32>
    %648 = vector.shape_cast %627 : vector<8x1xi1> to vector<8x1xi1>
    %649 = vector.broadcast %648 : vector<8x1xi1> to vector<8x128xi1>
    %650 = arith.select %649, %623, %559 : vector<8x128xi1>, vector<8x128xf32>
    %651 = vector.shape_cast %627 : vector<8x1xi1> to vector<8x1xi1>
    %652 = vector.broadcast %651 : vector<8x1xi1> to vector<8x128xi1>
    %653 = arith.select %652, %621, %562 : vector<8x128xi1>, vector<8x128xf32>
    %c7_i32_151 = arith.constant 7 : i32
    %c7_i32_152 = arith.constant 7 : i32
    %654 = arith.subi %c7_i32_152, %c7_i32_151 : i32
    %655 = arith.index_cast %c7_i32_151 : i32 to index
    %c0_153 = arith.constant 0 : index
    %c0_154 = arith.constant 0 : index
    %656 = vector.load %arg12[%655, %c0_153, %c0_154] : memref<8x8x512xf32, #tpu.memory_space<vmem>>, vector<1x8x512xf32>
    %657 = vector.shape_cast %656 : vector<1x8x512xf32> to vector<8x512xf32>
    %cst_155 = arith.constant dense<0.000000e+00> : vector<8x512xf32>
    %658 = tpu.matmul %644, %14, %cst_155 {dimension_numbers = #tpu.dot_dimension_numbers<[1], [0], [0], [1], [0, 0, 1, 1], [], []>} : vector<8x128xf32>, vector<128x512xf32>, vector<8x512xf32> -> vector<8x512xf32>
    %659 = arith.addf %657, %658 : vector<8x512xf32>
    %660 = arith.index_cast %654 : i32 to index
    %c0_156 = arith.constant 0 : index
    %c0_157 = arith.constant 0 : index
    %661 = vector.load %arg13[%660, %c0_156, %c0_157] : memref<8x8x512xf32, #tpu.memory_space<vmem>>, vector<1x8x512xf32>
    %662 = vector.shape_cast %661 : vector<1x8x512xf32> to vector<8x512xf32>
    %cst_158 = arith.constant dense<0.000000e+00> : vector<8x512xf32>
    %663 = tpu.matmul %650, %15, %cst_158 {dimension_numbers = #tpu.dot_dimension_numbers<[1], [0], [0], [1], [0, 0, 1, 1], [], []>} : vector<8x128xf32>, vector<128x512xf32>, vector<8x512xf32> -> vector<8x512xf32>
    %664 = arith.addf %662, %663 : vector<8x512xf32>
    %665 = vector.extract_strided_slice %659 {offsets = [0, 0], sizes = [8, 128], strides = [1, 1]} : vector<8x512xf32> to vector<8x128xf32>
    %666 = arith.negf %665 : vector<8x128xf32>
    %667 = math.exp %666 : vector<8x128xf32>
    %cst_159 = arith.constant 1.000000e+00 : f32
    %668 = vector.broadcast %cst_159 : f32 to vector<8x128xf32>
    %669 = arith.addf %668, %667 : vector<8x128xf32>
    %670 = arith.divf %668, %669 : vector<8x128xf32>
    %671 = vector.extract_strided_slice %659 {offsets = [0, 128], sizes = [8, 128], strides = [1, 1]} : vector<8x512xf32> to vector<8x128xf32>
    %672 = arith.negf %671 : vector<8x128xf32>
    %673 = math.exp %672 : vector<8x128xf32>
    %cst_160 = arith.constant 1.000000e+00 : f32
    %674 = vector.broadcast %cst_160 : f32 to vector<8x128xf32>
    %675 = arith.addf %674, %673 : vector<8x128xf32>
    %676 = arith.divf %674, %675 : vector<8x128xf32>
    %677 = vector.extract_strided_slice %659 {offsets = [0, 256], sizes = [8, 128], strides = [1, 1]} : vector<8x512xf32> to vector<8x128xf32>
    %678 = math.tanh %677 : vector<8x128xf32>
    %679 = vector.extract_strided_slice %659 {offsets = [0, 384], sizes = [8, 128], strides = [1, 1]} : vector<8x512xf32> to vector<8x128xf32>
    %680 = arith.negf %679 : vector<8x128xf32>
    %681 = math.exp %680 : vector<8x128xf32>
    %cst_161 = arith.constant 1.000000e+00 : f32
    %682 = vector.broadcast %cst_161 : f32 to vector<8x128xf32>
    %683 = arith.addf %682, %681 : vector<8x128xf32>
    %684 = arith.divf %682, %683 : vector<8x128xf32>
    %685 = arith.mulf %676, %647 : vector<8x128xf32>
    %686 = arith.mulf %670, %678 : vector<8x128xf32>
    %687 = arith.addf %685, %686 : vector<8x128xf32>
    %688 = math.tanh %687 : vector<8x128xf32>
    %689 = arith.mulf %684, %688 : vector<8x128xf32>
    %690 = vector.extract_strided_slice %664 {offsets = [0, 0], sizes = [8, 128], strides = [1, 1]} : vector<8x512xf32> to vector<8x128xf32>
    %691 = arith.negf %690 : vector<8x128xf32>
    %692 = math.exp %691 : vector<8x128xf32>
    %cst_162 = arith.constant 1.000000e+00 : f32
    %693 = vector.broadcast %cst_162 : f32 to vector<8x128xf32>
    %694 = arith.addf %693, %692 : vector<8x128xf32>
    %695 = arith.divf %693, %694 : vector<8x128xf32>
    %696 = vector.extract_strided_slice %664 {offsets = [0, 128], sizes = [8, 128], strides = [1, 1]} : vector<8x512xf32> to vector<8x128xf32>
    %697 = arith.negf %696 : vector<8x128xf32>
    %698 = math.exp %697 : vector<8x128xf32>
    %cst_163 = arith.constant 1.000000e+00 : f32
    %699 = vector.broadcast %cst_163 : f32 to vector<8x128xf32>
    %700 = arith.addf %699, %698 : vector<8x128xf32>
    %701 = arith.divf %699, %700 : vector<8x128xf32>
    %702 = vector.extract_strided_slice %664 {offsets = [0, 256], sizes = [8, 128], strides = [1, 1]} : vector<8x512xf32> to vector<8x128xf32>
    %703 = math.tanh %702 : vector<8x128xf32>
    %704 = vector.extract_strided_slice %664 {offsets = [0, 384], sizes = [8, 128], strides = [1, 1]} : vector<8x512xf32> to vector<8x128xf32>
    %705 = arith.negf %704 : vector<8x128xf32>
    %706 = math.exp %705 : vector<8x128xf32>
    %cst_164 = arith.constant 1.000000e+00 : f32
    %707 = vector.broadcast %cst_164 : f32 to vector<8x128xf32>
    %708 = arith.addf %707, %706 : vector<8x128xf32>
    %709 = arith.divf %707, %708 : vector<8x128xf32>
    %710 = arith.mulf %701, %653 : vector<8x128xf32>
    %711 = arith.mulf %695, %703 : vector<8x128xf32>
    %712 = arith.addf %710, %711 : vector<8x128xf32>
    %713 = math.tanh %712 : vector<8x128xf32>
    %714 = arith.mulf %709, %713 : vector<8x128xf32>
    %715 = vector.broadcast %c7_i32_151 : i32 to vector<8x1xi32>
    %716 = arith.cmpi slt, %715, %0 : vector<8x1xi32>
    %717 = vector.broadcast %654 : i32 to vector<8x1xi32>
    %718 = arith.cmpi slt, %717, %0 : vector<8x1xi32>
    %cst_165 = arith.constant 0.000000e+00 : f32
    %719 = vector.shape_cast %716 : vector<8x1xi1> to vector<8x1xi1>
    %720 = vector.broadcast %719 : vector<8x1xi1> to vector<8x128xi1>
    %721 = vector.broadcast %cst_165 : f32 to vector<8x128xf32>
    %722 = arith.select %720, %689, %721 : vector<8x128xi1>, vector<8x128xf32>
    %723 = vector.shape_cast %722 : vector<8x128xf32> to vector<1x8x128xf32>
    %724 = arith.index_cast %c7_i32_151 : i32 to index
    %c0_166 = arith.constant 0 : index
    %c0_167 = arith.constant 0 : index
    %725 = vector.load %arg14[%724, %c0_166, %c0_167] : memref<8x8x128xf32, #tpu.memory_space<vmem>>, vector<1x8x128xf32>
    tpu.vector_store %arg14[%724, %c0_166, %c0_167], %723 {strides = array<i32>} : memref<8x8x128xf32, #tpu.memory_space<vmem>>, vector<1x8x128xf32>,
    %cst_168 = arith.constant 0.000000e+00 : f32
    %726 = vector.shape_cast %718 : vector<8x1xi1> to vector<8x1xi1>
    %727 = vector.broadcast %726 : vector<8x1xi1> to vector<8x128xi1>
    %728 = vector.broadcast %cst_168 : f32 to vector<8x128xf32>
    %729 = arith.select %727, %714, %728 : vector<8x128xi1>, vector<8x128xf32>
    %730 = vector.shape_cast %729 : vector<8x128xf32> to vector<1x8x128xf32>
    %731 = arith.index_cast %654 : i32 to index
    %c0_169 = arith.constant 0 : index
    %c0_170 = arith.constant 0 : index
    %732 = vector.load %arg15[%731, %c0_169, %c0_170] : memref<8x8x128xf32, #tpu.memory_space<vmem>>, vector<1x8x128xf32>
    tpu.vector_store %arg15[%731, %c0_169, %c0_170], %730 {strides = array<i32>} : memref<8x8x128xf32, #tpu.memory_space<vmem>>, vector<1x8x128xf32>,
    %733 = vector.shape_cast %716 : vector<8x1xi1> to vector<8x1xi1>
    %734 = vector.broadcast %733 : vector<8x1xi1> to vector<8x128xi1>
    %735 = arith.select %734, %689, %644 : vector<8x128xi1>, vector<8x128xf32>
    %736 = vector.shape_cast %716 : vector<8x1xi1> to vector<8x1xi1>
    %737 = vector.broadcast %736 : vector<8x1xi1> to vector<8x128xi1>
    %738 = arith.select %737, %687, %647 : vector<8x128xi1>, vector<8x128xf32>
    %739 = vector.shape_cast %718 : vector<8x1xi1> to vector<8x1xi1>
    %740 = vector.broadcast %739 : vector<8x1xi1> to vector<8x128xi1>
    %741 = arith.select %740, %714, %650 : vector<8x128xi1>, vector<8x128xf32>
    %742 = vector.shape_cast %718 : vector<8x1xi1> to vector<8x1xi1>
    %743 = vector.broadcast %742 : vector<8x1xi1> to vector<8x128xi1>
    %744 = arith.select %743, %712, %653 : vector<8x128xi1>, vector<8x128xf32>
    %c8_i32 = arith.constant 8 : i32
    %c0_171 = arith.constant 0 : index
    %c0_172 = arith.constant 0 : index
    %c0_173 = arith.constant 0 : index
    %745 = vector.load %arg14[%c0_171, %c0_172, %c0_173] : memref<8x8x128xf32, #tpu.memory_space<vmem>>, vector<8x8x128xf32>
    %746 = vector.shape_cast %745 : vector<8x8x128xf32> to vector<64x128xf32>
    %c0_174 = arith.constant 0 : index
    %c0_175 = arith.constant 0 : index
    %c0_176 = arith.constant 0 : index
    %747 = vector.load %arg15[%c0_174, %c0_175, %c0_176] : memref<8x8x128xf32, #tpu.memory_space<vmem>>, vector<8x8x128xf32>
    %748 = vector.shape_cast %747 : vector<8x8x128xf32> to vector<64x128xf32>
    %c0_177 = arith.constant 0 : index
    %c0_178 = arith.constant 0 : index
    %749 = vector.load %arg7[%c0_177, %c0_178] : memref<128x5xf32, #tpu.memory_space<vmem>>, vector<128x5xf32>
    %cst_179 = arith.constant dense<0.000000e+00> : vector<64x5xf32>
    %750 = tpu.matmul %746, %749, %cst_179 {dimension_numbers = #tpu.dot_dimension_numbers<[1], [0], [0], [1], [0, 0, 1, 1], [], []>} : vector<64x128xf32>, vector<128x5xf32>, vector<64x5xf32> -> vector<64x5xf32>
    %c0_180 = arith.constant 0 : index
    %c0_181 = arith.constant 0 : index
    %751 = vector.load %arg8[%c0_180, %c0_181] : memref<128x5xf32, #tpu.memory_space<vmem>>, vector<128x5xf32>
    %cst_182 = arith.constant dense<0.000000e+00> : vector<64x5xf32>
    %752 = tpu.matmul %748, %751, %cst_182 {dimension_numbers = #tpu.dot_dimension_numbers<[1], [0], [0], [1], [0, 0, 1, 1], [], []>} : vector<64x128xf32>, vector<128x5xf32>, vector<64x5xf32> -> vector<64x5xf32>
    %753 = arith.addf %750, %752 : vector<64x5xf32>
    %c0_183 = arith.constant 0 : index
    %c0_184 = arith.constant 0 : index
    %754 = vector.load %arg9[%c0_183, %c0_184] : memref<1x5xf32, #tpu.memory_space<vmem>>, vector<1x5xf32>
    %755 = vector.broadcast %754 : vector<1x5xf32> to vector<64x5xf32>
    %756 = arith.addf %753, %755 : vector<64x5xf32>
    %757 = vector.shape_cast %756 : vector<64x5xf32> to vector<8x8x5xf32>
    %c0_185 = arith.constant 0 : index
    %c0_186 = arith.constant 0 : index
    %c0_187 = arith.constant 0 : index
    %758 = vector.load %arg16[%c0_185, %c0_186, %c0_187] : memref<8x8x5xf32, #tpu.memory_space<vmem>>, vector<8x8x5xf32>
    tpu.vector_store %arg16[%c0_185, %c0_186, %c0_187], %757 {strides = array<i32>} : memref<8x8x5xf32, #tpu.memory_space<vmem>>, vector<8x8x5xf32>,
    %c0_188 = arith.constant 0 : index
    %c0_189 = arith.constant 0 : index
    %759 = vector.load %arg10[%c0_188, %c0_189] : memref<5x5xf32, #tpu.memory_space<vmem>>, vector<5x5xf32>
    %760 = vector.shape_cast %759 : vector<5x5xf32> to vector<1x5x5xf32>
    %761 = vector.shape_cast %760 : vector<1x5x5xf32> to vector<1x5x5xf32>
    %762 = vector.broadcast %761 : vector<1x5x5xf32> to vector<8x5x5xf32>
    %763 = tpu.iota {dimensions = array<i32: 1>} : vector<8x5xi32>
    %c3_i32_190 = arith.constant 3 : i32
    %764 = vector.broadcast %c3_i32_190 : i32 to vector<8x5xi32>
    %765 = arith.cmpi eq, %763, %764 : vector<8x5xi32>
    %cst_191 = arith.constant 0.000000e+00 : f32
    %cst_192 = arith.constant -1.000000e+04 : f32
    %766 = vector.broadcast %cst_191 : f32 to vector<8x5xf32>
    %767 = vector.broadcast %cst_192 : f32 to vector<8x5xf32>
    %768 = arith.select %765, %766, %767 : vector<8x5xi1>, vector<8x5xf32>
    %cst_193 = arith.constant 0.000000e+00 : f32
    %769 = vector.broadcast %cst_193 : f32 to vector<8x5xf32>
    %c0_i32_194 = arith.constant 0 : i32
    %770 = arith.index_cast %c0_i32_194 : i32 to index
    %c0_195 = arith.constant 0 : index
    %c0_196 = arith.constant 0 : index
    %771 = vector.load %arg16[%770, %c0_195, %c0_196] : memref<8x8x5xf32, #tpu.memory_space<vmem>>, vector<1x8x5xf32>
    %772 = vector.shape_cast %771 : vector<1x8x5xf32> to vector<8x5xf32>
    %773 = vector.shape_cast %768 : vector<8x5xf32> to vector<8x1x5xf32>
    %774 = vector.broadcast %773 : vector<8x1x5xf32> to vector<8x5x5xf32>
    %775 = arith.addf %774, %762 : vector<8x5x5xf32>
    %cst_197 = arith.constant dense<0xFF800000> : vector<8x5xf32>
    %776 = vector.multi_reduction <maximumf>, %775, %cst_197 [2] : vector<8x5x5xf32> to vector<8x5xf32>
    %777 = arith.addf %776, %772 : vector<8x5xf32>
    %c1_i32_198 = arith.constant 1 : i32
    %778 = vector.broadcast %c1_i32_198 : i32 to vector<8x1xi32>
    %779 = arith.subi %0, %778 : vector<8x1xi32>
    %780 = vector.broadcast %c0_i32_194 : i32 to vector<8x1xi32>
    %781 = arith.cmpi eq, %780, %779 : vector<8x1xi32>
    %782 = vector.shape_cast %781 : vector<8x1xi1> to vector<8x1xi1>
    %783 = vector.broadcast %782 : vector<8x1xi1> to vector<8x5xi1>
    %784 = arith.select %783, %777, %769 : vector<8x5xi1>, vector<8x5xf32>
    %c1_i32_199 = arith.constant 1 : i32
    %785 = arith.index_cast %c1_i32_199 : i32 to index
    %c0_200 = arith.constant 0 : index
    %c0_201 = arith.constant 0 : index
    %786 = vector.load %arg16[%785, %c0_200, %c0_201] : memref<8x8x5xf32, #tpu.memory_space<vmem>>, vector<1x8x5xf32>
    %787 = vector.shape_cast %786 : vector<1x8x5xf32> to vector<8x5xf32>
    %788 = vector.shape_cast %777 : vector<8x5xf32> to vector<8x1x5xf32>
    %789 = vector.broadcast %788 : vector<8x1x5xf32> to vector<8x5x5xf32>
    %790 = arith.addf %789, %762 : vector<8x5x5xf32>
    %cst_202 = arith.constant dense<0xFF800000> : vector<8x5xf32>
    %791 = vector.multi_reduction <maximumf>, %790, %cst_202 [2] : vector<8x5x5xf32> to vector<8x5xf32>
    %792 = arith.addf %791, %787 : vector<8x5xf32>
    %c1_i32_203 = arith.constant 1 : i32
    %793 = vector.broadcast %c1_i32_203 : i32 to vector<8x1xi32>
    %794 = arith.subi %0, %793 : vector<8x1xi32>
    %795 = vector.broadcast %c1_i32_199 : i32 to vector<8x1xi32>
    %796 = arith.cmpi eq, %795, %794 : vector<8x1xi32>
    %797 = vector.shape_cast %796 : vector<8x1xi1> to vector<8x1xi1>
    %798 = vector.broadcast %797 : vector<8x1xi1> to vector<8x5xi1>
    %799 = arith.select %798, %792, %784 : vector<8x5xi1>, vector<8x5xf32>
    %c2_i32_204 = arith.constant 2 : i32
    %800 = arith.index_cast %c2_i32_204 : i32 to index
    %c0_205 = arith.constant 0 : index
    %c0_206 = arith.constant 0 : index
    %801 = vector.load %arg16[%800, %c0_205, %c0_206] : memref<8x8x5xf32, #tpu.memory_space<vmem>>, vector<1x8x5xf32>
    %802 = vector.shape_cast %801 : vector<1x8x5xf32> to vector<8x5xf32>
    %803 = vector.shape_cast %792 : vector<8x5xf32> to vector<8x1x5xf32>
    %804 = vector.broadcast %803 : vector<8x1x5xf32> to vector<8x5x5xf32>
    %805 = arith.addf %804, %762 : vector<8x5x5xf32>
    %cst_207 = arith.constant dense<0xFF800000> : vector<8x5xf32>
    %806 = vector.multi_reduction <maximumf>, %805, %cst_207 [2] : vector<8x5x5xf32> to vector<8x5xf32>
    %807 = arith.addf %806, %802 : vector<8x5xf32>
    %c1_i32_208 = arith.constant 1 : i32
    %808 = vector.broadcast %c1_i32_208 : i32 to vector<8x1xi32>
    %809 = arith.subi %0, %808 : vector<8x1xi32>
    %810 = vector.broadcast %c2_i32_204 : i32 to vector<8x1xi32>
    %811 = arith.cmpi eq, %810, %809 : vector<8x1xi32>
    %812 = vector.shape_cast %811 : vector<8x1xi1> to vector<8x1xi1>
    %813 = vector.broadcast %812 : vector<8x1xi1> to vector<8x5xi1>
    %814 = arith.select %813, %807, %799 : vector<8x5xi1>, vector<8x5xf32>
    %c3_i32_209 = arith.constant 3 : i32
    %815 = arith.index_cast %c3_i32_209 : i32 to index
    %c0_210 = arith.constant 0 : index
    %c0_211 = arith.constant 0 : index
    %816 = vector.load %arg16[%815, %c0_210, %c0_211] : memref<8x8x5xf32, #tpu.memory_space<vmem>>, vector<1x8x5xf32>
    %817 = vector.shape_cast %816 : vector<1x8x5xf32> to vector<8x5xf32>
    %818 = vector.shape_cast %807 : vector<8x5xf32> to vector<8x1x5xf32>
    %819 = vector.broadcast %818 : vector<8x1x5xf32> to vector<8x5x5xf32>
    %820 = arith.addf %819, %762 : vector<8x5x5xf32>
    %cst_212 = arith.constant dense<0xFF800000> : vector<8x5xf32>
    %821 = vector.multi_reduction <maximumf>, %820, %cst_212 [2] : vector<8x5x5xf32> to vector<8x5xf32>
    %822 = arith.addf %821, %817 : vector<8x5xf32>
    %c1_i32_213 = arith.constant 1 : i32
    %823 = vector.broadcast %c1_i32_213 : i32 to vector<8x1xi32>
    %824 = arith.subi %0, %823 : vector<8x1xi32>
    %825 = vector.broadcast %c3_i32_209 : i32 to vector<8x1xi32>
    %826 = arith.cmpi eq, %825, %824 : vector<8x1xi32>
    %827 = vector.shape_cast %826 : vector<8x1xi1> to vector<8x1xi1>
    %828 = vector.broadcast %827 : vector<8x1xi1> to vector<8x5xi1>
    %829 = arith.select %828, %822, %814 : vector<8x5xi1>, vector<8x5xf32>
    %c4_i32_214 = arith.constant 4 : i32
    %830 = arith.index_cast %c4_i32_214 : i32 to index
    %c0_215 = arith.constant 0 : index
    %c0_216 = arith.constant 0 : index
    %831 = vector.load %arg16[%830, %c0_215, %c0_216] : memref<8x8x5xf32, #tpu.memory_space<vmem>>, vector<1x8x5xf32>
    %832 = vector.shape_cast %831 : vector<1x8x5xf32> to vector<8x5xf32>
    %833 = vector.shape_cast %822 : vector<8x5xf32> to vector<8x1x5xf32>
    %834 = vector.broadcast %833 : vector<8x1x5xf32> to vector<8x5x5xf32>
    %835 = arith.addf %834, %762 : vector<8x5x5xf32>
    %cst_217 = arith.constant dense<0xFF800000> : vector<8x5xf32>
    %836 = vector.multi_reduction <maximumf>, %835, %cst_217 [2] : vector<8x5x5xf32> to vector<8x5xf32>
    %837 = arith.addf %836, %832 : vector<8x5xf32>
    %c1_i32_218 = arith.constant 1 : i32
    %838 = vector.broadcast %c1_i32_218 : i32 to vector<8x1xi32>
    %839 = arith.subi %0, %838 : vector<8x1xi32>
    %840 = vector.broadcast %c4_i32_214 : i32 to vector<8x1xi32>
    %841 = arith.cmpi eq, %840, %839 : vector<8x1xi32>
    %842 = vector.shape_cast %841 : vector<8x1xi1> to vector<8x1xi1>
    %843 = vector.broadcast %842 : vector<8x1xi1> to vector<8x5xi1>
    %844 = arith.select %843, %837, %829 : vector<8x5xi1>, vector<8x5xf32>
    %c5_i32_219 = arith.constant 5 : i32
    %845 = arith.index_cast %c5_i32_219 : i32 to index
    %c0_220 = arith.constant 0 : index
    %c0_221 = arith.constant 0 : index
    %846 = vector.load %arg16[%845, %c0_220, %c0_221] : memref<8x8x5xf32, #tpu.memory_space<vmem>>, vector<1x8x5xf32>
    %847 = vector.shape_cast %846 : vector<1x8x5xf32> to vector<8x5xf32>
    %848 = vector.shape_cast %837 : vector<8x5xf32> to vector<8x1x5xf32>
    %849 = vector.broadcast %848 : vector<8x1x5xf32> to vector<8x5x5xf32>
    %850 = arith.addf %849, %762 : vector<8x5x5xf32>
    %cst_222 = arith.constant dense<0xFF800000> : vector<8x5xf32>
    %851 = vector.multi_reduction <maximumf>, %850, %cst_222 [2] : vector<8x5x5xf32> to vector<8x5xf32>
    %852 = arith.addf %851, %847 : vector<8x5xf32>
    %c1_i32_223 = arith.constant 1 : i32
    %853 = vector.broadcast %c1_i32_223 : i32 to vector<8x1xi32>
    %854 = arith.subi %0, %853 : vector<8x1xi32>
    %855 = vector.broadcast %c5_i32_219 : i32 to vector<8x1xi32>
    %856 = arith.cmpi eq, %855, %854 : vector<8x1xi32>
    %857 = vector.shape_cast %856 : vector<8x1xi1> to vector<8x1xi1>
    %858 = vector.broadcast %857 : vector<8x1xi1> to vector<8x5xi1>
    %859 = arith.select %858, %852, %844 : vector<8x5xi1>, vector<8x5xf32>
    %c6_i32_224 = arith.constant 6 : i32
    %860 = arith.index_cast %c6_i32_224 : i32 to index
    %c0_225 = arith.constant 0 : index
    %c0_226 = arith.constant 0 : index
    %861 = vector.load %arg16[%860, %c0_225, %c0_226] : memref<8x8x5xf32, #tpu.memory_space<vmem>>, vector<1x8x5xf32>
    %862 = vector.shape_cast %861 : vector<1x8x5xf32> to vector<8x5xf32>
    %863 = vector.shape_cast %852 : vector<8x5xf32> to vector<8x1x5xf32>
    %864 = vector.broadcast %863 : vector<8x1x5xf32> to vector<8x5x5xf32>
    %865 = arith.addf %864, %762 : vector<8x5x5xf32>
    %cst_227 = arith.constant dense<0xFF800000> : vector<8x5xf32>
    %866 = vector.multi_reduction <maximumf>, %865, %cst_227 [2] : vector<8x5x5xf32> to vector<8x5xf32>
    %867 = arith.addf %866, %862 : vector<8x5xf32>
    %c1_i32_228 = arith.constant 1 : i32
    %868 = vector.broadcast %c1_i32_228 : i32 to vector<8x1xi32>
    %869 = arith.subi %0, %868 : vector<8x1xi32>
    %870 = vector.broadcast %c6_i32_224 : i32 to vector<8x1xi32>
    %871 = arith.cmpi eq, %870, %869 : vector<8x1xi32>
    %872 = vector.shape_cast %871 : vector<8x1xi1> to vector<8x1xi1>
    %873 = vector.broadcast %872 : vector<8x1xi1> to vector<8x5xi1>
    %874 = arith.select %873, %867, %859 : vector<8x5xi1>, vector<8x5xf32>
    %c7_i32_229 = arith.constant 7 : i32
    %875 = arith.index_cast %c7_i32_229 : i32 to index
    %c0_230 = arith.constant 0 : index
    %c0_231 = arith.constant 0 : index
    %876 = vector.load %arg16[%875, %c0_230, %c0_231] : memref<8x8x5xf32, #tpu.memory_space<vmem>>, vector<1x8x5xf32>
    %877 = vector.shape_cast %876 : vector<1x8x5xf32> to vector<8x5xf32>
    %878 = vector.shape_cast %867 : vector<8x5xf32> to vector<8x1x5xf32>
    %879 = vector.broadcast %878 : vector<8x1x5xf32> to vector<8x5x5xf32>
    %880 = arith.addf %879, %762 : vector<8x5x5xf32>
    %cst_232 = arith.constant dense<0xFF800000> : vector<8x5xf32>
    %881 = vector.multi_reduction <maximumf>, %880, %cst_232 [2] : vector<8x5x5xf32> to vector<8x5xf32>
    %882 = arith.addf %881, %877 : vector<8x5xf32>
    %c1_i32_233 = arith.constant 1 : i32
    %883 = vector.broadcast %c1_i32_233 : i32 to vector<8x1xi32>
    %884 = arith.subi %0, %883 : vector<8x1xi32>
    %885 = vector.broadcast %c7_i32_229 : i32 to vector<8x1xi32>
    %886 = arith.cmpi eq, %885, %884 : vector<8x1xi32>
    %887 = vector.shape_cast %886 : vector<8x1xi1> to vector<8x1xi1>
    %888 = vector.broadcast %887 : vector<8x1xi1> to vector<8x5xi1>
    %889 = arith.select %888, %882, %874 : vector<8x5xi1>, vector<8x5xf32>
    %c8_i32_234 = arith.constant 8 : i32
    %890 = vector.extract_strided_slice %759 {offsets = [4, 0], sizes = [1, 5], strides = [1, 1]} : vector<5x5xf32> to vector<1x5xf32>
    %891 = vector.broadcast %890 : vector<1x5xf32> to vector<8x5xf32>
    %892 = arith.addf %889, %891 : vector<8x5xf32>
    %cst_235 = arith.constant dense<0xFF800000> : vector<8xf32>
    %893 = vector.multi_reduction <maximumf>, %892, %cst_235 [1] : vector<8x5xf32> to vector<8xf32>
    %894 = vector.shape_cast %893 : vector<8xf32> to vector<8x1xf32>
    %c0_236 = arith.constant 0 : index
    %c0_237 = arith.constant 0 : index
    %895 = vector.load %arg11[%c0_236, %c0_237] : memref<8x1xf32, #tpu.memory_space<vmem>>, vector<8x1xf32>
    tpu.vector_store %arg11[%c0_236, %c0_237], %894 {strides = array<i32>} : memref<8x1xf32, #tpu.memory_space<vmem>>, vector<8x1xf32>,
    return
  }
  func.func @transform_0(%arg0: i32) -> (i32, i32, i32) {
    %c0_i32 = arith.constant 0 : i32
    %c0_i32_0 = arith.constant 0 : i32
    %c0_i32_1 = arith.constant 0 : i32
    return %c0_i32, %arg0, %c0_i32_0 : i32, i32, i32
  }
  func.func @transform_1(%arg0: i32) -> (i32, i32) {
    %c0_i32 = arith.constant 0 : i32
    %c0_i32_0 = arith.constant 0 : i32
    return %arg0, %c0_i32 : i32, i32
  }
  func.func @transform_2(%arg0: i32) -> (i32, i32) {
    %c0_i32 = arith.constant 0 : i32
    %c0_i32_0 = arith.constant 0 : i32
    %c0_i32_1 = arith.constant 0 : i32
    return %c0_i32, %c0_i32_0 : i32, i32
  }
  func.func @transform_3(%arg0: i32) -> (i32, i32) {
    %c0_i32 = arith.constant 0 : i32
    %c0_i32_0 = arith.constant 0 : i32
    %c0_i32_1 = arith.constant 0 : i32
    return %c0_i32, %c0_i32_0 : i32, i32
  }
  func.func @transform_4(%arg0: i32) -> (i32, i32) {
    %c0_i32 = arith.constant 0 : i32
    %c0_i32_0 = arith.constant 0 : i32
    %c0_i32_1 = arith.constant 0 : i32
    return %c0_i32, %c0_i32_0 : i32, i32
  }
  func.func @transform_5(%arg0: i32) -> (i32, i32) {
    %c0_i32 = arith.constant 0 : i32
    %c0_i32_0 = arith.constant 0 : i32
    %c0_i32_1 = arith.constant 0 : i32
    return %c0_i32, %c0_i32_0 : i32, i32
  }
  func.func @transform_6(%arg0: i32) -> (i32, i32) {
    %c0_i32 = arith.constant 0 : i32
    %c0_i32_0 = arith.constant 0 : i32
    %c0_i32_1 = arith.constant 0 : i32
    return %c0_i32, %c0_i32_0 : i32, i32
  }
  func.func @transform_7(%arg0: i32) -> (i32, i32) {
    %c0_i32 = arith.constant 0 : i32
    %c0_i32_0 = arith.constant 0 : i32
    %c0_i32_1 = arith.constant 0 : i32
    return %c0_i32, %c0_i32_0 : i32, i32
  }
  func.func @transform_8(%arg0: i32) -> (i32, i32) {
    %c0_i32 = arith.constant 0 : i32
    %c0_i32_0 = arith.constant 0 : i32
    %c0_i32_1 = arith.constant 0 : i32
    return %c0_i32, %c0_i32_0 : i32, i32
  }
  func.func @transform_9(%arg0: i32) -> (i32, i32) {
    %c0_i32 = arith.constant 0 : i32
    %c0_i32_0 = arith.constant 0 : i32
    %c0_i32_1 = arith.constant 0 : i32
    return %c0_i32, %c0_i32_0 : i32, i32
  }
  func.func @transform_10(%arg0: i32) -> (i32, i32) {
    %c0_i32 = arith.constant 0 : i32
    %c0_i32_0 = arith.constant 0 : i32
    return %arg0, %c0_i32 : i32, i32
  }
}

</mosaic_0001>

<bundles_post_ra>
// kernel: tpu_custom_call.1
= control target key start
LH: loop header
LB: loop body
LE: loop exit
PB: predicated region body
PF: predicated region fallthrough
CT: control target
= control target key end

     0   :  { %15 = vsyncpa [#allocation8], 0  ;;  %s13540_s0 = inlined_call_operand.hbm [shape: f32[8,8,32], index: 0, kind: input, shape index: {}]   ;;  %s13541_s1 = inlined_call_operand.vmem [shape: s32[8,1], index: 1, kind: input, shape index: {}]   ;;  %s13542_s2 = inlined_call_operand.vmem [shape: f32[32,1024], index: 2, kind: input, shape index: {}]   ;;  %s13543_s3 = inlined_call_operand.vmem [shape: f32[1,1024], index: 3, kind: input, shape index: {}]   ;;  %s13544_s4 = inlined_call_operand.hbm [shape: f32[128,512], index: 4, kind: input, shape index: {}]   ;;  %s13545_s5 = inlined_call_operand.hbm [shape: f32[128,512], index: 5, kind: input, shape index: {}]   ;;  %s13546_s6 = inlined_call_operand.vmem [shape: f32[128,5], index: 6, kind: input, shape index: {}]   ;;  %s13547_s7 = inlined_call_operand.vmem [shape: f32[128,5], index: 7, kind: input, shape index: {}]   ;;  %s13548_s8 = inlined_call_operand.vmem [shape: f32[1,5], index: 8, kind: input, shape index: {}]   ;;  %s13549_s9 = inlined_call_operand.vmem [shape: f32[5,5], index: 9, kind: input, shape index: {}]   ;;  %s13550_s10 = inlined_call_operand.vmem [shape: f32[8,1], index: 10, kind: output, shape index: {}]  }
   0x1   :  { %16 = vsyncpa [#allocation10], 0  ;;  %s10254_s13 = smov [#allocation9]   ;;  %s10184_s17 = scalar_lea.hbm %s13544_s4, 8192 }
   0x2   :  { %s40_s14 = sshll.u32 %s10254_s13, 4  ;;  %p10185_p0 = scmp.ne.s32.totalorder %s13544_s4, %s10184_s17  ;;  %s41_s14 = int_to_ptr.vmem [resolvable:$true] %s40_s14 }
   0x3   :  { %p10188_p1 = scmp.lt.u32.totalorder %s10184_s17, %s13544_s4 }
   0x5   :  { %p10190_p2 = pnand %p10188_p1, %p10185_p0 }
   0x7   :  { %10193 = shalt.err (!%p10190_p2)
}
   0x8   :  { %s10194_s22 = scalar_lea.vmem %s41_s14, 8192  ;;  %p10199_p4 = scmp.lt.s32.totalorder %s41_s14, %s41_s14 }
   0x9   :  { %p10195_p3 = scmp.ne.s32.totalorder %s41_s14, %s10194_s22  ;;  %p10200_p5 = scmp.lt.s32.totalorder %s10194_s22, %s10194_s22 }
   0xb   :  { %p10201_p6 = por %p10200_p5, %p10199_p4 }
   0xd   :  { %p10202_p7 = pnand %p10201_p6, %p10195_p3 }
   0xf   :  { %10205 = shalt.err (!%p10202_p7)
}
  0x10   :  { %s10255_s23 = smov 512   ;;  %s10256_s24 = smov 32  }
  0x11   :  { %46 = dma.hbm_to_vmem [thread:$0]  %s13544_s4, 8192, %s41_s14, [#allocation10], %s10255_s23, %s10255_s23, %s10256_s24  }
  0x12   :  { %s10257_s27 = smov [#allocation7]   ;;  %s10206_s11 = scalar_lea.hbm %s13540_s0, 1024 }
  0x13   :  { %s22_s28 = sshll.u32 %s10257_s27, 4  ;;  %p10207_p8 = scmp.ne.s32.totalorder %s13540_s0, %s10206_s11  ;;  %s23_s28 = int_to_ptr.vmem [resolvable:$true] %s22_s28 }
  0x14   :  { %p10210_p9 = scmp.lt.u32.totalorder %s10206_s11, %s13540_s0 }
  0x16   :  { %p10212_p10 = pnand %p10210_p9, %p10207_p8 }
  0x18   :  { %10215 = shalt.err (!%p10212_p10)
}
  0x19   :  { %s10216_s17 = scalar_lea.vmem %s23_s28, 1024  ;;  %p10221_p12 = scmp.lt.s32.totalorder %s23_s28, %s23_s28 }
  0x1a   :  { %p10217_p11 = scmp.ne.s32.totalorder %s23_s28, %s10216_s17  ;;  %p10222_p13 = scmp.lt.s32.totalorder %s10216_s17, %s10216_s17 }
  0x1c   :  { %p10223_p0 = por %p10222_p13, %p10221_p12 }
  0x1e   :  { %p10224_p1 = pnand %p10223_p0, %p10217_p11 }
  0x20   :  { %10227 = shalt.err (!%p10224_p1)
}
  0x21   :  { %s10258_s4 = smov 128   ;;  %s10259_s14 = smov 8  }
  0x22   :  { %28 = dma.hbm_to_vmem [thread:$0]  %s13540_s0, 1024, %s23_s28, [#allocation8], %s10258_s4, %s10258_s4, %s10259_s14  }
  0x23   :  { %s10260_s20 = smov [#allocation11]   ;;  %s10228_s26 = scalar_lea.hbm %s13545_s5, 8192 }
  0x24   :  { %s52_s21 = sshll.u32 %s10260_s20, 4  ;;  %p10229_p2 = scmp.ne.s32.totalorder %s13545_s5, %s10228_s26  ;;  %s53_s21 = int_to_ptr.vmem [resolvable:$true] %s52_s21 }
  0x25   :  { %p10232_p3 = scmp.lt.u32.totalorder %s10228_s26, %s13545_s5 }
  0x27   :  { %p10234_p4 = pnand %p10232_p3, %p10229_p2 }
  0x29   :  { %10237 = shalt.err (!%p10234_p4)
}
  0x2a   :  { %s10238_s12 = scalar_lea.vmem %s53_s21, 8192  ;;  %p10243_p6 = scmp.lt.s32.totalorder %s53_s21, %s53_s21 }
  0x2b   :  { %p10239_p5 = scmp.ne.s32.totalorder %s53_s21, %s10238_s12  ;;  %p10244_p7 = scmp.lt.s32.totalorder %s10238_s12, %s10238_s12 }
  0x2d   :  { %p10245_p8 = por %p10244_p7, %p10243_p6 }
  0x2f   :  { %p10246_p9 = pnand %p10245_p8, %p10239_p5 }
  0x31   :  { %10249 = shalt.err (!%p10246_p9)
}
  0x32   :  { %58 = dma.hbm_to_vmem [thread:$0]  %s13545_s5, 8192, %s53_s21, [#allocation10], %s10255_s23, %s10255_s23, %s10256_s24  }
  0x33   :  { %10250 = dma.done.wait [#allocation8], 1024  }
  0x34   :  { %10251 = vsyncadd [#allocation8], 4294966272 }
  0x35   :  { %10252 = dma.done.wait [#allocation10], 16384  }
  0x36   :  { %10253 = vsyncadd [#allocation10], 4294950912  ;;  %v13562_v0 = vmov 0.0   ;;  %v13551_v1 = vmov 0   ;;  %v86_v2 = vld [vmem:[%s13542_s2 + $0x8] sm:$0xff]  ;;  %v85_v7 = vld [vmem:[%s13542_s2] sm:$0xff]  ;;  %v119_v47 = vlaneseq }
  0x37   :  { %248 = vmatprep.mubr.f32.mxu1 %v13562_v0  ;;  %474 = vmatprep.mubr.f32.mxu0 %v13562_v0  ;;  %v94_v3 = vld [vmem:[%s13542_s2 + $0x48] sm:$0xff]  ;;  %v93_v8 = vld [vmem:[%s13542_s2 + $0x40] sm:$0xff]  ;;  %v88_v25 = vld [vmem:[%s13542_s2 + $0x18] sm:$0xff]  ;;  %vm159_vm0 = vcmask 261120   ;;  %vm4132_vm6 = vcmask 36864  }
  0x38   :  { %9925 = vset.pattern.permute.xlu0 %v13551_v1  ;;  %9926 = vset.pattern.permute.xlu1 %v13551_v1  ;;  %v90_v4 = vld [vmem:[%s13542_s2 + $0x28] sm:$0xff]  ;;  %v8658_v5 = vpack.c.bf16 %v94_v3, %v86_v2  ;;  %v8660_v10 = vpack.c.bf16 %v93_v8, %v85_v7  ;;  %v89_v11 = vld [vmem:[%s13542_s2 + $0x20] sm:$0xff]  ;;  %v96_v27 = vld [vmem:[%s13542_s2 + $0x58] sm:$0xff]  ;;  %v10468_v60 = vshrl.u32 %v119_v47, 7  ;;  %v10470_v61 = vand.u32 127, %v119_v47 }
  0x39   :  { %v98_v6 = vld [vmem:[%s13542_s2 + $0x68] sm:$0xff]  ;;  %v97_v12 = vld [vmem:[%s13542_s2 + $0x60] sm:$0xff]  ;;  %v8666_v30 = vpack.c.bf16 %v96_v27, %v88_v25  ;;  %v87_v32 = vld [vmem:[%s13542_s2 + $0x10] sm:$0xff] }
  0x3a   :  { %v8674_v9 = vpack.c.bf16 %v98_v6, %v90_v4  ;;  %v102_v13 = vld [vmem:[%s13542_s2 + $0x88] sm:$0xff]  ;;  %8659 = vmatprep.subr.bf16.mxu1 %v8658_v5  ;;  %v8676_v14 = vpack.c.bf16 %v97_v12, %v89_v11  ;;  %v101_v20 = vld [vmem:[%s13542_s2 + $0x80] sm:$0xff]  ;;  %v95_v33 = vld [vmem:[%s13542_s2 + $0x50] sm:$0xff]  ;;  %v10481_v5 = vsub.s32 %v10470_v61, %v10468_v60  ;;  %vm4031_vm5 = vcmp.eq.s32.totalorder %v10470_v61, 3 }
  0x3b   :  { %v110_v15 = vld [vmem:[%s13542_s2 + $0xc8] sm:$0xff]  ;;  %8661 = vmatpush1.bf16.msra.mxu1 %v8660_v10  ;;  %v109_v21 = vld [vmem:[%s13542_s2 + $0xc0] sm:$0xff]  ;;  %v8668_v36 = vpack.c.bf16 %v95_v33, %v87_v32  ;;  %v104_v50 = vld [vmem:[%s13542_s2 + $0x98] sm:$0xff] }
  0x3c   :  { %v106_v16 = vld [vmem:[%s13542_s2 + $0xa8] sm:$0xff]  ;;  %8675 = vmatprep.subr.bf16.mxu0 %v8674_v9  ;;  %v8662_v18 = vpack.c.bf16 %v110_v15, %v102_v13  ;;  %v105_v22 = vld [vmem:[%s13542_s2 + $0xa0] sm:$0xff]  ;;  %v8664_v23 = vpack.c.bf16 %v109_v21, %v101_v20  ;;  %v112_v54 = vld [vmem:[%s13542_s2 + $0xd8] sm:$0xff]  ;;  %13689 = vst [vmem:[#allocation21_spill] sm:$0xff] %v10481_v5 }
  0x3d   :  { %v114_v17 = vld [vmem:[%s13542_s2 + $0xe8] sm:$0xff]  ;;  %8677 = vmatpush1.bf16.msra.mxu0 %v8676_v14  ;;  %v113_v24 = vld [vmem:[%s13542_s2 + $0xe0] sm:$0xff]  ;;  %v8670_v56 = vpack.c.bf16 %v112_v54, %v104_v50  ;;  %v103_v57 = vld [vmem:[%s13542_s2 + $0x90] sm:$0xff] }
  0x3e   :  { %v8678_v19 = vpack.c.bf16 %v114_v17, %v106_v16  ;;  %8663 = vmatprep.subr.bf16.mxu1 %v8662_v18  ;;  %v8680_v26 = vpack.c.bf16 %v113_v24, %v105_v22  ;;  %v701_v28 = vld [vmem:[#allocation9 + $0x8] sm:$0xff]  ;;  %v700_v34 = vld [vmem:[#allocation9] sm:$0xff]  ;;  %v111_v58 = vld [vmem:[%s13542_s2 + $0xd0] sm:$0xff] }
  0x3f   :  { %v705_v29 = vld [vmem:[#allocation9 + $0x28] sm:$0xff]  ;;  %8665 = vmatpush1.bf16.msra.mxu1 %v8664_v23  ;;  %v10428_v35 = vld [vmem:[#allocation7] sm:$0xff]  ;;  %v10466_v59 = vld [vmem:[#allocation7 + $0x10] sm:$0xff]  ;;  %v8672_v4 = vpack.c.bf16 %v111_v58, %v103_v57 }
  0x40   :  { %8679 = vmatprep.subr.bf16.mxu0 %v8678_v19  ;;  %v10420_v31 = vpack.c.bf16 %v705_v29, %v701_v28  ;;  %v704_v37 = vld [vmem:[#allocation9 + $0x20] sm:$0xff]  ;;  %v709_v38 = vld [vmem:[#allocation9 + $0x48] sm:$0xff]  ;;  %8667 = vmatprep.subr.bf16.mxu1 %v8666_v30  ;;  %v10488_v8 = vld [vmem:[#allocation7 + $0x18] sm:$0xff] }
  0x41   :  { %8681 = vmatpush1.bf16.msra.mxu0 %v8680_v26  ;;  %v10430_v39 = vpack.c.bf16 %v704_v37, %v700_v34  ;;  %v713_v40 = vld [vmem:[#allocation9 + $0x68] sm:$0xff]  ;;  %v708_v42 = vld [vmem:[#allocation9 + $0x40] sm:$0xff]  ;;  %v92_v10 = vld [vmem:[%s13542_s2 + $0x38] sm:$0xff] }
  0x42   :  { %13682 = vst [vmem:[#allocation14_spill] sm:$0xff] %v10420_v31  ;;  %8691 = vmatprep.subr.bf16.mxu0 %v10420_v31  ;;  %v10433_v41 = vpack.c.bf16 %v713_v40, %v709_v38  ;;  %v712_v43 = vld [vmem:[#allocation9 + $0x60] sm:$0xff]  ;;  %8420 = vmatmul.mubr.msk.f32.vlgmr.msra.gmra.mrb[0].mxu1 %vm159_vm0, %v10428_v35  ;;  %v717_v44 = vld [vmem:[#allocation9 + $0x88] sm:$0xff]  ;;  %v100_v11 = vld [vmem:[%s13542_s2 + $0x78] sm:$0xff] }
  0x43   :  { %13683 = vst [vmem:[#allocation15_spill] sm:$0xff] %v10430_v39  ;;  %v721_v45 = vld [vmem:[#allocation9 + $0xa8] sm:$0xff]  ;;  %8669 = vmatpush1.bf16.msra.mxu1 %v8668_v36  ;;  %254 = vmatprep.mubr.f32.mxu1 %v13562_v0  ;;  %v10443_v48 = vpack.c.bf16 %v712_v43, %v708_v42  ;;  %v716_v49 = vld [vmem:[#allocation9 + $0x80] sm:$0xff]  ;;  %v8682_v15 = vpack.c.bf16 %v100_v11, %v92_v10  ;;  %v10536_v33 = vld [vmem:[#allocation7 + $0x30] sm:$0xff] }
  0x44   :  { %13684 = vst [vmem:[#allocation16_spill] sm:$0xff] %v10433_v41  ;;  %8436 = vmatmul.mubr.msk.f32.vlgmr.msra.gmra.mrb[0].mxu0 %vm159_vm0, %v10428_v35  ;;  %v10439_v46 = vld [vmem:[#allocation7 + $0x8] sm:$0xff]  ;;  %v10450_v51 = vpack.c.bf16 %v721_v45, %v717_v44  ;;  %v720_v52 = vld [vmem:[#allocation9 + $0xa0] sm:$0xff]  ;;  %8671 = vmatprep.subr.bf16.mxu1 %v8670_v56  ;;  %v10550_v43 = vld [vmem:[#allocation7 + $0x38] sm:$0xff] }
  0x45   :  { %8693 = vmatpush1.bf16.msra.mxu0 %v10430_v39  ;;  %13685 = vst [vmem:[#allocation17_spill] sm:$0xff] %v10443_v48  ;;  %480 = vmatprep.mubr.f32.mxu0 %v13562_v0  ;;  %v725_v53 = vld [vmem:[#allocation9 + $0xc8] sm:$0xff]  ;;  %v10474_v62 = vpack.c.bf16 %v720_v52, %v716_v49  ;;  %v724_v2 = vld [vmem:[#allocation9 + $0xc0] sm:$0xff]  ;;  %v91_v45 = vld [vmem:[%s13542_s2 + $0x30] sm:$0xff] }
  0x46   :  { %8695 = vmatprep.subr.bf16.mxu0 %v10433_v41  ;;  %13686 = vst [vmem:[#allocation18_spill] sm:$0xff] %v10450_v51  ;;  %8421 = vmatmul.mubr.msk.f32.gmra.mrb[2].mxu1 %vm159_vm0, %v10439_v46  ;;  %v729_v55 = vld [vmem:[#allocation9 + $0xe8] sm:$0xff]  ;;  %v728_v3 = vld [vmem:[#allocation9 + $0xe0] sm:$0xff]  ;;  %v99_v47 = vld [vmem:[%s13542_s2 + $0x70] sm:$0xff] }
  0x47   :  { %260 = vmatprep.mubr.f32.mxu1 %v13562_v0  ;;  %13687 = vst [vmem:[#allocation19_spill] sm:$0xff] %v10474_v62  ;;  %v10477_v63 = vpack.c.bf16 %v729_v55, %v725_v53  ;;  %v733_v6 = vld [vmem:[#allocation9 + $0x108] sm:$0xff]  ;;  %v10492_v9 = vpack.c.bf16 %v728_v3, %v724_v2  ;;  %8673 = vmatpush1.bf16.msra.mxu1 %v8672_v4  ;;  %v732_v13 = vld [vmem:[#allocation9 + $0x100] sm:$0xff]  ;;  %v108_v53 = vld [vmem:[%s13542_s2 + $0xb8] sm:$0xff] }
  0x48   :  { %8437 = vmatmul.mubr.msk.f32.gmra.mrb[2].mxu0 %vm159_vm0, %v10439_v46  ;;  %v737_v7 = vld [vmem:[#allocation9 + $0x128] sm:$0xff]  ;;  %v736_v14 = vld [vmem:[#allocation9 + $0x120] sm:$0xff]  ;;  %8683 = vmatprep.subr.bf16.mxu1 %v8682_v15  ;;  %v116_v54 = vld [vmem:[%s13542_s2 + $0xf8] sm:$0xff]  ;;  %v8684_v57 = vpack.c.bf16 %v99_v47, %v91_v45 }
  0x49   :  { %8697 = vmatpush1.bf16.msra.mxu0 %v10443_v48  ;;  %486 = vmatprep.mubr.f32.mxu0 %v13562_v0  ;;  %13688 = vst [vmem:[#allocation20_spill] sm:$0xff] %v10477_v63  ;;  %13690 = vst [vmem:[#allocation22_spill] sm:$0xff] %v10492_v9  ;;  %v10501_v12 = vpack.c.bf16 %v737_v7, %v733_v6  ;;  %v741_v16 = vld [vmem:[#allocation9 + $0x148] sm:$0xff]  ;;  %v10508_v18 = vld [vmem:[#allocation7 + $0x20] sm:$0xff]  ;;  %v10512_v19 = vpack.c.bf16 %v736_v14, %v732_v13 }
  0x4a   :  { %8699 = vmatprep.subr.bf16.mxu0 %v10450_v51  ;;  %8422 = vmatmul.mubr.msk.f32.gmra.mrb[4].mxu1 %vm159_vm0, %v10466_v59  ;;  %v745_v17 = vld [vmem:[#allocation9 + $0x168] sm:$0xff]  ;;  %v740_v21 = vld [vmem:[#allocation9 + $0x140] sm:$0xff]  ;;  %v107_v2 = vld [vmem:[%s13542_s2 + $0xb0] sm:$0xff]  ;;  %v8686_v6 = vpack.c.bf16 %v116_v54, %v108_v53 }
  0x4b   :  { %266 = vmatprep.mubr.f32.mxu1 %v13562_v0  ;;  %13691 = vst [vmem:[#allocation23_spill] sm:$0xff] %v10501_v12  ;;  %13692 = vst [vmem:[#allocation24_spill] sm:$0xff] %v10512_v19  ;;  %v10515_v20 = vpack.c.bf16 %v745_v17, %v741_v16  ;;  %v744_v22 = vld [vmem:[#allocation9 + $0x160] sm:$0xff]  ;;  %v749_v23 = vld [vmem:[#allocation9 + $0x188] sm:$0xff] }
  0x4c   :  { %8438 = vmatmul.mubr.msk.f32.gmra.mrb[4].mxu0 %vm159_vm0, %v10466_v59  ;;  %v753_v24 = vld [vmem:[#allocation9 + $0x1a8] sm:$0xff]  ;;  %v10526_v26 = vpack.c.bf16 %v744_v22, %v740_v21  ;;  %v748_v28 = vld [vmem:[#allocation9 + $0x180] sm:$0xff]  ;;  %v115_v3 = vld [vmem:[%s13542_s2 + $0xf0] sm:$0xff] }
  0x4d   :  { %8701 = vmatpush1.bf16.msra.mxu0 %v10474_v62  ;;  %492 = vmatprep.mubr.f32.mxu0 %v13562_v0  ;;  %13693 = vst [vmem:[#allocation25_spill] sm:$0xff] %v10515_v20  ;;  %v10522_v25 = vld [vmem:[#allocation7 + $0x28] sm:$0xff]  ;;  %v10529_v27 = vpack.c.bf16 %v753_v24, %v749_v23  ;;  %v752_v29 = vld [vmem:[#allocation9 + $0x1a0] sm:$0xff]  ;;  %v703_v11 = vld [vmem:[#allocation9 + $0x18] sm:$0xff]  ;;  %v8688_v16 = vpack.c.bf16 %v115_v3, %v107_v2 }
  0x4e   :  { %8703 = vmatprep.subr.bf16.mxu0 %v10477_v63  ;;  %8423 = vmatmul.mubr.msk.f32.gmra.mrb[6].mxu1 %vm159_vm0, %v10488_v8  ;;  %13694 = vst [vmem:[#allocation26_spill] sm:$0xff] %v10526_v26  ;;  %v757_v30 = vld [vmem:[#allocation9 + $0x1c8] sm:$0xff]  ;;  %v10540_v34 = vpack.c.bf16 %v752_v29, %v748_v28  ;;  %v756_v37 = vld [vmem:[#allocation9 + $0x1c0] sm:$0xff]  ;;  %v707_v13 = vld [vmem:[#allocation9 + $0x38] sm:$0xff] }
  0x4f   :  { %272 = vmatprep.mubr.f32.mxu1 %v13562_v0  ;;  %13695 = vst [vmem:[#allocation27_spill] sm:$0xff] %v10529_v27  ;;  %v761_v32 = vld [vmem:[#allocation9 + $0x1e8] sm:$0xff]  ;;  %v760_v38 = vld [vmem:[#allocation9 + $0x1e0] sm:$0xff]  ;;  %v10596_v21 = vpack.c.bf16 %v707_v13, %v703_v11 }
  0x50   :  { %8439 = vmatmul.mubr.msk.f32.gmra.mrb[6].mxu0 %vm159_vm0, %v10488_v8  ;;  %13696 = vst [vmem:[#allocation28_spill] sm:$0xff] %v10540_v34  ;;  %v10543_v36 = vpack.c.bf16 %v761_v32, %v757_v30  ;;  %v765_v40 = vld [vmem:[#allocation11 + $0x8] sm:$0xff]  ;;  %v10554_v44 = vpack.c.bf16 %v760_v38, %v756_v37  ;;  %v764_v50 = vld [vmem:[#allocation11] sm:$0xff] }
  0x51   :  { %8705 = vmatpush1.bf16.msra.mxu0 %v10492_v9  ;;  %498 = vmatprep.mubr.f32.mxu0 %v13562_v0  ;;  %v769_v42 = vld [vmem:[#allocation11 + $0x28] sm:$0xff]  ;;  %v768_v52 = vld [vmem:[#allocation11 + $0x20] sm:$0xff] }
  0x52   :  { %8707 = vmatprep.subr.bf16.mxu0 %v10501_v12  ;;  %8424 = vmatmul.mubr.msk.f32.gmra.mrb[8].mxu1 %vm159_vm0, %v10508_v18  ;;  %13697 = vst [vmem:[#allocation29_spill] sm:$0xff] %v10543_v36  ;;  %13698 = vst [vmem:[#allocation30_spill] sm:$0xff] %v10554_v44  ;;  %v10563_v49 = vpack.c.bf16 %v769_v42, %v765_v40  ;;  %v773_v55 = vld [vmem:[#allocation11 + $0x48] sm:$0xff]  ;;  %v10578_v58 = vpack.c.bf16 %v768_v52, %v764_v50  ;;  %v772_v4 = vld [vmem:[#allocation11 + $0x40] sm:$0xff] }
  0x53   :  { %278 = vmatprep.mubr.f32.mxu1 %v13562_v0  ;;  %v777_v56 = vld [vmem:[#allocation11 + $0x68] sm:$0xff]  ;;  %v776_v10 = vld [vmem:[#allocation11 + $0x60] sm:$0xff] }
  0x54   :  { %8440 = vmatmul.mubr.msk.f32.gmra.mrb[8].mxu0 %vm159_vm0, %v10508_v18  ;;  %13699 = vst [vmem:[#allocation31_spill] sm:$0xff] %v10563_v49  ;;  %v10587_v7 = vpack.c.bf16 %v777_v56, %v773_v55  ;;  %v781_v14 = vld [vmem:[#allocation11 + $0x88] sm:$0xff]  ;;  %v10594_v17 = vpack.c.bf16 %v776_v10, %v772_v4  ;;  %v780_v23 = vld [vmem:[#allocation11 + $0x80] sm:$0xff] }
  0x55   :  { %8709 = vmatpush1.bf16.msra.mxu0 %v10512_v19  ;;  %504 = vmatprep.mubr.f32.mxu0 %v13562_v0  ;;  %v785_v15 = vld [vmem:[#allocation11 + $0xa8] sm:$0xff]  ;;  %v784_v24 = vld [vmem:[#allocation11 + $0xa0] sm:$0xff] }
  0x56   :  { %8711 = vmatprep.subr.bf16.mxu0 %v10515_v20  ;;  %8425 = vmatmul.mubr.msk.f32.gmra.mrb[10].mxu1 %vm159_vm0, %v10522_v25  ;;  %v10599_v22 = vpack.c.bf16 %v785_v15, %v781_v14  ;;  %v789_v28 = vld [vmem:[#allocation11 + $0xc8] sm:$0xff]  ;;  %v10606_v30 = vpack.c.bf16 %v784_v24, %v780_v23  ;;  %v788_v37 = vld [vmem:[#allocation11 + $0xc0] sm:$0xff] }
  0x57   :  { %284 = vmatprep.mubr.f32.mxu1 %v13562_v0  ;;  %v793_v29 = vld [vmem:[#allocation11 + $0xe8] sm:$0xff]  ;;  %v792_v38 = vld [vmem:[#allocation11 + $0xe0] sm:$0xff] }
  0x58   :  { %8441 = vmatmul.mubr.msk.f32.gmra.mrb[10].mxu0 %vm159_vm0, %v10522_v25  ;;  %v10610_v32 = vpack.c.bf16 %v793_v29, %v789_v28  ;;  %v10615_v40 = vld [vmem:[%s13541_s1] sm:$0xff]  ;;  %v797_v42 = vld [vmem:[#allocation11 + $0x108] sm:$0xff]  ;;  %v10624_v50 = vpack.c.bf16 %v792_v38, %v788_v37 }
  0x59   :  { %8713 = vmatpush1.bf16.msra.mxu0 %v10526_v26  ;;  %510 = vmatprep.mubr.f32.mxu0 %v13562_v0  ;;  %v801_v45 = vld [vmem:[#allocation11 + $0x128] sm:$0xff]  ;;  %vm1177_vm1 = vcmp.gt.s32.totalorder %v10615_v40, 0  ;;  %vm1178_vm2 = vcmp.gt.s32.totalorder %v10615_v40, 7  ;;  %v796_v53 = vld [vmem:[#allocation11 + $0x100] sm:$0xff]  ;;  %vm1918_vm3 = vcmp.gt.s32.totalorder %v10615_v40, 2  ;;  %vm2290_vm4 = vcmp.gt.s32.totalorder %v10615_v40, 3 }
  0x5a   :  { %8715 = vmatprep.subr.bf16.mxu0 %v10529_v27  ;;  %8426 = vmatmul.mubr.msk.f32.gmra.mrb[12].mxu1 %vm159_vm0, %v10536_v33  ;;  %v1179_v47 = vsel %vm1177_vm1, 1, %v13551_v1  ;;  %v10627_v52 = vpack.c.bf16 %v801_v45, %v797_v42  ;;  %v800_v54 = vld [vmem:[#allocation11 + $0x120] sm:$0xff]  ;;  %v1186_v55 = vsel %vm1178_vm2, 1, %v13551_v1  ;;  %v805_v56 = vld [vmem:[#allocation11 + $0x148] sm:$0xff]  ;;  %v1920_v10 = vsel %vm1918_vm3, 1, %v13551_v1 }
  0x5b   :  { %290 = vmatprep.mubr.f32.mxu1 %v13562_v0  ;;  %1181 = vperm.xlu0 %9925, %v1179_v47   ;;  %v10635_v2 = vpack.c.bf16 %v800_v54, %v796_v53  ;;  %v804_v4 = vld [vmem:[#allocation11 + $0x140] sm:$0xff]  ;;  %v813_v11 = vld [vmem:[#allocation11 + $0x188] sm:$0xff]  ;;  %v2292_v24 = vsel %vm2290_vm4, 1, %v13551_v1  ;;  %v10263_v47 = vmov 1966171168   ;;  %v702_v54 = vld [vmem:[#allocation9 + $0x10] sm:$0xff] }
  0x5c   :  { %8442 = vmatmul.mubr.msk.f32.gmra.mrb[12].mxu0 %vm159_vm0, %v10536_v33  ;;  %v817_v13 = vld [vmem:[#allocation11 + $0x1a8] sm:$0xff]  ;;  %v816_v23 = vld [vmem:[#allocation11 + $0x1a0] sm:$0xff]  ;;  %v4037_v53 = vunpack.c.l.s4 %v10263_v47  ;;  %v718_v47 = vld [vmem:[#allocation9 + $0x90] sm:$0xff]  ;;  %vm1546_vm11 = vcmp.gt.s32.totalorder %v10615_v40, 1  ;;  %vm1547_vm12 = vcmp.gt.s32.totalorder %v10615_v40, 6  ;;  %vm1919_vm13 = vcmp.gt.s32.totalorder %v10615_v40, 5 }
  0x5d   :  { %8717 = vmatpush1.bf16.msra.mxu0 %v10540_v34  ;;  %516 = vmatprep.mubr.f32.mxu0 %v13562_v0  ;;  %v10649_v15 = vpack.c.bf16 %v817_v13, %v813_v11  ;;  %v821_v28 = vld [vmem:[#allocation11 + $0x1c8] sm:$0xff]  ;;  %v820_v42 = vld [vmem:[#allocation11 + $0x1c0] sm:$0xff]  ;;  %v710_v13 = vld [vmem:[#allocation9 + $0x50] sm:$0xff]  ;;  %vm2291_vm14 = vcmp.gt.s32.totalorder %v10615_v40, 4 }
  0x5e   :  { %8719 = vmatprep.subr.bf16.mxu0 %v10543_v36  ;;  %8427 = vmatmul.mubr.msk.f32.gmra.mrb[14].mxu1 %vm159_vm0, %v10550_v43  ;;  %v825_v29 = vld [vmem:[#allocation11 + $0x1e8] sm:$0xff]  ;;  %v824_v45 = vld [vmem:[#allocation11 + $0x1e0] sm:$0xff] }
  0x5f   :  { %361 = vmatprep.mubr.f32.mxu1 %v13562_v0  ;;  %1188 = vperm.xlu0 %9925, %v1186_v55   ;;  %v10659_v38 = vpack.c.bf16 %v825_v29, %v821_v28  ;;  %v706_v55 = vld [vmem:[#allocation9 + $0x30] sm:$0xff]  ;;  %v10264_v29 = vmov -10000.0  }
  0x60   :  { %8443 = vmatmul.mubr.msk.f32.gmra.mrb[14].mxu0 %vm159_vm0, %v10550_v43 }
  0x61   :  { %8721 = vmatpush1.bf16.msra.mxu0 %v10554_v44  ;;  %896 = vmatprep.mubr.f32.mxu0 %v13562_v0 }
  0x62   :  { %8755 = vmatprep.subr.bf16.mxu0 %v10563_v49  ;;  %8428 = vmatmul.mubr.msk.f32.vlgmr.msra.gmra.mrb[16].mxu1 %vm159_vm0, %v10428_v35 }
  0x63   :  { %8685 = vmatpush1.bf16.msra.mxu1 %v8684_v57  ;;  %367 = vmatprep.mubr.f32.mxu1 %v13562_v0  ;;  %v809_v57 = vld [vmem:[#allocation11 + $0x168] sm:$0xff] }
  0x64   :  { %897 = vmatmul.mubr.f32.vlgmr.msra.gmra.mrb[16].mxu0 %v13562_v0  ;;  %8687 = vmatprep.subr.bf16.mxu1 %v8686_v6  ;;  %v10638_v3 = vpack.c.bf16 %v809_v57, %v805_v56  ;;  %v808_v6 = vld [vmem:[#allocation11 + $0x160] sm:$0xff]  ;;  %v10665_v56 = vpack.c.bf16 %v824_v45, %v820_v42  ;;  %v711_v57 = vld [vmem:[#allocation9 + $0x58] sm:$0xff]  ;;  %v4032_v42 = vsel %vm4031_vm5, 0.0, %v10264_v29 }
  0x65   :  { %8757 = vmatpush1.bf16.msra.mxu0 %v10578_v58  ;;  %1047 = vmatprep.mubr.f32.mxu0 %v13562_v0  ;;  %v10646_v14 = vpack.c.bf16 %v808_v6, %v804_v4  ;;  %v715_v4 = vld [vmem:[#allocation9 + $0x78] sm:$0xff]  ;;  %v4038_v6 = vunpack.c.0.s8 %v4037_v53  ;;  %v722_v53 = vld [vmem:[#allocation9 + $0xb0] sm:$0xff] }
  0x66   :  { %8759 = vmatprep.subr.bf16.mxu0 %v10587_v7  ;;  %8429 = vmatmul.mubr.msk.f32.gmra.mrb[18].mxu1 %vm159_vm0, %v10439_v46  ;;  %13700 = vst [vmem:[#allocation32_spill] sm:$0xff] %v10665_v56  ;;  %v10674_v11 = vpack.c.bf16 %v715_v4, %v711_v57  ;;  %v10699_v57 = vpack.c.bf16 %v722_v53, %v718_v47 }
  0x67   :  { %373 = vmatprep.mubr.f32.mxu1 %v13562_v0  ;;  %8689 = vmatpush1.bf16.msra.mxu1 %v8688_v16  ;;  %v812_v16 = vld [vmem:[#allocation11 + $0x180] sm:$0xff]  ;;  %v10678_v28 = vsub.s32 %v4038_v6, %v10468_v60  ;;  %v726_v6 = vld [vmem:[#allocation9 + $0xd0] sm:$0xff] }
  0x68   :  { %8723 = vmatprep.subr.bf16.mxu1 %v10596_v21  ;;  %1922 = vperm.xlu0 %9925, %v1920_v10   ;;  %v10656_v37 = vpack.c.bf16 %v816_v23, %v812_v16  ;;  %v10671_v10 = vpack.c.bf16 %v706_v55, %v702_v54  ;;  %13701 = vst [vmem:[#allocation33_spill] sm:$0xff] %v10674_v11  ;;  %v714_v16 = vld [vmem:[#allocation9 + $0x70] sm:$0xff]  ;;  %v719_v23 = vld [vmem:[#allocation9 + $0x98] sm:$0xff]  ;;  %13704 = vst [vmem:[#allocation36_spill] sm:$0xff] %v10699_v57 }
  0x69   :  { %8761 = vmatpush1.bf16.msra.mxu0 %v10594_v17  ;;  %v10685_v61 = vpack.c.bf16 %v714_v16, %v710_v13  ;;  %v727_v54 = vld [vmem:[#allocation9 + $0xd8] sm:$0xff]  ;;  %v730_v13 = vld [vmem:[#allocation9 + $0xf0] sm:$0xff] }
  0x6a   :  { %8763 = vmatprep.subr.bf16.mxu0 %v10599_v22  ;;  %8430 = vmatmul.mubr.msk.f32.gmra.mrb[20].mxu1 %vm159_vm0, %v10466_v59  ;;  %v731_v55 = vld [vmem:[#allocation9 + $0xf8] sm:$0xff]  ;;  %v10714_v47 = vpack.c.bf16 %v730_v13, %v726_v6  ;;  %v10732_v6 = vld [vmem:[%s13549_s9] sm:$0x1f] }
  0x6b   :  { %379 = vmatprep.mubr.f32.mxu1 %v13562_v0  ;;  %13702 = vst [vmem:[#allocation34_spill] sm:$0xff] %v10685_v61  ;;  %v10702_v4 = vpack.c.bf16 %v731_v55, %v727_v54  ;;  %v735_v16 = vld [vmem:[#allocation9 + $0x118] sm:$0xff]  ;;  %v738_v54 = vld [vmem:[#allocation9 + $0x130] sm:$0xff] }
  0x6c   :  { %2294 = vperm.xlu0 %9925, %v2292_v24   ;;  %v723_v24 = vld [vmem:[#allocation9 + $0xb8] sm:$0xff]  ;;  %13707 = vst [vmem:[#allocation39_spill] sm:$0xff] %v10714_v47 }
  0x6d   :  { %8765 = vmatpush1.bf16.msra.mxu0 %v10606_v30  ;;  %v10688_v45 = vpack.c.bf16 %v723_v24, %v719_v23  ;;  %13705 = vst [vmem:[#allocation37_spill] sm:$0xff] %v10702_v4  ;;  %v739_v23 = vld [vmem:[#allocation9 + $0x138] sm:$0xff]  ;;  %v10705_v24 = vsub.s32 0, %v10468_v60 }
  0x6e   :  { %8767 = vmatprep.subr.bf16.mxu0 %v10610_v32  ;;  %8431 = vmatmul.mubr.msk.f32.gmra.mrb[22].mxu1 %vm159_vm0, %v10488_v8  ;;  %v10717_v53 = vpack.c.bf16 %v739_v23, %v735_v16  ;;  %v743_v55 = vld [vmem:[#allocation9 + $0x158] sm:$0xff]  ;;  %v742_v16 = vld [vmem:[#allocation9 + $0x150] sm:$0xff] }
  0x6f   :  { %385 = vmatprep.mubr.f32.mxu1 %v13562_v0  ;;  %13703 = vst [vmem:[#allocation35_spill] sm:$0xff] %v10688_v45  ;;  %13706 = vst [vmem:[#allocation38_spill] sm:$0xff] %v10705_v24  ;;  %v746_v23 = vld [vmem:[#allocation9 + $0x170] sm:$0xff] }
  0x70   :  { %13708 = vst [vmem:[#allocation40_spill] sm:$0xff] %v10717_v53 }
  0x71   :  { %8769 = vmatpush1.bf16.msra.mxu0 %v10624_v50 }
  0x72   :  { %8771 = vmatprep.subr.bf16.mxu0 %v10627_v52  ;;  %8432 = vmatmul.mubr.msk.f32.gmra.mrb[24].mxu1 %vm159_vm0, %v10508_v18 }
  0x73   :  { %391 = vmatprep.mubr.f32.mxu1 %v13562_v0 }
  0x75   :  { %8773 = vmatpush1.bf16.msra.mxu0 %v10635_v2 }
  0x76   :  { %8775 = vmatprep.subr.bf16.mxu0 %v10638_v3  ;;  %8433 = vmatmul.mubr.msk.f32.gmra.mrb[26].mxu1 %vm159_vm0, %v10522_v25 }
  0x77   :  { %397 = vmatprep.mubr.f32.mxu1 %v13562_v0 }
  0x79   :  { %8777 = vmatpush1.bf16.msra.mxu0 %v10646_v14 }
  0x7a   :  { %8779 = vmatprep.subr.bf16.mxu0 %v10649_v15  ;;  %8434 = vmatmul.mubr.msk.f32.gmra.mrb[28].mxu1 %vm159_vm0, %v10536_v33 }
  0x7b   :  { %403 = vmatprep.mubr.f32.mxu1 %v13562_v0 }
  0x7d   :  { %8781 = vmatpush1.bf16.msra.mxu0 %v10656_v37 }
  0x7e   :  { %8783 = vmatprep.subr.bf16.mxu0 %v10659_v38  ;;  %8435 = vmatmul.mubr.msk.f32.gmra.mrb[30].mxu1 %vm159_vm0, %v10550_v43 }
  0x7f   :  { %587 = vmatprep.mubr.f32.mxu1 %v13562_v0 }
  0x81   :  { %8785 = vmatpush1.bf16.msra.mxu0 %v10665_v56 }
  0x82   :  { %8819 = vmatprep.subr.bf16.mxu0 %v10420_v31  ;;  %8444 = vmatmul.mubr.msk.f32.vlgmr.msra.gmra.mrb[32].mxu1 %vm159_vm0, %v10428_v35  ;;  %v4042_v35 = vrot.slane %v4032_v42, %v10678_v28  ;;  %v13720_v31 = vmov 0  }
  0x83   :  { %8725 = vmatpush1.bf16.msra.mxu1 %v10671_v10  ;;  %593 = vmatprep.mubr.f32.mxu1 %v13562_v0 }
  0x84   :  { %8727 = vmatprep.subr.bf16.mxu1 %v10674_v11  ;;  %1048 = vmatmul.mubr.f32.vlgmr.msra.gmra.mrb[14].mxu0 %v13562_v0  ;;  %v4058_v29 = vrot.slane %v4042_v35, %v10678_v28  ;;  %v4050_v1 = vcombine.high %v4042_v35, %v4042_v35  ;;  %v747_v35 = vld [vmem:[#allocation9 + $0x178] sm:$0xff] }
  0x85   :  { %8821 = vmatpush1.bf16.msra.mxu0 %v10430_v39  ;;  %1265 = vmatprep.mubr.f32.mxu0 %v13562_v0  ;;  %v10740_v13 = vpack.c.bf16 %v747_v35, %v743_v55  ;;  %v754_v55 = vld [vmem:[#allocation9 + $0x1b0] sm:$0xff]  ;;  %v759_v35 = vld [vmem:[#allocation9 + $0x1d8] sm:$0xff] }
  0x86   :  { %8445 = vmatmul.mubr.msk.f32.gmra.mrb[34].mxu1 %vm159_vm0, %v10439_v46  ;;  %8823 = vmatprep.subr.bf16.mxu0 %v10433_v41  ;;  %v4035_v46 = vcombine.high %v4032_v42, %v4032_v42  ;;  %v734_v42 = vld [vmem:[#allocation9 + $0x110] sm:$0xff]  ;;  %v4087_v5 = vrot.slane %v4058_v29, %v10705_v24 }
  0x87   :  { %8729 = vmatpush1.bf16.msra.mxu1 %v10685_v61  ;;  %599 = vmatprep.mubr.f32.mxu1 %v13562_v0  ;;  %13710 = vst [vmem:[#allocation42_spill] sm:$0xff] %v10740_v13 }
  0x88   :  { %8731 = vmatprep.subr.bf16.mxu1 %v10688_v45 }
  0x89   :  { %8825 = vmatpush1.bf16.msra.mxu0 %v10443_v48  ;;  %v4080_v48 = vcombine.high %v4058_v29, %v4058_v29  ;;  %v4124_v29 = vadd.f32 %v4087_v5, %v10732_v6  ;;  %v10754_v5 = vpack.c.bf16 %v746_v23, %v742_v16  ;;  %v762_v23 = vld [vmem:[#allocation9 + $0x1f0] sm:$0xff] }
  0x8a   :  { %8446 = vmatmul.mubr.msk.f32.gmra.mrb[36].mxu1 %vm159_vm0, %v10466_v59  ;;  %8827 = vmatprep.subr.bf16.mxu0 %v10450_v51  ;;  %v10721_v59 = vrot.slane %v4050_v1, %v10678_v28  ;;  %v10724_v51 = vrot.slane %v4035_v46, %v10678_v28  ;;  %v10737_v1 = vpack.c.bf16 %v738_v54, %v734_v42  ;;  %v755_v46 = vld [vmem:[#allocation9 + $0x1b8] sm:$0xff]  ;;  %v13711_v42 = vmov 0.0   ;;  %v750_v54 = vld [vmem:[#allocation9 + $0x190] sm:$0xff] }
  0x8b   :  { %8733 = vmatpush1.bf16.msra.mxu1 %v10699_v57  ;;  %605 = vmatprep.mubr.f32.mxu1 %v13562_v0  ;;  %13712 = vst [vmem:[#allocation43_spill] sm:$0xff] %v10754_v5  ;;  %v4133_v41 = vsel %vm4132_vm6, %v4124_v29, -inf  ;;  %v10769_v16 = vpack.c.bf16 %v754_v55, %v750_v54  ;;  %v770_v54 = vld [vmem:[#allocation11 + $0x30] sm:$0xff]  ;;  %v779_v55 = vld [vmem:[#allocation11 + $0x78] sm:$0xff] }
  0x8c   :  { %8735 = vmatprep.subr.bf16.mxu1 %v10702_v4  ;;  %13709 = vst [vmem:[#allocation41_spill] sm:$0xff] %v10737_v1  ;;  %4134 = vmax.xlane.f32.xlu0 %v4133_v41 }
  0x8d   :  { %8829 = vmatpush1.bf16.msra.mxu0 %v10474_v62  ;;  %v4095_v62 = vrot.slane %v4080_v48, %v10705_v24  ;;  %13714 = vst [vmem:[#allocation45_spill] sm:$0xff] %v10769_v16 }
  0x8e   :  { %8447 = vmatmul.mubr.msk.f32.gmra.mrb[38].mxu1 %vm159_vm0, %v10488_v8  ;;  %8831 = vmatprep.subr.bf16.mxu0 %v10477_v63  ;;  %v751_v8 = vld [vmem:[#allocation9 + $0x198] sm:$0xff]  ;;  %v4082_v63 = vcombine.high %v10721_v59, %v10721_v59 }
  0x8f   :  { %8737 = vmatpush1.bf16.msra.mxu1 %v10714_v47  ;;  %611 = vmatprep.mubr.f32.mxu1 %v13562_v0  ;;  %v4051_v0 = vcombine.high %v10724_v51, %v10724_v51  ;;  %v10757_v48 = vpack.c.bf16 %v755_v46, %v751_v8  ;;  %v771_v8 = vld [vmem:[#allocation11 + $0x38] sm:$0xff] }
  0x90   :  { %8739 = vmatprep.subr.bf16.mxu1 %v10717_v53 }
  0x91   :  { %8833 = vmatpush1.bf16.msra.mxu0 %v10492_v9  ;;  %13713 = vst [vmem:[#allocation44_spill] sm:$0xff] %v10757_v48  ;;  %v763_v9 = vld [vmem:[#allocation9 + $0x1f8] sm:$0xff]  ;;  %v4079_v39 = vrot.slane %v4051_v0, %v10678_v28 }
  0x92   :  { %8448 = vmatmul.mubr.msk.f32.gmra.mrb[40].mxu1 %vm159_vm0, %v10508_v18  ;;  %8835 = vmatprep.subr.bf16.mxu0 %v10501_v12  ;;  %v4126_v18 = vadd.f32 %v4095_v62, %v10732_v6  ;;  %v4099_v12 = vrot.slane %v4082_v63, %v10705_v24  ;;  %v10772_v62 = vpack.c.bf16 %v763_v9, %v759_v35  ;;  %v758_v63 = vld [vmem:[#allocation9 + $0x1d0] sm:$0xff]  ;;  %v767_v0 = vld [vmem:[#allocation11 + $0x18] sm:$0xff] }
  0x93   :  { %8741 = vmatpush1.bf16.msra.mxu1 %v10737_v1  ;;  %617 = vmatprep.mubr.f32.mxu1 %v13711_v42  ;;  %v4107_v29 = vrot.slane %v4079_v39, %v10705_v24  ;;  %v10783_v41 = vpack.c.bf16 %v762_v23, %v758_v63  ;;  %v10786_v9 = vpack.c.bf16 %v771_v8, %v767_v0  ;;  %v774_v0 = vld [vmem:[#allocation11 + $0x50] sm:$0xff] }
  0x94   :  { %8743 = vmatprep.subr.bf16.mxu1 %v10740_v13  ;;  %13715 = vst [vmem:[#allocation46_spill] sm:$0xff] %v10772_v62  ;;  %v4139_v46 = vsel %vm4132_vm6, %v4126_v18, -inf  ;;  %v778_v8 = vld [vmem:[#allocation11 + $0x70] sm:$0xff] }
  0x95   :  { %8837 = vmatpush1.bf16.msra.mxu0 %v10512_v19  ;;  %13716 = vst [vmem:[#allocation47_spill] sm:$0xff] %v10783_v41  ;;  %13717 = vst [vmem:[#allocation48_spill] sm:$0xff] %v10786_v9  ;;  %4140 = vmax.xlane.f32.xlu0 %v4139_v46  ;;  %v787_v46 = vld [vmem:[#allocation11 + $0xb8] sm:$0xff] }
  0x96   :  { %8449 = vmatmul.mubr.msk.f32.gmra.mrb[42].mxu1 %vm159_vm0, %v10522_v25  ;;  %8839 = vmatprep.subr.bf16.mxu0 %v10515_v20  ;;  %v4127_v25 = vadd.f32 %v4099_v12, %v10732_v6  ;;  %v4083_v20 = vcombine.high %v4079_v39, %v4079_v39  ;;  %v766_v12 = vld [vmem:[#allocation11 + $0x10] sm:$0xff]  ;;  %v775_v39 = vld [vmem:[#allocation11 + $0x58] sm:$0xff] }
  0x97   :  { %8745 = vmatpush1.bf16.msra.mxu1 %v10754_v5  ;;  %623 = vmatprep.mubr.f32.mxu1 %v13711_v42  ;;  %v10797_v63 = vpack.c.bf16 %v770_v54, %v766_v12  ;;  %v10800_v23 = vpack.c.bf16 %v779_v55, %v775_v39  ;;  %v782_v54 = vld [vmem:[#allocation11 + $0x90] sm:$0xff]  ;;  %v791_v55 = vld [vmem:[#allocation11 + $0xd8] sm:$0xff] }
  0x98   :  { %8747 = vmatprep.subr.bf16.mxu1 %v10757_v48  ;;  %v4142_v35 = vsel %vm4132_vm6, %v4127_v25, -inf  ;;  %v4115_v18 = vrot.slane %v4083_v20, %v10705_v24  ;;  %v783_v20 = vld [vmem:[#allocation11 + $0x98] sm:$0xff]  ;;  %v786_v39 = vld [vmem:[#allocation11 + $0xb0] sm:$0xff] }
  0x99   :  { %8841 = vmatpush1.bf16.msra.mxu0 %v10526_v26  ;;  %4143 = vmax.xlane.f32.xlu0 %v4142_v35  ;;  %v10812_v12 = vpack.c.bf16 %v787_v46, %v783_v20  ;;  %v795_v35 = vld [vmem:[#allocation11 + $0xf8] sm:$0xff]  ;;  %v818_v26 = vld [vmem:[#allocation11 + $0x1b0] sm:$0xff] }
  0x9a   :  { %8450 = vmatmul.mubr.msk.f32.gmra.mrb[44].mxu1 %vm159_vm0, %v10536_v33  ;;  %8843 = vmatprep.subr.bf16.mxu0 %v10529_v27  ;;  %v4129_v33 = vadd.f32 %v4107_v29, %v10732_v6  ;;  %v10808_v29 = vpack.c.bf16 %v778_v8, %v774_v0  ;;  %v10819_v0 = vpack.c.bf16 %v795_v35, %v791_v55  ;;  %v790_v8 = vld [vmem:[#allocation11 + $0xd0] sm:$0xff]  ;;  %v799_v20 = vld [vmem:[#allocation11 + $0x118] sm:$0xff] }
  0x9b   :  { %8749 = vmatpush1.bf16.msra.mxu1 %v10769_v16  ;;  %629 = vmatprep.mubr.f32.mxu1 %v13711_v42  ;;  %v803_v46 = vld [vmem:[#allocation11 + $0x138] sm:$0xff]  ;;  %v814_v27 = vld [vmem:[#allocation11 + $0x190] sm:$0xff] }
  0x9c   :  { %8751 = vmatprep.subr.bf16.mxu1 %v10772_v62  ;;  %v4148_v25 = vsel %vm4132_vm6, %v4129_v33, -inf }
  0x9d   :  { %8845 = vmatpush1.bf16.msra.mxu0 %v10540_v34  ;;  %4149 = vmax.xlane.f32.xlu0 %v4148_v25  ;;  %v810_v34 = vld [vmem:[#allocation11 + $0x170] sm:$0xff] }
  0x9e   :  { %8451 = vmatmul.mubr.msk.f32.gmra.mrb[46].mxu1 %vm159_vm0, %v10550_v43  ;;  %8847 = vmatprep.subr.bf16.mxu0 %v10543_v36  ;;  %v4131_v43 = vadd.f32 %v4115_v18, %v10732_v6  ;;  %v10816_v18 = vpack.c.bf16 %v786_v39, %v782_v54  ;;  %v802_v54 = vld [vmem:[#allocation11 + $0x130] sm:$0xff]  ;;  %v807_v39 = vld [vmem:[#allocation11 + $0x158] sm:$0xff] }
  0x9f   :  { %8753 = vmatpush1.bf16.msra.mxu1 %v10783_v41  ;;  %967 = vmatprep.mubr.f32.mxu1 %v13711_v42  ;;  %v811_v36 = vld [vmem:[#allocation11 + $0x178] sm:$0xff] }
  0xa0   :  { %8787 = vmatprep.subr.bf16.mxu1 %v10786_v9  ;;  %v4154_v33 = vsel %vm4132_vm6, %v4131_v43, -inf  ;;  %v10825_v43 = vpack.c.bf16 %v803_v46, %v799_v20  ;;  %v10831_v35 = vpack.c.bf16 %v811_v36, %v807_v39  ;;  %v827_v36 = vld [vmem:[#allocation11 + $0x1f8] sm:$0xff]  ;;  %v10843_v39 = vpack.c.bf16 %v818_v26, %v814_v27 }
  0xa1   :  { %8849 = vmatpush1.bf16.msra.mxu0 %v10554_v44  ;;  %4155 = vmax.xlane.f32.xlu0 %v4154_v33  ;;  %v798_v44 = vld [vmem:[#allocation11 + $0x110] sm:$0xff]  ;;  %v10860_v27 = vsub.s32 3, %v10468_v60 }
  0xa2   :  { %968 = vmatmul.mubr.f32.vlgmr.msra.gmra.mrb[16].mxu1 %v13711_v42  ;;  %8883 = vmatprep.subr.bf16.mxu0 %v10563_v49  ;;  %v794_v49 = vld [vmem:[#allocation11 + $0xf0] sm:$0xff]  ;;  %v10828_v55 = vpack.c.bf16 %v802_v54, %v798_v44  ;;  %v10840_v44 = vadd.s32 4294967295, %v10615_v40  ;;  %v823_v54 = vld [vmem:[#allocation11 + $0x1d8] sm:$0xff] }
  0xa3   :  { %8789 = vmatpush1.bf16.msra.mxu1 %v10797_v63  ;;  %1118 = vmatprep.mubr.f32.mxu1 %v13711_v42  ;;  %v10822_v25 = vpack.c.bf16 %v794_v49, %v790_v8  ;;  %v806_v33 = vld [vmem:[#allocation11 + $0x150] sm:$0xff]  ;;  %v815_v49 = vld [vmem:[#allocation11 + $0x198] sm:$0xff]  ;;  %v10846_v19 = vpack.c.bf16 %v827_v36, %v823_v54  ;;  %13721 = vst [vmem:[#allocation51_spill] sm:$0xff] %v10860_v27 }
  0xa4   :  { %8791 = vmatprep.subr.bf16.mxu1 %v10800_v23  ;;  %v819_v8 = vld [vmem:[#allocation11 + $0x1b8] sm:$0xff]  ;;  %v10834_v20 = vpack.c.bf16 %v810_v34, %v806_v33  ;;  %13718 = vst [vmem:[#allocation49_spill] sm:$0xff] %v10840_v44  ;;  %v822_v34 = vld [vmem:[#allocation11 + $0x1d0] sm:$0xff]  ;;  %vm4231_vm7 = vcmp.eq.s32.totalorder %v10840_v44, 0  ;;  %v4344_v54 = vrot.slane %v10732_v6, %v10860_v27  ;;  %vm4857_vm8 = vcmp.eq.s32.totalorder %v10840_v44, 1 }
  0xa5   :  { %v10837_v46 = vpack.c.bf16 %v819_v8, %v815_v49  ;;  %v826_v33 = vld [vmem:[#allocation11 + $0x1f0] sm:$0xff]  ;;  %v10850_v49 = vsub.s32 1, %v10468_v60  ;;  %v4232_v56 = vsel %vm4231_vm7, 1, %v13720_v31  ;;  %vm6013_vm9 = vcmp.eq.s32.totalorder %v10840_v44, 3 }
  0xa6   :  { %v10853_v8 = vpack.c.bf16 %v826_v33, %v822_v34  ;;  %v6014_v36 = vsel %vm6013_vm9, 1, %v13720_v31  ;;  %vm7169_vm10 = vcmp.eq.s32.totalorder %v10840_v44, 5  ;;  %v10893_v33 = vld [vmem:[%s13543_s3] sm:$0xff]  ;;  %vm5435_vm15 = vcmp.eq.s32.totalorder %v10840_v44, 2 }
  0xa7   :  { %8793 = vmatpush1.bf16.msra.mxu1 %v10808_v29  ;;  %13719 = vst [vmem:[#allocation50_spill] sm:$0xff] %v10850_v49  ;;  %v4330_v26 = vrot.slane %v10732_v6, %v10850_v49  ;;  %v7170_v34 = vsel %vm7169_vm10, 1, %v13720_v31  ;;  %vm6591_vm0 = vcmp.eq.s32.totalorder %v10840_v44, 4  ;;  %v13755_v44 = vld [vmem:[#allocation37_spill] sm:$0xff]  ;;  %vm4019_vm10 = vcmask 39936  }
  0xa8   :  { %8795 = vmatprep.subr.bf16.mxu1 %v10812_v12 }
  0xab   :  { %8797 = vmatpush1.bf16.msra.mxu1 %v10816_v18 }
  0xac   :  { %8799 = vmatprep.subr.bf16.mxu1 %v10819_v0 }
  0xaf   :  { %8801 = vmatpush1.bf16.msra.mxu1 %v10822_v25 }
  0xb0   :  { %8803 = vmatprep.subr.bf16.mxu1 %v10825_v43 }
  0xb3   :  { %8805 = vmatpush1.bf16.msra.mxu1 %v10828_v55 }
  0xb4   :  { %8807 = vmatprep.subr.bf16.mxu1 %v10831_v35 }
  0xb7   :  { %8809 = vmatpush1.bf16.msra.mxu1 %v10834_v20  ;;  %4234 = vperm.xlu0 %9925, %v4232_v56   ;;  %v4858_v56 = vsel %vm4857_vm8, 1, %v13720_v31 }
  0xb8   :  { %8811 = vmatprep.subr.bf16.mxu1 %v10837_v46 }
  0xbb   :  { %8813 = vmatpush1.bf16.msra.mxu1 %v10843_v39  ;;  %4332 = vbcast.lane.b32.xlu0 %v4330_v26, 256 }
  0xbc   :  { %8815 = vmatprep.subr.bf16.mxu1 %v10846_v19 }
  0xbf   :  { %8817 = vmatpush1.bf16.msra.mxu1 %v10853_v8  ;;  %4346 = vbcast.lane.b32.xlu0 %v4344_v54, 256 }
  0xc0   :  { %8851 = vmatprep.subr.bf16.mxu1 %v10596_v21 }
  0xc2   :  { %1119 = vmatmul.mubr.f32.vlgmr.msra.gmra.mrb[46].mxu1 %v13711_v42 }
  0xc3   :  { %8853 = vmatpush1.bf16.msra.mxu1 %v10671_v10  ;;  %1336 = vmatprep.mubr.f32.mxu1 %v13711_v42 }
  0xc4   :  { %8855 = vmatprep.subr.bf16.mxu1 %v10674_v11  ;;  %4860 = vperm.xlu0 %9925, %v4858_v56   ;;  %v122_v56 = vrot.slane %v10893_v33, %v10705_v24 }
  0xc7   :  { %8857 = vmatpush1.bf16.msra.mxu1 %v10685_v61 }
  0xc8   :  { %8859 = vmatprep.subr.bf16.mxu1 %v10688_v45  ;;  %6016 = vperm.xlu0 %9925, %v6014_v36   ;;  %v126_v36 = vrot.slane %v10893_v33, %v10850_v49 }
  0xcb   :  { %8861 = vmatpush1.bf16.msra.mxu1 %v10699_v57 }
  0xcc   :  { %8863 = vmatprep.subr.bf16.mxu1 %v10702_v4  ;;  %7172 = vperm.xlu0 %9925, %v7170_v34  }
  0xcf   :  { %8865 = vmatpush1.bf16.msra.mxu1 %v10714_v47 }
  0xd0   :  { %8867 = vmatprep.subr.bf16.mxu1 %v10717_v53 }
  0xd3   :  { %8869 = vmatpush1.bf16.msra.mxu1 %v10737_v1 }
  0xd4   :  { %8871 = vmatprep.subr.bf16.mxu1 %v10740_v13 }
  0xd7   :  { %8873 = vmatpush1.bf16.msra.mxu1 %v10754_v5 }
  0xd8   :  { %8875 = vmatprep.subr.bf16.mxu1 %v10757_v48 }
  0xdb   :  { %8877 = vmatpush1.bf16.msra.mxu1 %v10769_v16 }
  0xdc   :  { %8879 = vmatprep.subr.bf16.mxu1 %v10772_v62 }
  0xdf   :  { %8881 = vmatpush1.bf16.msra.mxu1 %v10783_v41 }
  0xe0   :  { %8915 = vmatprep.subr.bf16.mxu1 %v10786_v9 }
 0x115   :  { %v250_v26 = vpop.f32.mrb[0].mxu1 }
 0x116   :  { %v252_v54 = vpop.f32.mrb[1].mxu1 }
 0x119   :  { %v256_v34 = vpop.f32.mrb[2].mxu1 }
 0x11a   :  { %v10899_v16 = vadd.f32 %v256_v34, %v122_v56  ;;  %v258_v62 = vpop.f32.mrb[3].mxu1 }
 0x11b   :  { %v10901_v41 = vadd.f32 %v258_v62, %v126_v36 }
 0x11c   :  { %13722 = vst [vmem:[#allocation52_spill] sm:$0xff] %v10899_v16 }
 0x11d   :  { %13723 = vst [vmem:[#allocation53_spill] sm:$0xff] %v10901_v41  ;;  %v262_v9 = vpop.f32.mrb[4].mxu1 }
 0x11e   :  { %v10903_v48 = vadd.f32 %v262_v9, %v122_v56  ;;  %v264_v5 = vpop.f32.mrb[5].mxu1 }
 0x11f   :  { %v10905_v13 = vadd.f32 %v264_v5, %v126_v36 }
 0x120   :  { %13724 = vst [vmem:[#allocation54_spill] sm:$0xff] %v10903_v48 }
 0x121   :  { %13725 = vst [vmem:[#allocation55_spill] sm:$0xff] %v10905_v13  ;;  %v268_v1 = vpop.f32.mrb[6].mxu1 }
 0x122   :  { %v10907_v53 = vadd.f32 %v268_v1, %v122_v56  ;;  %v270_v47 = vpop.f32.mrb[7].mxu1 }
 0x123   :  { %v10909_v4 = vadd.f32 %v270_v47, %v126_v36 }
 0x124   :  { %13726 = vst [vmem:[#allocation56_spill] sm:$0xff] %v10907_v53 }
 0x125   :  { %13727 = vst [vmem:[#allocation57_spill] sm:$0xff] %v10909_v4  ;;  %v274_v57 = vpop.f32.mrb[8].mxu1 }
 0x126   :  { %v10911_v49 = vadd.f32 %v274_v57, %v122_v56  ;;  %v276_v34 = vpop.f32.mrb[9].mxu1 }
 0x127   :  { %v10913_v16 = vadd.f32 %v276_v34, %v126_v36  ;;  %v251_v34 = vadd.f32 %v250_v26, %v122_v56  ;;  %v2300_v26 = vsel %vm2291_vm14, 1, %v13720_v31  ;;  %vm4307_vm14 = vcmask 1044484  }
 0x128   :  { %13728 = vst [vmem:[#allocation58_spill] sm:$0xff] %v10911_v49 }
 0x129   :  { %13729 = vst [vmem:[#allocation59_spill] sm:$0xff] %v10913_v16  ;;  %v280_v62 = vpop.f32.mrb[10].mxu1  ;;  %v13762_v16 = vld [vmem:[#allocation25_spill] sm:$0xff] }
 0x12a   :  { %v10915_v41 = vadd.f32 %v280_v62, %v122_v56  ;;  %v282_v9 = vpop.f32.mrb[11].mxu1  ;;  %v253_v62 = vadd.f32 %v252_v54, %v126_v36 }
 0x12b   :  { %v10917_v48 = vadd.f32 %v282_v9, %v126_v36 }
 0x12c   :  { %13730 = vst [vmem:[#allocation60_spill] sm:$0xff] %v10915_v41  ;;  %v13761_v41 = vld [vmem:[#allocation41_spill] sm:$0xff] }
 0x12d   :  { %13731 = vst [vmem:[#allocation61_spill] sm:$0xff] %v10917_v48  ;;  %v286_v5 = vpop.f32.mrb[12].mxu1  ;;  %v1548_v48 = vsel %vm1546_vm11, 1, %v13720_v31  ;;  %vm4301_vm11 = vcmask 1041409  }
 0x12e   :  { %v10919_v13 = vadd.f32 %v286_v5, %v122_v56  ;;  %v288_v1 = vpop.f32.mrb[13].mxu1  ;;  %1550 = vperm.xlu1 %9926, %v1548_v48  }
 0x12f   :  { %v10921_v53 = vadd.f32 %v288_v1, %v126_v36 }
 0x130   :  { %13732 = vst [vmem:[#allocation62_spill] sm:$0xff] %v10919_v13 }
 0x131   :  { %13733 = vst [vmem:[#allocation63_spill] sm:$0xff] %v10921_v53  ;;  %v292_v47 = vpop.f32.mrb[14].mxu1  ;;  %v1556_v53 = vsel %vm1547_vm12, 1, %v13720_v31  ;;  %vm4303_vm12 = vcmask 1042434  }
 0x132   :  { %v10923_v4 = vadd.f32 %v292_v47, %v122_v56  ;;  %v294_v57 = vpop.f32.mrb[15].mxu1  ;;  %1558 = vperm.xlu1 %9926, %v1556_v53   ;;  %v1928_v47 = vsel %vm1919_vm13, 1, %v13720_v31  ;;  %vm4305_vm13 = vcmask 1043459  }
 0x133   :  { %v10925_v49 = vadd.f32 %v294_v57, %v126_v36  ;;  %v4091_v36 = vrot.slane %v10721_v59, %v10705_v24 }
 0x134   :  { %13734 = vst [vmem:[#allocation64_spill] sm:$0xff] %v10923_v4  ;;  %v13760_v4 = vld [vmem:[#allocation24_spill] sm:$0xff] }
 0x135   :  { %13735 = vst [vmem:[#allocation65_spill] sm:$0xff] %v10925_v49  ;;  %v4125_v48 = vadd.f32 %v4091_v36, %v10732_v6 }
 0x136   :  { %1930 = vperm.xlu1 %9926, %v1928_v47  }
 0x137   :  { %v898_v9 = vpop.f32.mrb[16].mxu0  ;;  %v4136_v40 = vsel %vm4132_vm6, %v4125_v48, -inf }
 0x138   :  { %v974_v5 = vadd.f32 %v898_v9, %v251_v34  ;;  %v900_v13 = vpop.f32.mrb[17].mxu0 }
 0x139   :  { %v975_v1 = vadd.f32 %v900_v13, %v253_v62  ;;  %v4065_v13 = vrot.slane %v10724_v51, %v10678_v28 }
 0x13a   :  { %2302 = vperm.xlu1 %9926, %v2300_v26   ;;  %v8452_v62 = vmul.f32 -1.442695, %v974_v5  ;;  %v10948_v26 = vsub.s32 2, %v10468_v60 }
 0x13b   :  { %v4103_v53 = vrot.slane %v4065_v13, %v10705_v24  ;;  %v4081_v57 = vcombine.high %v4065_v13, %v4065_v13  ;;  %v8453_v34 = vmul.f32 -1.442695, %v975_v1 }
 0x13c   :  { %13736 = vst [vmem:[#allocation66_spill] sm:$0xff] %v10948_v26  ;;  %v10952_v13 = vrot.slane %v10893_v33, %v10948_v26 }
 0x13d   :  { %v4128_v9 = vadd.f32 %v4103_v53, %v10732_v6  ;;  %v4111_v47 = vrot.slane %v4081_v57, %v10705_v24  ;;  %9927 = vpow2.f32 %v8453_v34  ;;  %v10956_v53 = vrot.slane %v10893_v33, %v10860_v27 }
 0x13e   :  { %9929 = vpow2.f32 %v8452_v62  ;;  %v10959_v57 = vsub.s32 5, %v10468_v60  ;;  %v10962_v62 = vsub.s32 4, %v10468_v60 }
 0x13f   :  { %v4145_v59 = vsel %vm4132_vm6, %v4128_v9, -inf  ;;  %v4130_v51 = vadd.f32 %v4111_v47, %v10732_v6 }
 0x140   :  { %13737 = vst [vmem:[#allocation67_spill] sm:$0xff] %v10959_v57  ;;  %13738 = vst [vmem:[#allocation68_spill] sm:$0xff] %v10962_v62 }
 0x141   :  { %v4151_v28 = vsel %vm4132_vm6, %v4130_v51, -inf }
 0x147   :  { %v9928_v5 = vpop.eup %9927 }
 0x148   :  { %v9930_v1 = vpop.eup %9929  ;;  %v1138_v36 = vadd.f32 1.0, %v9928_v5  ;;  %v4323_v5 = vrot.slane %v10732_v6, %v10705_v24 }
 0x149   :  { %v1132_v48 = vadd.f32 1.0, %v9930_v1 }
 0x14a   :  { %9931 = vrcp.f32 %v1138_v36 }
 0x14b   :  { %9933 = vrcp.f32 %v1132_v48 }
 0x154   :  { %v9932_v48 = vpop.eup %9931 }
 0x155   :  { %v1148_v27 = vmul.f32 0.0, %v9932_v48 }
 0x157   :  { %v1049_v54 = vpop.f32.mrb[14].mxu0 }
 0x158   :  { %v1051_v56 = vpop.f32.mrb[15].mxu0 }
 0x15e   :  { %4137 = vmax.xlane.f32.xlu1 %v4136_v40 }
 0x162   :  { %4146 = vmax.xlane.f32.xlu1 %v4145_v59  ;;  %v10968_v59 = vrot.slane %v10893_v33, %v10959_v57 }
 0x164   :  { %v9841_v1 = vadd.f32 %v1051_v56, %v10968_v59 }
 0x166   :  { %4152 = vmax.xlane.f32.xlu1 %v4151_v28  ;;  %v10972_v28 = vrot.slane %v10893_v33, %v10962_v62 }
 0x168   :  { %v9840_v36 = vadd.f32 %v1049_v54, %v10972_v28 }
 0x16a   :  { %v8455_v57 = vmul.f32 -1.442695, %v9840_v36 }
 0x175   :  { %v969_v34 = vpop.f32.mrb[16].mxu1 }
 0x176   :  { %v9810_v40 = vadd.f32 %v969_v34, %v10952_v13  ;;  %v971_v9 = vpop.f32.mrb[17].mxu1  ;;  %v4337_v34 = vrot.slane %v10732_v6, %v10948_v26  ;;  %v13758_v26 = vld [vmem:[#allocation23_spill] sm:$0xff] }
 0x177   :  { %v9811_v47 = vadd.f32 %v971_v9, %v10956_v53  ;;  %4325 = vbcast.lane.b32.xlu1 %v4323_v5, 256  ;;  %v8456_v9 = vmul.f32 -1.442695, %v9841_v1  ;;  %v5436_v5 = vsel %vm5435_vm15, 1, %v13720_v31  ;;  %v10993_v1 = vsub.s32 6, %v10468_v60 }
 0x178   :  { %9935 = vtanh.f32 %v9810_v40  ;;  %v9934_v40 = vpop.eup %9933 }
 0x179   :  { %v8454_v51 = vmul.f32 -1.442695, %v9811_v47  ;;  %13740 = vst [vmem:[#allocation70_spill] sm:$0xff] %v10993_v1 }
 0x17b   :  { %9937 = vpow2.f32 %v8454_v51  ;;  %4339 = vbcast.lane.b32.xlu1 %v4337_v34, 256  ;;  %v10982_v51 = vrot.slane %v10732_v6, %v10962_v62  ;;  %v6592_v6 = vsel %vm6591_vm0, 1, %v13720_v31  ;;  %v11000_v34 = vrot.slane %v10893_v33, %v10993_v1  ;;  %v13754_v31 = vld [vmem:[#allocation20_spill] sm:$0xff]  ;;  %v13757_v1 = vld [vmem:[#allocation39_spill] sm:$0xff] }
 0x17c   :  { %9939 = vpow2.f32 %v8456_v9  ;;  %v13759_v62 = vld [vmem:[#allocation40_spill] sm:$0xff]  ;;  %vm4309_vm0 = vcmask 1045509  }
 0x17d   :  { %13739 = vst [vmem:[#allocation69_spill] sm:$0xff] %v10982_v51  ;;  %9941 = vpow2.f32 %v8455_v57 }
 0x17f   :  { %4353 = vbcast.lane.b32.xlu1 %v10982_v51, 256  ;;  %v13753_v51 = vld [vmem:[#allocation36_spill] sm:$0xff] }
 0x182   :  { %v9936_v47 = vpop.eup %9935 }
 0x183   :  { %v1149_v49 = vmul.f32 %v9936_v47, %v9934_v40  ;;  %5438 = vperm.xlu1 %9926, %v5436_v5   ;;  %v11002_v40 = vpop.permute.xlu0 %1181 }
 0x184   :  { %13742 = vst [vmem:[#allocation72_spill] sm:$0xff] %v11002_v40  ;;  %vm1183_vm1 = vcmp.eq.s32.totalorder %v11002_v40, 1  ;;  %v13798_v40 = vld [vmem:[#allocation25_spill] sm:$0xff] }
 0x185   :  { %v9938_v24 = vpop.eup %9937  ;;  %v10984_v56 = vadd.f32 %v1149_v49, %v1148_v27 }
 0x186   :  { %v1145_v54 = vadd.f32 1.0, %v9938_v24  ;;  %v9940_v49 = vpop.eup %9939  ;;  %v10996_v24 = vsub.s32 7, %v10468_v60 }
 0x187   :  { %9943 = vtanh.f32 %v10984_v56  ;;  %v9942_v27 = vpop.eup %9941  ;;  %6594 = vperm.xlu1 %9926, %v6592_v6   ;;  %v1162_v48 = vadd.f32 1.0, %v9940_v49 }
 0x188   :  { %9945 = vrcp.f32 %v1145_v54  ;;  %13741 = vst [vmem:[#allocation71_spill] sm:$0xff] %v10996_v24  ;;  %v1156_v9 = vadd.f32 1.0, %v9942_v27  ;;  %v11006_v47 = vrot.slane %v10893_v33, %v10996_v24  ;;  %v13756_v24 = vld [vmem:[#allocation22_spill] sm:$0xff] }
 0x189   :  { %9947 = vrcp.f32 %v1162_v48 }
 0x18a   :  { %9949 = vrcp.f32 %v1156_v9 }
 0x191   :  { %v9944_v57 = vpop.eup %9943 }
 0x192   :  { %v9946_v36 = vpop.eup %9945 }
 0x193   :  { %v11008_v54 = vmul.f32 %v9946_v36, %v9944_v57  ;;  %v9948_v27 = vpop.eup %9947 }
 0x194   :  { %v9950_v57 = vpop.eup %9949  ;;  %v1172_v48 = vmul.f32 0.0, %v9948_v27  ;;  %v13744_v27 = vld [vmem:[#allocation32_spill] sm:$0xff] }
 0x195   :  { %13743 = vst [vmem:[#allocation73_spill] sm:$0xff] %v11008_v54  ;;  %v1120_v60 = vpop.f32.mrb[46].mxu1  ;;  %8458 = vmatmul.mubr.msk.f32.vlgmr.msra.gmra.mrb[18].mxu0 %vm1183_vm1, %v11008_v54  ;;  %8459 = vmatmul.mubr.msk.f32.vlgmr.msra.gmra.mrb[18].mxu1 %vm1183_vm1, %v11008_v54 }
 0x196   :  { %v9856_v5 = vadd.f32 %v1120_v60, %v11000_v34  ;;  %v1122_v6 = vpop.f32.mrb[47].mxu1  ;;  %8885 = vmatpush1.bf16.msra.mxu0 %v10578_v58  ;;  %8917 = vmatpush1.bf16.msra.mxu1 %v10797_v63 }
 0x197   :  { %v9857_v33 = vadd.f32 %v1122_v6, %v11006_v47  ;;  %8887 = vmatprep.subr.bf16.mxu0 %v10587_v7  ;;  %8919 = vmatprep.subr.bf16.mxu1 %v10800_v23 }
 0x198   :  { %9951 = vtanh.f32 %v9856_v5  ;;  %1416 = vmatprep.mubr.f32.mxu0 %v13711_v42  ;;  %1487 = vmatprep.mubr.f32.mxu1 %v13711_v42 }
 0x199   :  { %v8457_v49 = vmul.f32 -1.442695, %v9857_v33 }
 0x19a   :  { %8889 = vmatpush1.bf16.msra.mxu0 %v10594_v17  ;;  %8921 = vmatpush1.bf16.msra.mxu1 %v10808_v29 }
 0x19b   :  { %9953 = vpow2.f32 %v8457_v49  ;;  %8891 = vmatprep.subr.bf16.mxu0 %v10599_v22  ;;  %8923 = vmatprep.subr.bf16.mxu1 %v10812_v12 }
 0x19e   :  { %8893 = vmatpush1.bf16.msra.mxu0 %v10606_v30  ;;  %8925 = vmatpush1.bf16.msra.mxu1 %v10816_v18 }
 0x19f   :  { %8895 = vmatprep.subr.bf16.mxu0 %v10610_v32  ;;  %8927 = vmatprep.subr.bf16.mxu1 %v10819_v0 }
 0x1a2   :  { %v9952_v36 = vpop.eup %9951  ;;  %8897 = vmatpush1.bf16.msra.mxu0 %v10624_v50  ;;  %8929 = vmatpush1.bf16.msra.mxu1 %v10822_v25 }
 0x1a3   :  { %v1173_v9 = vmul.f32 %v9952_v36, %v9950_v57  ;;  %8899 = vmatprep.subr.bf16.mxu0 %v10627_v52  ;;  %8931 = vmatprep.subr.bf16.mxu1 %v10825_v43  ;;  %v11054_v57 = vpop.permute.xlu0 %1188 }
 0x1a4   :  { %13745 = vst [vmem:[#allocation32_spill] sm:$0xff] %v11054_v57  ;;  %vm1190_vm2 = vcmp.eq.s32.totalorder %v11054_v57, 1  ;;  %v13795_v57 = vld [vmem:[#allocation40_spill] sm:$0xff] }
 0x1a5   :  { %v9954_v60 = vpop.eup %9953  ;;  %v11037_v5 = vadd.f32 %v1173_v9, %v1172_v48  ;;  %v13747_v48 = vld [vmem:[#allocation14_spill] sm:$0xff]  ;;  %v13748_v9 = vld [vmem:[#allocation15_spill] sm:$0xff] }
 0x1a6   :  { %v1169_v6 = vadd.f32 1.0, %v9954_v60  ;;  %8901 = vmatpush1.bf16.msra.mxu0 %v10635_v2  ;;  %8933 = vmatpush1.bf16.msra.mxu1 %v10828_v55  ;;  %v13749_v60 = vld [vmem:[#allocation16_spill] sm:$0xff] }
 0x1a7   :  { %9955 = vtanh.f32 %v11037_v5  ;;  %8903 = vmatprep.subr.bf16.mxu0 %v10638_v3  ;;  %8935 = vmatprep.subr.bf16.mxu1 %v10831_v35 }
 0x1a8   :  { %9957 = vrcp.f32 %v1169_v6  ;;  %v13750_v6 = vld [vmem:[#allocation17_spill] sm:$0xff] }
 0x1aa   :  { %8905 = vmatpush1.bf16.msra.mxu0 %v10646_v14  ;;  %8937 = vmatpush1.bf16.msra.mxu1 %v10834_v20 }
 0x1ab   :  { %8907 = vmatprep.subr.bf16.mxu0 %v10649_v15  ;;  %8939 = vmatprep.subr.bf16.mxu1 %v10837_v46 }
 0x1ae   :  { %8909 = vmatpush1.bf16.msra.mxu0 %v10656_v37  ;;  %8941 = vmatpush1.bf16.msra.mxu1 %v10843_v39 }
 0x1af   :  { %8911 = vmatprep.subr.bf16.mxu0 %v10659_v38  ;;  %8943 = vmatprep.subr.bf16.mxu1 %v10846_v19 }
 0x1b1   :  { %v9956_v33 = vpop.eup %9955 }
 0x1b2   :  { %v9958_v49 = vpop.eup %9957  ;;  %8913 = vmatpush1.bf16.msra.mxu0 %v13744_v27  ;;  %8945 = vmatpush1.bf16.msra.mxu1 %v10853_v8 }
 0x1b3   :  { %v11056_v36 = vmul.f32 %v9958_v49, %v9956_v33  ;;  %8947 = vmatprep.subr.bf16.mxu0 %v13747_v48  ;;  %8979 = vmatprep.subr.bf16.mxu1 %v10596_v21  ;;  %v13751_v33 = vld [vmem:[#allocation18_spill] sm:$0xff]  ;;  %v13752_v49 = vld [vmem:[#allocation19_spill] sm:$0xff] }
 0x1b5   :  { %13746 = vst [vmem:[#allocation74_spill] sm:$0xff] %v11056_v36  ;;  %8460 = vmatmul.mubr.msk.f32.vlgmr.msra.gmra.mrb[12].mxu0 %vm1190_vm2, %v11056_v36  ;;  %8461 = vmatmul.mubr.msk.f32.vlgmr.msra.gmra.mrb[44].mxu1 %vm1190_vm2, %v11056_v36 }
 0x1b6   :  { %8949 = vmatpush1.bf16.msra.mxu0 %v13748_v9  ;;  %8981 = vmatpush1.bf16.msra.mxu1 %v10671_v10 }
 0x1b7   :  { %8951 = vmatprep.subr.bf16.mxu0 %v13749_v60  ;;  %8983 = vmatprep.subr.bf16.mxu1 %v10674_v11 }
 0x1b8   :  { %1637 = vmatprep.mubr.f32.mxu0 %v13711_v42  ;;  %1708 = vmatprep.mubr.f32.mxu1 %v13711_v42 }
 0x1ba   :  { %8953 = vmatpush1.bf16.msra.mxu0 %v13750_v6  ;;  %8985 = vmatpush1.bf16.msra.mxu1 %v10685_v61  ;;  %v13777_v61 = vld [vmem:[#allocation53_spill] sm:$0xff] }
 0x1bb   :  { %8955 = vmatprep.subr.bf16.mxu0 %v13751_v33  ;;  %8987 = vmatprep.subr.bf16.mxu1 %v10688_v45  ;;  %v13776_v45 = vld [vmem:[#allocation52_spill] sm:$0xff] }
 0x1be   :  { %8957 = vmatpush1.bf16.msra.mxu0 %v13752_v49  ;;  %8989 = vmatpush1.bf16.msra.mxu1 %v13753_v51  ;;  %v13763_v49 = vld [vmem:[#allocation42_spill] sm:$0xff] }
 0x1bf   :  { %8959 = vmatprep.subr.bf16.mxu0 %v13754_v31  ;;  %8991 = vmatprep.subr.bf16.mxu1 %v13755_v44  ;;  %v13764_v51 = vld [vmem:[#allocation26_spill] sm:$0xff]  ;;  %v13765_v31 = vld [vmem:[#allocation43_spill] sm:$0xff] }
 0x1c0   :  { %v13766_v44 = vld [vmem:[#allocation27_spill] sm:$0xff] }
 0x1c2   :  { %8961 = vmatpush1.bf16.msra.mxu0 %v13756_v24  ;;  %8993 = vmatpush1.bf16.msra.mxu1 %v13757_v1  ;;  %v13767_v24 = vld [vmem:[#allocation44_spill] sm:$0xff] }
 0x1c3   :  { %8963 = vmatprep.subr.bf16.mxu0 %v13758_v26  ;;  %8995 = vmatprep.subr.bf16.mxu1 %v13759_v62  ;;  %v13768_v1 = vld [vmem:[#allocation28_spill] sm:$0xff]  ;;  %v13769_v26 = vld [vmem:[#allocation45_spill] sm:$0xff] }
 0x1c4   :  { %v13770_v62 = vld [vmem:[#allocation29_spill] sm:$0xff] }
 0x1c6   :  { %8965 = vmatpush1.bf16.msra.mxu0 %v13760_v4  ;;  %8997 = vmatpush1.bf16.msra.mxu1 %v13761_v41  ;;  %v13771_v4 = vld [vmem:[#allocation46_spill] sm:$0xff] }
 0x1c7   :  { %8967 = vmatprep.subr.bf16.mxu0 %v13762_v16  ;;  %8999 = vmatprep.subr.bf16.mxu1 %v13763_v49  ;;  %v13772_v41 = vld [vmem:[#allocation30_spill] sm:$0xff]  ;;  %v13773_v16 = vld [vmem:[#allocation47_spill] sm:$0xff] }
 0x1c8   :  { %v13774_v49 = vld [vmem:[#allocation31_spill] sm:$0xff] }
 0x1ca   :  { %8969 = vmatpush1.bf16.msra.mxu0 %v13764_v51  ;;  %9001 = vmatpush1.bf16.msra.mxu1 %v13765_v31  ;;  %v13775_v51 = vld [vmem:[#allocation48_spill] sm:$0xff] }
 0x1cb   :  { %8971 = vmatprep.subr.bf16.mxu0 %v13766_v44  ;;  %9003 = vmatprep.subr.bf16.mxu1 %v13767_v24 }
 0x1ce   :  { %8973 = vmatpush1.bf16.msra.mxu0 %v13768_v1  ;;  %9005 = vmatpush1.bf16.msra.mxu1 %v13769_v26 }
 0x1cf   :  { %8975 = vmatprep.subr.bf16.mxu0 %v13770_v62  ;;  %9007 = vmatprep.subr.bf16.mxu1 %v13771_v4 }
 0x1d2   :  { %8977 = vmatpush1.bf16.msra.mxu0 %v13772_v41  ;;  %9009 = vmatpush1.bf16.msra.mxu1 %v13773_v16 }
 0x1d3   :  { %9011 = vmatprep.subr.bf16.mxu0 %v13774_v49  ;;  %9043 = vmatprep.subr.bf16.mxu1 %v13775_v51 }
 0x268   :  { %v1267_v31 = vpop.f32.mrb[18].mxu0  ;;  %v1338_v44 = vpop.f32.mrb[18].mxu1 }
 0x269   :  { %v1343_v24 = vadd.f32 %v1267_v31, %v13776_v45  ;;  %v1269_v33 = vpop.f32.mrb[19].mxu0  ;;  %v1340_v1 = vpop.f32.mrb[19].mxu1  ;;  %v9812_v16 = vadd.f32 %v1338_v44, %v10952_v13 }
 0x26a   :  { %v1344_v26 = vadd.f32 %v1269_v33, %v13777_v61  ;;  %v9813_v41 = vadd.f32 %v1340_v1, %v10956_v53 }
 0x26b   :  { %v8462_v6 = vmul.f32 -1.442695, %v1343_v24 }
 0x26c   :  { %v8463_v62 = vmul.f32 -1.442695, %v1344_v26  ;;  %v8464_v4 = vmul.f32 -1.442695, %v9813_v41  ;;  %v1194_v41 = vsel %vm1183_vm1, %v10984_v56, 0.0 }
 0x26d   :  { %9959 = vpow2.f32 %v8462_v6 }
 0x26e   :  { %9961 = vpow2.f32 %v8463_v62  ;;  %v11108_v62 = vpop.permute.xlu1 %1550 }
 0x26f   :  { %9963 = vpow2.f32 %v8464_v4  ;;  %13778 = vst [vmem:[#allocation14_spill] sm:$0xff] %v11108_v62  ;;  %vm1552_vm3 = vcmp.eq.s32.totalorder %v11108_v62, 1  ;;  %v13799_v62 = vld [vmem:[#allocation42_spill] sm:$0xff] }
 0x270   :  { %9965 = vtanh.f32 %v9812_v16 }
 0x277   :  { %v9960_v49 = vpop.eup %9959 }
 0x278   :  { %v9962_v11 = vpop.eup %9961  ;;  %v1501_v51 = vadd.f32 1.0, %v9960_v49 }
 0x279   :  { %v1507_v60 = vadd.f32 1.0, %v9962_v11  ;;  %v9964_v31 = vpop.eup %9963 }
 0x27a   :  { %9967 = vrcp.f32 %v1501_v51  ;;  %v9966_v45 = vpop.eup %9965  ;;  %v1514_v6 = vadd.f32 1.0, %v9964_v31 }
 0x27b   :  { %9969 = vrcp.f32 %v1507_v60 }
 0x27c   :  { %9971 = vrcp.f32 %v1514_v6 }
 0x284   :  { %v9968_v61 = vpop.eup %9967 }
 0x285   :  { %v9970_v24 = vpop.eup %9969  ;;  %v1518_v26 = vmul.f32 %v9968_v61, %v9966_v45 }
 0x286   :  { %v1517_v44 = vmul.f32 %v9970_v24, %v1194_v41  ;;  %v9972_v61 = vpop.eup %9971 }
 0x288   :  { %v1519_v4 = vadd.f32 %v1518_v26, %v1517_v44  ;;  %v1418_v16 = vpop.f32.mrb[12].mxu0  ;;  %v1489_v11 = vpop.f32.mrb[44].mxu1 }
 0x289   :  { %v9838_v51 = vadd.f32 %v1418_v16, %v10972_v28  ;;  %v1420_v1 = vpop.f32.mrb[13].mxu0  ;;  %v1491_v60 = vpop.f32.mrb[45].mxu1  ;;  %v9854_v6 = vadd.f32 %v1489_v11, %v11000_v34 }
 0x28a   :  { %9973 = vtanh.f32 %v1519_v4  ;;  %v11114_v33 = vsel %vm1552_vm3, %v1519_v4, %v1194_v41  ;;  %v9839_v56 = vadd.f32 %v1420_v1, %v10968_v59  ;;  %v9855_v45 = vadd.f32 %v1491_v60, %v11006_v47 }
 0x28b   :  { %v8465_v49 = vmul.f32 -1.442695, %v9838_v51  ;;  %v1184_v41 = vsel %vm1183_vm1, %v11008_v54, 0.0  ;;  %v13794_v54 = vld [vmem:[#allocation23_spill] sm:$0xff] }
 0x28c   :  { %v8466_v31 = vmul.f32 -1.442695, %v9839_v56  ;;  %v8467_v26 = vmul.f32 -1.442695, %v9855_v45  ;;  %v1195_v45 = vsel %vm1190_vm2, %v11037_v5, 0.0 }
 0x28d   :  { %9975 = vpow2.f32 %v8465_v49 }
 0x28e   :  { %9977 = vpow2.f32 %v8466_v31 }
 0x28f   :  { %9979 = vpow2.f32 %v8467_v26 }
 0x290   :  { %9981 = vtanh.f32 %v9854_v6  ;;  %v11152_v6 = vpop.permute.xlu1 %1558 }
 0x291   :  { %13780 = vst [vmem:[#allocation52_spill] sm:$0xff] %v11152_v6  ;;  %vm1560_vm4 = vcmp.eq.s32.totalorder %v11152_v6, 1  ;;  %v13800_v6 = vld [vmem:[#allocation26_spill] sm:$0xff] }
 0x294   :  { %v9974_v24 = vpop.eup %9973 }
 0x295   :  { %v11119_v44 = vmul.f32 %v9974_v24, %v9972_v61 }
 0x297   :  { %13779 = vst [vmem:[#allocation15_spill] sm:$0xff] %v11119_v44  ;;  %v9976_v4 = vpop.eup %9975  ;;  %v11127_v16 = vsel %vm1552_vm3, %v11119_v44, %v1184_v41  ;;  %v13793_v44 = vld [vmem:[#allocation39_spill] sm:$0xff] }
 0x298   :  { %v9978_v51 = vpop.eup %9977  ;;  %v1525_v1 = vadd.f32 1.0, %v9976_v4  ;;  %1638 = vmatmul.mubr.f32.vlgmr.msra.gmra.mrb[20].mxu0 %v11127_v16  ;;  %1709 = vmatmul.mubr.f32.vlgmr.msra.gmra.mrb[20].mxu1 %v11127_v16 }
 0x299   :  { %v1531_v11 = vadd.f32 1.0, %v9978_v51  ;;  %9013 = vmatpush1.bf16.msra.mxu0 %v10578_v58  ;;  %9045 = vmatpush1.bf16.msra.mxu1 %v10797_v63  ;;  %v9980_v60 = vpop.eup %9979 }
 0x29a   :  { %9983 = vrcp.f32 %v1525_v1  ;;  %9015 = vmatprep.subr.bf16.mxu0 %v10587_v7  ;;  %9047 = vmatprep.subr.bf16.mxu1 %v10800_v23  ;;  %v9982_v56 = vpop.eup %9981  ;;  %v1538_v24 = vadd.f32 1.0, %v9980_v60 }
 0x29b   :  { %9985 = vrcp.f32 %v1531_v11  ;;  %1788 = vmatprep.mubr.f32.mxu0 %v13711_v42  ;;  %1859 = vmatprep.mubr.f32.mxu1 %v13711_v42  ;;  %v1191_v11 = vsel %vm1190_vm2, %v11056_v36, 0.0  ;;  %v13796_v36 = vld [vmem:[#allocation24_spill] sm:$0xff] }
 0x29c   :  { %9987 = vrcp.f32 %v1538_v24  ;;  %v13787_v24 = vld [vmem:[#allocation35_spill] sm:$0xff] }
 0x29d   :  { %9017 = vmatpush1.bf16.msra.mxu0 %v10594_v17  ;;  %9049 = vmatpush1.bf16.msra.mxu1 %v10808_v29 }
 0x29e   :  { %9019 = vmatprep.subr.bf16.mxu0 %v10599_v22  ;;  %9051 = vmatprep.subr.bf16.mxu1 %v10812_v12 }
 0x2a1   :  { %9021 = vmatpush1.bf16.msra.mxu0 %v10606_v30  ;;  %9053 = vmatpush1.bf16.msra.mxu1 %v10816_v18 }
 0x2a2   :  { %9023 = vmatprep.subr.bf16.mxu0 %v10610_v32  ;;  %9055 = vmatprep.subr.bf16.mxu1 %v10819_v0 }
 0x2a4   :  { %v9984_v49 = vpop.eup %9983 }
 0x2a5   :  { %v9986_v31 = vpop.eup %9985  ;;  %v1542_v61 = vmul.f32 %v9984_v49, %v9982_v56  ;;  %9025 = vmatpush1.bf16.msra.mxu0 %v10624_v50  ;;  %9057 = vmatpush1.bf16.msra.mxu1 %v10822_v25  ;;  %v13782_v56 = vld [vmem:[#allocation16_spill] sm:$0xff]  ;;  %v13783_v49 = vld [vmem:[#allocation33_spill] sm:$0xff] }
 0x2a6   :  { %v1541_v26 = vmul.f32 %v9986_v31, %v1195_v45  ;;  %9027 = vmatprep.subr.bf16.mxu0 %v10627_v52  ;;  %9059 = vmatprep.subr.bf16.mxu1 %v10825_v43  ;;  %v9988_v4 = vpop.eup %9987  ;;  %v13784_v31 = vld [vmem:[#allocation17_spill] sm:$0xff] }
 0x2a8   :  { %v1543_v41 = vadd.f32 %v1542_v61, %v1541_v26  ;;  %v13786_v61 = vld [vmem:[#allocation18_spill] sm:$0xff]  ;;  %v13788_v26 = vld [vmem:[#allocation19_spill] sm:$0xff] }
 0x2a9   :  { %9029 = vmatpush1.bf16.msra.mxu0 %v10635_v2  ;;  %9061 = vmatpush1.bf16.msra.mxu1 %v10828_v55 }
 0x2aa   :  { %9031 = vmatprep.subr.bf16.mxu0 %v10638_v3  ;;  %9063 = vmatprep.subr.bf16.mxu1 %v10831_v35  ;;  %9989 = vtanh.f32 %v1543_v41  ;;  %v11161_v5 = vsel %vm1560_vm4, %v1543_v41, %v1195_v45  ;;  %v13785_v45 = vld [vmem:[#allocation34_spill] sm:$0xff]  ;;  %v13789_v41 = vld [vmem:[#allocation36_spill] sm:$0xff] }
 0x2ad   :  { %9033 = vmatpush1.bf16.msra.mxu0 %v10646_v14  ;;  %9065 = vmatpush1.bf16.msra.mxu1 %v10834_v20 }
 0x2ae   :  { %9035 = vmatprep.subr.bf16.mxu0 %v10649_v15  ;;  %9067 = vmatprep.subr.bf16.mxu1 %v10837_v46 }
 0x2b1   :  { %9037 = vmatpush1.bf16.msra.mxu0 %v10656_v37  ;;  %9069 = vmatpush1.bf16.msra.mxu1 %v10843_v39 }
 0x2b2   :  { %9039 = vmatprep.subr.bf16.mxu0 %v10659_v38  ;;  %9071 = vmatprep.subr.bf16.mxu1 %v10846_v19 }
 0x2b4   :  { %v9990_v51 = vpop.eup %9989 }
 0x2b5   :  { %9041 = vmatpush1.bf16.msra.mxu0 %v13744_v27  ;;  %9073 = vmatpush1.bf16.msra.mxu1 %v10853_v8  ;;  %v11173_v1 = vmul.f32 %v9990_v51, %v9988_v4  ;;  %v13790_v4 = vld [vmem:[#allocation20_spill] sm:$0xff]  ;;  %v13791_v51 = vld [vmem:[#allocation37_spill] sm:$0xff] }
 0x2b6   :  { %9075 = vmatprep.subr.bf16.mxu0 %v13747_v48  ;;  %9107 = vmatprep.subr.bf16.mxu1 %v10596_v21 }
 0x2b7   :  { %13781 = vst [vmem:[#allocation53_spill] sm:$0xff] %v11173_v1  ;;  %v11183_v60 = vsel %vm1560_vm4, %v11173_v1, %v1191_v11  ;;  %v13792_v11 = vld [vmem:[#allocation22_spill] sm:$0xff]  ;;  %v13797_v1 = vld [vmem:[#allocation41_spill] sm:$0xff] }
 0x2b8   :  { %1789 = vmatmul.mubr.f32.vlgmr.msra.gmra.mrb[10].mxu0 %v11183_v60  ;;  %1860 = vmatmul.mubr.f32.vlgmr.msra.gmra.mrb[42].mxu1 %v11183_v60 }
 0x2b9   :  { %9077 = vmatpush1.bf16.msra.mxu0 %v13748_v9  ;;  %9109 = vmatpush1.bf16.msra.mxu1 %v10671_v10 }
 0x2ba   :  { %9079 = vmatprep.subr.bf16.mxu0 %v13782_v56  ;;  %9111 = vmatprep.subr.bf16.mxu1 %v13783_v49 }
 0x2bb   :  { %2009 = vmatprep.mubr.f32.mxu0 %v13711_v42  ;;  %2080 = vmatprep.mubr.f32.mxu1 %v13711_v42 }
 0x2bd   :  { %9081 = vmatpush1.bf16.msra.mxu0 %v13784_v31  ;;  %9113 = vmatpush1.bf16.msra.mxu1 %v13785_v45 }
 0x2be   :  { %9083 = vmatprep.subr.bf16.mxu0 %v13786_v61  ;;  %9115 = vmatprep.subr.bf16.mxu1 %v13787_v24  ;;  %v13813_v24 = vld [vmem:[#allocation55_spill] sm:$0xff] }
 0x2c1   :  { %9085 = vmatpush1.bf16.msra.mxu0 %v13788_v26  ;;  %9117 = vmatpush1.bf16.msra.mxu1 %v13789_v41  ;;  %v13812_v41 = vld [vmem:[#allocation54_spill] sm:$0xff] }
 0x2c2   :  { %9087 = vmatprep.subr.bf16.mxu0 %v13790_v4  ;;  %9119 = vmatprep.subr.bf16.mxu1 %v13791_v51  ;;  %v13801_v4 = vld [vmem:[#allocation43_spill] sm:$0xff] }
 0x2c3   :  { %v13802_v51 = vld [vmem:[#allocation27_spill] sm:$0xff] }
 0x2c5   :  { %9089 = vmatpush1.bf16.msra.mxu0 %v13792_v11  ;;  %9121 = vmatpush1.bf16.msra.mxu1 %v13793_v44  ;;  %v13803_v11 = vld [vmem:[#allocation44_spill] sm:$0xff] }
 0x2c6   :  { %9091 = vmatprep.subr.bf16.mxu0 %v13794_v54  ;;  %9123 = vmatprep.subr.bf16.mxu1 %v13795_v57  ;;  %v13804_v44 = vld [vmem:[#allocation28_spill] sm:$0xff]  ;;  %v13805_v54 = vld [vmem:[#allocation45_spill] sm:$0xff] }
 0x2c7   :  { %v13806_v57 = vld [vmem:[#allocation29_spill] sm:$0xff] }
 0x2c9   :  { %9093 = vmatpush1.bf16.msra.mxu0 %v13796_v36  ;;  %9125 = vmatpush1.bf16.msra.mxu1 %v13797_v1  ;;  %v13807_v36 = vld [vmem:[#allocation46_spill] sm:$0xff] }
 0x2ca   :  { %9095 = vmatprep.subr.bf16.mxu0 %v13798_v40  ;;  %9127 = vmatprep.subr.bf16.mxu1 %v13799_v62  ;;  %v13808_v1 = vld [vmem:[#allocation30_spill] sm:$0xff]  ;;  %v13809_v40 = vld [vmem:[#allocation47_spill] sm:$0xff] }
 0x2cb   :  { %v13810_v62 = vld [vmem:[#allocation31_spill] sm:$0xff] }
 0x2cd   :  { %9097 = vmatpush1.bf16.msra.mxu0 %v13800_v6  ;;  %9129 = vmatpush1.bf16.msra.mxu1 %v13801_v4  ;;  %v13811_v6 = vld [vmem:[#allocation48_spill] sm:$0xff] }
 0x2ce   :  { %9099 = vmatprep.subr.bf16.mxu0 %v13802_v51  ;;  %9131 = vmatprep.subr.bf16.mxu1 %v13803_v11 }
 0x2d1   :  { %9101 = vmatpush1.bf16.msra.mxu0 %v13804_v44  ;;  %9133 = vmatpush1.bf16.msra.mxu1 %v13805_v54 }
 0x2d2   :  { %9103 = vmatprep.subr.bf16.mxu0 %v13806_v57  ;;  %9135 = vmatprep.subr.bf16.mxu1 %v13807_v36 }
 0x2d5   :  { %9105 = vmatpush1.bf16.msra.mxu0 %v13808_v1  ;;  %9137 = vmatpush1.bf16.msra.mxu1 %v13809_v40 }
 0x2d6   :  { %9139 = vmatprep.subr.bf16.mxu0 %v13810_v62  ;;  %9171 = vmatprep.subr.bf16.mxu1 %v13811_v6 }
 0x36b   :  { %v1639_v4 = vpop.f32.mrb[20].mxu0  ;;  %v1710_v51 = vpop.f32.mrb[20].mxu1 }
 0x36c   :  { %v1715_v11 = vadd.f32 %v1639_v4, %v13812_v41  ;;  %v1641_v26 = vpop.f32.mrb[21].mxu0  ;;  %v1712_v44 = vpop.f32.mrb[21].mxu1  ;;  %v9814_v40 = vadd.f32 %v1710_v51, %v10952_v13 }
 0x36d   :  { %v1716_v54 = vadd.f32 %v1641_v26, %v13813_v24  ;;  %v9815_v1 = vadd.f32 %v1712_v44, %v10956_v53  ;;  %v11226_v44 = vpop.permute.xlu0 %1922 }
 0x36e   :  { %v8468_v61 = vmul.f32 -1.442695, %v1715_v11  ;;  %13814 = vst [vmem:[#allocation54_spill] sm:$0xff] %v11226_v44  ;;  %vm1924_vm5 = vcmp.eq.s32.totalorder %v11226_v44, 1  ;;  %v13833_v44 = vld [vmem:[#allocation42_spill] sm:$0xff] }
 0x36f   :  { %v8469_v57 = vmul.f32 -1.442695, %v1716_v54  ;;  %v8470_v36 = vmul.f32 -1.442695, %v9815_v1 }
 0x370   :  { %9991 = vpow2.f32 %v8468_v61 }
 0x371   :  { %9993 = vpow2.f32 %v8469_v57 }
 0x372   :  { %9995 = vpow2.f32 %v8470_v36 }
 0x373   :  { %9997 = vtanh.f32 %v9814_v40 }
 0x37a   :  { %v9992_v62 = vpop.eup %9991 }
 0x37b   :  { %v9994_v45 = vpop.eup %9993  ;;  %v1873_v6 = vadd.f32 1.0, %v9992_v62 }
 0x37c   :  { %v1879_v31 = vadd.f32 1.0, %v9994_v45  ;;  %v9996_v41 = vpop.eup %9995 }
 0x37d   :  { %9999 = vrcp.f32 %v1873_v6  ;;  %v9998_v4 = vpop.eup %9997  ;;  %v1886_v61 = vadd.f32 1.0, %v9996_v41 }
 0x37e   :  { %10001 = vrcp.f32 %v1879_v31 }
 0x37f   :  { %10003 = vrcp.f32 %v1886_v61 }
 0x387   :  { %v10000_v24 = vpop.eup %9999 }
 0x388   :  { %v10002_v26 = vpop.eup %10001  ;;  %v1890_v54 = vmul.f32 %v10000_v24, %v9998_v4 }
 0x389   :  { %v1889_v57 = vmul.f32 %v10002_v26, %v11114_v33  ;;  %v10004_v24 = vpop.eup %10003 }
 0x38b   :  { %v1891_v1 = vadd.f32 %v1890_v54, %v1889_v57  ;;  %v1790_v51 = vpop.f32.mrb[10].mxu0  ;;  %v1861_v11 = vpop.f32.mrb[42].mxu1 }
 0x38c   :  { %v9836_v40 = vadd.f32 %v1790_v51, %v10972_v28  ;;  %v1792_v36 = vpop.f32.mrb[11].mxu0  ;;  %v1863_v62 = vpop.f32.mrb[43].mxu1  ;;  %v9852_v61 = vadd.f32 %v1861_v11, %v11000_v34 }
 0x38d   :  { %v9837_v6 = vadd.f32 %v1792_v36, %v10968_v59  ;;  %10005 = vtanh.f32 %v1891_v1  ;;  %v11234_v31 = vsel %vm1924_vm5, %v1891_v1, %v11114_v33  ;;  %v9853_v4 = vadd.f32 %v1863_v62, %v11006_v47 }
 0x38e   :  { %v8471_v45 = vmul.f32 -1.442695, %v9836_v40 }
 0x38f   :  { %v8472_v41 = vmul.f32 -1.442695, %v9837_v6  ;;  %v8473_v54 = vmul.f32 -1.442695, %v9853_v4 }
 0x390   :  { %10007 = vpow2.f32 %v8471_v45 }
 0x391   :  { %10009 = vpow2.f32 %v8472_v41 }
 0x392   :  { %10011 = vpow2.f32 %v8473_v54 }
 0x393   :  { %10013 = vtanh.f32 %v9852_v61 }
 0x397   :  { %v10006_v26 = vpop.eup %10005 }
 0x398   :  { %v11238_v57 = vmul.f32 %v10006_v26, %v10004_v24  ;;  %v11267_v24 = vpop.permute.xlu1 %1930 }
 0x399   :  { %13816 = vst [vmem:[#allocation75_spill] sm:$0xff] %v11267_v24  ;;  %vm1932_vm7 = vcmp.eq.s32.totalorder %v11267_v24, 1  ;;  %v13834_v24 = vld [vmem:[#allocation26_spill] sm:$0xff] }
 0x39a   :  { %13815 = vst [vmem:[#allocation55_spill] sm:$0xff] %v11238_v57  ;;  %v10008_v51 = vpop.eup %10007  ;;  %v11244_v33 = vsel %vm1924_vm5, %v11238_v57, %v11127_v16  ;;  %v13831_v57 = vld [vmem:[#allocation41_spill] sm:$0xff] }
 0x39b   :  { %v10010_v1 = vpop.eup %10009  ;;  %v1897_v40 = vadd.f32 1.0, %v10008_v51  ;;  %2010 = vmatmul.mubr.f32.vlgmr.msra.gmra.mrb[22].mxu0 %v11244_v33  ;;  %2081 = vmatmul.mubr.f32.vlgmr.msra.gmra.mrb[22].mxu1 %v11244_v33 }
 0x39c   :  { %v1903_v36 = vadd.f32 1.0, %v10010_v1  ;;  %9141 = vmatpush1.bf16.msra.mxu0 %v10578_v58  ;;  %9173 = vmatpush1.bf16.msra.mxu1 %v10797_v63  ;;  %v10012_v16 = vpop.eup %10011 }
 0x39d   :  { %10015 = vrcp.f32 %v1897_v40  ;;  %9143 = vmatprep.subr.bf16.mxu0 %v10587_v7  ;;  %9175 = vmatprep.subr.bf16.mxu1 %v10800_v23  ;;  %v10014_v11 = vpop.eup %10013  ;;  %v1910_v41 = vadd.f32 1.0, %v10012_v16  ;;  %v13818_v40 = vld [vmem:[#allocation17_spill] sm:$0xff]  ;;  %v13821_v16 = vld [vmem:[#allocation35_spill] sm:$0xff] }
 0x39e   :  { %10017 = vrcp.f32 %v1903_v36  ;;  %2160 = vmatprep.mubr.f32.mxu0 %v13711_v42  ;;  %2231 = vmatprep.mubr.f32.mxu1 %v13711_v42  ;;  %v13820_v36 = vld [vmem:[#allocation18_spill] sm:$0xff] }
 0x39f   :  { %10019 = vrcp.f32 %v1910_v41  ;;  %v13826_v41 = vld [vmem:[#allocation22_spill] sm:$0xff] }
 0x3a0   :  { %9145 = vmatpush1.bf16.msra.mxu0 %v10594_v17  ;;  %9177 = vmatpush1.bf16.msra.mxu1 %v10808_v29 }
 0x3a1   :  { %9147 = vmatprep.subr.bf16.mxu0 %v10599_v22  ;;  %9179 = vmatprep.subr.bf16.mxu1 %v10812_v12 }
 0x3a4   :  { %9149 = vmatpush1.bf16.msra.mxu0 %v10606_v30  ;;  %9181 = vmatpush1.bf16.msra.mxu1 %v10816_v18 }
 0x3a5   :  { %9151 = vmatprep.subr.bf16.mxu0 %v10610_v32  ;;  %9183 = vmatprep.subr.bf16.mxu1 %v10819_v0 }
 0x3a7   :  { %v10016_v62 = vpop.eup %10015 }
 0x3a8   :  { %v10018_v6 = vpop.eup %10017  ;;  %v1914_v45 = vmul.f32 %v10016_v62, %v10014_v11  ;;  %9153 = vmatpush1.bf16.msra.mxu0 %v10624_v50  ;;  %9185 = vmatpush1.bf16.msra.mxu1 %v10822_v25  ;;  %v13822_v11 = vld [vmem:[#allocation19_spill] sm:$0xff]  ;;  %v13823_v62 = vld [vmem:[#allocation36_spill] sm:$0xff] }
 0x3a9   :  { %v1913_v4 = vmul.f32 %v10018_v6, %v11161_v5  ;;  %9155 = vmatprep.subr.bf16.mxu0 %v10627_v52  ;;  %9187 = vmatprep.subr.bf16.mxu1 %v10825_v43  ;;  %v10020_v61 = vpop.eup %10019  ;;  %v13824_v6 = vld [vmem:[#allocation20_spill] sm:$0xff] }
 0x3ab   :  { %v1915_v26 = vadd.f32 %v1914_v45, %v1913_v4  ;;  %v13825_v45 = vld [vmem:[#allocation37_spill] sm:$0xff]  ;;  %v13827_v4 = vld [vmem:[#allocation39_spill] sm:$0xff] }
 0x3ac   :  { %9157 = vmatpush1.bf16.msra.mxu0 %v10635_v2  ;;  %9189 = vmatpush1.bf16.msra.mxu1 %v10828_v55 }
 0x3ad   :  { %9159 = vmatprep.subr.bf16.mxu0 %v10638_v3  ;;  %9191 = vmatprep.subr.bf16.mxu1 %v10831_v35  ;;  %10021 = vtanh.f32 %v1915_v26  ;;  %v11277_v54 = vsel %vm1932_vm7, %v1915_v26, %v11161_v5  ;;  %v13828_v26 = vld [vmem:[#allocation23_spill] sm:$0xff] }
 0x3b0   :  { %9161 = vmatpush1.bf16.msra.mxu0 %v10646_v14  ;;  %9193 = vmatpush1.bf16.msra.mxu1 %v10834_v20 }
 0x3b1   :  { %9163 = vmatprep.subr.bf16.mxu0 %v10649_v15  ;;  %9195 = vmatprep.subr.bf16.mxu1 %v10837_v46 }
 0x3b4   :  { %9165 = vmatpush1.bf16.msra.mxu0 %v10656_v37  ;;  %9197 = vmatpush1.bf16.msra.mxu1 %v10843_v39 }
 0x3b5   :  { %9167 = vmatprep.subr.bf16.mxu0 %v10659_v38  ;;  %9199 = vmatprep.subr.bf16.mxu1 %v10846_v19 }
 0x3b7   :  { %v10022_v51 = vpop.eup %10021 }
 0x3b8   :  { %9169 = vmatpush1.bf16.msra.mxu0 %v13744_v27  ;;  %9201 = vmatpush1.bf16.msra.mxu1 %v10853_v8  ;;  %v11289_v5 = vmul.f32 %v10022_v51, %v10020_v61  ;;  %v13829_v61 = vld [vmem:[#allocation40_spill] sm:$0xff] }
 0x3b9   :  { %9203 = vmatprep.subr.bf16.mxu0 %v13747_v48  ;;  %9235 = vmatprep.subr.bf16.mxu1 %v10596_v21  ;;  %v13830_v51 = vld [vmem:[#allocation24_spill] sm:$0xff] }
 0x3ba   :  { %13817 = vst [vmem:[#allocation76_spill] sm:$0xff] %v11289_v5  ;;  %v11297_v1 = vsel %vm1932_vm7, %v11289_v5, %v11183_v60  ;;  %v13819_v60 = vld [vmem:[#allocation34_spill] sm:$0xff]  ;;  %v13832_v5 = vld [vmem:[#allocation25_spill] sm:$0xff] }
 0x3bb   :  { %2161 = vmatmul.mubr.f32.vlgmr.msra.gmra.mrb[8].mxu0 %v11297_v1  ;;  %2232 = vmatmul.mubr.f32.vlgmr.msra.gmra.mrb[40].mxu1 %v11297_v1 }
 0x3bc   :  { %9205 = vmatpush1.bf16.msra.mxu0 %v13748_v9  ;;  %9237 = vmatpush1.bf16.msra.mxu1 %v10671_v10 }
 0x3bd   :  { %9207 = vmatprep.subr.bf16.mxu0 %v13782_v56  ;;  %9239 = vmatprep.subr.bf16.mxu1 %v13783_v49 }
 0x3be   :  { %2381 = vmatprep.mubr.f32.mxu0 %v13711_v42  ;;  %2452 = vmatprep.mubr.f32.mxu1 %v13711_v42 }
 0x3c0   :  { %9209 = vmatpush1.bf16.msra.mxu0 %v13818_v40  ;;  %9241 = vmatpush1.bf16.msra.mxu1 %v13819_v60 }
 0x3c1   :  { %9211 = vmatprep.subr.bf16.mxu0 %v13820_v36  ;;  %9243 = vmatprep.subr.bf16.mxu1 %v13821_v16  ;;  %v13847_v16 = vld [vmem:[#allocation57_spill] sm:$0xff] }
 0x3c4   :  { %9213 = vmatpush1.bf16.msra.mxu0 %v13822_v11  ;;  %9245 = vmatpush1.bf16.msra.mxu1 %v13823_v62  ;;  %v13846_v62 = vld [vmem:[#allocation56_spill] sm:$0xff] }
 0x3c5   :  { %9215 = vmatprep.subr.bf16.mxu0 %v13824_v6  ;;  %9247 = vmatprep.subr.bf16.mxu1 %v13825_v45  ;;  %v13835_v6 = vld [vmem:[#allocation43_spill] sm:$0xff] }
 0x3c6   :  { %v13836_v45 = vld [vmem:[#allocation27_spill] sm:$0xff] }
 0x3c8   :  { %9217 = vmatpush1.bf16.msra.mxu0 %v13826_v41  ;;  %9249 = vmatpush1.bf16.msra.mxu1 %v13827_v4  ;;  %v13837_v41 = vld [vmem:[#allocation44_spill] sm:$0xff] }
 0x3c9   :  { %9219 = vmatprep.subr.bf16.mxu0 %v13828_v26  ;;  %9251 = vmatprep.subr.bf16.mxu1 %v13829_v61  ;;  %v13838_v4 = vld [vmem:[#allocation28_spill] sm:$0xff]  ;;  %v13839_v26 = vld [vmem:[#allocation45_spill] sm:$0xff] }
 0x3ca   :  { %v13840_v61 = vld [vmem:[#allocation29_spill] sm:$0xff] }
 0x3cc   :  { %9221 = vmatpush1.bf16.msra.mxu0 %v13830_v51  ;;  %9253 = vmatpush1.bf16.msra.mxu1 %v13831_v57  ;;  %v13841_v51 = vld [vmem:[#allocation46_spill] sm:$0xff] }
 0x3cd   :  { %9223 = vmatprep.subr.bf16.mxu0 %v13832_v5  ;;  %9255 = vmatprep.subr.bf16.mxu1 %v13833_v44  ;;  %v13842_v57 = vld [vmem:[#allocation30_spill] sm:$0xff]  ;;  %v13843_v5 = vld [vmem:[#allocation47_spill] sm:$0xff] }
 0x3ce   :  { %v13844_v44 = vld [vmem:[#allocation31_spill] sm:$0xff] }
 0x3d0   :  { %9225 = vmatpush1.bf16.msra.mxu0 %v13834_v24  ;;  %9257 = vmatpush1.bf16.msra.mxu1 %v13835_v6  ;;  %v13845_v24 = vld [vmem:[#allocation48_spill] sm:$0xff] }
 0x3d1   :  { %9227 = vmatprep.subr.bf16.mxu0 %v13836_v45  ;;  %9259 = vmatprep.subr.bf16.mxu1 %v13837_v41 }
 0x3d4   :  { %9229 = vmatpush1.bf16.msra.mxu0 %v13838_v4  ;;  %9261 = vmatpush1.bf16.msra.mxu1 %v13839_v26 }
 0x3d5   :  { %9231 = vmatprep.subr.bf16.mxu0 %v13840_v61  ;;  %9263 = vmatprep.subr.bf16.mxu1 %v13841_v51 }
 0x3d8   :  { %9233 = vmatpush1.bf16.msra.mxu0 %v13842_v57  ;;  %9265 = vmatpush1.bf16.msra.mxu1 %v13843_v5 }
 0x3d9   :  { %9267 = vmatprep.subr.bf16.mxu0 %v13844_v44  ;;  %9299 = vmatprep.subr.bf16.mxu1 %v13845_v24 }
 0x46e   :  { %v2011_v6 = vpop.f32.mrb[22].mxu0  ;;  %v2082_v45 = vpop.f32.mrb[22].mxu1 }
 0x46f   :  { %v2087_v41 = vadd.f32 %v2011_v6, %v13846_v62  ;;  %v2013_v11 = vpop.f32.mrb[23].mxu0  ;;  %v2084_v4 = vpop.f32.mrb[23].mxu1  ;;  %v9816_v5 = vadd.f32 %v2082_v45, %v10952_v13 }
 0x470   :  { %v2088_v26 = vadd.f32 %v2013_v11, %v13847_v16  ;;  %v9817_v57 = vadd.f32 %v2084_v4, %v10956_v53  ;;  %v11340_v4 = vpop.permute.xlu0 %2294 }
 0x471   :  { %v8474_v36 = vmul.f32 -1.442695, %v2087_v41  ;;  %13848 = vst [vmem:[#allocation56_spill] sm:$0xff] %v11340_v4  ;;  %vm2296_vm8 = vcmp.eq.s32.totalorder %v11340_v4, 1  ;;  %v13901_v4 = vld [vmem:[#allocation42_spill] sm:$0xff] }
 0x472   :  { %v8475_v61 = vmul.f32 -1.442695, %v2088_v26  ;;  %v8476_v51 = vmul.f32 -1.442695, %v9817_v57 }
 0x473   :  { %10023 = vpow2.f32 %v8474_v36 }
 0x474   :  { %10025 = vpow2.f32 %v8475_v61 }
 0x475   :  { %10027 = vpow2.f32 %v8476_v51 }
 0x476   :  { %10029 = vtanh.f32 %v9816_v5 }
 0x47d   :  { %v10024_v44 = vpop.eup %10023 }
 0x47e   :  { %v10026_v60 = vpop.eup %10025  ;;  %v2245_v24 = vadd.f32 1.0, %v10024_v44 }
 0x47f   :  { %v2251_v40 = vadd.f32 1.0, %v10026_v60  ;;  %v10028_v62 = vpop.eup %10027 }
 0x480   :  { %10031 = vrcp.f32 %v2245_v24  ;;  %v10030_v6 = vpop.eup %10029  ;;  %v2258_v36 = vadd.f32 1.0, %v10028_v62 }
 0x481   :  { %10033 = vrcp.f32 %v2251_v40 }
 0x482   :  { %10035 = vrcp.f32 %v2258_v36 }
 0x48a   :  { %v10032_v16 = vpop.eup %10031 }
 0x48b   :  { %v10034_v11 = vpop.eup %10033  ;;  %v2262_v41 = vmul.f32 %v10032_v16, %v10030_v6 }
 0x48c   :  { %v2261_v26 = vmul.f32 %v10034_v11, %v11234_v31  ;;  %v10036_v16 = vpop.eup %10035 }
 0x48e   :  { %v2263_v57 = vadd.f32 %v2262_v41, %v2261_v26  ;;  %v2162_v45 = vpop.f32.mrb[8].mxu0  ;;  %v2233_v61 = vpop.f32.mrb[40].mxu1 }
 0x48f   :  { %v9834_v44 = vadd.f32 %v2162_v45, %v10972_v28  ;;  %v2164_v24 = vpop.f32.mrb[9].mxu0  ;;  %v2235_v5 = vpop.f32.mrb[41].mxu1  ;;  %v9850_v36 = vadd.f32 %v2233_v61, %v11000_v34 }
 0x490   :  { %v9835_v40 = vadd.f32 %v2164_v24, %v10968_v59  ;;  %10037 = vtanh.f32 %v2263_v57  ;;  %v11348_v60 = vsel %vm2296_vm8, %v2263_v57, %v11234_v31  ;;  %v9851_v6 = vadd.f32 %v2235_v5, %v11006_v47 }
 0x491   :  { %v8477_v51 = vmul.f32 -1.442695, %v9834_v44 }
 0x492   :  { %v8478_v62 = vmul.f32 -1.442695, %v9835_v40  ;;  %v8479_v41 = vmul.f32 -1.442695, %v9851_v6 }
 0x493   :  { %10039 = vpow2.f32 %v8477_v51 }
 0x494   :  { %10041 = vpow2.f32 %v8478_v62 }
 0x495   :  { %10043 = vpow2.f32 %v8479_v41 }
 0x496   :  { %10045 = vtanh.f32 %v9850_v36 }
 0x49a   :  { %v10038_v11 = vpop.eup %10037 }
 0x49b   :  { %v11352_v26 = vmul.f32 %v10038_v11, %v10036_v16  ;;  %v11381_v16 = vpop.permute.xlu1 %2302 }
 0x49c   :  { %13850 = vst [vmem:[#allocation77_spill] sm:$0xff] %v11381_v16  ;;  %vm2304_vm9 = vcmp.eq.s32.totalorder %v11381_v16, 1  ;;  %v13900_v16 = vld [vmem:[#allocation25_spill] sm:$0xff] }
 0x49d   :  { %13849 = vst [vmem:[#allocation57_spill] sm:$0xff] %v11352_v26  ;;  %v10040_v45 = vpop.eup %10039  ;;  %v11358_v31 = vsel %vm2296_vm8, %v11352_v26, %v11244_v33  ;;  %v13865_v26 = vld [vmem:[#allocation41_spill] sm:$0xff] }
 0x49e   :  { %v10042_v57 = vpop.eup %10041  ;;  %v2269_v44 = vadd.f32 1.0, %v10040_v45  ;;  %2382 = vmatmul.mubr.f32.vlgmr.msra.gmra.mrb[24].mxu0 %v11358_v31  ;;  %2453 = vmatmul.mubr.f32.vlgmr.msra.gmra.mrb[24].mxu1 %v11358_v31 }
 0x49f   :  { %v2275_v24 = vadd.f32 1.0, %v10042_v57  ;;  %9269 = vmatpush1.bf16.msra.mxu0 %v10578_v58  ;;  %9301 = vmatpush1.bf16.msra.mxu1 %v10797_v63  ;;  %v10044_v33 = vpop.eup %10043 }
 0x4a0   :  { %10047 = vrcp.f32 %v2269_v44  ;;  %9271 = vmatprep.subr.bf16.mxu0 %v10587_v7  ;;  %9303 = vmatprep.subr.bf16.mxu1 %v10800_v23  ;;  %v10046_v61 = vpop.eup %10045  ;;  %v2282_v62 = vadd.f32 1.0, %v10044_v33  ;;  %v13852_v44 = vld [vmem:[#allocation17_spill] sm:$0xff]  ;;  %v13855_v33 = vld [vmem:[#allocation35_spill] sm:$0xff] }
 0x4a1   :  { %10049 = vrcp.f32 %v2275_v24  ;;  %2532 = vmatprep.mubr.f32.mxu0 %v13711_v42  ;;  %2603 = vmatprep.mubr.f32.mxu1 %v13711_v42  ;;  %v13854_v24 = vld [vmem:[#allocation18_spill] sm:$0xff] }
 0x4a2   :  { %10051 = vrcp.f32 %v2282_v62  ;;  %v13860_v62 = vld [vmem:[#allocation22_spill] sm:$0xff] }
 0x4a3   :  { %9273 = vmatpush1.bf16.msra.mxu0 %v10594_v17  ;;  %9305 = vmatpush1.bf16.msra.mxu1 %v10808_v29 }
 0x4a4   :  { %9275 = vmatprep.subr.bf16.mxu0 %v10599_v22  ;;  %9307 = vmatprep.subr.bf16.mxu1 %v10812_v12 }
 0x4a7   :  { %9277 = vmatpush1.bf16.msra.mxu0 %v10606_v30  ;;  %9309 = vmatpush1.bf16.msra.mxu1 %v10816_v18 }
 0x4a8   :  { %9279 = vmatprep.subr.bf16.mxu0 %v10610_v32  ;;  %9311 = vmatprep.subr.bf16.mxu1 %v10819_v0 }
 0x4aa   :  { %v10048_v5 = vpop.eup %10047 }
 0x4ab   :  { %v10050_v40 = vpop.eup %10049  ;;  %v2286_v51 = vmul.f32 %v10048_v5, %v10046_v61  ;;  %9281 = vmatpush1.bf16.msra.mxu0 %v10624_v50  ;;  %9313 = vmatpush1.bf16.msra.mxu1 %v10822_v25  ;;  %v13856_v61 = vld [vmem:[#allocation19_spill] sm:$0xff]  ;;  %v13857_v5 = vld [vmem:[#allocation36_spill] sm:$0xff] }
 0x4ac   :  { %v2285_v6 = vmul.f32 %v10050_v40, %v11277_v54  ;;  %9283 = vmatprep.subr.bf16.mxu0 %v10627_v52  ;;  %9315 = vmatprep.subr.bf16.mxu1 %v10825_v43  ;;  %v10052_v36 = vpop.eup %10051  ;;  %v13858_v40 = vld [vmem:[#allocation20_spill] sm:$0xff] }
 0x4ae   :  { %v2287_v11 = vadd.f32 %v2286_v51, %v2285_v6  ;;  %v13859_v51 = vld [vmem:[#allocation37_spill] sm:$0xff]  ;;  %v13861_v6 = vld [vmem:[#allocation39_spill] sm:$0xff] }
 0x4af   :  { %9285 = vmatpush1.bf16.msra.mxu0 %v10635_v2  ;;  %9317 = vmatpush1.bf16.msra.mxu1 %v10828_v55 }
 0x4b0   :  { %9287 = vmatprep.subr.bf16.mxu0 %v10638_v3  ;;  %9319 = vmatprep.subr.bf16.mxu1 %v10831_v35  ;;  %10053 = vtanh.f32 %v2287_v11  ;;  %v11391_v41 = vsel %vm2304_vm9, %v2287_v11, %v11277_v54  ;;  %v13862_v11 = vld [vmem:[#allocation23_spill] sm:$0xff] }
 0x4b3   :  { %9289 = vmatpush1.bf16.msra.mxu0 %v10646_v14  ;;  %9321 = vmatpush1.bf16.msra.mxu1 %v10834_v20 }
 0x4b4   :  { %9291 = vmatprep.subr.bf16.mxu0 %v10649_v15  ;;  %9323 = vmatprep.subr.bf16.mxu1 %v10837_v46 }
 0x4b7   :  { %9293 = vmatpush1.bf16.msra.mxu0 %v10656_v37  ;;  %9325 = vmatpush1.bf16.msra.mxu1 %v10843_v39 }
 0x4b8   :  { %9295 = vmatprep.subr.bf16.mxu0 %v10659_v38  ;;  %9327 = vmatprep.subr.bf16.mxu1 %v10846_v19 }
 0x4ba   :  { %v10054_v45 = vpop.eup %10053 }
 0x4bb   :  { %9297 = vmatpush1.bf16.msra.mxu0 %v13744_v27  ;;  %9329 = vmatpush1.bf16.msra.mxu1 %v10853_v8  ;;  %v11403_v54 = vmul.f32 %v10054_v45, %v10052_v36  ;;  %v13863_v36 = vld [vmem:[#allocation40_spill] sm:$0xff] }
 0x4bc   :  { %9331 = vmatprep.subr.bf16.mxu0 %v13747_v48  ;;  %9363 = vmatprep.subr.bf16.mxu1 %v10596_v21  ;;  %v13864_v45 = vld [vmem:[#allocation24_spill] sm:$0xff] }
 0x4bd   :  { %13851 = vst [vmem:[#allocation78_spill] sm:$0xff] %v11403_v54  ;;  %v11411_v57 = vsel %vm2304_vm9, %v11403_v54, %v11297_v1  ;;  %v13853_v1 = vld [vmem:[#allocation34_spill] sm:$0xff]  ;;  %v13866_v54 = vld [vmem:[#allocation25_spill] sm:$0xff] }
 0x4be   :  { %2533 = vmatmul.mubr.f32.vlgmr.msra.gmra.mrb[6].mxu0 %v11411_v57  ;;  %2604 = vmatmul.mubr.f32.vlgmr.msra.gmra.mrb[38].mxu1 %v11411_v57 }
 0x4bf   :  { %9333 = vmatpush1.bf16.msra.mxu0 %v13748_v9  ;;  %9365 = vmatpush1.bf16.msra.mxu1 %v10671_v10 }
 0x4c0   :  { %9335 = vmatprep.subr.bf16.mxu0 %v13782_v56  ;;  %9367 = vmatprep.subr.bf16.mxu1 %v13783_v49 }
 0x4c1   :  { %2741 = vmatprep.mubr.f32.mxu0 %v13711_v42  ;;  %2812 = vmatprep.mubr.f32.mxu1 %v13711_v42 }
 0x4c3   :  { %9337 = vmatpush1.bf16.msra.mxu0 %v13852_v44  ;;  %9369 = vmatpush1.bf16.msra.mxu1 %v13853_v1  ;;  %v13881_v1 = vld [vmem:[#allocation59_spill] sm:$0xff] }
 0x4c4   :  { %9339 = vmatprep.subr.bf16.mxu0 %v13854_v24  ;;  %9371 = vmatprep.subr.bf16.mxu1 %v13855_v33  ;;  %v13880_v33 = vld [vmem:[#allocation58_spill] sm:$0xff] }
 0x4c7   :  { %9341 = vmatpush1.bf16.msra.mxu0 %v13856_v61  ;;  %9373 = vmatpush1.bf16.msra.mxu1 %v13857_v5  ;;  %v13867_v61 = vld [vmem:[#allocation42_spill] sm:$0xff] }
 0x4c8   :  { %9343 = vmatprep.subr.bf16.mxu0 %v13858_v40  ;;  %9375 = vmatprep.subr.bf16.mxu1 %v13859_v51  ;;  %v13868_v5 = vld [vmem:[#allocation26_spill] sm:$0xff]  ;;  %v13869_v40 = vld [vmem:[#allocation43_spill] sm:$0xff] }
 0x4c9   :  { %v13870_v51 = vld [vmem:[#allocation27_spill] sm:$0xff] }
 0x4cb   :  { %9345 = vmatpush1.bf16.msra.mxu0 %v13860_v62  ;;  %9377 = vmatpush1.bf16.msra.mxu1 %v13861_v6  ;;  %v13871_v62 = vld [vmem:[#allocation44_spill] sm:$0xff] }
 0x4cc   :  { %9347 = vmatprep.subr.bf16.mxu0 %v13862_v11  ;;  %9379 = vmatprep.subr.bf16.mxu1 %v13863_v36  ;;  %v13872_v6 = vld [vmem:[#allocation28_spill] sm:$0xff]  ;;  %v13873_v11 = vld [vmem:[#allocation45_spill] sm:$0xff] }
 0x4cd   :  { %v13874_v36 = vld [vmem:[#allocation29_spill] sm:$0xff] }
 0x4cf   :  { %9349 = vmatpush1.bf16.msra.mxu0 %v13864_v45  ;;  %9381 = vmatpush1.bf16.msra.mxu1 %v13865_v26  ;;  %v13875_v45 = vld [vmem:[#allocation46_spill] sm:$0xff] }
 0x4d0   :  { %9351 = vmatprep.subr.bf16.mxu0 %v13866_v54  ;;  %9383 = vmatprep.subr.bf16.mxu1 %v13867_v61  ;;  %v13876_v26 = vld [vmem:[#allocation30_spill] sm:$0xff]  ;;  %v13877_v54 = vld [vmem:[#allocation47_spill] sm:$0xff] }
 0x4d1   :  { %v13878_v61 = vld [vmem:[#allocation31_spill] sm:$0xff] }
 0x4d3   :  { %9353 = vmatpush1.bf16.msra.mxu0 %v13868_v5  ;;  %9385 = vmatpush1.bf16.msra.mxu1 %v13869_v40  ;;  %v13879_v5 = vld [vmem:[#allocation48_spill] sm:$0xff] }
 0x4d4   :  { %9355 = vmatprep.subr.bf16.mxu0 %v13870_v51  ;;  %9387 = vmatprep.subr.bf16.mxu1 %v13871_v62 }
 0x4d7   :  { %9357 = vmatpush1.bf16.msra.mxu0 %v13872_v6  ;;  %9389 = vmatpush1.bf16.msra.mxu1 %v13873_v11 }
 0x4d8   :  { %9359 = vmatprep.subr.bf16.mxu0 %v13874_v36  ;;  %9391 = vmatprep.subr.bf16.mxu1 %v13875_v45 }
 0x4db   :  { %9361 = vmatpush1.bf16.msra.mxu0 %v13876_v26  ;;  %9393 = vmatpush1.bf16.msra.mxu1 %v13877_v54 }
 0x4dc   :  { %9395 = vmatprep.subr.bf16.mxu0 %v13878_v61  ;;  %9427 = vmatprep.subr.bf16.mxu1 %v13879_v5 }
 0x571   :  { %v2383_v40 = vpop.f32.mrb[24].mxu0  ;;  %v2454_v51 = vpop.f32.mrb[24].mxu1 }
 0x572   :  { %v2459_v62 = vadd.f32 %v2383_v40, %v13880_v33  ;;  %v2385_v24 = vpop.f32.mrb[25].mxu0  ;;  %v2456_v6 = vpop.f32.mrb[25].mxu1  ;;  %v9818_v54 = vadd.f32 %v2454_v51, %v10952_v13 }
 0x573   :  { %v2460_v11 = vadd.f32 %v2385_v24, %v13881_v1  ;;  %v9819_v26 = vadd.f32 %v2456_v6, %v10956_v53 }
 0x574   :  { %v8480_v44 = vmul.f32 -1.442695, %v2459_v62 }
 0x575   :  { %v8481_v36 = vmul.f32 -1.442695, %v2460_v11  ;;  %v8482_v45 = vmul.f32 -1.442695, %v9819_v26 }
 0x576   :  { %10055 = vpow2.f32 %v8480_v44 }
 0x577   :  { %10057 = vpow2.f32 %v8481_v36 }
 0x578   :  { %10059 = vpow2.f32 %v8482_v45 }
 0x579   :  { %10061 = vtanh.f32 %v9818_v54 }
 0x580   :  { %v10056_v61 = vpop.eup %10055 }
 0x581   :  { %v10058_v49 = vpop.eup %10057  ;;  %v2617_v5 = vadd.f32 1.0, %v10056_v61 }
 0x582   :  { %v2623_v56 = vadd.f32 1.0, %v10058_v49  ;;  %v10060_v33 = vpop.eup %10059 }
 0x583   :  { %10063 = vrcp.f32 %v2617_v5  ;;  %v10062_v40 = vpop.eup %10061  ;;  %v2630_v44 = vadd.f32 1.0, %v10060_v33 }
 0x584   :  { %10065 = vrcp.f32 %v2623_v56 }
 0x585   :  { %10067 = vrcp.f32 %v2630_v44 }
 0x58d   :  { %v10064_v1 = vpop.eup %10063 }
 0x58e   :  { %v10066_v24 = vpop.eup %10065  ;;  %v2634_v62 = vmul.f32 %v10064_v1, %v10062_v40 }
 0x58f   :  { %v2633_v11 = vmul.f32 %v10066_v24, %v11348_v60  ;;  %v10068_v40 = vpop.eup %10067 }
 0x591   :  { %v2635_v6 = vadd.f32 %v2634_v62, %v2633_v11  ;;  %v2534_v26 = vpop.f32.mrb[6].mxu0  ;;  %v2605_v36 = vpop.f32.mrb[38].mxu1 }
 0x592   :  { %v9832_v51 = vadd.f32 %v2534_v26, %v10972_v28  ;;  %v2536_v61 = vpop.f32.mrb[7].mxu0  ;;  %v2607_v45 = vpop.f32.mrb[39].mxu1  ;;  %v9848_v62 = vadd.f32 %v2605_v36, %v11000_v34 }
 0x593   :  { %v9833_v49 = vadd.f32 %v2536_v61, %v10968_v59  ;;  %10069 = vtanh.f32 %v2635_v6  ;;  %v11459_v56 = vsel %vm2304_vm9, %v2635_v6, %v11348_v60  ;;  %v9849_v33 = vadd.f32 %v2607_v45, %v11006_v47 }
 0x594   :  { %v8483_v54 = vmul.f32 -1.442695, %v9832_v51 }
 0x595   :  { %v8484_v5 = vmul.f32 -1.442695, %v9833_v49  ;;  %v8485_v24 = vmul.f32 -1.442695, %v9849_v33 }
 0x596   :  { %10071 = vpow2.f32 %v8483_v54 }
 0x597   :  { %10073 = vpow2.f32 %v8484_v5 }
 0x598   :  { %10075 = vpow2.f32 %v8485_v24 }
 0x599   :  { %10077 = vtanh.f32 %v9848_v62 }
 0x59d   :  { %v10070_v1 = vpop.eup %10069 }
 0x59e   :  { %v11463_v44 = vmul.f32 %v10070_v1, %v10068_v40 }
 0x5a0   :  { %13882 = vst [vmem:[#allocation58_spill] sm:$0xff] %v11463_v44  ;;  %v10072_v11 = vpop.eup %10071  ;;  %v11469_v60 = vsel %vm2304_vm9, %v11463_v44, %v11358_v31  ;;  %v13899_v44 = vld [vmem:[#allocation41_spill] sm:$0xff] }
 0x5a1   :  { %v10074_v6 = vpop.eup %10073  ;;  %v2641_v26 = vadd.f32 1.0, %v10072_v11  ;;  %2742 = vmatmul.mubr.f32.vlgmr.msra.gmra.mrb[26].mxu0 %v11469_v60  ;;  %2813 = vmatmul.mubr.f32.vlgmr.msra.gmra.mrb[26].mxu1 %v11469_v60  ;;  %v13884_v11 = vld [vmem:[#allocation16_spill] sm:$0xff] }
 0x5a2   :  { %v2647_v51 = vadd.f32 1.0, %v10074_v6  ;;  %9397 = vmatpush1.bf16.msra.mxu0 %v10578_v58  ;;  %9429 = vmatpush1.bf16.msra.mxu1 %v10797_v63  ;;  %v10076_v31 = vpop.eup %10075  ;;  %v13885_v6 = vld [vmem:[#allocation33_spill] sm:$0xff] }
 0x5a3   :  { %10079 = vrcp.f32 %v2641_v26  ;;  %9399 = vmatprep.subr.bf16.mxu0 %v10587_v7  ;;  %9431 = vmatprep.subr.bf16.mxu1 %v10800_v23  ;;  %v10078_v36 = vpop.eup %10077  ;;  %v2654_v54 = vadd.f32 1.0, %v10076_v31  ;;  %v13886_v26 = vld [vmem:[#allocation17_spill] sm:$0xff]  ;;  %v13889_v31 = vld [vmem:[#allocation35_spill] sm:$0xff] }
 0x5a4   :  { %10081 = vrcp.f32 %v2647_v51  ;;  %2892 = vmatprep.mubr.f32.mxu0 %v13711_v42  ;;  %2963 = vmatprep.mubr.f32.mxu1 %v13711_v42  ;;  %v13888_v51 = vld [vmem:[#allocation18_spill] sm:$0xff] }
 0x5a5   :  { %10083 = vrcp.f32 %v2654_v54  ;;  %v13894_v54 = vld [vmem:[#allocation22_spill] sm:$0xff] }
 0x5a6   :  { %9401 = vmatpush1.bf16.msra.mxu0 %v10594_v17  ;;  %9433 = vmatpush1.bf16.msra.mxu1 %v10808_v29 }
 0x5a7   :  { %9403 = vmatprep.subr.bf16.mxu0 %v10599_v22  ;;  %9435 = vmatprep.subr.bf16.mxu1 %v10812_v12 }
 0x5aa   :  { %9405 = vmatpush1.bf16.msra.mxu0 %v10606_v30  ;;  %9437 = vmatpush1.bf16.msra.mxu1 %v10816_v18 }
 0x5ab   :  { %9407 = vmatprep.subr.bf16.mxu0 %v10610_v32  ;;  %9439 = vmatprep.subr.bf16.mxu1 %v10819_v0 }
 0x5ad   :  { %v10080_v61 = vpop.eup %10079 }
 0x5ae   :  { %v10082_v45 = vpop.eup %10081  ;;  %v2658_v49 = vmul.f32 %v10080_v61, %v10078_v36  ;;  %9409 = vmatpush1.bf16.msra.mxu0 %v10624_v50  ;;  %9441 = vmatpush1.bf16.msra.mxu1 %v10822_v25  ;;  %v13890_v36 = vld [vmem:[#allocation19_spill] sm:$0xff]  ;;  %v13891_v61 = vld [vmem:[#allocation36_spill] sm:$0xff] }
 0x5af   :  { %v2657_v5 = vmul.f32 %v10082_v45, %v11391_v41  ;;  %9411 = vmatprep.subr.bf16.mxu0 %v10627_v52  ;;  %9443 = vmatprep.subr.bf16.mxu1 %v10825_v43  ;;  %v10084_v1 = vpop.eup %10083  ;;  %v13892_v45 = vld [vmem:[#allocation20_spill] sm:$0xff] }
 0x5b1   :  { %v2659_v33 = vadd.f32 %v2658_v49, %v2657_v5  ;;  %v13893_v49 = vld [vmem:[#allocation37_spill] sm:$0xff]  ;;  %v13895_v5 = vld [vmem:[#allocation39_spill] sm:$0xff] }
 0x5b2   :  { %9413 = vmatpush1.bf16.msra.mxu0 %v10635_v2  ;;  %9445 = vmatpush1.bf16.msra.mxu1 %v10828_v55 }
 0x5b3   :  { %9415 = vmatprep.subr.bf16.mxu0 %v10638_v3  ;;  %9447 = vmatprep.subr.bf16.mxu1 %v10831_v35  ;;  %10085 = vtanh.f32 %v2659_v33  ;;  %v11499_v40 = vsel %vm2296_vm8, %v2659_v33, %v11391_v41  ;;  %v13896_v33 = vld [vmem:[#allocation23_spill] sm:$0xff] }
 0x5b6   :  { %9417 = vmatpush1.bf16.msra.mxu0 %v10646_v14  ;;  %9449 = vmatpush1.bf16.msra.mxu1 %v10834_v20 }
 0x5b7   :  { %9419 = vmatprep.subr.bf16.mxu0 %v10649_v15  ;;  %9451 = vmatprep.subr.bf16.mxu1 %v10837_v46 }
 0x5ba   :  { %9421 = vmatpush1.bf16.msra.mxu0 %v10656_v37  ;;  %9453 = vmatpush1.bf16.msra.mxu1 %v10843_v39 }
 0x5bb   :  { %9423 = vmatprep.subr.bf16.mxu0 %v10659_v38  ;;  %9455 = vmatprep.subr.bf16.mxu1 %v10846_v19 }
 0x5bd   :  { %v10086_v24 = vpop.eup %10085 }
 0x5be   :  { %9425 = vmatpush1.bf16.msra.mxu0 %v13744_v27  ;;  %9457 = vmatpush1.bf16.msra.mxu1 %v10853_v8  ;;  %v11511_v41 = vmul.f32 %v10086_v24, %v10084_v1  ;;  %v13897_v1 = vld [vmem:[#allocation40_spill] sm:$0xff] }
 0x5bf   :  { %9459 = vmatprep.subr.bf16.mxu0 %v13747_v48  ;;  %9491 = vmatprep.subr.bf16.mxu1 %v10596_v21  ;;  %v13898_v24 = vld [vmem:[#allocation24_spill] sm:$0xff] }
 0x5c0   :  { %13883 = vst [vmem:[#allocation59_spill] sm:$0xff] %v11511_v41  ;;  %v11519_v62 = vsel %vm2296_vm8, %v11511_v41, %v11411_v57  ;;  %v13887_v57 = vld [vmem:[#allocation34_spill] sm:$0xff] }
 0x5c1   :  { %2893 = vmatmul.mubr.f32.vlgmr.msra.gmra.mrb[4].mxu0 %v11519_v62  ;;  %2964 = vmatmul.mubr.f32.vlgmr.msra.gmra.mrb[36].mxu1 %v11519_v62  ;;  %v13902_v41 = vld [vmem:[#allocation26_spill] sm:$0xff] }
 0x5c2   :  { %9461 = vmatpush1.bf16.msra.mxu0 %v13748_v9  ;;  %9493 = vmatpush1.bf16.msra.mxu1 %v10671_v10 }
 0x5c3   :  { %9463 = vmatprep.subr.bf16.mxu0 %v13884_v11  ;;  %9495 = vmatprep.subr.bf16.mxu1 %v13885_v6 }
 0x5c4   :  { %3101 = vmatprep.mubr.f32.mxu0 %v13711_v42  ;;  %3172 = vmatprep.mubr.f32.mxu1 %v13711_v42 }
 0x5c6   :  { %9465 = vmatpush1.bf16.msra.mxu0 %v13886_v26  ;;  %9497 = vmatpush1.bf16.msra.mxu1 %v13887_v57 }
 0x5c7   :  { %9467 = vmatprep.subr.bf16.mxu0 %v13888_v51  ;;  %9499 = vmatprep.subr.bf16.mxu1 %v13889_v31  ;;  %v13915_v31 = vld [vmem:[#allocation61_spill] sm:$0xff] }
 0x5ca   :  { %9469 = vmatpush1.bf16.msra.mxu0 %v13890_v36  ;;  %9501 = vmatpush1.bf16.msra.mxu1 %v13891_v61  ;;  %v13914_v61 = vld [vmem:[#allocation60_spill] sm:$0xff] }
 0x5cb   :  { %9471 = vmatprep.subr.bf16.mxu0 %v13892_v45  ;;  %9503 = vmatprep.subr.bf16.mxu1 %v13893_v49  ;;  %v13903_v45 = vld [vmem:[#allocation43_spill] sm:$0xff] }
 0x5cc   :  { %v13904_v49 = vld [vmem:[#allocation27_spill] sm:$0xff] }
 0x5ce   :  { %9473 = vmatpush1.bf16.msra.mxu0 %v13894_v54  ;;  %9505 = vmatpush1.bf16.msra.mxu1 %v13895_v5  ;;  %v13905_v54 = vld [vmem:[#allocation44_spill] sm:$0xff] }
 0x5cf   :  { %9475 = vmatprep.subr.bf16.mxu0 %v13896_v33  ;;  %9507 = vmatprep.subr.bf16.mxu1 %v13897_v1  ;;  %v13906_v5 = vld [vmem:[#allocation28_spill] sm:$0xff]  ;;  %v13907_v33 = vld [vmem:[#allocation45_spill] sm:$0xff] }
 0x5d0   :  { %v13908_v1 = vld [vmem:[#allocation29_spill] sm:$0xff] }
 0x5d2   :  { %9477 = vmatpush1.bf16.msra.mxu0 %v13898_v24  ;;  %9509 = vmatpush1.bf16.msra.mxu1 %v13899_v44  ;;  %v13909_v24 = vld [vmem:[#allocation46_spill] sm:$0xff] }
 0x5d3   :  { %9479 = vmatprep.subr.bf16.mxu0 %v13900_v16  ;;  %9511 = vmatprep.subr.bf16.mxu1 %v13901_v4  ;;  %v13910_v44 = vld [vmem:[#allocation30_spill] sm:$0xff]  ;;  %v13911_v16 = vld [vmem:[#allocation47_spill] sm:$0xff] }
 0x5d4   :  { %v13912_v4 = vld [vmem:[#allocation31_spill] sm:$0xff] }
 0x5d6   :  { %9481 = vmatpush1.bf16.msra.mxu0 %v13902_v41  ;;  %9513 = vmatpush1.bf16.msra.mxu1 %v13903_v45  ;;  %v13913_v41 = vld [vmem:[#allocation48_spill] sm:$0xff] }
 0x5d7   :  { %9483 = vmatprep.subr.bf16.mxu0 %v13904_v49  ;;  %9515 = vmatprep.subr.bf16.mxu1 %v13905_v54 }
 0x5da   :  { %9485 = vmatpush1.bf16.msra.mxu0 %v13906_v5  ;;  %9517 = vmatpush1.bf16.msra.mxu1 %v13907_v33 }
 0x5db   :  { %9487 = vmatprep.subr.bf16.mxu0 %v13908_v1  ;;  %9519 = vmatprep.subr.bf16.mxu1 %v13909_v24 }
 0x5de   :  { %9489 = vmatpush1.bf16.msra.mxu0 %v13910_v44  ;;  %9521 = vmatpush1.bf16.msra.mxu1 %v13911_v16 }
 0x5df   :  { %9523 = vmatprep.subr.bf16.mxu0 %v13912_v4  ;;  %9555 = vmatprep.subr.bf16.mxu1 %v13913_v41 }
 0x674   :  { %v2743_v45 = vpop.f32.mrb[26].mxu0  ;;  %v2814_v49 = vpop.f32.mrb[26].mxu1 }
 0x675   :  { %v2819_v54 = vadd.f32 %v2743_v45, %v13914_v61  ;;  %v2745_v36 = vpop.f32.mrb[27].mxu0  ;;  %v2816_v5 = vpop.f32.mrb[27].mxu1  ;;  %v9820_v16 = vadd.f32 %v2814_v49, %v10952_v13 }
 0x676   :  { %v2820_v33 = vadd.f32 %v2745_v36, %v13915_v31  ;;  %v9821_v44 = vadd.f32 %v2816_v5, %v10956_v53 }
 0x677   :  { %v8486_v51 = vmul.f32 -1.442695, %v2819_v54 }
 0x678   :  { %v8487_v1 = vmul.f32 -1.442695, %v2820_v33  ;;  %v8488_v24 = vmul.f32 -1.442695, %v9821_v44 }
 0x679   :  { %10087 = vpow2.f32 %v8486_v51 }
 0x67a   :  { %10089 = vpow2.f32 %v8487_v1 }
 0x67b   :  { %10091 = vpow2.f32 %v8488_v24 }
 0x67c   :  { %10093 = vtanh.f32 %v9820_v16 }
 0x683   :  { %v10088_v4 = vpop.eup %10087 }
 0x684   :  { %v10090_v57 = vpop.eup %10089  ;;  %v2977_v41 = vadd.f32 1.0, %v10088_v4 }
 0x685   :  { %v2983_v26 = vadd.f32 1.0, %v10090_v57  ;;  %v10092_v61 = vpop.eup %10091 }
 0x686   :  { %10095 = vrcp.f32 %v2977_v41  ;;  %v10094_v45 = vpop.eup %10093  ;;  %v2990_v51 = vadd.f32 1.0, %v10092_v61 }
 0x687   :  { %10097 = vrcp.f32 %v2983_v26 }
 0x688   :  { %10099 = vrcp.f32 %v2990_v51 }
 0x690   :  { %v10096_v31 = vpop.eup %10095 }
 0x691   :  { %v10098_v36 = vpop.eup %10097  ;;  %v2994_v54 = vmul.f32 %v10096_v31, %v10094_v45 }
 0x692   :  { %v2993_v33 = vmul.f32 %v10098_v36, %v11459_v56  ;;  %v10100_v31 = vpop.eup %10099 }
 0x694   :  { %v2995_v5 = vadd.f32 %v2994_v54, %v2993_v33  ;;  %v2894_v44 = vpop.f32.mrb[4].mxu0  ;;  %v2965_v1 = vpop.f32.mrb[36].mxu1 }
 0x695   :  { %v9830_v49 = vadd.f32 %v2894_v44, %v10972_v28  ;;  %v2896_v4 = vpop.f32.mrb[5].mxu0  ;;  %v2967_v24 = vpop.f32.mrb[37].mxu1  ;;  %v9846_v51 = vadd.f32 %v2965_v1, %v11000_v34 }
 0x696   :  { %v9831_v16 = vadd.f32 %v2896_v4, %v10968_v59  ;;  %10101 = vtanh.f32 %v2995_v5  ;;  %v11567_v26 = vsel %vm1932_vm7, %v2995_v5, %v11459_v56  ;;  %v9847_v45 = vadd.f32 %v2967_v24, %v11006_v47 }
 0x697   :  { %v8489_v57 = vmul.f32 -1.442695, %v9830_v49 }
 0x698   :  { %v8490_v61 = vmul.f32 -1.442695, %v9831_v16  ;;  %v8491_v54 = vmul.f32 -1.442695, %v9847_v45 }
 0x699   :  { %10103 = vpow2.f32 %v8489_v57 }
 0x69a   :  { %10105 = vpow2.f32 %v8490_v61 }
 0x69b   :  { %10107 = vpow2.f32 %v8491_v54 }
 0x69c   :  { %10109 = vtanh.f32 %v9846_v51 }
 0x6a0   :  { %v10102_v36 = vpop.eup %10101 }
 0x6a1   :  { %v11571_v33 = vmul.f32 %v10102_v36, %v10100_v31  ;;  %v8504_v36 = vld [vmem:[%s13548_s8] ss:$0 sm:$0xff] }
 0x6a3   :  { %v10104_v44 = vpop.eup %10103  ;;  %v11577_v56 = vsel %vm1932_vm7, %v11571_v33, %v11469_v60 }
 0x6a4   :  { %v10106_v5 = vpop.eup %10105  ;;  %v3001_v49 = vadd.f32 1.0, %v10104_v44  ;;  %3102 = vmatmul.mubr.f32.vlgmr.msra.gmra.mrb[28].mxu0 %v11577_v56  ;;  %3173 = vmatmul.mubr.f32.vlgmr.msra.gmra.mrb[28].mxu1 %v11577_v56 }
 0x6a5   :  { %v3007_v4 = vadd.f32 1.0, %v10106_v5  ;;  %9525 = vmatpush1.bf16.msra.mxu0 %v10578_v58  ;;  %9557 = vmatpush1.bf16.msra.mxu1 %v10797_v63  ;;  %v10108_v60 = vpop.eup %10107 }
 0x6a6   :  { %10111 = vrcp.f32 %v3001_v49  ;;  %9527 = vmatprep.subr.bf16.mxu0 %v10587_v7  ;;  %9559 = vmatprep.subr.bf16.mxu1 %v10800_v23  ;;  %v10110_v1 = vpop.eup %10109  ;;  %v3014_v61 = vadd.f32 1.0, %v10108_v60  ;;  %v13921_v49 = vld [vmem:[#allocation35_spill] sm:$0xff] }
 0x6a7   :  { %10113 = vrcp.f32 %v3007_v4  ;;  %3252 = vmatprep.mubr.f32.mxu0 %v13711_v42  ;;  %3323 = vmatprep.mubr.f32.mxu1 %v13711_v42  ;;  %v13922_v4 = vld [vmem:[#allocation19_spill] sm:$0xff] }
 0x6a8   :  { %10115 = vrcp.f32 %v3014_v61  ;;  %v13927_v60 = vld [vmem:[#allocation39_spill] sm:$0xff]  ;;  %v13932_v61 = vld [vmem:[#allocation25_spill] sm:$0xff] }
 0x6a9   :  { %9529 = vmatpush1.bf16.msra.mxu0 %v10594_v17  ;;  %9561 = vmatpush1.bf16.msra.mxu1 %v10808_v29 }
 0x6aa   :  { %9531 = vmatprep.subr.bf16.mxu0 %v10599_v22  ;;  %9563 = vmatprep.subr.bf16.mxu1 %v10812_v12 }
 0x6ad   :  { %9533 = vmatpush1.bf16.msra.mxu0 %v10606_v30  ;;  %9565 = vmatpush1.bf16.msra.mxu1 %v10816_v18 }
 0x6ae   :  { %9535 = vmatprep.subr.bf16.mxu0 %v10610_v32  ;;  %9567 = vmatprep.subr.bf16.mxu1 %v10819_v0 }
 0x6b0   :  { %v10112_v24 = vpop.eup %10111 }
 0x6b1   :  { %v10114_v16 = vpop.eup %10113  ;;  %v3018_v57 = vmul.f32 %v10112_v24, %v10110_v1  ;;  %9537 = vmatpush1.bf16.msra.mxu0 %v10624_v50  ;;  %9569 = vmatpush1.bf16.msra.mxu1 %v10822_v25  ;;  %v13928_v1 = vld [vmem:[#allocation23_spill] sm:$0xff]  ;;  %v13929_v24 = vld [vmem:[#allocation40_spill] sm:$0xff] }
 0x6b2   :  { %v3017_v45 = vmul.f32 %v10114_v16, %v11499_v40  ;;  %9539 = vmatprep.subr.bf16.mxu0 %v10627_v52  ;;  %9571 = vmatprep.subr.bf16.mxu1 %v10825_v43  ;;  %v10116_v51 = vpop.eup %10115  ;;  %v13930_v16 = vld [vmem:[#allocation24_spill] sm:$0xff] }
 0x6b4   :  { %v3019_v31 = vadd.f32 %v3018_v57, %v3017_v45  ;;  %v13931_v57 = vld [vmem:[#allocation41_spill] sm:$0xff]  ;;  %v13933_v45 = vld [vmem:[#allocation42_spill] sm:$0xff] }
 0x6b5   :  { %9541 = vmatpush1.bf16.msra.mxu0 %v10635_v2  ;;  %9573 = vmatpush1.bf16.msra.mxu1 %v10828_v55 }
 0x6b6   :  { %9543 = vmatprep.subr.bf16.mxu0 %v10638_v3  ;;  %9575 = vmatprep.subr.bf16.mxu1 %v10831_v35  ;;  %10117 = vtanh.f32 %v3019_v31  ;;  %v11607_v54 = vsel %vm1924_vm5, %v3019_v31, %v11499_v40  ;;  %v13934_v31 = vld [vmem:[#allocation26_spill] sm:$0xff] }
 0x6b9   :  { %9545 = vmatpush1.bf16.msra.mxu0 %v10646_v14  ;;  %9577 = vmatpush1.bf16.msra.mxu1 %v10834_v20 }
 0x6ba   :  { %9547 = vmatprep.subr.bf16.mxu0 %v10649_v15  ;;  %9579 = vmatprep.subr.bf16.mxu1 %v10837_v46 }
 0x6bd   :  { %9549 = vmatpush1.bf16.msra.mxu0 %v10656_v37  ;;  %9581 = vmatpush1.bf16.msra.mxu1 %v10843_v39 }
 0x6be   :  { %9551 = vmatprep.subr.bf16.mxu0 %v10659_v38  ;;  %9583 = vmatprep.subr.bf16.mxu1 %v10846_v19 }
 0x6c0   :  { %v10118_v44 = vpop.eup %10117 }
 0x6c1   :  { %9553 = vmatpush1.bf16.msra.mxu0 %v13744_v27  ;;  %9585 = vmatpush1.bf16.msra.mxu1 %v10853_v8  ;;  %v11619_v40 = vmul.f32 %v10118_v44, %v10116_v51  ;;  %v13935_v51 = vld [vmem:[#allocation43_spill] sm:$0xff] }
 0x6c2   :  { %9587 = vmatprep.subr.bf16.mxu0 %v13747_v48  ;;  %9619 = vmatprep.subr.bf16.mxu1 %v10596_v21  ;;  %v13918_v21 = vld [vmem:[#allocation17_spill] sm:$0xff]  ;;  %v13919_v48 = vld [vmem:[#allocation34_spill] sm:$0xff]  ;;  %v13936_v44 = vld [vmem:[#allocation27_spill] sm:$0xff] }
 0x6c3   :  { %v11627_v5 = vsel %vm1924_vm5, %v11619_v40, %v11519_v62  ;;  %v13920_v62 = vld [vmem:[#allocation18_spill] sm:$0xff] }
 0x6c4   :  { %3253 = vmatmul.mubr.f32.vlgmr.msra.gmra.mrb[2].mxu0 %v11627_v5  ;;  %3324 = vmatmul.mubr.f32.vlgmr.msra.gmra.mrb[34].mxu1 %v11627_v5 }
 0x6c5   :  { %9589 = vmatpush1.bf16.msra.mxu0 %v13748_v9  ;;  %9621 = vmatpush1.bf16.msra.mxu1 %v10671_v10  ;;  %v13923_v9 = vld [vmem:[#allocation36_spill] sm:$0xff] }
 0x6c6   :  { %9591 = vmatprep.subr.bf16.mxu0 %v13884_v11  ;;  %9623 = vmatprep.subr.bf16.mxu1 %v13885_v6  ;;  %v13924_v10 = vld [vmem:[#allocation20_spill] sm:$0xff]  ;;  %v13925_v11 = vld [vmem:[#allocation37_spill] sm:$0xff]  ;;  %v13926_v6 = vld [vmem:[#allocation22_spill] sm:$0xff] }
 0x6c7   :  { %3461 = vmatprep.mubr.f32.mxu0 %v13711_v42  ;;  %3532 = vmatprep.mubr.f32.mxu1 %v13711_v42 }
 0x6c9   :  { %9593 = vmatpush1.bf16.msra.mxu0 %v13918_v21  ;;  %9625 = vmatpush1.bf16.msra.mxu1 %v13919_v48  ;;  %v13937_v21 = vld [vmem:[#allocation44_spill] sm:$0xff] }
 0x6ca   :  { %9595 = vmatprep.subr.bf16.mxu0 %v13920_v62  ;;  %9627 = vmatprep.subr.bf16.mxu1 %v13921_v49  ;;  %v13938_v48 = vld [vmem:[#allocation28_spill] sm:$0xff]  ;;  %v13939_v62 = vld [vmem:[#allocation45_spill] sm:$0xff] }
 0x6cb   :  { %v13940_v49 = vld [vmem:[#allocation29_spill] sm:$0xff] }
 0x6cd   :  { %9597 = vmatpush1.bf16.msra.mxu0 %v13922_v4  ;;  %9629 = vmatpush1.bf16.msra.mxu1 %v13923_v9  ;;  %v13941_v4 = vld [vmem:[#allocation46_spill] sm:$0xff] }
 0x6ce   :  { %9599 = vmatprep.subr.bf16.mxu0 %v13924_v10  ;;  %9631 = vmatprep.subr.bf16.mxu1 %v13925_v11  ;;  %v13942_v9 = vld [vmem:[#allocation30_spill] sm:$0xff]  ;;  %v13943_v10 = vld [vmem:[#allocation47_spill] sm:$0xff] }
 0x6cf   :  { %v13944_v11 = vld [vmem:[#allocation31_spill] sm:$0xff] }
 0x6d1   :  { %9601 = vmatpush1.bf16.msra.mxu0 %v13926_v6  ;;  %9633 = vmatpush1.bf16.msra.mxu1 %v13927_v60  ;;  %v13945_v6 = vld [vmem:[#allocation48_spill] sm:$0xff] }
 0x6d2   :  { %9603 = vmatprep.subr.bf16.mxu0 %v13928_v1  ;;  %9635 = vmatprep.subr.bf16.mxu1 %v13929_v24  ;;  %v13946_v24 = vld [vmem:[#allocation62_spill] sm:$0xff] }
 0x6d5   :  { %9605 = vmatpush1.bf16.msra.mxu0 %v13930_v16  ;;  %9637 = vmatpush1.bf16.msra.mxu1 %v13931_v57 }
 0x6d6   :  { %9607 = vmatprep.subr.bf16.mxu0 %v13932_v61  ;;  %9639 = vmatprep.subr.bf16.mxu1 %v13933_v45  ;;  %v13947_v45 = vld [vmem:[#allocation63_spill] sm:$0xff] }
 0x6d9   :  { %9609 = vmatpush1.bf16.msra.mxu0 %v13934_v31  ;;  %9641 = vmatpush1.bf16.msra.mxu1 %v13935_v51 }
 0x6da   :  { %9611 = vmatprep.subr.bf16.mxu0 %v13936_v44  ;;  %9643 = vmatprep.subr.bf16.mxu1 %v13937_v21 }
 0x6dd   :  { %9613 = vmatpush1.bf16.msra.mxu0 %v13938_v48  ;;  %9645 = vmatpush1.bf16.msra.mxu1 %v13939_v62 }
 0x6de   :  { %9615 = vmatprep.subr.bf16.mxu0 %v13940_v49  ;;  %9647 = vmatprep.subr.bf16.mxu1 %v13941_v4 }
 0x6e1   :  { %9617 = vmatpush1.bf16.msra.mxu0 %v13942_v9  ;;  %9649 = vmatpush1.bf16.msra.mxu1 %v13943_v10 }
 0x6e2   :  { %9651 = vmatprep.subr.bf16.mxu0 %v13944_v11  ;;  %9683 = vmatprep.subr.bf16.mxu1 %v13945_v6 }
 0x777   :  { %v3103_v60 = vpop.f32.mrb[28].mxu0  ;;  %v3174_v1 = vpop.f32.mrb[28].mxu1 }
 0x778   :  { %v3179_v16 = vadd.f32 %v3103_v60, %v13946_v24  ;;  %v3105_v57 = vpop.f32.mrb[29].mxu0  ;;  %v3176_v61 = vpop.f32.mrb[29].mxu1  ;;  %v9822_v62 = vadd.f32 %v3174_v1, %v10952_v13 }
 0x779   :  { %v3180_v31 = vadd.f32 %v3105_v57, %v13947_v45  ;;  %v9823_v21 = vadd.f32 %v3176_v61, %v10956_v53 }
 0x77a   :  { %v8492_v51 = vmul.f32 -1.442695, %v3179_v16 }
 0x77b   :  { %v8493_v44 = vmul.f32 -1.442695, %v3180_v31  ;;  %v8494_v48 = vmul.f32 -1.442695, %v9823_v21 }
 0x77c   :  { %10119 = vpow2.f32 %v8492_v51 }
 0x77d   :  { %10121 = vpow2.f32 %v8493_v44 }
 0x77e   :  { %10123 = vpow2.f32 %v8494_v48 }
 0x77f   :  { %10125 = vtanh.f32 %v9822_v62 }
 0x786   :  { %v10120_v49 = vpop.eup %10119 }
 0x787   :  { %v10122_v4 = vpop.eup %10121  ;;  %v3337_v9 = vadd.f32 1.0, %v10120_v49 }
 0x788   :  { %v3343_v10 = vadd.f32 1.0, %v10122_v4  ;;  %v10124_v11 = vpop.eup %10123 }
 0x789   :  { %10127 = vrcp.f32 %v3337_v9  ;;  %v10126_v6 = vpop.eup %10125  ;;  %v3350_v57 = vadd.f32 1.0, %v10124_v11 }
 0x78a   :  { %10129 = vrcp.f32 %v3343_v10 }
 0x78b   :  { %10131 = vrcp.f32 %v3350_v57 }
 0x793   :  { %v10128_v60 = vpop.eup %10127 }
 0x794   :  { %v10130_v24 = vpop.eup %10129  ;;  %v3354_v16 = vmul.f32 %v10128_v60, %v10126_v6 }
 0x795   :  { %v3353_v45 = vmul.f32 %v10130_v24, %v11567_v26  ;;  %v10132_v11 = vpop.eup %10131 }
 0x797   :  { %v3355_v61 = vadd.f32 %v3354_v16, %v3353_v45  ;;  %v3254_v31 = vpop.f32.mrb[2].mxu0  ;;  %v3325_v51 = vpop.f32.mrb[34].mxu1 }
 0x798   :  { %v9828_v1 = vadd.f32 %v3254_v31, %v10972_v28  ;;  %v3256_v44 = vpop.f32.mrb[3].mxu0  ;;  %v3327_v21 = vpop.f32.mrb[35].mxu1  ;;  %v9844_v24 = vadd.f32 %v3325_v51, %v11000_v34 }
 0x799   :  { %v9829_v48 = vadd.f32 %v3256_v44, %v10968_v59  ;;  %10133 = vtanh.f32 %v3355_v61  ;;  %v11675_v49 = vsel %vm1560_vm4, %v3355_v61, %v11567_v26  ;;  %v9845_v10 = vadd.f32 %v3327_v21, %v11006_v47  ;;  %v3793_v44 = vld [vmem:[%s13547_s7 + $0x78] sm:$0xff] }
 0x79a   :  { %v8495_v4 = vmul.f32 -1.442695, %v9828_v1  ;;  %v3792_v1 = vld [vmem:[%s13547_s7 + $0x70] sm:$0xff] }
 0x79b   :  { %v8496_v9 = vmul.f32 -1.442695, %v9829_v48  ;;  %v8497_v60 = vmul.f32 -1.442695, %v9845_v10  ;;  %v9742_v21 = vpack.c.bf16 %v3793_v44, %v3792_v1  ;;  %v3762_v48 = vld [vmem:[%s13546_s6] sm:$0xff] }
 0x79c   :  { %10135 = vpow2.f32 %v8495_v4  ;;  %v3763_v4 = vld [vmem:[%s13546_s6 + $0x8] sm:$0xff] }
 0x79d   :  { %10137 = vpow2.f32 %v8496_v9  ;;  %v11783_v9 = vpack.c.bf16 %v3763_v4, %v3762_v48  ;;  %v3764_v48 = vld [vmem:[%s13546_s6 + $0x10] sm:$0xff]  ;;  %v3765_v4 = vld [vmem:[%s13546_s6 + $0x18] sm:$0xff] }
 0x79e   :  { %10139 = vpow2.f32 %v8497_v60 }
 0x79f   :  { %10141 = vtanh.f32 %v9844_v24 }
 0x7a3   :  { %v10134_v6 = vpop.eup %10133 }
 0x7a4   :  { %v11679_v16 = vmul.f32 %v10134_v6, %v10132_v11  ;;  %v13950_v6 = vld [vmem:[#allocation64_spill] sm:$0xff] }
 0x7a6   :  { %v10136_v57 = vpop.eup %10135  ;;  %v3388_v26 = vsel %vm1560_vm4, %v11679_v16, %v11577_v56 }
 0x7a7   :  { %v10138_v45 = vpop.eup %10137  ;;  %v3361_v61 = vadd.f32 1.0, %v10136_v57  ;;  %3462 = vmatmul.mubr.f32.vlgmr.msra.gmra.mrb[30].mxu0 %v3388_v26  ;;  %3533 = vmatmul.mubr.f32.vlgmr.msra.gmra.mrb[30].mxu1 %v3388_v26  ;;  %v13951_v26 = vld [vmem:[#allocation65_spill] sm:$0xff] }
 0x7a8   :  { %v3367_v31 = vadd.f32 1.0, %v10138_v45  ;;  %9653 = vmatpush1.bf16.msra.mxu0 %v10578_v58  ;;  %9685 = vmatpush1.bf16.msra.mxu1 %v10797_v63  ;;  %v10140_v58 = vpop.eup %10139 }
 0x7a9   :  { %10143 = vrcp.f32 %v3361_v61  ;;  %9655 = vmatprep.subr.bf16.mxu0 %v10587_v7  ;;  %9687 = vmatprep.subr.bf16.mxu1 %v10800_v23  ;;  %v10142_v7 = vpop.eup %10141 }
 0x7aa   :  { %10145 = vrcp.f32 %v3367_v31  ;;  %3611 = vmatprep.mubr.f32.mxu0 %v13711_v42  ;;  %3682 = vmatprep.mubr.f32.mxu1 %v13711_v42 }
 0x7ac   :  { %9657 = vmatpush1.bf16.msra.mxu0 %v10594_v17  ;;  %9689 = vmatpush1.bf16.msra.mxu1 %v10808_v29  ;;  %v3374_v17 = vadd.f32 1.0, %v10140_v58  ;;  %v3781_v29 = vld [vmem:[%s13547_s7 + $0x18] sm:$0xff] }
 0x7ad   :  { %9659 = vmatprep.subr.bf16.mxu0 %v10599_v22  ;;  %9691 = vmatprep.subr.bf16.mxu1 %v10812_v12 }
 0x7ae   :  { %10147 = vrcp.f32 %v3374_v17 }
 0x7b0   :  { %9661 = vmatpush1.bf16.msra.mxu0 %v10606_v30  ;;  %9693 = vmatpush1.bf16.msra.mxu1 %v10816_v18  ;;  %v3782_v18 = vld [vmem:[%s13547_s7 + $0x20] sm:$0xff] }
 0x7b1   :  { %9663 = vmatprep.subr.bf16.mxu0 %v10610_v32  ;;  %9695 = vmatprep.subr.bf16.mxu1 %v10819_v0  ;;  %v3783_v0 = vld [vmem:[%s13547_s7 + $0x28] sm:$0xff] }
 0x7b3   :  { %v10144_v63 = vpop.eup %10143 }
 0x7b4   :  { %v10146_v42 = vpop.eup %10145  ;;  %v3378_v23 = vmul.f32 %v10144_v63, %v10142_v7  ;;  %9665 = vmatpush1.bf16.msra.mxu0 %v10624_v50  ;;  %9697 = vmatpush1.bf16.msra.mxu1 %v10822_v25  ;;  %v9722_v25 = vpack.c.bf16 %v3783_v0, %v3782_v18 }
 0x7b5   :  { %v3377_v22 = vmul.f32 %v10146_v42, %v11607_v54  ;;  %9667 = vmatprep.subr.bf16.mxu0 %v10627_v52  ;;  %9699 = vmatprep.subr.bf16.mxu1 %v10825_v43  ;;  %v3784_v43 = vld [vmem:[%s13547_s7 + $0x30] sm:$0xff] }
 0x7b7   :  { %v3379_v30 = vadd.f32 %v3378_v23, %v3377_v22 }
 0x7b8   :  { %9669 = vmatpush1.bf16.msra.mxu0 %v10635_v2  ;;  %9701 = vmatpush1.bf16.msra.mxu1 %v10828_v55  ;;  %v10148_v52 = vpop.eup %10147  ;;  %v3785_v55 = vld [vmem:[%s13547_s7 + $0x38] sm:$0xff] }
 0x7b9   :  { %9671 = vmatprep.subr.bf16.mxu0 %v10638_v3  ;;  %9703 = vmatprep.subr.bf16.mxu1 %v10831_v35  ;;  %10149 = vtanh.f32 %v3379_v30  ;;  %v11711_v50 = vsel %vm1552_vm3, %v3379_v30, %v11607_v54  ;;  %v9726_v35 = vpack.c.bf16 %v3785_v55, %v3784_v43  ;;  %v3790_v54 = vld [vmem:[%s13547_s7 + $0x60] sm:$0xff] }
 0x7bc   :  { %9673 = vmatpush1.bf16.msra.mxu0 %v10646_v14  ;;  %9705 = vmatpush1.bf16.msra.mxu1 %v10834_v20  ;;  %v3786_v20 = vld [vmem:[%s13547_s7 + $0x40] sm:$0xff] }
 0x7bd   :  { %9675 = vmatprep.subr.bf16.mxu0 %v10649_v15  ;;  %9707 = vmatprep.subr.bf16.mxu1 %v10837_v46  ;;  %v3778_v15 = vld [vmem:[%s13547_s7] sm:$0xff]  ;;  %v3787_v46 = vld [vmem:[%s13547_s7 + $0x48] sm:$0xff] }
 0x7c0   :  { %9677 = vmatpush1.bf16.msra.mxu0 %v10656_v37  ;;  %9709 = vmatpush1.bf16.msra.mxu1 %v10843_v39  ;;  %v9730_v39 = vpack.c.bf16 %v3787_v46, %v3786_v20 }
 0x7c1   :  { %9679 = vmatprep.subr.bf16.mxu0 %v10659_v38  ;;  %9711 = vmatprep.subr.bf16.mxu1 %v10846_v19  ;;  %v3779_v19 = vld [vmem:[%s13547_s7 + $0x8] sm:$0xff]  ;;  %v3780_v38 = vld [vmem:[%s13547_s7 + $0x10] sm:$0xff] }
 0x7c2   :  { %v9714_v37 = vpack.c.bf16 %v3779_v19, %v3778_v15  ;;  %v9718_v12 = vpack.c.bf16 %v3781_v29, %v3780_v38 }
 0x7c3   :  { %v10150_v2 = vpop.eup %10149 }
 0x7c4   :  { %9681 = vmatpush1.bf16.msra.mxu0 %v13744_v27  ;;  %9713 = vmatpush1.bf16.msra.mxu1 %v10853_v8  ;;  %v11723_v3 = vmul.f32 %v10150_v2, %v10148_v52  ;;  %v3788_v8 = vld [vmem:[%s13547_s7 + $0x50] sm:$0xff]  ;;  %v3789_v27 = vld [vmem:[%s13547_s7 + $0x58] sm:$0xff] }
 0x7c5   :  { %9715 = vmatprep.subr.bf16.mxu0 %v9714_v37  ;;  %v9734_v56 = vpack.c.bf16 %v3789_v27, %v3788_v8 }
 0x7c6   :  { %v3390_v14 = vsel %vm1552_vm3, %v11723_v3, %v11627_v5  ;;  %v3791_v5 = vld [vmem:[%s13547_s7 + $0x68] sm:$0xff] }
 0x7c7   :  { %3612 = vmatmul.mubr.f32.vlgmr.msra.gmra.mrb[0].mxu0 %v3390_v14  ;;  %3683 = vmatmul.mubr.f32.vlgmr.msra.gmra.mrb[32].mxu1 %v3390_v14  ;;  %v9738_v51 = vpack.c.bf16 %v3791_v5, %v3790_v54 }
 0x7c8   :  { %9717 = vmatpush3.bf16.msra.mxu0 %v9714_v37 }
 0x7c9   :  { %9719 = vmatprep.subr.bf16.mxu0 %v9718_v12 }
 0x7cc   :  { %9721 = vmatpush3.bf16.msra.mxu0 %v9718_v12 }
 0x7cd   :  { %9723 = vmatprep.subr.bf16.mxu0 %v9722_v25 }
 0x7d0   :  { %9725 = vmatpush3.bf16.msra.mxu0 %v9722_v25 }
 0x7d1   :  { %9727 = vmatprep.subr.bf16.mxu0 %v9726_v35 }
 0x7d4   :  { %9729 = vmatpush3.bf16.msra.mxu0 %v9726_v35 }
 0x7d5   :  { %9731 = vmatprep.subr.bf16.mxu0 %v9730_v39 }
 0x7d8   :  { %9733 = vmatpush3.bf16.msra.mxu0 %v9730_v39 }
 0x7d9   :  { %9735 = vmatprep.subr.bf16.mxu0 %v9734_v56 }
 0x7dc   :  { %9737 = vmatpush3.bf16.msra.mxu0 %v9734_v56 }
 0x7dd   :  { %9739 = vmatprep.subr.bf16.mxu0 %v9738_v51 }
 0x7e0   :  { %9741 = vmatpush3.bf16.msra.mxu0 %v9738_v51 }
 0x7e1   :  { %9743 = vmatprep.subr.bf16.mxu0 %v9742_v21 }
 0x7e4   :  { %9745 = vmatpush3.bf16.msra.mxu0 %v9742_v21 }
 0x7e5   :  { %9747 = vmatprep.subr.bf16.mxu0 %v11783_v9 }
 0x87a   :  { %v3463_v10 = vpop.f32.mrb[30].mxu0  ;;  %v3534_v11 = vpop.f32.mrb[30].mxu1 }
 0x87b   :  { %v3539_v60 = vadd.f32 %v3463_v10, %v13950_v6  ;;  %v3465_v24 = vpop.f32.mrb[31].mxu0  ;;  %v3536_v57 = vpop.f32.mrb[31].mxu1  ;;  %v9824_v63 = vadd.f32 %v3534_v11, %v10952_v13  ;;  %v9750_v6 = vpack.c.bf16 %v3765_v4, %v3764_v48  ;;  %v13971_v4 = vld [vmem:[#allocation51_spill] sm:$0xff] }
 0x87c   :  { %v3540_v45 = vadd.f32 %v3465_v24, %v13951_v26  ;;  %v9825_v58 = vadd.f32 %v3536_v57, %v10956_v53  ;;  %v3767_v24 = vld [vmem:[%s13546_s6 + $0x28] sm:$0xff]  ;;  %v3768_v26 = vld [vmem:[%s13546_s6 + $0x30] sm:$0xff] }
 0x87d   :  { %v8498_v61 = vmul.f32 -1.442695, %v3539_v60 }
 0x87e   :  { %v8499_v31 = vmul.f32 -1.442695, %v3540_v45  ;;  %v8500_v7 = vmul.f32 -1.442695, %v9825_v58  ;;  %v3769_v45 = vld [vmem:[%s13546_s6 + $0x38] sm:$0xff]  ;;  %v3770_v58 = vld [vmem:[%s13546_s6 + $0x40] sm:$0xff] }
 0x87f   :  { %10151 = vpow2.f32 %v8498_v61  ;;  %v13953_v61 = vld [vmem:[#allocation59_spill] sm:$0xff] }
 0x880   :  { %10153 = vpow2.f32 %v8499_v31 }
 0x881   :  { %10155 = vpow2.f32 %v8500_v7  ;;  %v3771_v7 = vld [vmem:[%s13546_s6 + $0x48] sm:$0xff] }
 0x882   :  { %10157 = vtanh.f32 %v9824_v63  ;;  %v13957_v63 = vld [vmem:[#allocation76_spill] sm:$0xff] }
 0x889   :  { %v10152_v42 = vpop.eup %10151 }
 0x88a   :  { %v10154_v23 = vpop.eup %10153  ;;  %v3696_v17 = vadd.f32 1.0, %v10152_v42  ;;  %v13958_v42 = vld [vmem:[#allocation53_spill] sm:$0xff] }
 0x88b   :  { %v3702_v22 = vadd.f32 1.0, %v10154_v23  ;;  %v10156_v30 = vpop.eup %10155  ;;  %v9762_v23 = vpack.c.bf16 %v3771_v7, %v3770_v58 }
 0x88c   :  { %10159 = vrcp.f32 %v3696_v17  ;;  %v10158_v52 = vpop.eup %10157  ;;  %v3709_v19 = vadd.f32 1.0, %v10156_v30  ;;  %v3772_v17 = vld [vmem:[%s13546_s6 + $0x50] sm:$0xff]  ;;  %v13959_v30 = vld [vmem:[#allocation74_spill] sm:$0xff] }
 0x88d   :  { %10161 = vrcp.f32 %v3702_v22  ;;  %v3773_v22 = vld [vmem:[%s13546_s6 + $0x58] sm:$0xff] }
 0x88e   :  { %10163 = vrcp.f32 %v3709_v19  ;;  %v3775_v19 = vld [vmem:[%s13546_s6 + $0x68] sm:$0xff] }
 0x896   :  { %v10160_v2 = vpop.eup %10159 }
 0x897   :  { %v10162_v14 = vpop.eup %10161  ;;  %v3713_v15 = vmul.f32 %v10160_v2, %v10158_v52  ;;  %v13961_v2 = vld [vmem:[#allocation73_spill] sm:$0xff] }
 0x898   :  { %v3712_v37 = vmul.f32 %v10162_v14, %v11675_v49  ;;  %v10164_v35 = vpop.eup %10163  ;;  %v9766_v14 = vpack.c.bf16 %v3773_v22, %v3772_v17 }
 0x89a   :  { %v3714_v53 = vadd.f32 %v3713_v15, %v3712_v37  ;;  %v3613_v38 = vpop.f32.mrb[0].mxu0  ;;  %v3684_v29 = vpop.f32.mrb[32].mxu1  ;;  %v3774_v15 = vld [vmem:[%s13546_s6 + $0x60] sm:$0xff] }
 0x89b   :  { %v9826_v13 = vadd.f32 %v3613_v38, %v10972_v28  ;;  %v3615_v12 = vpop.f32.mrb[1].mxu0  ;;  %v3686_v18 = vpop.f32.mrb[33].mxu1  ;;  %v9842_v46 = vadd.f32 %v3684_v29, %v11000_v34  ;;  %v9770_v37 = vpack.c.bf16 %v3775_v19, %v3774_v15  ;;  %v3777_v38 = vld [vmem:[%s13546_s6 + $0x78] sm:$0xff] }
 0x89c   :  { %10165 = vtanh.f32 %v3714_v53  ;;  %v9827_v0 = vadd.f32 %v3615_v12, %v10968_v59  ;;  %v9843_v55 = vadd.f32 %v3686_v18, %v11006_v47  ;;  %v3776_v53 = vld [vmem:[%s13546_s6 + $0x70] sm:$0xff]  ;;  %v13963_v12 = vld [vmem:[#allocation55_spill] sm:$0xff]  ;;  %v13964_v18 = vld [vmem:[#allocation57_spill] sm:$0xff] }
 0x89d   :  { %v8501_v25 = vmul.f32 -1.442695, %v9826_v13  ;;  %v9774_v29 = vpack.c.bf16 %v3777_v38, %v3776_v53  ;;  %v13962_v13 = vld [vmem:[#allocation15_spill] sm:$0xff] }
 0x89e   :  { %v8502_v43 = vmul.f32 -1.442695, %v9827_v0  ;;  %v8503_v49 = vmul.f32 -1.442695, %v9843_v55  ;;  %v13965_v0 = vld [vmem:[#allocation58_spill] sm:$0xff] }
 0x89f   :  { %10167 = vpow2.f32 %v8501_v25 }
 0x8a0   :  { %10169 = vpow2.f32 %v8502_v43 }
 0x8a1   :  { %10171 = vpow2.f32 %v8503_v49 }
 0x8a2   :  { %10173 = vtanh.f32 %v9842_v46 }
 0x8a6   :  { %v10166_v20 = vpop.eup %10165 }
 0x8a7   :  { %v11795_v39 = vmul.f32 %v10166_v20, %v10164_v35 }
 0x8a9   :  { %v10168_v8 = vpop.eup %10167 }
 0x8aa   :  { %v10170_v28 = vpop.eup %10169  ;;  %v3720_v27 = vadd.f32 1.0, %v10168_v8  ;;  %v13966_v8 = vld [vmem:[#allocation50_spill] sm:$0xff] }
 0x8ab   :  { %v3726_v56 = vadd.f32 1.0, %v10170_v28  ;;  %v10172_v59 = vpop.eup %10171 }
 0x8ac   :  { %10175 = vrcp.f32 %v3720_v27  ;;  %v10174_v54 = vpop.eup %10173  ;;  %v3733_v1 = vadd.f32 1.0, %v10172_v59  ;;  %v13967_v27 = vld [vmem:[#allocation38_spill] sm:$0xff] }
 0x8ad   :  { %10177 = vrcp.f32 %v3726_v56 }
 0x8ae   :  { %10179 = vrcp.f32 %v3733_v1 }
 0x8b6   :  { %v10176_v5 = vpop.eup %10175 }
 0x8b7   :  { %v10178_v51 = vpop.eup %10177  ;;  %v3737_v47 = vmul.f32 %v10176_v5, %v10174_v54 }
 0x8b8   :  { %v3736_v44 = vmul.f32 %v10178_v51, %v11711_v50  ;;  %v10180_v34 = vpop.eup %10179  ;;  %v3766_v50 = vld [vmem:[%s13546_s6 + $0x20] sm:$0xff] }
 0x8b9   :  { %v9754_v57 = vpack.c.bf16 %v3767_v24, %v3766_v50  ;;  %v13973_v24 = vld [vmem:[#allocation71_spill] sm:$0xff] }
 0x8ba   :  { %v3738_v21 = vadd.f32 %v3737_v47, %v3736_v44  ;;  %v13968_v47 = vld [vmem:[#allocation68_spill] sm:$0xff]  ;;  %v13969_v44 = vld [vmem:[#allocation66_spill] sm:$0xff] }
 0x8bc   :  { %10181 = vtanh.f32 %v3738_v21 }
 0x8c6   :  { %v10182_v10 = vpop.eup %10181 }
 0x8c7   :  { %v3740_v11 = vmul.f32 %v10182_v10, %v10180_v34  ;;  %v13970_v34 = vld [vmem:[#allocation70_spill] sm:$0xff] }
 0x8c9   :  { %8602 = vmatprep.mubr.msk.f32.mxu0 %vm1183_vm1, %v3740_v11 }
 0x8ca   :  { %8603 = vmatmul.mubr.msk.f32.vlgmr.msra.gmra.mrb[32].mxu0 %vm1552_vm3, %v11723_v3  ;;  %v13955_v3 = vld [vmem:[#allocation78_spill] sm:$0xff] }
 0x8cb   :  { %9749 = vmatpush3.bf16.msra.mxu0 %v11783_v9  ;;  %8605 = vmatprep.mubr.msk.f32.mxu0 %vm1924_vm5, %v11619_v40  ;;  %v9758_v40 = vpack.c.bf16 %v3769_v45, %v3768_v26 }
 0x8cc   :  { %9751 = vmatprep.subr.bf16.mxu0 %v9750_v6 }
 0x8ce   :  { %8606 = vmatmul.mubr.msk.f32.gmra.mrb[34].mxu0 %vm2296_vm8, %v13953_v61 }
 0x8cf   :  { %9753 = vmatpush3.bf16.msra.mxu0 %v9750_v6  ;;  %8608 = vmatprep.mubr.msk.f32.mxu0 %vm2304_vm9, %v13955_v3  ;;  %v13972_v6 = vld [vmem:[#allocation67_spill] sm:$0xff] }
 0x8d0   :  { %9755 = vmatprep.subr.bf16.mxu0 %v9754_v57 }
 0x8d2   :  { %8609 = vmatmul.mubr.msk.f32.gmra.mrb[36].mxu0 %vm1932_vm7, %v13957_v63 }
 0x8d3   :  { %9757 = vmatpush3.bf16.msra.mxu0 %v9754_v57  ;;  %8611 = vmatprep.mubr.msk.f32.mxu0 %vm1560_vm4, %v13958_v42 }
 0x8d4   :  { %9759 = vmatprep.subr.bf16.mxu0 %v9758_v40 }
 0x8d6   :  { %8612 = vmatmul.mubr.msk.f32.gmra.mrb[38].mxu0 %vm1190_vm2, %v13959_v30 }
 0x8d7   :  { %9761 = vmatpush3.bf16.msra.mxu0 %v9758_v40  ;;  %8646 = vmatprep.mubr.msk.f32.mxu0 %vm1183_vm1, %v13961_v2  ;;  %vm4311_vm1 = vcmask 1046534  }
 0x8d8   :  { %9763 = vmatprep.subr.bf16.mxu0 %v9762_v23 }
 0x8db   :  { %9765 = vmatpush3.bf16.msra.mxu0 %v9762_v23 }
 0x8dc   :  { %9767 = vmatprep.subr.bf16.mxu0 %v9766_v14 }
 0x8df   :  { %9769 = vmatpush3.bf16.msra.mxu0 %v9766_v14 }
 0x8e0   :  { %9771 = vmatprep.subr.bf16.mxu0 %v9770_v37 }
 0x8e3   :  { %9773 = vmatpush3.bf16.msra.mxu0 %v9770_v37  ;;  %v11925_v37 = vpop.xlane.xlu0 %4134 }
 0x8e4   :  { %9775 = vmatprep.subr.bf16.mxu0 %v9774_v29 }
 0x8e7   :  { %9777 = vmatpush3.bf16.msra.mxu0 %v9774_v29 }
 0x8ea   :  { %8647 = vmatmul.mubr.msk.f32.vlgmr.msra.gmra.mrb[32].mxu0 %vm1552_vm3, %v13962_v13 }
 0x8eb   :  { %8649 = vmatprep.mubr.msk.f32.mxu0 %vm1924_vm5, %v13963_v12  ;;  %v11931_v12 = vpop.xlane.xlu0 %4140 }
 0x8ee   :  { %8650 = vmatmul.mubr.msk.f32.gmra.mrb[34].mxu0 %vm2296_vm8, %v13964_v18 }
 0x8ef   :  { %8652 = vmatprep.mubr.msk.f32.mxu0 %vm2304_vm9, %v13965_v0 }
 0x8f2   :  { %8653 = vmatmul.mubr.msk.f32.gmra.mrb[36].mxu0 %vm1932_vm7, %v11571_v33 }
 0x8f3   :  { %8655 = vmatprep.mubr.msk.f32.mxu0 %vm1560_vm4, %v11679_v16 }
 0x8f6   :  { %8656 = vmatmul.mubr.msk.f32.gmra.mrb[38].mxu0 %vm1190_vm2, %v11795_v39  ;;  %vm4313_vm2 = vcmask 1047559  }
 0x9bd   :  { %v8648_v32 = vpop.f32.mrb[32].mxu0 }
 0x9be   :  { %v4012_v25 = vadd.f32 %v8648_v32, %v8504_v36  ;;  %v3965_v43 = vpop.f32.mrb[33].mxu0  ;;  %v11935_v32 = vpop.xlane.xlu0 %4143 }
 0x9bf   :  { %v4011_v55 = vadd.f32 %v8504_v36, %v3965_v43 }
 0x9c0   :  { %4021 = vst.msk [vmem:[#allocation6 + $0x8] sm:$0xff] %vm4019_vm10, %v4012_v25 }
 0x9c1   :  { %4020 = vst.msk [vmem:[#allocation6] sm:$0xff] %vm4019_vm10, %v4011_v55  ;;  %v8651_v41 = vpop.f32.mrb[34].mxu0 }
 0x9c2   :  { %v4014_v33 = vadd.f32 %v8651_v41, %v8504_v36  ;;  %v3975_v62 = vpop.f32.mrb[35].mxu0 }
 0x9c3   :  { %v4013_v16 = vadd.f32 %v8504_v36, %v3975_v62  ;;  %v4138_v62 = vpop.xlane.xlu1 %4137 }
 0x9c4   :  { %4023 = vst.msk [vmem:[#allocation6 + $0x18] sm:$0xff] %vm4019_vm10, %v4014_v33  ;;  %v11941_v33 = vpop.xlane.xlu0 %4149 }
 0x9c5   :  { %4022 = vst.msk [vmem:[#allocation6 + $0x10] sm:$0xff] %vm4019_vm10, %v4013_v16  ;;  %v8654_v35 = vpop.f32.mrb[36].mxu0 }
 0x9c6   :  { %v4016_v20 = vadd.f32 %v8654_v35, %v8504_v36  ;;  %v3985_v49 = vpop.f32.mrb[37].mxu0 }
 0x9c7   :  { %v4015_v46 = vadd.f32 %v8504_v36, %v3985_v49  ;;  %v4318_v39 = vld [vmem:[#allocation6 + $0x8] sm:$0xff]  ;;  %v11947_v49 = vpop.xlane.xlu1 %4146 }
 0x9c8   :  { %4025 = vst.msk [vmem:[#allocation6 + $0x28] sm:$0xff] %vm4019_vm10, %v4016_v20  ;;  %v4795_v28 = vrot.slane %v4318_v39, %v13966_v8  ;;  %v4788_v56 = vrot.slane %v4318_v39, %v13967_v27  ;;  %v4816_v1 = vrot.slane %v4318_v39, %v13968_v47  ;;  %v4802_v21 = vrot.slane %v4318_v39, %v13969_v44  ;;  %v4033_v11 = vld [vmem:[#allocation6] sm:$0xff]  ;;  %v11945_v20 = vpop.xlane.xlu0 %4155 }
 0x9c9   :  { %4024 = vst.msk [vmem:[#allocation6 + $0x20] sm:$0xff] %vm4019_vm10, %v4015_v46  ;;  %v8657_v59 = vpop.f32.mrb[38].mxu0  ;;  %v4830_v48 = vrot.slane %v4318_v39, %v13970_v34  ;;  %v4809_v10 = vrot.slane %v4318_v39, %v13971_v4  ;;  %v4823_v60 = vrot.slane %v4318_v39, %v13972_v6  ;;  %v4168_v50 = vrot.slane %v4033_v11, %v13966_v8 }
 0x9ca   :  { %v4018_v54 = vadd.f32 %v8657_v59, %v8504_v36  ;;  %4797 = vbcast.lane.b32.xlu0 %v4795_v28, 256  ;;  %4790 = vbcast.lane.b32.xlu1 %v4788_v56, 256  ;;  %v3995_v5 = vpop.f32.mrb[39].mxu0  ;;  %v4837_v57 = vrot.slane %v4318_v39, %v13973_v24  ;;  %v4189_v26 = vrot.slane %v4033_v11, %v13968_v47 }
 0x9cb   :  { %v4017_v51 = vadd.f32 %v8504_v36, %v3995_v5  ;;  %v4203_v45 = vrot.slane %v4033_v11, %v13970_v34  ;;  %v4161_v61 = vrot.slane %v4033_v11, %v13967_v27  ;;  %v5515_v31 = vld [vmem:[#allocation6 + $0x18] sm:$0xff]  ;;  %v4175_v3 = vrot.slane %v4033_v11, %v13969_v44  ;;  %v4153_v5 = vpop.xlane.xlu1 %4152 }
 0x9cc   :  { %4027 = vst.msk [vmem:[#allocation6 + $0x38] sm:$0xff] %vm4019_vm10, %v4018_v54  ;;  %v5951_v9 = vrot.slane %v5515_v31, %v13966_v8  ;;  %v4182_v40 = vrot.slane %v4033_v11, %v13971_v4  ;;  %v5972_v58 = vrot.slane %v5515_v31, %v13968_v47  ;;  %v4196_v7 = vrot.slane %v4033_v11, %v13972_v6  ;;  %v4937_v42 = vld [vmem:[#allocation6 + $0x10] sm:$0xff]  ;;  %v11953_v54 = vpop.permute.xlu0 %4234 }
 0x9cd   :  { %4026 = vst.msk [vmem:[#allocation6 + $0x30] sm:$0xff] %vm4019_vm10, %v4017_v51  ;;  %v5986_v63 = vrot.slane %v5515_v31, %v13970_v34  ;;  %v4210_v23 = vrot.slane %v4033_v11, %v13973_v24  ;;  %v5366_v17 = vrot.slane %v4937_v42, %v13967_v27  ;;  %v5944_v22 = vrot.slane %v5515_v31, %v13967_v27 }
 0x9ce   :  { %4818 = vbcast.lane.b32.xlu0 %v4816_v1, 256  ;;  %4804 = vbcast.lane.b32.xlu1 %v4802_v21, 256  ;;  %v5387_v30 = vrot.slane %v4937_v42, %v13971_v4  ;;  %v5958_v52 = vrot.slane %v5515_v31, %v13969_v44  ;;  %v5401_v2 = vrot.slane %v4937_v42, %v13972_v6 }
 0x9cf   :  { %v5965_v14 = vrot.slane %v5515_v31, %v13971_v4  ;;  %v5415_v15 = vrot.slane %v4937_v42, %v13973_v24  ;;  %v6671_v19 = vld [vmem:[#allocation6 + $0x28] sm:$0xff]  ;;  %v5979_v53 = vrot.slane %v5515_v31, %v13972_v6  ;;  %v5993_v29 = vrot.slane %v5515_v31, %v13973_v24  ;;  %13974 = vst [vmem:[#allocation16_spill] sm:$0xff] %v11953_v54 }
 0x9d0   :  { %v7107_v38 = vrot.slane %v6671_v19, %v13966_v8  ;;  %v7128_v13 = vrot.slane %v6671_v19, %v13968_v47  ;;  %v5373_v18 = vrot.slane %v4937_v42, %v13966_v8  ;;  %v7142_v0 = vrot.slane %v6671_v19, %v13970_v34  ;;  %v6093_v36 = vld [vmem:[#allocation6 + $0x20] sm:$0xff]  ;;  %v11957_v21 = vpop.permute.xlu0 %4332 }
 0x9d1   :  { %v5380_v25 = vrot.slane %v4937_v42, %v13969_v44  ;;  %v6522_v43 = vrot.slane %v6093_v36, %v13967_v27  ;;  %v5394_v55 = vrot.slane %v4937_v42, %v13968_v47  ;;  %v6543_v41 = vrot.slane %v6093_v36, %v13971_v4 }
 0x9d2   :  { %4832 = vbcast.lane.b32.xlu0 %v4830_v48, 256  ;;  %4811 = vbcast.lane.b32.xlu1 %v4809_v10, 256  ;;  %v5408_v16 = vrot.slane %v4937_v42, %v13970_v34  ;;  %v6557_v35 = vrot.slane %v6093_v36, %v13972_v6  ;;  %v7100_v46 = vrot.slane %v6671_v19, %v13967_v27  ;;  %v11959_v48 = vpop.permute.xlu1 %4325 }
 0x9d3   :  { %v6571_v39 = vrot.slane %v6093_v36, %v13973_v24  ;;  %v7114_v56 = vrot.slane %v6671_v19, %v13969_v44  ;;  %v7121_v51 = vrot.slane %v6671_v19, %v13971_v4  ;;  %v7135_v10 = vrot.slane %v6671_v19, %v13972_v6 }
 0x9d4   :  { %v7249_v28 = vld [vmem:[#allocation6 + $0x30] sm:$0xff]  ;;  %v6536_v31 = vrot.slane %v6093_v36, %v13969_v44 }
 0x9d5   :  { %v7678_v59 = vrot.slane %v7249_v28, %v13967_v27  ;;  %v7699_v1 = vrot.slane %v7249_v28, %v13971_v4  ;;  %v7713_v11 = vrot.slane %v7249_v28, %v13972_v6  ;;  %v7685_v42 = vrot.slane %v7249_v28, %v13966_v8 }
 0x9d6   :  { %4825 = vbcast.lane.b32.xlu1 %v4823_v60, 256  ;;  %4170 = vbcast.lane.b32.xlu0 %v4168_v50, 256  ;;  %v7149_v60 = vrot.slane %v6671_v19, %v13973_v24  ;;  %v11964_v50 = vpop.permute.xlu0 %4346 }
 0x9da   :  { %4839 = vbcast.lane.b32.xlu1 %v4837_v57, 256  ;;  %4191 = vbcast.lane.b32.xlu0 %v4189_v26, 256  ;;  %v11966_v57 = vpop.permute.xlu1 %4339  ;;  %v6529_v26 = vrot.slane %v6093_v36, %v13966_v8 }
 0x9de   :  { %4205 = vbcast.lane.b32.xlu0 %v4203_v45, 256  ;;  %4163 = vbcast.lane.b32.xlu1 %v4161_v61, 256  ;;  %v11969_v45 = vpop.permute.xlu0 %4860  ;;  %v11971_v61 = vpop.permute.xlu1 %4353 }
 0x9df   :  { %13975 = vst [vmem:[#allocation33_spill] sm:$0xff] %v11969_v45 }
 0x9e2   :  { %4177 = vbcast.lane.b32.xlu1 %v4175_v3, 256  ;;  %5953 = vbcast.lane.b32.xlu0 %v5951_v9, 256  ;;  %v6550_v3 = vrot.slane %v6093_v36, %v13968_v47  ;;  %v11975_v9 = vpop.permute.xlu0 %6016 }
 0x9e3   :  { %13976 = vst [vmem:[#allocation60_spill] sm:$0xff] %v11975_v9 }
 0x9e6   :  { %4184 = vbcast.lane.b32.xlu1 %v4182_v40, 256  ;;  %5974 = vbcast.lane.b32.xlu0 %v5972_v58, 256  ;;  %v11977_v40 = vpop.permute.xlu1 %5438  ;;  %v6564_v58 = vrot.slane %v6093_v36, %v13970_v34 }
 0x9e7   :  { %13977 = vst [vmem:[#allocation61_spill] sm:$0xff] %v11977_v40 }
 0x9ea   :  { %4198 = vbcast.lane.b32.xlu1 %v4196_v7, 256  ;;  %5988 = vbcast.lane.b32.xlu0 %v5986_v63, 256  ;;  %v11980_v7 = vpop.permute.xlu0 %7172  ;;  %v11982_v63 = vpop.permute.xlu1 %6594 }
 0x9eb   :  { %13978 = vst [vmem:[#allocation75_spill] sm:$0xff] %v11980_v7  ;;  %13979 = vst [vmem:[#allocation54_spill] sm:$0xff] %v11982_v63 }
 0x9ee   :  { %4212 = vbcast.lane.b32.xlu1 %v4210_v23, 256  ;;  %5368 = vbcast.lane.b32.xlu0 %v5366_v17, 256 }
 0x9f2   :  { %5946 = vbcast.lane.b32.xlu1 %v5944_v22, 256  ;;  %5389 = vbcast.lane.b32.xlu0 %v5387_v30, 256  ;;  %v7692_v22 = vrot.slane %v7249_v28, %v13969_v44 }
 0x9f6   :  { %5960 = vbcast.lane.b32.xlu1 %v5958_v52, 256  ;;  %5403 = vbcast.lane.b32.xlu0 %v5401_v2, 256  ;;  %v7706_v2 = vrot.slane %v7249_v28, %v13968_v47 }
 0x9fa   :  { %5967 = vbcast.lane.b32.xlu1 %v5965_v14, 256  ;;  %5417 = vbcast.lane.b32.xlu0 %v5415_v15, 256 }
 0x9fe   :  { %5981 = vbcast.lane.b32.xlu1 %v5979_v53, 256  ;;  %7109 = vbcast.lane.b32.xlu0 %v7107_v38, 256 }
 0xa02   :  { %5995 = vbcast.lane.b32.xlu1 %v5993_v29, 256  ;;  %7130 = vbcast.lane.b32.xlu0 %v7128_v13, 256 }
 0xa06   :  { %5375 = vbcast.lane.b32.xlu1 %v5373_v18, 256  ;;  %7144 = vbcast.lane.b32.xlu0 %v7142_v0, 256 }
 0xa0a   :  { %5382 = vbcast.lane.b32.xlu1 %v5380_v25, 256  ;;  %6524 = vbcast.lane.b32.xlu0 %v6522_v43, 256 }
 0xa0e   :  { %5396 = vbcast.lane.b32.xlu1 %v5394_v55, 256  ;;  %6545 = vbcast.lane.b32.xlu0 %v6543_v41, 256 }
 0xa12   :  { %5410 = vbcast.lane.b32.xlu1 %v5408_v16, 256  ;;  %6559 = vbcast.lane.b32.xlu0 %v6557_v35, 256 }
 0xa16   :  { %7102 = vbcast.lane.b32.xlu1 %v7100_v46, 256  ;;  %6573 = vbcast.lane.b32.xlu0 %v6571_v39, 256 }
 0xa1a   :  { %7116 = vbcast.lane.b32.xlu1 %v7114_v56, 256  ;;  %7680 = vbcast.lane.b32.xlu0 %v7678_v59, 256 }
 0xa1e   :  { %7123 = vbcast.lane.b32.xlu1 %v7121_v51, 256  ;;  %7701 = vbcast.lane.b32.xlu0 %v7699_v1, 256 }
 0xa22   :  { %7137 = vbcast.lane.b32.xlu1 %v7135_v10, 256  ;;  %7715 = vbcast.lane.b32.xlu0 %v7713_v11, 256 }
 0xa26   :  { %7151 = vbcast.lane.b32.xlu1 %v7149_v60, 256 }
 0xa2a   :  { %6531 = vbcast.lane.b32.xlu1 %v6529_v26, 256 }
 0xa2e   :  { %6538 = vbcast.lane.b32.xlu1 %v6536_v31, 256 }
 0xa32   :  { %6552 = vbcast.lane.b32.xlu1 %v6550_v3, 256 }
 0xa36   :  { %6566 = vbcast.lane.b32.xlu1 %v6564_v58, 256 }
 0xa3a   :  { %7687 = vbcast.lane.b32.xlu1 %v7685_v42, 256 }
 0xa3c   :  { %v11985_v23 = vpop.permute.xlu1 %4790  ;;  %v11987_v17 = vpop.permute.xlu0 %4797 }
 0xa3e   :  { %7694 = vbcast.lane.b32.xlu1 %v7692_v22, 256 }
 0xa40   :  { %v11990_v30 = vpop.permute.xlu1 %4804  ;;  %v11992_v52 = vpop.permute.xlu0 %4818 }
 0xa42   :  { %7708 = vbcast.lane.b32.xlu1 %v7706_v2, 256 }
 0xa44   :  { %v11995_v14 = vpop.permute.xlu1 %4811  ;;  %v11997_v15 = vpop.permute.xlu0 %4832 }
 0xa48   :  { %v11999_v19 = vpop.permute.xlu1 %4825  ;;  %v4171_v53 = vpop.permute.xlu0 %4170 }
 0xa49   :  { %v4223_v38 = vadd.f32 %v4171_v53, %v4138_v62 }
 0xa4b   :  { %4249 = vperm.xlu0 %9925, %v4223_v38   ;;  %v4367_v51 = vadd.f32 %v11966_v57, %v4223_v38  ;;  %v4366_v10 = vadd.f32 %v11957_v21, %v4223_v38  ;;  %v4369_v11 = vadd.f32 %v11971_v61, %v4223_v38  ;;  %v4368_v31 = vadd.f32 %v11964_v50, %v4223_v38 }
 0xa4c   :  { %v12001_v29 = vpop.permute.xlu1 %4839  ;;  %v4192_v0 = vpop.permute.xlu0 %4191 }
 0xa4d   :  { %v12006_v55 = vadd.f32 %v4192_v0, %v11947_v49 }
 0xa50   :  { %v4164_v13 = vpop.permute.xlu1 %4163  ;;  %v4206_v62 = vpop.permute.xlu0 %4205 }
 0xa51   :  { %v4222_v18 = vadd.f32 %v4164_v13, %v11925_v37  ;;  %v12013_v37 = vadd.f32 %v4206_v62, %v4153_v5 }
 0xa53   :  { %4246 = vperm.xlu1 %9926, %v4222_v18   ;;  %v4360_v39 = vadd.f32 %v11959_v48, %v4222_v18  ;;  %v4362_v56 = vadd.f32 %v11966_v57, %v4222_v18  ;;  %v4364_v5 = vadd.f32 %v11971_v61, %v4222_v18 }
 0xa54   :  { %v4178_v36 = vpop.permute.xlu1 %4177  ;;  %v12041_v60 = vpop.permute.xlu0 %5953 }
 0xa55   :  { %v4224_v25 = vadd.f32 %v4178_v36, %v11931_v12 }
 0xa57   :  { %4252 = vperm.xlu1 %9926, %v4224_v25   ;;  %v4371_v3 = vadd.f32 %v11957_v21, %v4224_v25  ;;  %v4370_v22 = vadd.f32 %v11959_v48, %v4224_v25  ;;  %v4373_v2 = vadd.f32 %v11964_v50, %v4224_v25  ;;  %v4372_v13 = vadd.f32 %v11966_v57, %v4224_v25 }
 0xa58   :  { %v4185_v43 = vpop.permute.xlu1 %4184  ;;  %v12047_v58 = vpop.permute.xlu0 %5974  ;;  %v4374_v36 = vadd.f32 %v11971_v61, %v4224_v25 }
 0xa59   :  { %v12009_v41 = vadd.f32 %v4185_v43, %v11935_v32  ;;  %v4361_v32 = vadd.f32 %v11957_v21, %v4222_v18 }
 0xa5b   :  { %4255 = vperm.xlu0 %9925, %v12009_v41   ;;  %4258 = vperm.xlu1 %9926, %v12006_v55   ;;  %v4377_v43 = vadd.f32 %v11966_v57, %v12009_v41  ;;  %v4378_v25 = vadd.f32 %v11964_v50, %v12009_v41 }
 0xa5c   :  { %v4199_v16 = vpop.permute.xlu1 %4198 }
 0xa5d   :  { %v12016_v35 = vadd.f32 %v4199_v16, %v11941_v33  ;;  %v4363_v33 = vadd.f32 %v11964_v50, %v4222_v18  ;;  %v12058_v18 = vpop.permute.xlu0 %5988  ;;  %v4376_v16 = vadd.f32 %v11957_v21, %v12009_v41 }
 0xa5f   :  { %4261 = vperm.xlu0 %9925, %v12016_v35   ;;  %4264 = vperm.xlu1 %9926, %v12013_v37  }
 0xa60   :  { %v4213_v12 = vpop.permute.xlu1 %4212 }
 0xa61   :  { %v12021_v49 = vadd.f32 %v4213_v12, %v11945_v20  ;;  %v4365_v20 = vadd.f32 %v11959_v48, %v4223_v38  ;;  %v4375_v38 = vadd.f32 %v11959_v48, %v12009_v41  ;;  %v12065_v62 = vpop.permute.xlu0 %5368  ;;  %v4379_v12 = vadd.f32 %v11971_v61, %v12009_v41 }
 0xa62   :  { %v4382_v41 = vadd.f32 %v11966_v57, %v12006_v55 }
 0xa63   :  { %4267 = vperm.xlu0 %9925, %v12021_v49   ;;  %4444 = vperm.xlu1 %9926, %v4361_v32  }
 0xa64   :  { %v12025_v46 = vpop.permute.xlu1 %5946 }
 0xa67   :  { %4441 = vperm.xlu0 %9925, %v4360_v39   ;;  %4450 = vperm.xlu1 %9926, %v4363_v33   ;;  %v4381_v39 = vadd.f32 %v11957_v21, %v12006_v55  ;;  %v12077_v33 = vpop.permute.xlu0 %5389 }
 0xa68   :  { %v12029_v28 = vpop.permute.xlu1 %5960 }
 0xa6b   :  { %4447 = vperm.xlu0 %9925, %v4362_v56   ;;  %4456 = vperm.xlu1 %9926, %v4365_v20   ;;  %v4380_v20 = vadd.f32 %v11959_v48, %v12006_v55 }
 0xa6c   :  { %v12033_v59 = vpop.permute.xlu1 %5967 }
 0xa6f   :  { %4453 = vperm.xlu0 %9925, %v4364_v5   ;;  %4462 = vperm.xlu1 %9926, %v4367_v51   ;;  %v4383_v5 = vadd.f32 %v11964_v50, %v12006_v55  ;;  %v12085_v51 = vpop.permute.xlu0 %5403 }
 0xa70   :  { %v12037_v1 = vpop.permute.xlu1 %5981 }
 0xa73   :  { %4459 = vperm.xlu0 %9925, %v4366_v10   ;;  %4468 = vperm.xlu1 %9926, %v4369_v11   ;;  %v4385_v10 = vadd.f32 %v11959_v48, %v12016_v35 }
 0xa74   :  { %v12043_v26 = vpop.permute.xlu1 %5995 }
 0xa77   :  { %4465 = vperm.xlu0 %9925, %v4368_v31   ;;  %4474 = vperm.xlu1 %9926, %v4371_v3   ;;  %v4384_v31 = vadd.f32 %v11971_v61, %v12006_v55  ;;  %v4387_v3 = vadd.f32 %v11966_v57, %v12016_v35  ;;  %v4388_v55 = vadd.f32 %v11964_v50, %v12016_v35 }
 0xa78   :  { %v12049_v42 = vpop.permute.xlu1 %5375 }
 0xa7b   :  { %4471 = vperm.xlu0 %9925, %v4370_v22   ;;  %4480 = vperm.xlu1 %9926, %v4373_v2   ;;  %v12097_v22 = vpop.permute.xlu0 %5417 }
 0xa7c   :  { %v12053_v53 = vpop.permute.xlu1 %5382 }
 0xa7f   :  { %4477 = vperm.xlu0 %9925, %v4372_v13   ;;  %4486 = vperm.xlu1 %9926, %v4375_v38   ;;  %v4386_v13 = vadd.f32 %v11957_v21, %v12016_v35  ;;  %v4389_v38 = vadd.f32 %v11971_v61, %v12016_v35  ;;  %v4395_v35 = vadd.f32 %v11959_v48, %v12021_v49 }
 0xa80   :  { %v12060_v0 = vpop.permute.xlu1 %5396 }
 0xa83   :  { %4483 = vperm.xlu0 %9925, %v4374_v36   ;;  %4492 = vperm.xlu1 %9926, %v4377_v43   ;;  %v12105_v36 = vpop.permute.xlu0 %7109  ;;  %v4391_v43 = vadd.f32 %v11957_v21, %v12013_v37 }
 0xa84   :  { %v12071_v32 = vpop.permute.xlu1 %5410 }
 0xa87   :  { %4489 = vperm.xlu0 %9925, %v4376_v16   ;;  %4498 = vperm.xlu1 %9926, %v4379_v12   ;;  %v4393_v12 = vadd.f32 %v11964_v50, %v12013_v37 }
 0xa88   :  { %v12079_v56 = vpop.permute.xlu1 %7102 }
 0xa8b   :  { %4495 = vperm.xlu0 %9925, %v4378_v25   ;;  %4504 = vperm.xlu1 %9926, %v4381_v39   ;;  %v4390_v25 = vadd.f32 %v11959_v48, %v12013_v37  ;;  %v12117_v39 = vpop.permute.xlu0 %7130 }
 0xa8c   :  { %v12091_v11 = vpop.permute.xlu1 %7116 }
 0xa8f   :  { %4501 = vperm.xlu0 %9925, %v4380_v20   ;;  %4510 = vperm.xlu1 %9926, %v4383_v5   ;;  %v4392_v5 = vadd.f32 %v11966_v57, %v12013_v37 }
 0xa90   :  { %v12099_v2 = vpop.permute.xlu1 %7123 }
 0xa93   :  { %4507 = vperm.xlu0 %9925, %v4382_v41   ;;  %4516 = vperm.xlu1 %9926, %v4385_v10   ;;  %v12125_v41 = vpop.permute.xlu0 %7144  ;;  %v4397_v10 = vadd.f32 %v11966_v57, %v12021_v49 }
 0xa94   :  { %v12111_v16 = vpop.permute.xlu1 %7137 }
 0xa97   :  { %4513 = vperm.xlu0 %9925, %v4384_v31   ;;  %4522 = vperm.xlu1 %9926, %v4387_v3   ;;  %v4394_v31 = vadd.f32 %v11971_v61, %v12013_v37 }
 0xa98   :  { %v12119_v20 = vpop.permute.xlu1 %7151 }
 0xa9b   :  { %4519 = vperm.xlu0 %9925, %v4386_v13   ;;  %4528 = vperm.xlu1 %9926, %v4389_v38   ;;  %v4399_v13 = vadd.f32 %v11971_v61, %v12021_v49  ;;  %v4396_v38 = vadd.f32 %v11957_v21, %v12021_v49 }
 0xa9c   :  { %v12131_v3 = vpop.permute.xlu1 %6531 }
 0xa9f   :  { %4525 = vperm.xlu0 %9925, %v4388_v55   ;;  %4534 = vperm.xlu1 %9926, %v4391_v43   ;;  %v12137_v55 = vpop.permute.xlu0 %6524 }
 0xaa0   :  { %v12139_v43 = vpop.permute.xlu1 %6538 }
 0xaa3   :  { %4540 = vperm.xlu1 %9926, %v4393_v12   ;;  %4531 = vperm.xlu0 %9925, %v4390_v25   ;;  %v4398_v12 = vadd.f32 %v11964_v50, %v12021_v49  ;;  %v12143_v37 = vpop.permute.xlu0 %6545 }
 0xaa4   :  { %v12145_v25 = vpop.permute.xlu1 %6552 }
 0xaa7   :  { %4546 = vperm.xlu1 %9926, %v4395_v35   ;;  %4537 = vperm.xlu0 %9925, %v4392_v5   ;;  %v12147_v35 = vpop.permute.xlu0 %6559 }
 0xaa8   :  { %v12149_v5 = vpop.permute.xlu1 %6566 }
 0xaab   :  { %4552 = vperm.xlu1 %9926, %v4397_v10   ;;  %4543 = vperm.xlu0 %9925, %v4394_v31   ;;  %v12151_v10 = vpop.permute.xlu0 %6573 }
 0xaac   :  { %v12153_v31 = vpop.permute.xlu1 %7687 }
 0xaad   :  { %13980 = vst [vmem:[#allocation17_spill] sm:$0xff] %v12153_v31 }
 0xaaf   :  { %4558 = vperm.xlu1 %9926, %v4399_v13   ;;  %4549 = vperm.xlu0 %9925, %v4396_v38   ;;  %v12155_v13 = vpop.permute.xlu0 %7680 }
 0xab0   :  { %13981 = vst [vmem:[#allocation34_spill] sm:$0xff] %v12155_v13  ;;  %v12157_v38 = vpop.permute.xlu1 %7694 }
 0xab1   :  { %13982 = vst [vmem:[#allocation18_spill] sm:$0xff] %v12157_v38 }
 0xab3   :  { %4555 = vperm.xlu0 %9925, %v4398_v12   ;;  %v12159_v7 = vpop.permute.xlu0 %7701 }
 0xab4   :  { %13983 = vst [vmem:[#allocation35_spill] sm:$0xff] %v12159_v7  ;;  %v12161_v49 = vpop.permute.xlu1 %7708 }
 0xab5   :  { %13984 = vst [vmem:[#allocation19_spill] sm:$0xff] %v12161_v49 }
 0xab7   :  { %v12163_v12 = vpop.permute.xlu0 %7715 }
 0xab8   :  { %13985 = vst [vmem:[#allocation36_spill] sm:$0xff] %v12163_v12  ;;  %v13994_v12 = vld [vmem:[#allocation21_spill] sm:$0xff] }
 0xaca   :  { %v12167_v9 = vpop.permute.xlu0 %4249 }
 0xacb   :  { %13987 = vst [vmem:[#allocation37_spill] sm:$0xff] %v12167_v9 }
 0xad2   :  { %v12165_v63 = vpop.permute.xlu1 %4246 }
 0xad3   :  { %13986 = vst [vmem:[#allocation20_spill] sm:$0xff] %v12165_v63 }
 0xad6   :  { %v12169_v40 = vpop.permute.xlu1 %4252 }
 0xad7   :  { %13988 = vst [vmem:[#allocation22_spill] sm:$0xff] %v12169_v40 }
 0xada   :  { %v12171_v45 = vpop.permute.xlu1 %4258  ;;  %v12173_v54 = vpop.permute.xlu0 %4255 }
 0xadb   :  { %13989 = vst [vmem:[#allocation39_spill] sm:$0xff] %v12171_v45  ;;  %13990 = vst [vmem:[#allocation23_spill] sm:$0xff] %v12173_v54 }
 0xade   :  { %v12175_v6 = vpop.permute.xlu1 %4264  ;;  %v12177_v4 = vpop.permute.xlu0 %4261 }
 0xadf   :  { %13991 = vst [vmem:[#allocation40_spill] sm:$0xff] %v12175_v6  ;;  %13992 = vst [vmem:[#allocation24_spill] sm:$0xff] %v12177_v4 }
 0xae2   :  { %v4445_v47 = vpop.permute.xlu1 %4444  ;;  %v12179_v27 = vpop.permute.xlu0 %4267 }
 0xae3   :  { %13993 = vst [vmem:[#allocation41_spill] sm:$0xff] %v12179_v27  ;;  %v4567_v63 = vrot.slane %v4445_v47, %v13994_v12 }
 0xae6   :  { %v4451_v44 = vpop.permute.xlu1 %4450  ;;  %v4442_v8 = vpop.permute.xlu0 %4441 }
 0xae7   :  { %v4563_v49 = vrot.slane %v4442_v8, %v13994_v12  ;;  %v4575_v4 = vrot.slane %v4451_v44, %v13994_v12 }
 0xae9   :  { %v4720_v54 = vsel %vm4301_vm11, %v4567_v63, %v4563_v49 }
 0xaea   :  { %v4457_v9 = vpop.permute.xlu1 %4456  ;;  %v4448_v7 = vpop.permute.xlu0 %4447 }
 0xaeb   :  { %v4571_v45 = vrot.slane %v4448_v7, %v13994_v12  ;;  %v4583_v63 = vrot.slane %v4457_v9, %v13994_v12 }
 0xaed   :  { %v4721_v6 = vsel %vm4303_vm12, %v4571_v45, %v4720_v54 }
 0xaee   :  { %v4463_v40 = vpop.permute.xlu1 %4462  ;;  %v4454_v27 = vpop.permute.xlu0 %4453  ;;  %v4722_v8 = vsel %vm4305_vm13, %v4575_v4, %v4721_v6 }
 0xaef   :  { %v4579_v38 = vrot.slane %v4454_v27, %v13994_v12  ;;  %v4591_v45 = vrot.slane %v4463_v40, %v13994_v12 }
 0xaf1   :  { %v4723_v47 = vsel %vm4307_vm14, %v4579_v38, %v4722_v8 }
 0xaf2   :  { %v4469_v31 = vpop.permute.xlu1 %4468  ;;  %v4460_v13 = vpop.permute.xlu0 %4459  ;;  %v4760_v7 = vsel %vm4132_vm6, %v4723_v47, -inf }
 0xaf3   :  { %v4587_v54 = vrot.slane %v4460_v13, %v13994_v12  ;;  %4761 = vmax.xlane.f32.xlu0 %v4760_v7  ;;  %v4599_v4 = vrot.slane %v4469_v31, %v13994_v12 }
 0xaf5   :  { %v4724_v44 = vsel %vm4301_vm11, %v4587_v54, %v4583_v63 }
 0xaf6   :  { %v4475_v49 = vpop.permute.xlu1 %4474  ;;  %v4466_v27 = vpop.permute.xlu0 %4465  ;;  %v4725_v6 = vsel %vm4303_vm12, %v4591_v45, %v4724_v44 }
 0xaf7   :  { %v4595_v24 = vrot.slane %v4466_v27, %v13994_v12  ;;  %v4607_v40 = vrot.slane %v4475_v49, %v13994_v12 }
 0xaf9   :  { %v4726_v38 = vsel %vm4305_vm13, %v4595_v24, %v4725_v6 }
 0xafa   :  { %v4481_v8 = vpop.permute.xlu1 %4480  ;;  %v4472_v47 = vpop.permute.xlu0 %4471  ;;  %v4727_v9 = vsel %vm4307_vm14, %v4599_v4, %v4726_v38 }
 0xafb   :  { %v4763_v13 = vsel %vm4132_vm6, %v4727_v9, -inf  ;;  %v4603_v7 = vrot.slane %v4472_v47, %v13994_v12  ;;  %v4615_v24 = vrot.slane %v4481_v8, %v13994_v12 }
 0xafc   :  { %4764 = vmax.xlane.f32.xlu1 %v4763_v13 }
 0xafd   :  { %v4728_v31 = vsel %vm4301_vm11, %v4607_v40, %v4603_v7 }
 0xafe   :  { %v4487_v63 = vpop.permute.xlu1 %4486  ;;  %v4478_v54 = vpop.permute.xlu0 %4477 }
 0xaff   :  { %v4611_v27 = vrot.slane %v4478_v54, %v13994_v12  ;;  %v4623_v54 = vrot.slane %v4487_v63, %v13994_v12 }
 0xb01   :  { %v4729_v44 = vsel %vm4303_vm12, %v4611_v27, %v4728_v31 }
 0xb02   :  { %v4493_v45 = vpop.permute.xlu1 %4492  ;;  %v4484_v6 = vpop.permute.xlu0 %4483  ;;  %v4730_v38 = vsel %vm4305_vm13, %v4615_v24, %v4729_v44 }
 0xb03   :  { %v4619_v4 = vrot.slane %v4484_v6, %v13994_v12  ;;  %v4631_v8 = vrot.slane %v4493_v45, %v13994_v12 }
 0xb05   :  { %v4731_v47 = vsel %vm4307_vm14, %v4619_v4, %v4730_v38 }
 0xb06   :  { %v4499_v9 = vpop.permute.xlu1 %4498  ;;  %v4490_v49 = vpop.permute.xlu0 %4489  ;;  %v4766_v13 = vsel %vm4132_vm6, %v4731_v47, -inf }
 0xb07   :  { %v4627_v7 = vrot.slane %v4490_v49, %v13994_v12  ;;  %4767 = vmax.xlane.f32.xlu0 %v4766_v13  ;;  %v4639_v44 = vrot.slane %v4499_v9, %v13994_v12 }
 0xb09   :  { %v4732_v40 = vsel %vm4301_vm11, %v4627_v7, %v4623_v54 }
 0xb0a   :  { %v4505_v27 = vpop.permute.xlu1 %4504  ;;  %v4496_v31 = vpop.permute.xlu0 %4495  ;;  %v4733_v24 = vsel %vm4303_vm12, %v4631_v8, %v4732_v40 }
 0xb0b   :  { %v4635_v6 = vrot.slane %v4496_v31, %v13994_v12  ;;  %v4647_v45 = vrot.slane %v4505_v27, %v13994_v12 }
 0xb0d   :  { %v4734_v4 = vsel %vm4305_vm13, %v4635_v6, %v4733_v24 }
 0xb0e   :  { %v4511_v38 = vpop.permute.xlu1 %4510  ;;  %v4502_v47 = vpop.permute.xlu0 %4501  ;;  %v4735_v63 = vsel %vm4307_vm14, %v4639_v44, %v4734_v4 }
 0xb0f   :  { %v4769_v49 = vsel %vm4132_vm6, %v4735_v63, -inf  ;;  %v4643_v13 = vrot.slane %v4502_v47, %v13994_v12  ;;  %v4655_v8 = vrot.slane %v4511_v38, %v13994_v12 }
 0xb10   :  { %4770 = vmax.xlane.f32.xlu0 %v4769_v49 }
 0xb11   :  { %v4736_v9 = vsel %vm4301_vm11, %v4647_v45, %v4643_v13 }
 0xb12   :  { %v4517_v54 = vpop.permute.xlu1 %4516  ;;  %v4508_v7 = vpop.permute.xlu0 %4507 }
 0xb13   :  { %v4651_v31 = vrot.slane %v4508_v7, %v13994_v12  ;;  %v4663_v7 = vrot.slane %v4517_v54, %v13994_v12 }
 0xb15   :  { %v4737_v40 = vsel %vm4303_vm12, %v4651_v31, %v4736_v9 }
 0xb16   :  { %v4523_v6 = vpop.permute.xlu1 %4522  ;;  %v4514_v24 = vpop.permute.xlu0 %4513  ;;  %v4738_v4 = vsel %vm4305_vm13, %v4655_v8, %v4737_v40 }
 0xb17   :  { %v4659_v44 = vrot.slane %v4514_v24, %v13994_v12  ;;  %v4671_v38 = vrot.slane %v4523_v6, %v13994_v12 }
 0xb19   :  { %v4739_v47 = vsel %vm4307_vm14, %v4659_v44, %v4738_v4 }
 0xb1a   :  { %v4529_v63 = vpop.permute.xlu1 %4528  ;;  %v4520_v27 = vpop.permute.xlu0 %4519  ;;  %v4772_v49 = vsel %vm4132_vm6, %v4739_v47, -inf }
 0xb1b   :  { %v4667_v13 = vrot.slane %v4520_v27, %v13994_v12  ;;  %4773 = vmax.xlane.f32.xlu1 %v4772_v49  ;;  %v4679_v40 = vrot.slane %v4529_v63, %v13994_v12 }
 0xb1d   :  { %v4740_v45 = vsel %vm4301_vm11, %v4667_v13, %v4663_v7 }
 0xb1e   :  { %v4535_v31 = vpop.permute.xlu1 %4534  ;;  %v4526_v9 = vpop.permute.xlu0 %4525  ;;  %v4741_v8 = vsel %vm4303_vm12, %v4671_v38, %v4740_v45 }
 0xb1f   :  { %v4675_v24 = vrot.slane %v4526_v9, %v13994_v12  ;;  %v4687_v6 = vrot.slane %v4535_v31, %v13994_v12 }
 0xb21   :  { %v4742_v44 = vsel %vm4305_vm13, %v4675_v24, %v4741_v8 }
 0xb22   :  { %v4541_v4 = vpop.permute.xlu1 %4540  ;;  %v4532_v47 = vpop.permute.xlu0 %4531  ;;  %v4743_v54 = vsel %vm4307_vm14, %v4679_v40, %v4742_v44 }
 0xb23   :  { %v4775_v27 = vsel %vm4132_vm6, %v4743_v54, -inf  ;;  %v4683_v49 = vrot.slane %v4532_v47, %v13994_v12  ;;  %v4695_v38 = vrot.slane %v4541_v4, %v13994_v12 }
 0xb24   :  { %4776 = vmax.xlane.f32.xlu0 %v4775_v27 }
 0xb25   :  { %v4744_v63 = vsel %vm4301_vm11, %v4687_v6, %v4683_v49 }
 0xb26   :  { %v4547_v7 = vpop.permute.xlu1 %4546  ;;  %v4538_v13 = vpop.permute.xlu0 %4537 }
 0xb27   :  { %v4691_v9 = vrot.slane %v4538_v13, %v13994_v12  ;;  %v4703_v27 = vrot.slane %v4547_v7, %v13994_v12 }
 0xb29   :  { %v4745_v45 = vsel %vm4303_vm12, %v4691_v9, %v4744_v63 }
 0xb2a   :  { %v4544_v24 = vpop.permute.xlu0 %4543  ;;  %v4553_v8 = vpop.permute.xlu1 %4552  ;;  %v4746_v44 = vsel %vm4305_vm13, %v4695_v38, %v4745_v45 }
 0xb2b   :  { %v4699_v40 = vrot.slane %v4544_v24, %v13994_v12  ;;  %v4711_v4 = vrot.slane %v4553_v8, %v13994_v12 }
 0xb2d   :  { %v4747_v47 = vsel %vm4307_vm14, %v4699_v40, %v4746_v44 }
 0xb2e   :  { %v4550_v54 = vpop.permute.xlu0 %4549  ;;  %v4778_v31 = vsel %vm4132_vm6, %v4747_v47, -inf  ;;  %v4559_v49 = vpop.permute.xlu1 %4558 }
 0xb2f   :  { %v4707_v13 = vrot.slane %v4550_v54, %v13994_v12  ;;  %4779 = vmax.xlane.f32.xlu1 %v4778_v31  ;;  %v4719_v45 = vrot.slane %v4559_v49, %v13994_v12 }
 0xb31   :  { %v4748_v6 = vsel %vm4301_vm11, %v4707_v13, %v4703_v27 }
 0xb32   :  { %v4556_v9 = vpop.permute.xlu0 %4555  ;;  %v4749_v38 = vsel %vm4303_vm12, %v4711_v4, %v4748_v6 }
 0xb33   :  { %v4715_v63 = vrot.slane %v4556_v9, %v13994_v12 }
 0xb35   :  { %v4750_v24 = vsel %vm4305_vm13, %v4715_v63, %v4749_v38 }
 0xb36   :  { %v4751_v40 = vsel %vm4307_vm14, %v4719_v45, %v4750_v24 }
 0xb37   :  { %v4781_v7 = vsel %vm4132_vm6, %v4751_v40, -inf }
 0xb38   :  { %4782 = vmax.xlane.f32.xlu0 %v4781_v7 }
 0xb80   :  { %v4762_v44 = vpop.xlane.xlu0 %4761 }
 0xb81   :  { %v4849_v47 = vadd.f32 %v11985_v23, %v4762_v44 }
 0xb83   :  { %4872 = vperm.xlu1 %9926, %v4849_v47   ;;  %v4940_v45 = vadd.f32 %v4849_v47, %v11966_v57  ;;  %v4939_v38 = vadd.f32 %v4849_v47, %v11957_v21  ;;  %v4941_v24 = vadd.f32 %v4849_v47, %v11964_v50 }
 0xb89   :  { %v4765_v54 = vpop.xlane.xlu1 %4764 }
 0xb8a   :  { %v4850_v8 = vadd.f32 %v11987_v17, %v4765_v54 }
 0xb8c   :  { %4875 = vperm.xlu0 %9925, %v4850_v8   ;;  %v4946_v40 = vadd.f32 %v4850_v8, %v11964_v50  ;;  %v4945_v44 = vadd.f32 %v4850_v8, %v11966_v57 }
 0xb94   :  { %v4768_v31 = vpop.xlane.xlu0 %4767 }
 0xb95   :  { %v4851_v27 = vadd.f32 %v11990_v30, %v4768_v31  ;;  %v4938_v30 = vadd.f32 %v4849_v47, %v11959_v48  ;;  %v4947_v31 = vadd.f32 %v4850_v8, %v11971_v61 }
 0xb97   :  { %4878 = vperm.xlu1 %9926, %v4851_v27   ;;  %v4948_v7 = vadd.f32 %v4851_v27, %v11959_v48  ;;  %v4950_v54 = vadd.f32 %v4851_v27, %v11966_v57 }
 0xb9d   :  { %v4771_v13 = vpop.xlane.xlu0 %4770 }
 0xb9e   :  { %v4852_v49 = vadd.f32 %v11995_v14, %v4771_v13  ;;  %v4949_v13 = vadd.f32 %v4851_v27, %v11957_v21 }
 0xba0   :  { %4881 = vperm.xlu0 %9925, %v4852_v49  }
 0xba8   :  { %v4774_v6 = vpop.xlane.xlu1 %4773 }
 0xba9   :  { %v4853_v4 = vadd.f32 %v11992_v52, %v4774_v6  ;;  %v4954_v6 = vadd.f32 %v4852_v49, %v11957_v21 }
 0xbab   :  { %4884 = vperm.xlu1 %9926, %v4853_v4  }
 0xbb1   :  { %v4777_v9 = vpop.xlane.xlu0 %4776 }
 0xbb2   :  { %v12267_v23 = vadd.f32 %v11999_v19, %v4777_v9  ;;  %v4942_v19 = vadd.f32 %v4849_v47, %v11971_v61  ;;  %v4952_v47 = vadd.f32 %v4851_v27, %v11971_v61  ;;  %v4951_v9 = vadd.f32 %v4851_v27, %v11964_v50 }
 0xbb3   :  { %v4962_v27 = vadd.f32 %v4853_v4, %v11971_v61 }
 0xbb4   :  { %4887 = vperm.xlu0 %9925, %v12267_v23  }
 0xbbc   :  { %v4780_v17 = vpop.xlane.xlu1 %4779 }
 0xbbd   :  { %v12271_v63 = vadd.f32 %v11997_v15, %v4780_v17  ;;  %v4944_v15 = vadd.f32 %v4850_v8, %v11957_v21  ;;  %v4956_v17 = vadd.f32 %v4852_v49, %v11964_v50 }
 0xbbf   :  { %4890 = vperm.xlu1 %9926, %v12271_v63  }
 0xbc3   :  { %5019 = vperm.xlu1 %9926, %v4938_v30   ;;  %v4953_v30 = vadd.f32 %v4852_v49, %v11959_v48 }
 0xbc5   :  { %v4783_v14 = vpop.xlane.xlu0 %4782 }
 0xbc6   :  { %v12277_v52 = vadd.f32 %v12001_v29, %v4783_v14  ;;  %v4943_v29 = vadd.f32 %v4850_v8, %v11959_v48  ;;  %v4958_v8 = vadd.f32 %v4853_v4, %v11959_v48  ;;  %v4955_v14 = vadd.f32 %v4852_v49, %v11966_v57 }
 0xbc7   :  { %5025 = vperm.xlu1 %9926, %v4940_v45   ;;  %v4960_v45 = vadd.f32 %v4853_v4, %v11966_v57 }
 0xbc8   :  { %4893 = vperm.xlu0 %9925, %v12277_v52  }
 0xbcb   :  { %5031 = vperm.xlu1 %9926, %v4942_v19   ;;  %v4957_v19 = vadd.f32 %v4852_v49, %v11971_v61  ;;  %v4963_v49 = vadd.f32 %v12267_v23, %v11959_v48 }
 0xbcc   :  { %5022 = vperm.xlu0 %9925, %v4939_v38   ;;  %v4959_v38 = vadd.f32 %v4853_v4, %v11957_v21 }
 0xbcf   :  { %5037 = vperm.xlu1 %9926, %v4944_v15   ;;  %v4964_v15 = vadd.f32 %v12267_v23, %v11957_v21 }
 0xbd0   :  { %5028 = vperm.xlu0 %9925, %v4941_v24   ;;  %v4961_v24 = vadd.f32 %v4853_v4, %v11964_v50  ;;  %v4970_v4 = vadd.f32 %v12271_v63, %v11966_v57 }
 0xbd3   :  { %5043 = vperm.xlu1 %9926, %v4946_v40   ;;  %v4966_v40 = vadd.f32 %v12267_v23, %v11964_v50 }
 0xbd4   :  { %5034 = vperm.xlu0 %9925, %v4943_v29   ;;  %v4968_v29 = vadd.f32 %v12271_v63, %v11959_v48 }
 0xbd7   :  { %5049 = vperm.xlu1 %9926, %v4948_v7   ;;  %v4965_v7 = vadd.f32 %v12267_v23, %v11966_v57 }
 0xbd8   :  { %5040 = vperm.xlu0 %9925, %v4945_v44   ;;  %v4967_v44 = vadd.f32 %v12267_v23, %v11971_v61  ;;  %v4976_v23 = vadd.f32 %v12277_v52, %v11964_v50 }
 0xbdb   :  { %5055 = vperm.xlu1 %9926, %v4950_v54   ;;  %v4972_v54 = vadd.f32 %v12271_v63, %v11971_v61 }
 0xbdc   :  { %5046 = vperm.xlu0 %9925, %v4947_v31   ;;  %v4969_v31 = vadd.f32 %v12271_v63, %v11957_v21 }
 0xbdf   :  { %5061 = vperm.xlu1 %9926, %v4952_v47   ;;  %v4974_v47 = vadd.f32 %v12277_v52, %v11957_v21 }
 0xbe0   :  { %5052 = vperm.xlu0 %9925, %v4949_v13   ;;  %v4971_v13 = vadd.f32 %v12271_v63, %v11964_v50 }
 0xbe3   :  { %5067 = vperm.xlu1 %9926, %v4954_v6   ;;  %v4973_v6 = vadd.f32 %v12277_v52, %v11959_v48 }
 0xbe4   :  { %5058 = vperm.xlu0 %9925, %v4951_v9   ;;  %v4975_v9 = vadd.f32 %v12277_v52, %v11966_v57 }
 0xbe7   :  { %5073 = vperm.xlu1 %9926, %v4956_v17   ;;  %v4977_v17 = vadd.f32 %v12277_v52, %v11971_v61 }
 0xbe8   :  { %5064 = vperm.xlu0 %9925, %v4953_v30  }
 0xbeb   :  { %5079 = vperm.xlu1 %9926, %v4958_v8  }
 0xbec   :  { %5070 = vperm.xlu0 %9925, %v4955_v14  }
 0xbef   :  { %5085 = vperm.xlu1 %9926, %v4960_v45  }
 0xbf0   :  { %5076 = vperm.xlu0 %9925, %v4957_v19  }
 0xbf3   :  { %5091 = vperm.xlu1 %9926, %v4962_v27  }
 0xbf4   :  { %5082 = vperm.xlu0 %9925, %v4959_v38  }
 0xbf7   :  { %5097 = vperm.xlu1 %9926, %v4964_v15  }
 0xbf8   :  { %5088 = vperm.xlu0 %9925, %v4961_v24  }
 0xbfb   :  { %5103 = vperm.xlu1 %9926, %v4966_v40  }
 0xbfc   :  { %5094 = vperm.xlu0 %9925, %v4963_v49  }
 0xbff   :  { %5109 = vperm.xlu1 %9926, %v4968_v29  }
 0xc00   :  { %5100 = vperm.xlu0 %9925, %v4965_v7  }
 0xc02   :  { %v12333_v30 = vpop.permute.xlu1 %4872 }
 0xc03   :  { %5115 = vperm.xlu1 %9926, %v4970_v4  }
 0xc04   :  { %5106 = vperm.xlu0 %9925, %v4967_v44  }
 0xc07   :  { %5121 = vperm.xlu1 %9926, %v4972_v54  }
 0xc08   :  { %5112 = vperm.xlu0 %9925, %v4969_v31  }
 0xc0b   :  { %5127 = vperm.xlu1 %9926, %v4974_v47   ;;  %v12339_v14 = vpop.permute.xlu0 %4875 }
 0xc0c   :  { %5118 = vperm.xlu0 %9925, %v4971_v13  }
 0xc0f   :  { %5133 = vperm.xlu1 %9926, %v4976_v23  }
 0xc10   :  { %5124 = vperm.xlu0 %9925, %v4973_v6  }
 0xc14   :  { %5130 = vperm.xlu0 %9925, %v4975_v9  }
 0xc16   :  { %v12335_v63 = vpop.permute.xlu1 %4878 }
 0xc18   :  { %5136 = vperm.xlu0 %9925, %v4977_v17  }
 0xc1f   :  { %v12343_v19 = vpop.permute.xlu0 %4881 }
 0xc2a   :  { %v12337_v8 = vpop.permute.xlu1 %4884 }
 0xc33   :  { %v12345_v38 = vpop.permute.xlu0 %4887 }
 0xc3e   :  { %v12341_v45 = vpop.permute.xlu1 %4890 }
 0xc42   :  { %v5020_v27 = vpop.permute.xlu1 %5019 }
 0xc43   :  { %v5141_v49 = vrot.slane %v5020_v27, %v13994_v12 }
 0xc46   :  { %v5026_v15 = vpop.permute.xlu1 %5025 }
 0xc47   :  { %v12347_v24 = vpop.permute.xlu0 %4893  ;;  %v5149_v44 = vrot.slane %v5026_v15, %v13994_v12 }
 0xc4a   :  { %v5032_v52 = vpop.permute.xlu1 %5031 }
 0xc4b   :  { %v5023_v40 = vpop.permute.xlu0 %5022  ;;  %v5157_v47 = vrot.slane %v5032_v52, %v13994_v12 }
 0xc4c   :  { %v5145_v29 = vrot.slane %v5023_v40, %v13994_v12 }
 0xc4e   :  { %v5298_v7 = vsel %vm4301_vm11, %v5145_v29, %v5141_v49  ;;  %v5038_v4 = vpop.permute.xlu1 %5037 }
 0xc4f   :  { %v5029_v54 = vpop.permute.xlu0 %5028  ;;  %v5299_v13 = vsel %vm4303_vm12, %v5149_v44, %v5298_v7  ;;  %v5165_v15 = vrot.slane %v5038_v4, %v13994_v12 }
 0xc50   :  { %v5153_v31 = vrot.slane %v5029_v54, %v13994_v12 }
 0xc52   :  { %v5044_v23 = vpop.permute.xlu1 %5043  ;;  %v5300_v6 = vsel %vm4305_vm13, %v5153_v31, %v5299_v13 }
 0xc53   :  { %v5035_v9 = vpop.permute.xlu0 %5034  ;;  %v5301_v17 = vsel %vm4307_vm14, %v5157_v47, %v5300_v6  ;;  %v5173_v31 = vrot.slane %v5044_v23, %v13994_v12 }
 0xc54   :  { %v5338_v27 = vsel %vm4132_vm6, %v5301_v17, -inf  ;;  %v5161_v40 = vrot.slane %v5035_v9, %v13994_v12 }
 0xc55   :  { %5339 = vmax.xlane.f32.xlu1 %v5338_v27 }
 0xc56   :  { %v5050_v49 = vpop.permute.xlu1 %5049  ;;  %v5302_v52 = vsel %vm4301_vm11, %v5165_v15, %v5161_v40 }
 0xc57   :  { %v5041_v29 = vpop.permute.xlu0 %5040 }
 0xc58   :  { %v5169_v54 = vrot.slane %v5041_v29, %v13994_v12  ;;  %v5181_v29 = vrot.slane %v5050_v49, %v13994_v12 }
 0xc5a   :  { %v5303_v7 = vsel %vm4303_vm12, %v5169_v54, %v5302_v52  ;;  %v5056_v44 = vpop.permute.xlu1 %5055 }
 0xc5b   :  { %v5047_v13 = vpop.permute.xlu0 %5046  ;;  %v5304_v6 = vsel %vm4305_vm13, %v5173_v31, %v5303_v7  ;;  %v5189_v23 = vrot.slane %v5056_v44, %v13994_v12 }
 0xc5c   :  { %v5177_v47 = vrot.slane %v5047_v13, %v13994_v12 }
 0xc5e   :  { %v5062_v9 = vpop.permute.xlu1 %5061  ;;  %v5305_v17 = vsel %vm4307_vm14, %v5177_v47, %v5304_v6 }
 0xc5f   :  { %v5053_v27 = vpop.permute.xlu0 %5052  ;;  %v5341_v4 = vsel %vm4132_vm6, %v5305_v17, -inf  ;;  %v5197_v7 = vrot.slane %v5062_v9, %v13994_v12 }
 0xc60   :  { %v5185_v40 = vrot.slane %v5053_v27, %v13994_v12  ;;  %5342 = vmax.xlane.f32.xlu0 %v5341_v4 }
 0xc62   :  { %v5306_v15 = vsel %vm4301_vm11, %v5185_v40, %v5181_v29  ;;  %v5068_v54 = vpop.permute.xlu1 %5067 }
 0xc63   :  { %v5059_v52 = vpop.permute.xlu0 %5058  ;;  %v5307_v31 = vsel %vm4303_vm12, %v5189_v23, %v5306_v15  ;;  %v5205_v44 = vrot.slane %v5068_v54, %v13994_v12 }
 0xc64   :  { %v5193_v13 = vrot.slane %v5059_v52, %v13994_v12 }
 0xc66   :  { %v5074_v47 = vpop.permute.xlu1 %5073  ;;  %v5308_v6 = vsel %vm4305_vm13, %v5193_v13, %v5307_v31 }
 0xc67   :  { %v5065_v17 = vpop.permute.xlu0 %5064  ;;  %v5309_v49 = vsel %vm4307_vm14, %v5197_v7, %v5308_v6  ;;  %v5213_v13 = vrot.slane %v5074_v47, %v13994_v12 }
 0xc68   :  { %v5344_v27 = vsel %vm4132_vm6, %v5309_v49, -inf  ;;  %v5201_v4 = vrot.slane %v5065_v17, %v13994_v12 }
 0xc69   :  { %5345 = vmax.xlane.f32.xlu0 %v5344_v27 }
 0xc6a   :  { %v5080_v29 = vpop.permute.xlu1 %5079  ;;  %v5310_v9 = vsel %vm4301_vm11, %v5205_v44, %v5201_v4 }
 0xc6b   :  { %v5071_v40 = vpop.permute.xlu0 %5070 }
 0xc6c   :  { %v5209_v52 = vrot.slane %v5071_v40, %v13994_v12  ;;  %v5221_v40 = vrot.slane %v5080_v29, %v13994_v12 }
 0xc6e   :  { %v5311_v15 = vsel %vm4303_vm12, %v5209_v52, %v5310_v9  ;;  %v5086_v23 = vpop.permute.xlu1 %5085 }
 0xc6f   :  { %v5077_v31 = vpop.permute.xlu0 %5076  ;;  %v5312_v6 = vsel %vm4305_vm13, %v5213_v13, %v5311_v15  ;;  %v5229_v47 = vrot.slane %v5086_v23, %v13994_v12 }
 0xc70   :  { %v5217_v7 = vrot.slane %v5077_v31, %v13994_v12 }
 0xc72   :  { %v5092_v17 = vpop.permute.xlu1 %5091  ;;  %v5313_v49 = vsel %vm4307_vm14, %v5217_v7, %v5312_v6 }
 0xc73   :  { %v5083_v27 = vpop.permute.xlu0 %5082  ;;  %v5347_v54 = vsel %vm4132_vm6, %v5313_v49, -inf  ;;  %v5237_v15 = vrot.slane %v5092_v17, %v13994_v12 }
 0xc74   :  { %v5225_v4 = vrot.slane %v5083_v27, %v13994_v12  ;;  %5348 = vmax.xlane.f32.xlu1 %v5347_v54 }
 0xc76   :  { %v5314_v44 = vsel %vm4301_vm11, %v5225_v4, %v5221_v40  ;;  %v5098_v52 = vpop.permute.xlu1 %5097 }
 0xc77   :  { %v5089_v9 = vpop.permute.xlu0 %5088  ;;  %v5315_v13 = vsel %vm4303_vm12, %v5229_v47, %v5314_v44  ;;  %v5245_v23 = vrot.slane %v5098_v52, %v13994_v12 }
 0xc78   :  { %v5233_v31 = vrot.slane %v5089_v9, %v13994_v12 }
 0xc7a   :  { %v5104_v7 = vpop.permute.xlu1 %5103  ;;  %v5316_v6 = vsel %vm4305_vm13, %v5233_v31, %v5315_v13 }
 0xc7b   :  { %v5095_v49 = vpop.permute.xlu0 %5094  ;;  %v5317_v29 = vsel %vm4307_vm14, %v5237_v15, %v5316_v6  ;;  %v5253_v31 = vrot.slane %v5104_v7, %v13994_v12 }
 0xc7c   :  { %v5350_v27 = vsel %vm4132_vm6, %v5317_v29, -inf  ;;  %v5241_v54 = vrot.slane %v5095_v49, %v13994_v12 }
 0xc7d   :  { %5351 = vmax.xlane.f32.xlu0 %v5350_v27 }
 0xc7e   :  { %v5110_v40 = vpop.permute.xlu1 %5109  ;;  %v5318_v17 = vsel %vm4301_vm11, %v5245_v23, %v5241_v54 }
 0xc7f   :  { %v5101_v4 = vpop.permute.xlu0 %5100  ;;  %v5261_v27 = vrot.slane %v5110_v40, %v13994_v12 }
 0xc80   :  { %v5249_v9 = vrot.slane %v5101_v4, %v13994_v12 }
 0xc82   :  { %v5319_v44 = vsel %vm4303_vm12, %v5249_v9, %v5318_v17  ;;  %v5116_v47 = vpop.permute.xlu1 %5115 }
 0xc83   :  { %v5107_v13 = vpop.permute.xlu0 %5106  ;;  %v5320_v6 = vsel %vm4305_vm13, %v5253_v31, %v5319_v44  ;;  %v5269_v7 = vrot.slane %v5116_v47, %v13994_v12 }
 0xc84   :  { %v5257_v15 = vrot.slane %v5107_v13, %v13994_v12 }
 0xc86   :  { %v5321_v49 = vsel %vm4307_vm14, %v5257_v15, %v5320_v6  ;;  %v5122_v4 = vpop.permute.xlu1 %5121 }
 0xc87   :  { %v5113_v29 = vpop.permute.xlu0 %5112  ;;  %v5353_v52 = vsel %vm4132_vm6, %v5321_v49, -inf  ;;  %v5277_v44 = vrot.slane %v5122_v4, %v13994_v12 }
 0xc88   :  { %v5265_v54 = vrot.slane %v5113_v29, %v13994_v12  ;;  %5354 = vmax.xlane.f32.xlu1 %v5353_v52 }
 0xc8a   :  { %v5322_v23 = vsel %vm4301_vm11, %v5265_v54, %v5261_v27  ;;  %v5128_v13 = vpop.permute.xlu1 %5127 }
 0xc8b   :  { %v5119_v9 = vpop.permute.xlu0 %5118  ;;  %v5323_v31 = vsel %vm4303_vm12, %v5269_v7, %v5322_v23  ;;  %v5285_v47 = vrot.slane %v5128_v13, %v13994_v12 }
 0xc8c   :  { %v5273_v17 = vrot.slane %v5119_v9, %v13994_v12 }
 0xc8e   :  { %v5324_v15 = vsel %vm4305_vm13, %v5273_v17, %v5323_v31  ;;  %v5134_v27 = vpop.permute.xlu1 %5133 }
 0xc8f   :  { %v5125_v6 = vpop.permute.xlu0 %5124  ;;  %v5325_v40 = vsel %vm4307_vm14, %v5277_v44, %v5324_v15  ;;  %v5293_v7 = vrot.slane %v5134_v27, %v13994_v12 }
 0xc90   :  { %v5356_v49 = vsel %vm4132_vm6, %v5325_v40, -inf  ;;  %v5281_v29 = vrot.slane %v5125_v6, %v13994_v12 }
 0xc91   :  { %5357 = vmax.xlane.f32.xlu0 %v5356_v49 }
 0xc92   :  { %v5326_v4 = vsel %vm4301_vm11, %v5285_v47, %v5281_v29 }
 0xc93   :  { %v5131_v52 = vpop.permute.xlu0 %5130 }
 0xc94   :  { %v5289_v54 = vrot.slane %v5131_v52, %v13994_v12 }
 0xc96   :  { %v5327_v23 = vsel %vm4303_vm12, %v5289_v54, %v5326_v4 }
 0xc97   :  { %v5137_v9 = vpop.permute.xlu0 %5136  ;;  %v5328_v44 = vsel %vm4305_vm13, %v5293_v7, %v5327_v23 }
 0xc98   :  { %v5297_v17 = vrot.slane %v5137_v9, %v13994_v12 }
 0xc9a   :  { %v5329_v31 = vsel %vm4307_vm14, %v5297_v17, %v5328_v44 }
 0xc9b   :  { %v5359_v15 = vsel %vm4132_vm6, %v5329_v31, -inf }
 0xc9c   :  { %5360 = vmax.xlane.f32.xlu1 %v5359_v15 }
 0xce2   :  { %v5340_v13 = vpop.xlane.xlu1 %5339 }
 0xce3   :  { %v5427_v6 = vadd.f32 %v12065_v62, %v5340_v13 }
 0xce5   :  { %5450 = vperm.xlu0 %9925, %v5427_v6   ;;  %v5519_v44 = vadd.f32 %v5427_v6, %v11964_v50 }
 0xced   :  { %v5343_v40 = vpop.xlane.xlu0 %5342 }
 0xcee   :  { %v5428_v49 = vadd.f32 %v12049_v42, %v5343_v40 }
 0xcf0   :  { %5453 = vperm.xlu1 %9926, %v5428_v49   ;;  %v5522_v17 = vadd.f32 %v5428_v49, %v11957_v21  ;;  %v5524_v31 = vadd.f32 %v5428_v49, %v11964_v50  ;;  %v5523_v13 = vadd.f32 %v5428_v49, %v11966_v57 }
 0xcf6   :  { %v5346_v29 = vpop.xlane.xlu0 %5345 }
 0xcf7   :  { %v5429_v47 = vadd.f32 %v12053_v53, %v5346_v29  ;;  %v5516_v53 = vadd.f32 %v5427_v6, %v11959_v48  ;;  %v5525_v29 = vadd.f32 %v5428_v49, %v11971_v61 }
 0xcf9   :  { %5456 = vperm.xlu0 %9925, %v5429_v47   ;;  %v5526_v15 = vadd.f32 %v5429_v47, %v11959_v48  ;;  %v5528_v40 = vadd.f32 %v5429_v47, %v11966_v57 }
 0xd01   :  { %v5349_v52 = vpop.xlane.xlu1 %5348 }
 0xd02   :  { %v5430_v27 = vadd.f32 %v12077_v33, %v5349_v52  ;;  %v5518_v33 = vadd.f32 %v5427_v6, %v11966_v57  ;;  %v5527_v52 = vadd.f32 %v5429_v47, %v11957_v21 }
 0xd04   :  { %5459 = vperm.xlu1 %9926, %v5430_v27  }
 0xd0a   :  { %v5352_v54 = vpop.xlane.xlu0 %5351 }
 0xd0b   :  { %v5431_v4 = vadd.f32 %v12060_v0, %v5352_v54  ;;  %v5532_v54 = vadd.f32 %v5430_v27, %v11957_v21 }
 0xd0d   :  { %5462 = vperm.xlu0 %9925, %v5431_v4  }
 0xd15   :  { %v5355_v23 = vpop.xlane.xlu1 %5354 }
 0xd16   :  { %v12435_v62 = vadd.f32 %v12085_v51, %v5355_v23  ;;  %v5520_v51 = vadd.f32 %v5427_v6, %v11971_v61  ;;  %v5529_v23 = vadd.f32 %v5429_v47, %v11964_v50 }
 0xd18   :  { %5465 = vperm.xlu1 %9926, %v12435_v62  }
 0xd1e   :  { %v5358_v42 = vpop.xlane.xlu0 %5357 }
 0xd1f   :  { %v12439_v7 = vadd.f32 %v12071_v32, %v5358_v42  ;;  %v5517_v32 = vadd.f32 %v5427_v6, %v11957_v21  ;;  %v5530_v6 = vadd.f32 %v5429_v47, %v11971_v61  ;;  %v5534_v42 = vadd.f32 %v5430_v27, %v11964_v50 }
 0xd20   :  { %v5540_v47 = vadd.f32 %v5431_v4, %v11971_v61 }
 0xd21   :  { %5468 = vperm.xlu0 %9925, %v12439_v7  }
 0xd25   :  { %5597 = vperm.xlu0 %9925, %v5516_v53   ;;  %v5531_v53 = vadd.f32 %v5430_v27, %v11959_v48 }
 0xd29   :  { %v5361_v9 = vpop.xlane.xlu1 %5360  ;;  %5603 = vperm.xlu0 %9925, %v5518_v33   ;;  %v5533_v33 = vadd.f32 %v5430_v27, %v11966_v57 }
 0xd2a   :  { %v12445_v0 = vadd.f32 %v12097_v22, %v5361_v9  ;;  %v5521_v22 = vadd.f32 %v5428_v49, %v11959_v48  ;;  %v5536_v49 = vadd.f32 %v5431_v4, %v11959_v48  ;;  %v5538_v9 = vadd.f32 %v5431_v4, %v11966_v57 }
 0xd2c   :  { %5471 = vperm.xlu1 %9926, %v12445_v0  }
 0xd2d   :  { %5609 = vperm.xlu0 %9925, %v5520_v51   ;;  %v5535_v51 = vadd.f32 %v5430_v27, %v11971_v61  ;;  %v5541_v27 = vadd.f32 %v12435_v62, %v11959_v48 }
 0xd30   :  { %5600 = vperm.xlu1 %9926, %v5517_v32   ;;  %v5537_v32 = vadd.f32 %v5431_v4, %v11957_v21 }
 0xd31   :  { %5615 = vperm.xlu0 %9925, %v5522_v17   ;;  %v5542_v17 = vadd.f32 %v12435_v62, %v11957_v21 }
 0xd34   :  { %5606 = vperm.xlu1 %9926, %v5519_v44   ;;  %v5539_v44 = vadd.f32 %v5431_v4, %v11964_v50  ;;  %v5545_v4 = vadd.f32 %v12435_v62, %v11971_v61 }
 0xd35   :  { %5621 = vperm.xlu0 %9925, %v5524_v31   ;;  %v5544_v31 = vadd.f32 %v12435_v62, %v11964_v50 }
 0xd38   :  { %5612 = vperm.xlu1 %9926, %v5521_v22   ;;  %v5546_v22 = vadd.f32 %v12439_v7, %v11959_v48 }
 0xd39   :  { %5627 = vperm.xlu0 %9925, %v5526_v15   ;;  %v5543_v15 = vadd.f32 %v12435_v62, %v11966_v57  ;;  %v5551_v62 = vadd.f32 %v12445_v0, %v11959_v48 }
 0xd3c   :  { %5618 = vperm.xlu1 %9926, %v5523_v13   ;;  %v5548_v13 = vadd.f32 %v12439_v7, %v11966_v57 }
 0xd3d   :  { %5633 = vperm.xlu0 %9925, %v5528_v40   ;;  %v5550_v40 = vadd.f32 %v12439_v7, %v11971_v61 }
 0xd40   :  { %5624 = vperm.xlu1 %9926, %v5525_v29   ;;  %v5547_v29 = vadd.f32 %v12439_v7, %v11957_v21 }
 0xd41   :  { %5639 = vperm.xlu0 %9925, %v5530_v6   ;;  %v5552_v6 = vadd.f32 %v12445_v0, %v11957_v21 }
 0xd44   :  { %5630 = vperm.xlu1 %9926, %v5527_v52   ;;  %v5549_v52 = vadd.f32 %v12439_v7, %v11964_v50 }
 0xd45   :  { %5645 = vperm.xlu0 %9925, %v5532_v54   ;;  %v5554_v54 = vadd.f32 %v12445_v0, %v11964_v50 }
 0xd48   :  { %5636 = vperm.xlu1 %9926, %v5529_v23   ;;  %v5553_v23 = vadd.f32 %v12445_v0, %v11966_v57 }
 0xd49   :  { %5651 = vperm.xlu0 %9925, %v5534_v42   ;;  %v5555_v42 = vadd.f32 %v12445_v0, %v11971_v61 }
 0xd4c   :  { %5642 = vperm.xlu1 %9926, %v5531_v53  }
 0xd4d   :  { %5657 = vperm.xlu0 %9925, %v5536_v49  }
 0xd50   :  { %5648 = vperm.xlu1 %9926, %v5533_v33  }
 0xd51   :  { %5663 = vperm.xlu0 %9925, %v5538_v9  }
 0xd54   :  { %5654 = vperm.xlu1 %9926, %v5535_v51  }
 0xd55   :  { %5669 = vperm.xlu0 %9925, %v5540_v47  }
 0xd58   :  { %5660 = vperm.xlu1 %9926, %v5537_v32  }
 0xd59   :  { %5675 = vperm.xlu0 %9925, %v5542_v17  }
 0xd5c   :  { %5666 = vperm.xlu1 %9926, %v5539_v44  }
 0xd5d   :  { %5681 = vperm.xlu0 %9925, %v5544_v31  }
 0xd60   :  { %5672 = vperm.xlu1 %9926, %v5541_v27  }
 0xd61   :  { %5687 = vperm.xlu0 %9925, %v5546_v22  }
 0xd64   :  { %5678 = vperm.xlu1 %9926, %v5543_v15   ;;  %v12501_v53 = vpop.permute.xlu0 %5450 }
 0xd65   :  { %5693 = vperm.xlu0 %9925, %v5548_v13  }
 0xd68   :  { %5684 = vperm.xlu1 %9926, %v5545_v4  }
 0xd69   :  { %5699 = vperm.xlu0 %9925, %v5550_v40  }
 0xd6c   :  { %5690 = vperm.xlu1 %9926, %v5547_v29  }
 0xd6d   :  { %5705 = vperm.xlu0 %9925, %v5552_v6  }
 0xd6f   :  { %v12507_v33 = vpop.permute.xlu1 %5453 }
 0xd70   :  { %5696 = vperm.xlu1 %9926, %v5549_v52  }
 0xd71   :  { %5711 = vperm.xlu0 %9925, %v5554_v54  }
 0xd74   :  { %5702 = vperm.xlu1 %9926, %v5551_v62  }
 0xd78   :  { %5708 = vperm.xlu1 %9926, %v5553_v23   ;;  %v12503_v7 = vpop.permute.xlu0 %5456 }
 0xd7c   :  { %5714 = vperm.xlu1 %9926, %v5555_v42  }
 0xd83   :  { %v12511_v51 = vpop.permute.xlu1 %5459 }
 0xd8c   :  { %v12505_v49 = vpop.permute.xlu0 %5462 }
 0xd97   :  { %v12513_v32 = vpop.permute.xlu1 %5465 }
 0xda0   :  { %v12509_v9 = vpop.permute.xlu0 %5468 }
 0xda4   :  { %v5598_v47 = vpop.permute.xlu0 %5597 }
 0xda5   :  { %v5719_v27 = vrot.slane %v5598_v47, %v13994_v12 }
 0xda8   :  { %v5604_v17 = vpop.permute.xlu0 %5603 }
 0xda9   :  { %v5727_v4 = vrot.slane %v5604_v17, %v13994_v12 }
 0xdab   :  { %v12515_v44 = vpop.permute.xlu1 %5471 }
 0xdac   :  { %13995 = vst [vmem:[#allocation25_spill] sm:$0xff] %v12515_v44  ;;  %v5610_v0 = vpop.permute.xlu0 %5609 }
 0xdad   :  { %v5735_v52 = vrot.slane %v5610_v0, %v13994_v12 }
 0xdaf   :  { %v5601_v31 = vpop.permute.xlu1 %5600 }
 0xdb0   :  { %v5723_v22 = vrot.slane %v5601_v31, %v13994_v12  ;;  %v5616_v15 = vpop.permute.xlu0 %5615 }
 0xdb1   :  { %v5743_v17 = vrot.slane %v5616_v15, %v13994_v12 }
 0xdb2   :  { %v5876_v13 = vsel %vm4301_vm11, %v5723_v22, %v5719_v27 }
 0xdb3   :  { %v5607_v40 = vpop.permute.xlu1 %5606  ;;  %v5877_v54 = vsel %vm4303_vm12, %v5727_v4, %v5876_v13 }
 0xdb4   :  { %v5731_v29 = vrot.slane %v5607_v40, %v13994_v12  ;;  %v5622_v6 = vpop.permute.xlu0 %5621 }
 0xdb5   :  { %v5751_v4 = vrot.slane %v5622_v6, %v13994_v12 }
 0xdb6   :  { %v5878_v62 = vsel %vm4305_vm13, %v5731_v29, %v5877_v54 }
 0xdb7   :  { %v5613_v23 = vpop.permute.xlu1 %5612  ;;  %v5879_v42 = vsel %vm4307_vm14, %v5735_v52, %v5878_v62 }
 0xdb8   :  { %v5628_v47 = vpop.permute.xlu0 %5627  ;;  %v5916_v31 = vsel %vm4132_vm6, %v5879_v42, -inf  ;;  %v5739_v27 = vrot.slane %v5613_v23, %v13994_v12 }
 0xdb9   :  { %5917 = vmax.xlane.f32.xlu0 %v5916_v31  ;;  %v5759_v31 = vrot.slane %v5628_v47, %v13994_v12 }
 0xdba   :  { %v5880_v0 = vsel %vm4301_vm11, %v5743_v17, %v5739_v27 }
 0xdbb   :  { %v5619_v22 = vpop.permute.xlu1 %5618 }
 0xdbc   :  { %v5747_v40 = vrot.slane %v5619_v22, %v13994_v12  ;;  %v5634_v44 = vpop.permute.xlu0 %5633 }
 0xdbd   :  { %v5767_v6 = vrot.slane %v5634_v44, %v13994_v12 }
 0xdbe   :  { %v5881_v13 = vsel %vm4303_vm12, %v5747_v40, %v5880_v0 }
 0xdbf   :  { %v5625_v29 = vpop.permute.xlu1 %5624  ;;  %v5882_v62 = vsel %vm4305_vm13, %v5751_v4, %v5881_v13 }
 0xdc0   :  { %v5755_v52 = vrot.slane %v5625_v29, %v13994_v12  ;;  %v5640_v54 = vpop.permute.xlu0 %5639 }
 0xdc1   :  { %v5775_v13 = vrot.slane %v5640_v54, %v13994_v12 }
 0xdc2   :  { %v5883_v23 = vsel %vm4307_vm14, %v5755_v52, %v5882_v62 }
 0xdc3   :  { %v5631_v42 = vpop.permute.xlu1 %5630  ;;  %v5919_v15 = vsel %vm4132_vm6, %v5883_v23, -inf }
 0xdc4   :  { %v5763_v22 = vrot.slane %v5631_v42, %v13994_v12  ;;  %5920 = vmax.xlane.f32.xlu1 %v5919_v15  ;;  %v5646_v27 = vpop.permute.xlu0 %5645 }
 0xdc5   :  { %v5783_v44 = vrot.slane %v5646_v27, %v13994_v12 }
 0xdc6   :  { %v5884_v17 = vsel %vm4301_vm11, %v5763_v22, %v5759_v31 }
 0xdc7   :  { %v5637_v40 = vpop.permute.xlu1 %5636  ;;  %v5885_v4 = vsel %vm4303_vm12, %v5767_v6, %v5884_v17 }
 0xdc8   :  { %v5771_v0 = vrot.slane %v5637_v40, %v13994_v12  ;;  %v5652_v29 = vpop.permute.xlu0 %5651 }
 0xdc9   :  { %v5791_v6 = vrot.slane %v5652_v29, %v13994_v12 }
 0xdca   :  { %v5886_v52 = vsel %vm4305_vm13, %v5771_v0, %v5885_v4 }
 0xdcb   :  { %v5643_v62 = vpop.permute.xlu1 %5642  ;;  %v5887_v47 = vsel %vm4307_vm14, %v5775_v13, %v5886_v52 }
 0xdcc   :  { %v5658_v23 = vpop.permute.xlu0 %5657  ;;  %v5922_v42 = vsel %vm4132_vm6, %v5887_v47, -inf  ;;  %v5779_v15 = vrot.slane %v5643_v62, %v13994_v12 }
 0xdcd   :  { %5923 = vmax.xlane.f32.xlu0 %v5922_v42  ;;  %v5799_v42 = vrot.slane %v5658_v23, %v13994_v12 }
 0xdce   :  { %v5888_v54 = vsel %vm4301_vm11, %v5783_v44, %v5779_v15 }
 0xdcf   :  { %v5649_v31 = vpop.permute.xlu1 %5648 }
 0xdd0   :  { %v5787_v22 = vrot.slane %v5649_v31, %v13994_v12  ;;  %v5664_v40 = vpop.permute.xlu0 %5663 }
 0xdd1   :  { %v5807_v29 = vrot.slane %v5664_v40, %v13994_v12 }
 0xdd2   :  { %v5889_v17 = vsel %vm4303_vm12, %v5787_v22, %v5888_v54 }
 0xdd3   :  { %v5655_v0 = vpop.permute.xlu1 %5654  ;;  %v5890_v52 = vsel %vm4305_vm13, %v5791_v6, %v5889_v17 }
 0xdd4   :  { %v5795_v13 = vrot.slane %v5655_v0, %v13994_v12  ;;  %v5670_v4 = vpop.permute.xlu0 %5669 }
 0xdd5   :  { %v5815_v17 = vrot.slane %v5670_v4, %v13994_v12 }
 0xdd6   :  { %v5891_v62 = vsel %vm4307_vm14, %v5795_v13, %v5890_v52 }
 0xdd7   :  { %v5661_v47 = vpop.permute.xlu1 %5660  ;;  %v5925_v27 = vsel %vm4132_vm6, %v5891_v62, -inf }
 0xdd8   :  { %v5803_v31 = vrot.slane %v5661_v47, %v13994_v12  ;;  %5926 = vmax.xlane.f32.xlu0 %v5925_v27  ;;  %v5676_v15 = vpop.permute.xlu0 %5675 }
 0xdd9   :  { %v5823_v40 = vrot.slane %v5676_v15, %v13994_v12 }
 0xdda   :  { %v5892_v44 = vsel %vm4301_vm11, %v5803_v31, %v5799_v42 }
 0xddb   :  { %v5667_v22 = vpop.permute.xlu1 %5666  ;;  %v5893_v6 = vsel %vm4303_vm12, %v5807_v29, %v5892_v44 }
 0xddc   :  { %v5811_v54 = vrot.slane %v5667_v22, %v13994_v12  ;;  %v5682_v0 = vpop.permute.xlu0 %5681 }
 0xddd   :  { %v5831_v22 = vrot.slane %v5682_v0, %v13994_v12 }
 0xdde   :  { %v5894_v13 = vsel %vm4305_vm13, %v5811_v54, %v5893_v6 }
 0xddf   :  { %v5673_v52 = vpop.permute.xlu1 %5672  ;;  %v5895_v23 = vsel %vm4307_vm14, %v5815_v17, %v5894_v13 }
 0xde0   :  { %v5688_v62 = vpop.permute.xlu0 %5687  ;;  %v5928_v47 = vsel %vm4132_vm6, %v5895_v23, -inf  ;;  %v5819_v27 = vrot.slane %v5673_v52, %v13994_v12 }
 0xde1   :  { %5929 = vmax.xlane.f32.xlu1 %v5928_v47  ;;  %v5839_v23 = vrot.slane %v5688_v62, %v13994_v12 }
 0xde2   :  { %v5896_v4 = vsel %vm4301_vm11, %v5823_v40, %v5819_v27 }
 0xde3   :  { %v5679_v42 = vpop.permute.xlu1 %5678 }
 0xde4   :  { %v5827_v31 = vrot.slane %v5679_v42, %v13994_v12  ;;  %v5694_v29 = vpop.permute.xlu0 %5693 }
 0xde5   :  { %v5847_v0 = vrot.slane %v5694_v29, %v13994_v12 }
 0xde6   :  { %v5897_v44 = vsel %vm4303_vm12, %v5827_v31, %v5896_v4 }
 0xde7   :  { %v5685_v54 = vpop.permute.xlu1 %5684  ;;  %v5898_v6 = vsel %vm4305_vm13, %v5831_v22, %v5897_v44 }
 0xde8   :  { %v5835_v17 = vrot.slane %v5685_v54, %v13994_v12  ;;  %v5700_v47 = vpop.permute.xlu0 %5699 }
 0xde9   :  { %v5855_v4 = vrot.slane %v5700_v47, %v13994_v12 }
 0xdea   :  { %v5899_v13 = vsel %vm4307_vm14, %v5835_v17, %v5898_v6 }
 0xdeb   :  { %v5691_v52 = vpop.permute.xlu1 %5690  ;;  %v5931_v15 = vsel %vm4132_vm6, %v5899_v13, -inf }
 0xdec   :  { %v5843_v27 = vrot.slane %v5691_v52, %v13994_v12  ;;  %5932 = vmax.xlane.f32.xlu0 %v5931_v15  ;;  %v5706_v22 = vpop.permute.xlu0 %5705 }
 0xded   :  { %v5863_v29 = vrot.slane %v5706_v22, %v13994_v12 }
 0xdee   :  { %v5900_v40 = vsel %vm4301_vm11, %v5843_v27, %v5839_v23 }
 0xdef   :  { %v5697_v42 = vpop.permute.xlu1 %5696  ;;  %v5901_v44 = vsel %vm4303_vm12, %v5847_v0, %v5900_v40 }
 0xdf0   :  { %v5851_v31 = vrot.slane %v5697_v42, %v13994_v12  ;;  %v5712_v15 = vpop.permute.xlu0 %5711 }
 0xdf1   :  { %v5871_v40 = vrot.slane %v5712_v15, %v13994_v12 }
 0xdf2   :  { %v5902_v54 = vsel %vm4305_vm13, %v5851_v31, %v5901_v44 }
 0xdf3   :  { %v5703_v17 = vpop.permute.xlu1 %5702  ;;  %v5903_v62 = vsel %vm4307_vm14, %v5855_v4, %v5902_v54 }
 0xdf4   :  { %v5934_v6 = vsel %vm4132_vm6, %v5903_v62, -inf  ;;  %v5859_v13 = vrot.slane %v5703_v17, %v13994_v12 }
 0xdf5   :  { %5935 = vmax.xlane.f32.xlu1 %v5934_v6 }
 0xdf6   :  { %v5904_v47 = vsel %vm4301_vm11, %v5863_v29, %v5859_v13 }
 0xdf7   :  { %v5709_v52 = vpop.permute.xlu1 %5708 }
 0xdf8   :  { %v5867_v23 = vrot.slane %v5709_v52, %v13994_v12 }
 0xdfa   :  { %v5905_v27 = vsel %vm4303_vm12, %v5867_v23, %v5904_v47 }
 0xdfb   :  { %v5715_v0 = vpop.permute.xlu1 %5714  ;;  %v5906_v31 = vsel %vm4305_vm13, %v5871_v40, %v5905_v27 }
 0xdfc   :  { %v5875_v42 = vrot.slane %v5715_v0, %v13994_v12 }
 0xdfe   :  { %v5907_v4 = vsel %vm4307_vm14, %v5875_v42, %v5906_v31 }
 0xdff   :  { %v5937_v44 = vsel %vm4132_vm6, %v5907_v4, -inf }
 0xe00   :  { %5938 = vmax.xlane.f32.xlu0 %v5937_v44 }
 0xe46   :  { %v5918_v22 = vpop.xlane.xlu0 %5917 }
 0xe47   :  { %v6005_v54 = vadd.f32 %v12025_v46, %v5918_v22 }
 0xe49   :  { %6028 = vperm.xlu1 %9926, %v6005_v54   ;;  %v6097_v42 = vadd.f32 %v6005_v54, %v11964_v50 }
 0xe51   :  { %v5921_v17 = vpop.xlane.xlu1 %5920 }
 0xe52   :  { %v6006_v62 = vadd.f32 %v12041_v60, %v5921_v17 }
 0xe54   :  { %6031 = vperm.xlu0 %9925, %v6006_v62   ;;  %v6100_v0 = vadd.f32 %v6006_v62, %v11957_v21  ;;  %v6102_v31 = vadd.f32 %v6006_v62, %v11964_v50  ;;  %v6101_v44 = vadd.f32 %v6006_v62, %v11966_v57  ;;  %v6103_v17 = vadd.f32 %v6006_v62, %v11971_v61 }
 0xe5a   :  { %v5924_v6 = vpop.xlane.xlu0 %5923 }
 0xe5b   :  { %v6007_v13 = vadd.f32 %v12029_v28, %v5924_v6  ;;  %v6094_v28 = vadd.f32 %v6005_v54, %v11959_v48 }
 0xe5d   :  { %6034 = vperm.xlu1 %9926, %v6007_v13   ;;  %v6104_v4 = vadd.f32 %v6007_v13, %v11959_v48  ;;  %v6106_v22 = vadd.f32 %v6007_v13, %v11966_v57  ;;  %v6105_v6 = vadd.f32 %v6007_v13, %v11957_v21 }
 0xe65   :  { %v5927_v29 = vpop.xlane.xlu0 %5926 }
 0xe66   :  { %v6008_v52 = vadd.f32 %v12033_v59, %v5927_v29  ;;  %v6096_v59 = vadd.f32 %v6005_v54, %v11966_v57 }
 0xe68   :  { %6037 = vperm.xlu0 %9925, %v6008_v52   ;;  %v6110_v29 = vadd.f32 %v6008_v52, %v11957_v21 }
 0xe6e   :  { %v5930_v15 = vpop.xlane.xlu1 %5929 }
 0xe6f   :  { %v6009_v23 = vadd.f32 %v12047_v58, %v5930_v15  ;;  %v6107_v15 = vadd.f32 %v6007_v13, %v11964_v50 }
 0xe71   :  { %6040 = vperm.xlu1 %9926, %v6009_v23  }
 0xe79   :  { %v5933_v47 = vpop.xlane.xlu0 %5932 }
 0xe7a   :  { %v12603_v46 = vadd.f32 %v12037_v1, %v5933_v47  ;;  %v6098_v1 = vadd.f32 %v6005_v54, %v11971_v61  ;;  %v6112_v47 = vadd.f32 %v6008_v52, %v11964_v50 }
 0xe7c   :  { %6043 = vperm.xlu0 %9925, %v12603_v46  }
 0xe82   :  { %v5936_v60 = vpop.xlane.xlu1 %5935 }
 0xe83   :  { %v12607_v27 = vadd.f32 %v12058_v18, %v5936_v60  ;;  %v6095_v18 = vadd.f32 %v6005_v54, %v11957_v21  ;;  %v6108_v54 = vadd.f32 %v6007_v13, %v11971_v61  ;;  %v6109_v60 = vadd.f32 %v6008_v52, %v11959_v48 }
 0xe84   :  { %v6118_v13 = vadd.f32 %v6009_v23, %v11971_v61 }
 0xe85   :  { %6046 = vperm.xlu1 %9926, %v12607_v27  }
 0xe89   :  { %6175 = vperm.xlu1 %9926, %v6094_v28   ;;  %v6111_v28 = vadd.f32 %v6008_v52, %v11966_v57 }
 0xe8d   :  { %6181 = vperm.xlu1 %9926, %v6096_v59   ;;  %v5939_v58 = vpop.xlane.xlu0 %5938  ;;  %v6116_v59 = vadd.f32 %v6009_v23, %v11966_v57 }
 0xe8e   :  { %v12613_v40 = vadd.f32 %v12043_v26, %v5939_v58  ;;  %v6099_v26 = vadd.f32 %v6006_v62, %v11959_v48  ;;  %v6114_v62 = vadd.f32 %v6009_v23, %v11959_v48  ;;  %v6113_v58 = vadd.f32 %v6008_v52, %v11971_v61 }
 0xe8f   :  { %v6119_v52 = vadd.f32 %v12603_v46, %v11959_v48 }
 0xe90   :  { %6049 = vperm.xlu0 %9925, %v12613_v40  }
 0xe91   :  { %6187 = vperm.xlu1 %9926, %v6098_v1   ;;  %v6115_v1 = vadd.f32 %v6009_v23, %v11957_v21 }
 0xe94   :  { %6178 = vperm.xlu0 %9925, %v6095_v18   ;;  %v6120_v18 = vadd.f32 %v12603_v46, %v11957_v21 }
 0xe95   :  { %6193 = vperm.xlu1 %9926, %v6100_v0   ;;  %v6117_v0 = vadd.f32 %v6009_v23, %v11964_v50  ;;  %v6123_v23 = vadd.f32 %v12603_v46, %v11971_v61 }
 0xe98   :  { %6184 = vperm.xlu0 %9925, %v6097_v42   ;;  %v6122_v42 = vadd.f32 %v12603_v46, %v11964_v50 }
 0xe99   :  { %6199 = vperm.xlu1 %9926, %v6102_v31   ;;  %v6124_v31 = vadd.f32 %v12607_v27, %v11959_v48 }
 0xe9c   :  { %6190 = vperm.xlu0 %9925, %v6099_v26   ;;  %v6121_v26 = vadd.f32 %v12603_v46, %v11966_v57  ;;  %v6129_v46 = vadd.f32 %v12613_v40, %v11959_v48 }
 0xe9d   :  { %6205 = vperm.xlu1 %9926, %v6104_v4   ;;  %v6126_v4 = vadd.f32 %v12607_v27, %v11966_v57 }
 0xea0   :  { %6196 = vperm.xlu0 %9925, %v6101_v44   ;;  %v6128_v44 = vadd.f32 %v12607_v27, %v11971_v61 }
 0xea1   :  { %6211 = vperm.xlu1 %9926, %v6106_v22   ;;  %v6125_v22 = vadd.f32 %v12607_v27, %v11957_v21 }
 0xea4   :  { %6202 = vperm.xlu0 %9925, %v6103_v17   ;;  %v6130_v17 = vadd.f32 %v12613_v40, %v11957_v21 }
 0xea5   :  { %6217 = vperm.xlu1 %9926, %v6108_v54   ;;  %v6127_v54 = vadd.f32 %v12607_v27, %v11964_v50 }
 0xea8   :  { %6208 = vperm.xlu0 %9925, %v6105_v6   ;;  %v6132_v6 = vadd.f32 %v12613_v40, %v11964_v50 }
 0xea9   :  { %6223 = vperm.xlu1 %9926, %v6110_v29   ;;  %v6131_v29 = vadd.f32 %v12613_v40, %v11966_v57 }
 0xeac   :  { %6214 = vperm.xlu0 %9925, %v6107_v15   ;;  %v6133_v15 = vadd.f32 %v12613_v40, %v11971_v61 }
 0xead   :  { %6229 = vperm.xlu1 %9926, %v6112_v47  }
 0xeb0   :  { %6220 = vperm.xlu0 %9925, %v6109_v60  }
 0xeb1   :  { %6235 = vperm.xlu1 %9926, %v6114_v62  }
 0xeb4   :  { %6226 = vperm.xlu0 %9925, %v6111_v28  }
 0xeb5   :  { %6241 = vperm.xlu1 %9926, %v6116_v59  }
 0xeb8   :  { %6232 = vperm.xlu0 %9925, %v6113_v58  }
 0xeb9   :  { %6247 = vperm.xlu1 %9926, %v6118_v13  }
 0xebc   :  { %6238 = vperm.xlu0 %9925, %v6115_v1  }
 0xebd   :  { %6253 = vperm.xlu1 %9926, %v6120_v18  }
 0xec0   :  { %6244 = vperm.xlu0 %9925, %v6117_v0  }
 0xec1   :  { %6259 = vperm.xlu1 %9926, %v6122_v42  }
 0xec4   :  { %6250 = vperm.xlu0 %9925, %v6119_v52  }
 0xec5   :  { %6265 = vperm.xlu1 %9926, %v6124_v31  }
 0xec8   :  { %6256 = vperm.xlu0 %9925, %v6121_v26   ;;  %v12669_v47 = vpop.permute.xlu1 %6028 }
 0xec9   :  { %6271 = vperm.xlu1 %9926, %v6126_v4  }
 0xecc   :  { %6262 = vperm.xlu0 %9925, %v6123_v23  }
 0xecd   :  { %6277 = vperm.xlu1 %9926, %v6128_v44  }
 0xed0   :  { %6268 = vperm.xlu0 %9925, %v6125_v22  }
 0xed1   :  { %6283 = vperm.xlu1 %9926, %v6130_v17  }
 0xed3   :  { %v12675_v62 = vpop.permute.xlu0 %6031 }
 0xed4   :  { %6274 = vperm.xlu0 %9925, %v6127_v54  }
 0xed5   :  { %6289 = vperm.xlu1 %9926, %v6132_v6  }
 0xed8   :  { %6280 = vperm.xlu0 %9925, %v6129_v46  }
 0xedc   :  { %6286 = vperm.xlu0 %9925, %v6131_v29   ;;  %v12671_v27 = vpop.permute.xlu1 %6034 }
 0xee0   :  { %6292 = vperm.xlu0 %9925, %v6133_v15  }
 0xee7   :  { %v12679_v59 = vpop.permute.xlu0 %6037 }
 0xef0   :  { %v12673_v60 = vpop.permute.xlu1 %6040 }
 0xefb   :  { %v12681_v13 = vpop.permute.xlu0 %6043 }
 0xf04   :  { %v12677_v28 = vpop.permute.xlu1 %6046 }
 0xf08   :  { %v6176_v58 = vpop.permute.xlu1 %6175 }
 0xf09   :  { %v6297_v42 = vrot.slane %v6176_v58, %v13994_v12 }
 0xf0c   :  { %v6182_v1 = vpop.permute.xlu1 %6181 }
 0xf0d   :  { %v6305_v4 = vrot.slane %v6182_v1, %v13994_v12 }
 0xf0f   :  { %v12683_v18 = vpop.permute.xlu0 %6049 }
 0xf10   :  { %v6188_v40 = vpop.permute.xlu1 %6187 }
 0xf11   :  { %v6313_v17 = vrot.slane %v6188_v40, %v13994_v12 }
 0xf13   :  { %v6179_v0 = vpop.permute.xlu0 %6178 }
 0xf14   :  { %v6301_v52 = vrot.slane %v6179_v0, %v13994_v12  ;;  %v6194_v31 = vpop.permute.xlu1 %6193 }
 0xf15   :  { %v6321_v1 = vrot.slane %v6194_v31, %v13994_v12 }
 0xf16   :  { %v6454_v26 = vsel %vm4301_vm11, %v6301_v52, %v6297_v42 }
 0xf17   :  { %v6185_v23 = vpop.permute.xlu0 %6184  ;;  %v6455_v54 = vsel %vm4303_vm12, %v6305_v4, %v6454_v26 }
 0xf18   :  { %v6309_v44 = vrot.slane %v6185_v23, %v13994_v12  ;;  %v6200_v22 = vpop.permute.xlu1 %6199 }
 0xf19   :  { %v6329_v4 = vrot.slane %v6200_v22, %v13994_v12 }
 0xf1a   :  { %v6456_v6 = vsel %vm4305_vm13, %v6309_v44, %v6455_v54 }
 0xf1b   :  { %v6191_v46 = vpop.permute.xlu0 %6190  ;;  %v6457_v29 = vsel %vm4307_vm14, %v6313_v17, %v6456_v6 }
 0xf1c   :  { %v6206_v15 = vpop.permute.xlu1 %6205  ;;  %v6494_v58 = vsel %vm4132_vm6, %v6457_v29, -inf  ;;  %v6317_v0 = vrot.slane %v6191_v46, %v13994_v12 }
 0xf1d   :  { %6495 = vmax.xlane.f32.xlu1 %v6494_v58  ;;  %v6337_v58 = vrot.slane %v6206_v15, %v13994_v12 }
 0xf1e   :  { %v6458_v40 = vsel %vm4301_vm11, %v6321_v1, %v6317_v0 }
 0xf1f   :  { %v6197_v42 = vpop.permute.xlu0 %6196 }
 0xf20   :  { %v6325_v52 = vrot.slane %v6197_v42, %v13994_v12  ;;  %v6212_v23 = vpop.permute.xlu1 %6211 }
 0xf21   :  { %v6345_v22 = vrot.slane %v6212_v23, %v13994_v12 }
 0xf22   :  { %v6459_v26 = vsel %vm4303_vm12, %v6325_v52, %v6458_v40 }
 0xf23   :  { %v6203_v44 = vpop.permute.xlu0 %6202  ;;  %v6460_v6 = vsel %vm4305_vm13, %v6329_v4, %v6459_v26 }
 0xf24   :  { %v6333_v17 = vrot.slane %v6203_v44, %v13994_v12  ;;  %v6218_v54 = vpop.permute.xlu1 %6217 }
 0xf25   :  { %v6353_v26 = vrot.slane %v6218_v54, %v13994_v12 }
 0xf26   :  { %v6461_v46 = vsel %vm4307_vm14, %v6333_v17, %v6460_v6 }
 0xf27   :  { %v6209_v29 = vpop.permute.xlu0 %6208  ;;  %v6497_v31 = vsel %vm4132_vm6, %v6461_v46, -inf }
 0xf28   :  { %v6341_v42 = vrot.slane %v6209_v29, %v13994_v12  ;;  %v6224_v0 = vpop.permute.xlu1 %6223  ;;  %6498 = vmax.xlane.f32.xlu0 %v6497_v31 }
 0xf29   :  { %v6361_v23 = vrot.slane %v6224_v0, %v13994_v12 }
 0xf2a   :  { %v6462_v1 = vsel %vm4301_vm11, %v6341_v42, %v6337_v58 }
 0xf2b   :  { %v6215_v52 = vpop.permute.xlu0 %6214  ;;  %v6463_v4 = vsel %vm4303_vm12, %v6345_v22, %v6462_v1 }
 0xf2c   :  { %v6349_v40 = vrot.slane %v6215_v52, %v13994_v12  ;;  %v6230_v44 = vpop.permute.xlu1 %6229 }
 0xf2d   :  { %v6369_v22 = vrot.slane %v6230_v44, %v13994_v12 }
 0xf2e   :  { %v6464_v17 = vsel %vm4305_vm13, %v6349_v40, %v6463_v4 }
 0xf2f   :  { %v6221_v6 = vpop.permute.xlu0 %6220  ;;  %v6465_v15 = vsel %vm4307_vm14, %v6353_v26, %v6464_v17 }
 0xf30   :  { %v6236_v46 = vpop.permute.xlu1 %6235  ;;  %v6500_v29 = vsel %vm4132_vm6, %v6465_v15, -inf  ;;  %v6357_v31 = vrot.slane %v6221_v6, %v13994_v12 }
 0xf31   :  { %6501 = vmax.xlane.f32.xlu0 %v6500_v29  ;;  %v6377_v29 = vrot.slane %v6236_v46, %v13994_v12 }
 0xf32   :  { %v6466_v54 = vsel %vm4301_vm11, %v6361_v23, %v6357_v31 }
 0xf33   :  { %v6227_v58 = vpop.permute.xlu0 %6226 }
 0xf34   :  { %v6365_v42 = vrot.slane %v6227_v58, %v13994_v12  ;;  %v6242_v52 = vpop.permute.xlu1 %6241 }
 0xf35   :  { %v6385_v44 = vrot.slane %v6242_v52, %v13994_v12 }
 0xf36   :  { %v6467_v1 = vsel %vm4303_vm12, %v6365_v42, %v6466_v54 }
 0xf37   :  { %v6233_v40 = vpop.permute.xlu0 %6232  ;;  %v6468_v17 = vsel %vm4305_vm13, %v6369_v22, %v6467_v1 }
 0xf38   :  { %v6373_v26 = vrot.slane %v6233_v40, %v13994_v12  ;;  %v6248_v4 = vpop.permute.xlu1 %6247 }
 0xf39   :  { %v6393_v1 = vrot.slane %v6248_v4, %v13994_v12 }
 0xf3a   :  { %v6469_v6 = vsel %vm4307_vm14, %v6373_v26, %v6468_v17 }
 0xf3b   :  { %v6239_v15 = vpop.permute.xlu0 %6238  ;;  %v6503_v0 = vsel %vm4132_vm6, %v6469_v6, -inf }
 0xf3c   :  { %v6381_v58 = vrot.slane %v6239_v15, %v13994_v12  ;;  %v6254_v31 = vpop.permute.xlu1 %6253  ;;  %6504 = vmax.xlane.f32.xlu1 %v6503_v0 }
 0xf3d   :  { %v6401_v52 = vrot.slane %v6254_v31, %v13994_v12 }
 0xf3e   :  { %v6470_v23 = vsel %vm4301_vm11, %v6381_v58, %v6377_v29 }
 0xf3f   :  { %v6245_v42 = vpop.permute.xlu0 %6244  ;;  %v6471_v22 = vsel %vm4303_vm12, %v6385_v44, %v6470_v23 }
 0xf40   :  { %v6389_v54 = vrot.slane %v6245_v42, %v13994_v12  ;;  %v6260_v40 = vpop.permute.xlu1 %6259 }
 0xf41   :  { %v6409_v42 = vrot.slane %v6260_v40, %v13994_v12 }
 0xf42   :  { %v6472_v26 = vsel %vm4305_vm13, %v6389_v54, %v6471_v22 }
 0xf43   :  { %v6251_v17 = vpop.permute.xlu0 %6250  ;;  %v6473_v46 = vsel %vm4307_vm14, %v6393_v1, %v6472_v26 }
 0xf44   :  { %v6266_v6 = vpop.permute.xlu1 %6265  ;;  %v6506_v15 = vsel %vm4132_vm6, %v6473_v46, -inf  ;;  %v6397_v0 = vrot.slane %v6251_v17, %v13994_v12 }
 0xf45   :  { %6507 = vmax.xlane.f32.xlu0 %v6506_v15  ;;  %v6417_v46 = vrot.slane %v6266_v6, %v13994_v12 }
 0xf46   :  { %v6474_v4 = vsel %vm4301_vm11, %v6401_v52, %v6397_v0 }
 0xf47   :  { %v6257_v29 = vpop.permute.xlu0 %6256 }
 0xf48   :  { %v6405_v58 = vrot.slane %v6257_v29, %v13994_v12  ;;  %v6272_v44 = vpop.permute.xlu1 %6271 }
 0xf49   :  { %v6425_v40 = vrot.slane %v6272_v44, %v13994_v12 }
 0xf4a   :  { %v6475_v23 = vsel %vm4303_vm12, %v6405_v58, %v6474_v4 }
 0xf4b   :  { %v6263_v54 = vpop.permute.xlu0 %6262  ;;  %v6476_v22 = vsel %vm4305_vm13, %v6409_v42, %v6475_v23 }
 0xf4c   :  { %v6413_v1 = vrot.slane %v6263_v54, %v13994_v12  ;;  %v6278_v15 = vpop.permute.xlu1 %6277 }
 0xf4d   :  { %v6433_v4 = vrot.slane %v6278_v15, %v13994_v12 }
 0xf4e   :  { %v6477_v26 = vsel %vm4307_vm14, %v6413_v1, %v6476_v22 }
 0xf4f   :  { %v6269_v17 = vpop.permute.xlu0 %6268  ;;  %v6509_v31 = vsel %vm4132_vm6, %v6477_v26, -inf }
 0xf50   :  { %v6421_v0 = vrot.slane %v6269_v17, %v13994_v12  ;;  %6510 = vmax.xlane.f32.xlu1 %v6509_v31  ;;  %v6284_v42 = vpop.permute.xlu1 %6283 }
 0xf51   :  { %v6441_v44 = vrot.slane %v6284_v42, %v13994_v12 }
 0xf52   :  { %v6478_v52 = vsel %vm4301_vm11, %v6421_v0, %v6417_v46 }
 0xf53   :  { %v6275_v29 = vpop.permute.xlu0 %6274  ;;  %v6479_v23 = vsel %vm4303_vm12, %v6425_v40, %v6478_v52 }
 0xf54   :  { %v6429_v58 = vrot.slane %v6275_v29, %v13994_v12  ;;  %v6290_v31 = vpop.permute.xlu1 %6289 }
 0xf55   :  { %v6449_v52 = vrot.slane %v6290_v31, %v13994_v12 }
 0xf56   :  { %v6480_v54 = vsel %vm4305_vm13, %v6429_v58, %v6479_v23 }
 0xf57   :  { %v6281_v1 = vpop.permute.xlu0 %6280  ;;  %v6481_v6 = vsel %vm4307_vm14, %v6433_v4, %v6480_v54 }
 0xf58   :  { %v6512_v22 = vsel %vm4132_vm6, %v6481_v6, -inf  ;;  %v6437_v26 = vrot.slane %v6281_v1, %v13994_v12 }
 0xf59   :  { %6513 = vmax.xlane.f32.xlu0 %v6512_v22 }
 0xf5a   :  { %v6482_v15 = vsel %vm4301_vm11, %v6441_v44, %v6437_v26 }
 0xf5b   :  { %v6287_v17 = vpop.permute.xlu0 %6286 }
 0xf5c   :  { %v6445_v46 = vrot.slane %v6287_v17, %v13994_v12 }
 0xf5e   :  { %v6483_v0 = vsel %vm4303_vm12, %v6445_v46, %v6482_v15 }
 0xf5f   :  { %v6293_v40 = vpop.permute.xlu0 %6292  ;;  %v6484_v58 = vsel %vm4305_vm13, %v6449_v52, %v6483_v0 }
 0xf60   :  { %v6453_v29 = vrot.slane %v6293_v40, %v13994_v12 }
 0xf62   :  { %v6485_v4 = vsel %vm4307_vm14, %v6453_v29, %v6484_v58 }
 0xf63   :  { %v6515_v23 = vsel %vm4132_vm6, %v6485_v4, -inf }
 0xf64   :  { %6516 = vmax.xlane.f32.xlu1 %v6515_v23 }
 0xfaa   :  { %v6496_v42 = vpop.xlane.xlu1 %6495 }
 0xfab   :  { %v6583_v54 = vadd.f32 %v12137_v55, %v6496_v42 }
 0xfad   :  { %6606 = vperm.xlu0 %9925, %v6583_v54   ;;  %v6675_v29 = vadd.f32 %v6583_v54, %v11964_v50 }
 0xfb5   :  { %v6499_v1 = vpop.xlane.xlu0 %6498 }
 0xfb6   :  { %v6584_v6 = vadd.f32 %v12131_v3, %v6499_v1 }
 0xfb8   :  { %6609 = vperm.xlu1 %9926, %v6584_v6   ;;  %v6678_v40 = vadd.f32 %v6584_v6, %v11957_v21  ;;  %v6680_v58 = vadd.f32 %v6584_v6, %v11964_v50  ;;  %v6679_v23 = vadd.f32 %v6584_v6, %v11966_v57  ;;  %v6681_v1 = vadd.f32 %v6584_v6, %v11971_v61 }
 0xfbe   :  { %v6502_v22 = vpop.xlane.xlu0 %6501 }
 0xfbf   :  { %v6585_v26 = vadd.f32 %v12139_v43, %v6502_v22  ;;  %v6672_v43 = vadd.f32 %v6583_v54, %v11959_v48 }
 0xfc1   :  { %6612 = vperm.xlu0 %9925, %v6585_v26   ;;  %v6682_v4 = vadd.f32 %v6585_v26, %v11959_v48  ;;  %v6684_v42 = vadd.f32 %v6585_v26, %v11966_v57  ;;  %v6683_v22 = vadd.f32 %v6585_v26, %v11957_v21 }
 0xfc9   :  { %v6505_v44 = vpop.xlane.xlu1 %6504 }
 0xfca   :  { %v6586_v17 = vadd.f32 %v12143_v37, %v6505_v44  ;;  %v6674_v37 = vadd.f32 %v6583_v54, %v11966_v57 }
 0xfcc   :  { %6615 = vperm.xlu1 %9926, %v6586_v17   ;;  %v6688_v44 = vadd.f32 %v6586_v17, %v11957_v21 }
 0xfd2   :  { %v6508_v31 = vpop.xlane.xlu0 %6507 }
 0xfd3   :  { %v6587_v46 = vadd.f32 %v12145_v25, %v6508_v31  ;;  %v6685_v31 = vadd.f32 %v6585_v26, %v11964_v50 }
 0xfd5   :  { %6618 = vperm.xlu0 %9925, %v6587_v46  }
 0xfdd   :  { %v6511_v15 = vpop.xlane.xlu1 %6510 }
 0xfde   :  { %v12771_v55 = vadd.f32 %v12147_v35, %v6511_v15  ;;  %v6676_v35 = vadd.f32 %v6583_v54, %v11971_v61  ;;  %v6690_v15 = vadd.f32 %v6586_v17, %v11964_v50 }
 0xfe0   :  { %6621 = vperm.xlu1 %9926, %v12771_v55  }
 0xfe6   :  { %v6514_v3 = vpop.xlane.xlu0 %6513 }
 0xfe7   :  { %v12775_v0 = vadd.f32 %v12149_v5, %v6514_v3  ;;  %v6673_v5 = vadd.f32 %v6583_v54, %v11957_v21  ;;  %v6686_v54 = vadd.f32 %v6585_v26, %v11971_v61  ;;  %v6687_v3 = vadd.f32 %v6586_v17, %v11959_v48 }
 0xfe8   :  { %v6696_v26 = vadd.f32 %v6587_v46, %v11971_v61 }
 0xfe9   :  { %6624 = vperm.xlu0 %9925, %v12775_v0  }
 0xfed   :  { %6753 = vperm.xlu0 %9925, %v6672_v43   ;;  %v6689_v43 = vadd.f32 %v6586_v17, %v11966_v57 }
 0xff1   :  { %v6517_v52 = vpop.xlane.xlu1 %6516  ;;  %6759 = vperm.xlu0 %9925, %v6674_v37   ;;  %v6694_v37 = vadd.f32 %v6587_v46, %v11966_v57 }
 0xff2   :  { %v12781_v25 = vadd.f32 %v12151_v10, %v6517_v52  ;;  %v6677_v10 = vadd.f32 %v6584_v6, %v11959_v48  ;;  %v6692_v6 = vadd.f32 %v6587_v46, %v11959_v48  ;;  %v6691_v52 = vadd.f32 %v6586_v17, %v11971_v61 }
 0xff3   :  { %v6697_v17 = vadd.f32 %v12771_v55, %v11959_v48 }
 0xff4   :  { %6627 = vperm.xlu1 %9926, %v12781_v25  }
 0xff5   :  { %6765 = vperm.xlu0 %9925, %v6676_v35   ;;  %v6693_v35 = vadd.f32 %v6587_v46, %v11957_v21 }
 0xff8   :  { %6756 = vperm.xlu1 %9926, %v6673_v5   ;;  %v6698_v5 = vadd.f32 %v12771_v55, %v11957_v21 }
 0xff9   :  { %6771 = vperm.xlu0 %9925, %v6678_v40   ;;  %v6695_v40 = vadd.f32 %v6587_v46, %v11964_v50  ;;  %v6701_v46 = vadd.f32 %v12771_v55, %v11971_v61 }
 0xffc   :  { %6762 = vperm.xlu1 %9926, %v6675_v29   ;;  %v6700_v29 = vadd.f32 %v12771_v55, %v11964_v50 }
 0xffd   :  { %6777 = vperm.xlu0 %9925, %v6680_v58   ;;  %v6702_v58 = vadd.f32 %v12775_v0, %v11959_v48 }
0x1000   :  { %6768 = vperm.xlu1 %9926, %v6677_v10   ;;  %v6699_v10 = vadd.f32 %v12771_v55, %v11966_v57  ;;  %v6707_v55 = vadd.f32 %v12781_v25, %v11959_v48 }
0x1001   :  { %6783 = vperm.xlu0 %9925, %v6682_v4   ;;  %v6704_v4 = vadd.f32 %v12775_v0, %v11966_v57 }
0x1004   :  { %6774 = vperm.xlu1 %9926, %v6679_v23   ;;  %v6706_v23 = vadd.f32 %v12775_v0, %v11971_v61 }
0x1005   :  { %6789 = vperm.xlu0 %9925, %v6684_v42   ;;  %v6703_v42 = vadd.f32 %v12775_v0, %v11957_v21 }
0x1008   :  { %6780 = vperm.xlu1 %9926, %v6681_v1   ;;  %v6708_v1 = vadd.f32 %v12781_v25, %v11957_v21 }
0x1009   :  { %6795 = vperm.xlu0 %9925, %v6686_v54   ;;  %v6705_v54 = vadd.f32 %v12775_v0, %v11964_v50 }
0x100c   :  { %6786 = vperm.xlu1 %9926, %v6683_v22   ;;  %v6710_v22 = vadd.f32 %v12781_v25, %v11964_v50 }
0x100d   :  { %6801 = vperm.xlu0 %9925, %v6688_v44   ;;  %v6709_v44 = vadd.f32 %v12781_v25, %v11966_v57 }
0x1010   :  { %6792 = vperm.xlu1 %9926, %v6685_v31   ;;  %v6711_v31 = vadd.f32 %v12781_v25, %v11971_v61 }
0x1011   :  { %6807 = vperm.xlu0 %9925, %v6690_v15  }
0x1014   :  { %6798 = vperm.xlu1 %9926, %v6687_v3  }
0x1015   :  { %6813 = vperm.xlu0 %9925, %v6692_v6  }
0x1018   :  { %6804 = vperm.xlu1 %9926, %v6689_v43  }
0x1019   :  { %6819 = vperm.xlu0 %9925, %v6694_v37  }
0x101c   :  { %6810 = vperm.xlu1 %9926, %v6691_v52  }
0x101d   :  { %6825 = vperm.xlu0 %9925, %v6696_v26  }
0x1020   :  { %6816 = vperm.xlu1 %9926, %v6693_v35  }
0x1021   :  { %6831 = vperm.xlu0 %9925, %v6698_v5  }
0x1024   :  { %6822 = vperm.xlu1 %9926, %v6695_v40  }
0x1025   :  { %6837 = vperm.xlu0 %9925, %v6700_v29  }
0x1028   :  { %6828 = vperm.xlu1 %9926, %v6697_v17  }
0x1029   :  { %6843 = vperm.xlu0 %9925, %v6702_v58  }
0x102c   :  { %6834 = vperm.xlu1 %9926, %v6699_v10   ;;  %v12837_v15 = vpop.permute.xlu0 %6606 }
0x102d   :  { %6849 = vperm.xlu0 %9925, %v6704_v4  }
0x1030   :  { %6840 = vperm.xlu1 %9926, %v6701_v46  }
0x1031   :  { %6855 = vperm.xlu0 %9925, %v6706_v23  }
0x1034   :  { %6846 = vperm.xlu1 %9926, %v6703_v42  }
0x1035   :  { %6861 = vperm.xlu0 %9925, %v6708_v1  }
0x1037   :  { %v12843_v6 = vpop.permute.xlu1 %6609 }
0x1038   :  { %6852 = vperm.xlu1 %9926, %v6705_v54  }
0x1039   :  { %6867 = vperm.xlu0 %9925, %v6710_v22  }
0x103c   :  { %6858 = vperm.xlu1 %9926, %v6707_v55  }
0x1040   :  { %6864 = vperm.xlu1 %9926, %v6709_v44   ;;  %v12839_v0 = vpop.permute.xlu0 %6612 }
0x1044   :  { %6870 = vperm.xlu1 %9926, %v6711_v31  }
0x104b   :  { %v12847_v37 = vpop.permute.xlu1 %6615 }
0x1054   :  { %v12841_v3 = vpop.permute.xlu0 %6618 }
0x1055   :  { %13996 = vst [vmem:[#allocation42_spill] sm:$0xff] %v12841_v3 }
0x105f   :  { %v12849_v26 = vpop.permute.xlu1 %6621 }
0x1060   :  { %13998 = vst [vmem:[#allocation43_spill] sm:$0xff] %v12849_v26 }
0x1068   :  { %v12845_v43 = vpop.permute.xlu0 %6624 }
0x1069   :  { %13997 = vst [vmem:[#allocation26_spill] sm:$0xff] %v12845_v43 }
0x106c   :  { %v6754_v52 = vpop.permute.xlu0 %6753 }
0x106d   :  { %v6875_v29 = vrot.slane %v6754_v52, %v13994_v12 }
0x1070   :  { %v6760_v35 = vpop.permute.xlu0 %6759 }
0x1071   :  { %v6883_v4 = vrot.slane %v6760_v35, %v13994_v12 }
0x1073   :  { %v12851_v5 = vpop.permute.xlu1 %6627 }
0x1074   :  { %13999 = vst [vmem:[#allocation27_spill] sm:$0xff] %v12851_v5  ;;  %v6766_v25 = vpop.permute.xlu0 %6765 }
0x1075   :  { %v6891_v1 = vrot.slane %v6766_v25, %v13994_v12 }
0x1077   :  { %v6757_v40 = vpop.permute.xlu1 %6756 }
0x1078   :  { %v6879_v17 = vrot.slane %v6757_v40, %v13994_v12  ;;  %v6772_v58 = vpop.permute.xlu0 %6771 }
0x1079   :  { %v6899_v35 = vrot.slane %v6772_v58, %v13994_v12 }
0x107a   :  { %v7032_v10 = vsel %vm4301_vm11, %v6879_v17, %v6875_v29 }
0x107b   :  { %v6763_v46 = vpop.permute.xlu1 %6762  ;;  %v7033_v54 = vsel %vm4303_vm12, %v6883_v4, %v7032_v10 }
0x107c   :  { %v6887_v23 = vrot.slane %v6763_v46, %v13994_v12  ;;  %v6778_v42 = vpop.permute.xlu0 %6777 }
0x107d   :  { %v6907_v4 = vrot.slane %v6778_v42, %v13994_v12 }
0x107e   :  { %v7034_v22 = vsel %vm4305_vm13, %v6887_v23, %v7033_v54 }
0x107f   :  { %v6769_v55 = vpop.permute.xlu1 %6768  ;;  %v7035_v44 = vsel %vm4307_vm14, %v6891_v1, %v7034_v22 }
0x1080   :  { %v6784_v31 = vpop.permute.xlu0 %6783  ;;  %v7072_v52 = vsel %vm4132_vm6, %v7035_v44, -inf  ;;  %v6895_v40 = vrot.slane %v6769_v55, %v13994_v12 }
0x1081   :  { %7073 = vmax.xlane.f32.xlu0 %v7072_v52  ;;  %v6915_v52 = vrot.slane %v6784_v31, %v13994_v12 }
0x1082   :  { %v7036_v25 = vsel %vm4301_vm11, %v6899_v35, %v6895_v40 }
0x1083   :  { %v6775_v29 = vpop.permute.xlu1 %6774 }
0x1084   :  { %v6903_v17 = vrot.slane %v6775_v29, %v13994_v12  ;;  %v6790_v46 = vpop.permute.xlu0 %6789 }
0x1085   :  { %v6923_v42 = vrot.slane %v6790_v46, %v13994_v12 }
0x1086   :  { %v7037_v10 = vsel %vm4303_vm12, %v6903_v17, %v7036_v25 }
0x1087   :  { %v6781_v23 = vpop.permute.xlu1 %6780  ;;  %v7038_v22 = vsel %vm4305_vm13, %v6907_v4, %v7037_v10 }
0x1088   :  { %v6911_v1 = vrot.slane %v6781_v23, %v13994_v12  ;;  %v6796_v54 = vpop.permute.xlu0 %6795 }
0x1089   :  { %v6931_v10 = vrot.slane %v6796_v54, %v13994_v12 }
0x108a   :  { %v7039_v55 = vsel %vm4307_vm14, %v6911_v1, %v7038_v22 }
0x108b   :  { %v6787_v44 = vpop.permute.xlu1 %6786  ;;  %v7075_v58 = vsel %vm4132_vm6, %v7039_v55, -inf }
0x108c   :  { %v6919_v29 = vrot.slane %v6787_v44, %v13994_v12  ;;  %7076 = vmax.xlane.f32.xlu1 %v7075_v58  ;;  %v6802_v40 = vpop.permute.xlu0 %6801 }
0x108d   :  { %v6939_v46 = vrot.slane %v6802_v40, %v13994_v12 }
0x108e   :  { %v7040_v35 = vsel %vm4301_vm11, %v6919_v29, %v6915_v52 }
0x108f   :  { %v6793_v17 = vpop.permute.xlu1 %6792  ;;  %v7041_v4 = vsel %vm4303_vm12, %v6923_v42, %v7040_v35 }
0x1090   :  { %v6927_v25 = vrot.slane %v6793_v17, %v13994_v12  ;;  %v6808_v23 = vpop.permute.xlu0 %6807 }
0x1091   :  { %v6947_v42 = vrot.slane %v6808_v23, %v13994_v12 }
0x1092   :  { %v7042_v1 = vsel %vm4305_vm13, %v6927_v25, %v7041_v4 }
0x1093   :  { %v6799_v22 = vpop.permute.xlu1 %6798  ;;  %v7043_v31 = vsel %vm4307_vm14, %v6931_v10, %v7042_v1 }
0x1094   :  { %v6814_v55 = vpop.permute.xlu0 %6813  ;;  %v7078_v44 = vsel %vm4132_vm6, %v7043_v31, -inf  ;;  %v6935_v58 = vrot.slane %v6799_v22, %v13994_v12 }
0x1095   :  { %7079 = vmax.xlane.f32.xlu0 %v7078_v44  ;;  %v6955_v44 = vrot.slane %v6814_v55, %v13994_v12 }
0x1096   :  { %v7044_v54 = vsel %vm4301_vm11, %v6939_v46, %v6935_v58 }
0x1097   :  { %v6805_v52 = vpop.permute.xlu1 %6804 }
0x1098   :  { %v6943_v29 = vrot.slane %v6805_v52, %v13994_v12  ;;  %v6820_v17 = vpop.permute.xlu0 %6819 }
0x1099   :  { %v6963_v23 = vrot.slane %v6820_v17, %v13994_v12 }
0x109a   :  { %v7045_v35 = vsel %vm4303_vm12, %v6943_v29, %v7044_v54 }
0x109b   :  { %v6811_v25 = vpop.permute.xlu1 %6810  ;;  %v7046_v1 = vsel %vm4305_vm13, %v6947_v42, %v7045_v35 }
0x109c   :  { %v6951_v10 = vrot.slane %v6811_v25, %v13994_v12  ;;  %v6826_v4 = vpop.permute.xlu0 %6825 }
0x109d   :  { %v6971_v35 = vrot.slane %v6826_v4, %v13994_v12 }
0x109e   :  { %v7047_v22 = vsel %vm4307_vm14, %v6951_v10, %v7046_v1 }
0x109f   :  { %v6817_v31 = vpop.permute.xlu1 %6816  ;;  %v7081_v40 = vsel %vm4132_vm6, %v7047_v22, -inf }
0x10a0   :  { %v6959_v52 = vrot.slane %v6817_v31, %v13994_v12  ;;  %7082 = vmax.xlane.f32.xlu0 %v7081_v40  ;;  %v6832_v58 = vpop.permute.xlu0 %6831 }
0x10a1   :  { %v6979_v17 = vrot.slane %v6832_v58, %v13994_v12 }
0x10a2   :  { %v7048_v46 = vsel %vm4301_vm11, %v6959_v52, %v6955_v44 }
0x10a3   :  { %v6823_v29 = vpop.permute.xlu1 %6822  ;;  %v7049_v42 = vsel %vm4303_vm12, %v6963_v23, %v7048_v46 }
0x10a4   :  { %v6967_v54 = vrot.slane %v6823_v29, %v13994_v12  ;;  %v6838_v25 = vpop.permute.xlu0 %6837 }
0x10a5   :  { %v6987_v29 = vrot.slane %v6838_v25, %v13994_v12 }
0x10a6   :  { %v7050_v10 = vsel %vm4305_vm13, %v6967_v54, %v7049_v42 }
0x10a7   :  { %v6829_v1 = vpop.permute.xlu1 %6828  ;;  %v7051_v55 = vsel %vm4307_vm14, %v6971_v35, %v7050_v10 }
0x10a8   :  { %v6844_v22 = vpop.permute.xlu0 %6843  ;;  %v7084_v31 = vsel %vm4132_vm6, %v7051_v55, -inf  ;;  %v6975_v40 = vrot.slane %v6829_v1, %v13994_v12 }
0x10a9   :  { %7085 = vmax.xlane.f32.xlu1 %v7084_v31  ;;  %v6995_v55 = vrot.slane %v6844_v22, %v13994_v12 }
0x10aa   :  { %v7052_v4 = vsel %vm4301_vm11, %v6979_v17, %v6975_v40 }
0x10ab   :  { %v6835_v44 = vpop.permute.xlu1 %6834 }
0x10ac   :  { %v6983_v52 = vrot.slane %v6835_v44, %v13994_v12  ;;  %v6850_v23 = vpop.permute.xlu0 %6849 }
0x10ad   :  { %v7003_v25 = vrot.slane %v6850_v23, %v13994_v12 }
0x10ae   :  { %v7053_v46 = vsel %vm4303_vm12, %v6983_v52, %v7052_v4 }
0x10af   :  { %v6841_v54 = vpop.permute.xlu1 %6840  ;;  %v7054_v42 = vsel %vm4305_vm13, %v6987_v29, %v7053_v46 }
0x10b0   :  { %v6991_v35 = vrot.slane %v6841_v54, %v13994_v12  ;;  %v6856_v31 = vpop.permute.xlu0 %6855 }
0x10b1   :  { %v7011_v4 = vrot.slane %v6856_v31, %v13994_v12 }
0x10b2   :  { %v7055_v10 = vsel %vm4307_vm14, %v6991_v35, %v7054_v42 }
0x10b3   :  { %v6847_v1 = vpop.permute.xlu1 %6846  ;;  %v7087_v58 = vsel %vm4132_vm6, %v7055_v10, -inf }
0x10b4   :  { %v6999_v40 = vrot.slane %v6847_v1, %v13994_v12  ;;  %7088 = vmax.xlane.f32.xlu0 %v7087_v58  ;;  %v6862_v29 = vpop.permute.xlu0 %6861 }
0x10b5   :  { %v7019_v23 = vrot.slane %v6862_v29, %v13994_v12 }
0x10b6   :  { %v7056_v17 = vsel %vm4301_vm11, %v6999_v40, %v6995_v55 }
0x10b7   :  { %v6853_v44 = vpop.permute.xlu1 %6852  ;;  %v7057_v46 = vsel %vm4303_vm12, %v7003_v25, %v7056_v17 }
0x10b8   :  { %v7007_v52 = vrot.slane %v6853_v44, %v13994_v12  ;;  %v6868_v58 = vpop.permute.xlu0 %6867 }
0x10b9   :  { %v7027_v17 = vrot.slane %v6868_v58, %v13994_v12 }
0x10ba   :  { %v7058_v54 = vsel %vm4305_vm13, %v7007_v52, %v7057_v46 }
0x10bb   :  { %v6859_v35 = vpop.permute.xlu1 %6858  ;;  %v7059_v22 = vsel %vm4307_vm14, %v7011_v4, %v7058_v54 }
0x10bc   :  { %v7090_v42 = vsel %vm4132_vm6, %v7059_v22, -inf  ;;  %v7015_v10 = vrot.slane %v6859_v35, %v13994_v12 }
0x10bd   :  { %7091 = vmax.xlane.f32.xlu1 %v7090_v42 }
0x10be   :  { %v7060_v31 = vsel %vm4301_vm11, %v7019_v23, %v7015_v10 }
0x10bf   :  { %v6865_v1 = vpop.permute.xlu1 %6864 }
0x10c0   :  { %v7023_v55 = vrot.slane %v6865_v1, %v13994_v12 }
0x10c2   :  { %v7061_v40 = vsel %vm4303_vm12, %v7023_v55, %v7060_v31 }
0x10c3   :  { %v6871_v25 = vpop.permute.xlu1 %6870  ;;  %v7062_v52 = vsel %vm4305_vm13, %v7027_v17, %v7061_v40 }
0x10c4   :  { %v7031_v44 = vrot.slane %v6871_v25, %v13994_v12 }
0x10c6   :  { %v7063_v4 = vsel %vm4307_vm14, %v7031_v44, %v7062_v52 }
0x10c7   :  { %v7093_v46 = vsel %vm4132_vm6, %v7063_v4, -inf }
0x10c8   :  { %7094 = vmax.xlane.f32.xlu0 %v7093_v46 }
0x110e   :  { %v7074_v29 = vpop.xlane.xlu0 %7073 }
0x110f   :  { %v7161_v54 = vadd.f32 %v12079_v56, %v7074_v29 }
0x1111   :  { %7184 = vperm.xlu1 %9926, %v7161_v54   ;;  %v7253_v44 = vadd.f32 %v7161_v54, %v11964_v50 }
0x1119   :  { %v7077_v35 = vpop.xlane.xlu1 %7076 }
0x111a   :  { %v7162_v22 = vadd.f32 %v12105_v36, %v7077_v35 }
0x111c   :  { %7187 = vperm.xlu0 %9925, %v7162_v22   ;;  %v7256_v25 = vadd.f32 %v7162_v22, %v11957_v21  ;;  %v7258_v52 = vadd.f32 %v7162_v22, %v11964_v50  ;;  %v7257_v46 = vadd.f32 %v7162_v22, %v11966_v57  ;;  %v7259_v35 = vadd.f32 %v7162_v22, %v11971_v61 }
0x1122   :  { %v7080_v42 = vpop.xlane.xlu0 %7079 }
0x1123   :  { %v7163_v10 = vadd.f32 %v12091_v11, %v7080_v42 }
0x1125   :  { %7190 = vperm.xlu1 %9926, %v7163_v10   ;;  %v7260_v4 = vadd.f32 %v7163_v10, %v11959_v48  ;;  %v7262_v29 = vadd.f32 %v7163_v10, %v11966_v57  ;;  %v7261_v42 = vadd.f32 %v7163_v10, %v11957_v21 }
0x112d   :  { %v7083_v23 = vpop.xlane.xlu0 %7082 }
0x112e   :  { %v7164_v1 = vadd.f32 %v12099_v2, %v7083_v23  ;;  %v7250_v2 = vadd.f32 %v7161_v54, %v11959_v48 }
0x1130   :  { %7193 = vperm.xlu0 %9925, %v7164_v1   ;;  %v7266_v23 = vadd.f32 %v7164_v1, %v11957_v21 }
0x1136   :  { %v7086_v58 = vpop.xlane.xlu1 %7085 }
0x1137   :  { %v12938_v55 = vadd.f32 %v12117_v39, %v7086_v58  ;;  %v7252_v39 = vadd.f32 %v7161_v54, %v11966_v57  ;;  %v7263_v58 = vadd.f32 %v7163_v10, %v11964_v50 }
0x1139   :  { %7196 = vperm.xlu1 %9926, %v12938_v55  }
0x1141   :  { %v7089_v56 = vpop.xlane.xlu0 %7088 }
0x1142   :  { %v12942_v31 = vadd.f32 %v12111_v16, %v7089_v56  ;;  %v7254_v16 = vadd.f32 %v7161_v54, %v11971_v61  ;;  %v7268_v56 = vadd.f32 %v7164_v1, %v11964_v50 }
0x1144   :  { %7199 = vperm.xlu0 %9925, %v12942_v31  }
0x114a   :  { %v7092_v36 = vpop.xlane.xlu1 %7091 }
0x114b   :  { %v12946_v11 = vadd.f32 %v12125_v41, %v7092_v36  ;;  %v7251_v41 = vadd.f32 %v7161_v54, %v11957_v21  ;;  %v7264_v54 = vadd.f32 %v7163_v10, %v11971_v61  ;;  %v7265_v36 = vadd.f32 %v7164_v1, %v11959_v48 }
0x114c   :  { %v7269_v10 = vadd.f32 %v7164_v1, %v11971_v61 }
0x114d   :  { %7202 = vperm.xlu1 %9926, %v12946_v11  }
0x1151   :  { %7331 = vperm.xlu1 %9926, %v7250_v2   ;;  %v7267_v2 = vadd.f32 %v7164_v1, %v11966_v57  ;;  %v7273_v1 = vadd.f32 %v12938_v55, %v11964_v50 }
0x1155   :  { %7337 = vperm.xlu1 %9926, %v7252_v39   ;;  %v7095_v40 = vpop.xlane.xlu0 %7094  ;;  %v7272_v39 = vadd.f32 %v12938_v55, %v11966_v57 }
0x1156   :  { %v12952_v17 = vadd.f32 %v12119_v20, %v7095_v40  ;;  %v7255_v20 = vadd.f32 %v7162_v22, %v11959_v48  ;;  %v7270_v22 = vadd.f32 %v12938_v55, %v11959_v48  ;;  %v7276_v40 = vadd.f32 %v12942_v31, %v11957_v21 }
0x1158   :  { %7205 = vperm.xlu0 %9925, %v12952_v17  }
0x1159   :  { %7343 = vperm.xlu1 %9926, %v7254_v16   ;;  %v7271_v16 = vadd.f32 %v12938_v55, %v11957_v21 }
0x115c   :  { %7334 = vperm.xlu0 %9925, %v7251_v41   ;;  %v7277_v41 = vadd.f32 %v12942_v31, %v11966_v57 }
0x115d   :  { %7349 = vperm.xlu1 %9926, %v7256_v25   ;;  %v7275_v25 = vadd.f32 %v12942_v31, %v11959_v48 }
0x1160   :  { %7340 = vperm.xlu0 %9925, %v7253_v44   ;;  %v7281_v44 = vadd.f32 %v12946_v11, %v11957_v21 }
0x1161   :  { %7355 = vperm.xlu1 %9926, %v7258_v52   ;;  %v7278_v52 = vadd.f32 %v12942_v31, %v11964_v50 }
0x1164   :  { %7346 = vperm.xlu0 %9925, %v7255_v20   ;;  %v7280_v20 = vadd.f32 %v12946_v11, %v11959_v48 }
0x1165   :  { %7361 = vperm.xlu1 %9926, %v7260_v4   ;;  %v7285_v4 = vadd.f32 %v12952_v17, %v11959_v48 }
0x1168   :  { %7352 = vperm.xlu0 %9925, %v7257_v46   ;;  %v7274_v46 = vadd.f32 %v12938_v55, %v11971_v61  ;;  %v7283_v55 = vadd.f32 %v12946_v11, %v11964_v50 }
0x1169   :  { %7367 = vperm.xlu1 %9926, %v7262_v29   ;;  %v7279_v29 = vadd.f32 %v12942_v31, %v11971_v61  ;;  %v10183_v31 = vld [vmem:[#allocation6 + $0x30] sm:$0xff] }
0x116c   :  { %7358 = vperm.xlu0 %9925, %v7259_v35   ;;  %v7282_v35 = vadd.f32 %v12946_v11, %v11966_v57 }
0x116d   :  { %7373 = vperm.xlu1 %9926, %v7264_v54   ;;  %v7287_v54 = vadd.f32 %v12952_v17, %v11966_v57 }
0x1170   :  { %7364 = vperm.xlu0 %9925, %v7261_v42   ;;  %v7286_v42 = vadd.f32 %v12952_v17, %v11957_v21 }
0x1171   :  { %7379 = vperm.xlu1 %9926, %v7266_v23   ;;  %v7288_v23 = vadd.f32 %v12952_v17, %v11964_v50 }
0x1174   :  { %7370 = vperm.xlu0 %9925, %v7263_v58   ;;  %v7720_v58 = vrot.slane %v10183_v31, %v13970_v34 }
0x1175   :  { %7385 = vperm.xlu1 %9926, %v7268_v56   ;;  %v14000_v56 = vld [vmem:[#allocation49_spill] sm:$0xff] }
0x1176   :  { %vm7747_vm15 = vcmp.eq.s32.totalorder %v14000_v56, 6 }
0x1178   :  { %7376 = vperm.xlu0 %9925, %v7265_v36   ;;  %v7284_v36 = vadd.f32 %v12946_v11, %v11971_v61 }
0x1179   :  { %7391 = vperm.xlu1 %9926, %v7270_v22   ;;  %v14001_v22 = vmov 0  }
0x117c   :  { %7382 = vperm.xlu0 %9925, %v7267_v2   ;;  %v7748_v2 = vsel %vm7747_vm15, 1, %v14001_v22 }
0x117d   :  { %7397 = vperm.xlu1 %9926, %v7272_v39   ;;  %v7289_v39 = vadd.f32 %v12952_v17, %v11971_v61 }
0x1180   :  { %7388 = vperm.xlu0 %9925, %v7269_v10   ;;  %v14002_v10 = vld [vmem:[#allocation71_spill] sm:$0xff] }
0x1181   :  { %7409 = vperm.xlu1 %9926, %v7276_v40   ;;  %v7727_v40 = vrot.slane %v10183_v31, %v14002_v10 }
0x1184   :  { %7394 = vperm.xlu0 %9925, %v7271_v16  }
0x1185   :  { %7412 = vperm.xlu1 %9926, %v7277_v41  }
0x1188   :  { %7406 = vperm.xlu0 %9925, %v7275_v25  }
0x1189   :  { %7424 = vperm.xlu1 %9926, %v7281_v44  }
0x118c   :  { %7400 = vperm.xlu0 %9925, %v7273_v1  }
0x118d   :  { %7415 = vperm.xlu1 %9926, %v7278_v52  }
0x1190   :  { %7421 = vperm.xlu0 %9925, %v7280_v20   ;;  %v13017_v16 = vpop.permute.xlu1 %7184 }
0x1191   :  { %7436 = vperm.xlu1 %9926, %v7285_v4   ;;  %14003 = vst [vmem:[#allocation44_spill] sm:$0xff] %v13017_v16 }
0x1194   :  { %7403 = vperm.xlu0 %9925, %v7274_v46  }
0x1195   :  { %7418 = vperm.xlu1 %9926, %v7279_v29  }
0x1198   :  { %7427 = vperm.xlu0 %9925, %v7282_v35  }
0x1199   :  { %7442 = vperm.xlu1 %9926, %v7287_v54  }
0x119b   :  { %v13023_v44 = vpop.permute.xlu0 %7187 }
0x119c   :  { %7439 = vperm.xlu0 %9925, %v7286_v42   ;;  %14006 = vst [vmem:[#allocation29_spill] sm:$0xff] %v13023_v44 }
0x119d   :  { %7445 = vperm.xlu1 %9926, %v7288_v23  }
0x11a0   :  { %7430 = vperm.xlu0 %9925, %v7283_v55  }
0x11a1   :  { %7722 = vbcast.lane.b32.xlu1 %v7720_v58, 256 }
0x11a4   :  { %7433 = vperm.xlu0 %9925, %v7284_v36   ;;  %v13019_v41 = vpop.permute.xlu1 %7190 }
0x11a5   :  { %7750 = vperm.xlu1 %9926, %v7748_v2   ;;  %14004 = vst [vmem:[#allocation28_spill] sm:$0xff] %v13019_v41 }
0x11a8   :  { %7448 = vperm.xlu0 %9925, %v7289_v39  }
0x11ac   :  { %7729 = vbcast.lane.b32.xlu0 %v7727_v40, 256 }
0x11af   :  { %v13027_v1 = vpop.permute.xlu0 %7193 }
0x11b0   :  { %14008 = vst [vmem:[#allocation30_spill] sm:$0xff] %v13027_v1 }
0x11b8   :  { %v13021_v25 = vpop.permute.xlu1 %7196 }
0x11b9   :  { %14005 = vst [vmem:[#allocation45_spill] sm:$0xff] %v13021_v25 }
0x11c3   :  { %v13029_v20 = vpop.permute.xlu0 %7199 }
0x11c4   :  { %14009 = vst [vmem:[#allocation47_spill] sm:$0xff] %v13029_v20 }
0x11cc   :  { %v13025_v11 = vpop.permute.xlu1 %7202 }
0x11cd   :  { %14007 = vst [vmem:[#allocation46_spill] sm:$0xff] %v13025_v11 }
0x11d0   :  { %v7332_v52 = vpop.permute.xlu1 %7331 }
0x11d1   :  { %v7453_v35 = vrot.slane %v7332_v52, %v13994_v12 }
0x11d4   :  { %v7338_v17 = vpop.permute.xlu1 %7337 }
0x11d5   :  { %v7461_v55 = vrot.slane %v7338_v17, %v13994_v12 }
0x11d7   :  { %v13031_v4 = vpop.permute.xlu0 %7205 }
0x11d8   :  { %14010 = vst [vmem:[#allocation31_spill] sm:$0xff] %v13031_v4  ;;  %v7344_v46 = vpop.permute.xlu1 %7343 }
0x11d9   :  { %v7469_v2 = vrot.slane %v7344_v46, %v13994_v12 }
0x11db   :  { %v7335_v29 = vpop.permute.xlu0 %7334 }
0x11dc   :  { %v7457_v54 = vrot.slane %v7335_v29, %v13994_v12  ;;  %v7350_v42 = vpop.permute.xlu1 %7349 }
0x11dd   :  { %v7477_v17 = vrot.slane %v7350_v42, %v13994_v12 }
0x11de   :  { %v7610_v23 = vsel %vm4301_vm11, %v7457_v54, %v7453_v35 }
0x11df   :  { %v7341_v31 = vpop.permute.xlu0 %7340  ;;  %v7611_v39 = vsel %vm4303_vm12, %v7461_v55, %v7610_v23 }
0x11e0   :  { %v7465_v58 = vrot.slane %v7341_v31, %v13994_v12  ;;  %v7356_v36 = vpop.permute.xlu1 %7355 }
0x11e1   :  { %v7485_v55 = vrot.slane %v7356_v36, %v13994_v12 }
0x11e2   :  { %v7612_v40 = vsel %vm4305_vm13, %v7465_v58, %v7611_v39 }
0x11e3   :  { %v7347_v4 = vpop.permute.xlu0 %7346  ;;  %v7613_v52 = vsel %vm4307_vm14, %v7469_v2, %v7612_v40 }
0x11e4   :  { %v7362_v11 = vpop.permute.xlu1 %7361  ;;  %v7650_v29 = vsel %vm4132_vm6, %v7613_v52, -inf  ;;  %v7473_v35 = vrot.slane %v7347_v4, %v13994_v12 }
0x11e5   :  { %7651 = vmax.xlane.f32.xlu1 %v7650_v29  ;;  %v7493_v29 = vrot.slane %v7362_v11, %v13994_v12 }
0x11e6   :  { %v7614_v46 = vsel %vm4301_vm11, %v7477_v17, %v7473_v35 }
0x11e7   :  { %v7353_v54 = vpop.permute.xlu0 %7352 }
0x11e8   :  { %v7481_v31 = vrot.slane %v7353_v54, %v13994_v12  ;;  %v7368_v20 = vpop.permute.xlu1 %7367 }
0x11e9   :  { %v7501_v36 = vrot.slane %v7368_v20, %v13994_v12 }
0x11ea   :  { %v7615_v23 = vsel %vm4303_vm12, %v7481_v31, %v7614_v46 }
0x11eb   :  { %v7359_v58 = vpop.permute.xlu0 %7358  ;;  %v7616_v40 = vsel %vm4305_vm13, %v7485_v55, %v7615_v23 }
0x11ec   :  { %v7489_v2 = vrot.slane %v7359_v58, %v13994_v12  ;;  %v7374_v39 = vpop.permute.xlu1 %7373 }
0x11ed   :  { %v7509_v23 = vrot.slane %v7374_v39, %v13994_v12 }
0x11ee   :  { %v7617_v4 = vsel %vm4307_vm14, %v7489_v2, %v7616_v40 }
0x11ef   :  { %v7365_v52 = vpop.permute.xlu0 %7364  ;;  %v7653_v42 = vsel %vm4132_vm6, %v7617_v4, -inf }
0x11f0   :  { %v7497_v54 = vrot.slane %v7365_v52, %v13994_v12  ;;  %v7380_v35 = vpop.permute.xlu1 %7379  ;;  %7654 = vmax.xlane.f32.xlu0 %v7653_v42 }
0x11f1   :  { %v7517_v20 = vrot.slane %v7380_v35, %v13994_v12 }
0x11f2   :  { %v7618_v17 = vsel %vm4301_vm11, %v7497_v54, %v7493_v29 }
0x11f3   :  { %v7371_v31 = vpop.permute.xlu0 %7370  ;;  %v7619_v55 = vsel %vm4303_vm12, %v7501_v36, %v7618_v17 }
0x11f4   :  { %v7505_v46 = vrot.slane %v7371_v31, %v13994_v12  ;;  %v7386_v58 = vpop.permute.xlu1 %7385 }
0x11f5   :  { %v7525_v36 = vrot.slane %v7386_v58, %v13994_v12 }
0x11f6   :  { %v7620_v2 = vsel %vm4305_vm13, %v7505_v46, %v7619_v55 }
0x11f7   :  { %v7377_v40 = vpop.permute.xlu0 %7376  ;;  %v7621_v11 = vsel %vm4307_vm14, %v7509_v23, %v7620_v2 }
0x11f8   :  { %v7392_v4 = vpop.permute.xlu1 %7391  ;;  %v7656_v52 = vsel %vm4132_vm6, %v7621_v11, -inf  ;;  %v7513_v42 = vrot.slane %v7377_v40, %v13994_v12 }
0x11f9   :  { %7657 = vmax.xlane.f32.xlu0 %v7656_v52 }
0x11fa   :  { %v7622_v39 = vsel %vm4301_vm11, %v7517_v20, %v7513_v42 }
0x11fb   :  { %v7383_v29 = vpop.permute.xlu0 %7382 }
0x11fc   :  { %v7521_v54 = vrot.slane %v7383_v29, %v13994_v12  ;;  %v7398_v31 = vpop.permute.xlu1 %7397 }
0x11fe   :  { %v7623_v17 = vsel %vm4303_vm12, %v7521_v54, %v7622_v39  ;;  %v7533_v39 = vrot.slane %v7392_v4, %v13994_v12 }
0x11ff   :  { %v7389_v46 = vpop.permute.xlu0 %7388  ;;  %v7624_v2 = vsel %vm4305_vm13, %v7525_v36, %v7623_v17 }
0x1200   :  { %v7529_v23 = vrot.slane %v7389_v46, %v13994_v12  ;;  %v7410_v55 = vpop.permute.xlu1 %7409 }
0x1201   :  { %v7557_v17 = vrot.slane %v7410_v55, %v13994_v12 }
0x1202   :  { %v7625_v40 = vsel %vm4307_vm14, %v7529_v23, %v7624_v2 }
0x1203   :  { %v7395_v11 = vpop.permute.xlu0 %7394  ;;  %v7659_v35 = vsel %vm4132_vm6, %v7625_v40, -inf  ;;  %v7541_v40 = vrot.slane %v7398_v31, %v13994_v12 }
0x1204   :  { %v7413_v52 = vpop.permute.xlu1 %7412  ;;  %7660 = vmax.xlane.f32.xlu1 %v7659_v35  ;;  %v7537_v54 = vrot.slane %v7395_v11, %v13994_v12 }
0x1205   :  { %v7561_v11 = vrot.slane %v7413_v52, %v13994_v12 }
0x1206   :  { %v7626_v23 = vsel %vm4301_vm11, %v7537_v54, %v7533_v39 }
0x1207   :  { %v7407_v29 = vpop.permute.xlu0 %7406  ;;  %v7627_v1 = vsel %vm4303_vm12, %v7541_v40, %v7626_v23 }
0x1208   :  { %v7425_v5 = vpop.permute.xlu1 %7424  ;;  %v7553_v58 = vrot.slane %v7407_v29, %v13994_v12 }
0x120a   :  { %v7630_v35 = vsel %vm4301_vm11, %v7557_v17, %v7553_v58 }
0x120b   :  { %v7401_v42 = vpop.permute.xlu0 %7400 }
0x120c   :  { %v7416_v20 = vpop.permute.xlu1 %7415  ;;  %v7545_v2 = vrot.slane %v7401_v42, %v13994_v12  ;;  %v7631_v42 = vsel %vm4303_vm12, %v7561_v11, %v7630_v35 }
0x120d   :  { %v7565_v43 = vrot.slane %v7416_v20, %v13994_v12 }
0x120e   :  { %v7628_v54 = vsel %vm4305_vm13, %v7545_v2, %v7627_v1 }
0x120f   :  { %v7422_v46 = vpop.permute.xlu0 %7421  ;;  %v7632_v58 = vsel %vm4305_vm13, %v7565_v43, %v7631_v42  ;;  %v7577_v43 = vrot.slane %v7425_v5, %v13994_v12 }
0x1210   :  { %v7437_v36 = vpop.permute.xlu1 %7436  ;;  %v7573_v40 = vrot.slane %v7422_v46, %v13994_v12 }
0x1211   :  { %v7593_v11 = vrot.slane %v7437_v36, %v13994_v12 }
0x1213   :  { %v7404_v25 = vpop.permute.xlu0 %7403 }
0x1214   :  { %v7549_v29 = vrot.slane %v7404_v25, %v13994_v12  ;;  %v7419_v4 = vpop.permute.xlu1 %7418 }
0x1215   :  { %v7569_v55 = vrot.slane %v7419_v4, %v13994_v12 }
0x1216   :  { %v7629_v31 = vsel %vm4307_vm14, %v7549_v29, %v7628_v54 }
0x1217   :  { %v7428_v39 = vpop.permute.xlu0 %7427  ;;  %v7662_v20 = vsel %vm4132_vm6, %v7629_v31, -inf  ;;  %v7633_v52 = vsel %vm4307_vm14, %v7569_v55, %v7632_v58  ;;  %v7634_v55 = vsel %vm4301_vm11, %v7577_v43, %v7573_v40 }
0x1218   :  { %7663 = vmax.xlane.f32.xlu0 %v7662_v20  ;;  %v7665_v25 = vsel %vm4132_vm6, %v7633_v52, -inf  ;;  %v7443_v23 = vpop.permute.xlu1 %7442  ;;  %v7581_v35 = vrot.slane %v7428_v39, %v13994_v12 }
0x1219   :  { %7666 = vmax.xlane.f32.xlu1 %v7665_v25  ;;  %v7601_v46 = vrot.slane %v7443_v23, %v13994_v12 }
0x121a   :  { %v7635_v31 = vsel %vm4303_vm12, %v7581_v35, %v7634_v55 }
0x121b   :  { %v7440_v17 = vpop.permute.xlu0 %7439 }
0x121c   :  { %v7597_v1 = vrot.slane %v7440_v17, %v13994_v12  ;;  %v7446_v4 = vpop.permute.xlu1 %7445 }
0x121d   :  { %v7605_v39 = vrot.slane %v7446_v4, %v13994_v12 }
0x121e   :  { %v7638_v54 = vsel %vm4301_vm11, %v7597_v1, %v7593_v11  ;;  %v14012_v11 = vld [vmem:[#allocation34_spill] sm:$0xff] }
0x121f   :  { %v7431_v2 = vpop.permute.xlu0 %7430  ;;  %v7639_v20 = vsel %vm4303_vm12, %v7601_v46, %v7638_v54 }
0x1220   :  { %v7585_v29 = vrot.slane %v7431_v2, %v13994_v12  ;;  %v7640_v40 = vsel %vm4305_vm13, %v7605_v39, %v7639_v20  ;;  %v13113_v2 = vpop.permute.xlu1 %7722 }
0x1222   :  { %v7636_v5 = vsel %vm4305_vm13, %v7585_v29, %v7635_v31  ;;  %v14013_v31 = vld [vmem:[#allocation17_spill] sm:$0xff] }
0x1223   :  { %v7434_v42 = vpop.permute.xlu0 %7433 }
0x1224   :  { %v7589_v58 = vrot.slane %v7434_v42, %v13994_v12  ;;  %v13115_v35 = vpop.permute.xlu1 %7750 }
0x1225   :  { %14011 = vst [vmem:[#allocation48_spill] sm:$0xff] %v13115_v35 }
0x1226   :  { %v7637_v36 = vsel %vm4307_vm14, %v7589_v58, %v7636_v5 }
0x1227   :  { %v7449_v52 = vpop.permute.xlu0 %7448  ;;  %v7668_v25 = vsel %vm4132_vm6, %v7637_v36, -inf }
0x1228   :  { %v7609_v17 = vrot.slane %v7449_v52, %v13994_v12  ;;  %7669 = vmax.xlane.f32.xlu0 %v7668_v25  ;;  %v14014_v52 = vld [vmem:[#allocation18_spill] sm:$0xff] }
0x122a   :  { %v7641_v23 = vsel %vm4307_vm14, %v7609_v17, %v7640_v40 }
0x122b   :  { %v7671_v1 = vsel %vm4132_vm6, %v7641_v23, -inf  ;;  %v13120_v54 = vpop.permute.xlu0 %7729 }
0x122c   :  { %7672 = vmax.xlane.f32.xlu1 %v7671_v1 }
0x1272   :  { %v7652_v43 = vpop.xlane.xlu1 %7651 }
0x1273   :  { %v7739_v29 = vadd.f32 %v14012_v11, %v7652_v43 }
0x1275   :  { %7762 = vperm.xlu0 %9925, %v7739_v29   ;;  %v7828_v4 = vadd.f32 %v7739_v29, %v11959_v48  ;;  %v7829_v55 = vadd.f32 %v7739_v29, %v11957_v21  ;;  %v7830_v36 = vadd.f32 %v7739_v29, %v11966_v57  ;;  %v7831_v1 = vadd.f32 %v7739_v29, %v11964_v50 }
0x1277   :  { %7909 = vperm.xlu1 %9926, %v7828_v4   ;;  %v14015_v4 = vld [vmem:[#allocation35_spill] sm:$0xff] }
0x1279   :  { %7912 = vperm.xlu0 %9925, %v7829_v55  }
0x127d   :  { %v7655_v42 = vpop.xlane.xlu0 %7654 }
0x127e   :  { %v13123_v46 = vadd.f32 %v14013_v31, %v7655_v42 }
0x1280   :  { %v7834_v58 = vadd.f32 %v13123_v46, %v11957_v21  ;;  %v7833_v39 = vadd.f32 %v13123_v46, %v11959_v48  ;;  %v7835_v5 = vadd.f32 %v13123_v46, %v11966_v57  ;;  %v7836_v23 = vadd.f32 %v13123_v46, %v11964_v50 }
0x1282   :  { %7927 = vperm.xlu0 %9925, %v7834_v58   ;;  %7924 = vperm.xlu1 %9926, %v7833_v39   ;;  %v7832_v58 = vadd.f32 %v7739_v29, %v11971_v61  ;;  %v7837_v39 = vadd.f32 %v13123_v46, %v11971_v61 }
0x1286   :  { %7930 = vperm.xlu0 %9925, %v7835_v5   ;;  %7915 = vperm.xlu1 %9926, %v7830_v36   ;;  %v7658_v20 = vpop.xlane.xlu0 %7657 }
0x1287   :  { %v13133_v25 = vadd.f32 %v14014_v52, %v7658_v20  ;;  %v14016_v52 = vld [vmem:[#allocation19_spill] sm:$0xff] }
0x1289   :  { %v7839_v17 = vadd.f32 %v13133_v25, %v11957_v21  ;;  %v7838_v40 = vadd.f32 %v13133_v25, %v11959_v48  ;;  %v7840_v11 = vadd.f32 %v13133_v25, %v11966_v57  ;;  %v7841_v5 = vadd.f32 %v13133_v25, %v11964_v50 }
0x128b   :  { %7942 = vperm.xlu0 %9925, %v7839_v17   ;;  %7939 = vperm.xlu1 %9926, %v7838_v40  }
0x128f   :  { %7933 = vperm.xlu0 %9925, %v7836_v23   ;;  %7918 = vperm.xlu1 %9926, %v7831_v1   ;;  %v14017_v1 = vld [vmem:[#allocation36_spill] sm:$0xff] }
0x1291   :  { %v7661_v43 = vpop.xlane.xlu1 %7660 }
0x1292   :  { %v13145_v55 = vadd.f32 %v14015_v4, %v7661_v43  ;;  %v7842_v4 = vadd.f32 %v13133_v25, %v11971_v61 }
0x1293   :  { %7945 = vperm.xlu1 %9926, %v7840_v11  }
0x1294   :  { %v7843_v42 = vadd.f32 %v13145_v55, %v11959_v48  ;;  %v7844_v31 = vadd.f32 %v13145_v55, %v11957_v21  ;;  %v7845_v36 = vadd.f32 %v13145_v55, %v11966_v57  ;;  %v7846_v11 = vadd.f32 %v13145_v55, %v11964_v50 }
0x1296   :  { %7954 = vperm.xlu0 %9925, %v7843_v42  }
0x1297   :  { %7957 = vperm.xlu1 %9926, %v7844_v31  }
0x129a   :  { %7921 = vperm.xlu0 %9925, %v7832_v58   ;;  %v7847_v58 = vadd.f32 %v13145_v55, %v11971_v61 }
0x129b   :  { %7936 = vperm.xlu1 %9926, %v7837_v39  }
0x129e   :  { %7948 = vperm.xlu0 %9925, %v7841_v5  }
0x129f   :  { %7960 = vperm.xlu1 %9926, %v7845_v36  }
0x12a5   :  { %v7664_v20 = vpop.xlane.xlu0 %7663 }
0x12a6   :  { %v13159_v17 = vadd.f32 %v14016_v52, %v7664_v20  ;;  %v7667_v23 = vpop.xlane.xlu1 %7666 }
0x12a7   :  { %v13166_v43 = vadd.f32 %v14017_v1, %v7667_v23 }
0x12a8   :  { %v7849_v29 = vadd.f32 %v13159_v17, %v11957_v21  ;;  %v7848_v40 = vadd.f32 %v13159_v17, %v11959_v48  ;;  %v7850_v31 = vadd.f32 %v13159_v17, %v11966_v57  ;;  %v7851_v52 = vadd.f32 %v13159_v17, %v11964_v50 }
0x12a9   :  { %v7853_v42 = vadd.f32 %v13166_v43, %v11959_v48  ;;  %v7854_v39 = vadd.f32 %v13166_v43, %v11957_v21  ;;  %v7855_v20 = vadd.f32 %v13166_v43, %v11966_v57  ;;  %v7856_v1 = vadd.f32 %v13166_v43, %v11964_v50 }
0x12aa   :  { %7972 = vperm.xlu1 %9926, %v7849_v29   ;;  %7969 = vperm.xlu0 %9925, %v7848_v40  }
0x12ae   :  { %7963 = vperm.xlu1 %9926, %v7846_v11   ;;  %7951 = vperm.xlu0 %9925, %v7842_v4   ;;  %v7852_v11 = vadd.f32 %v13159_v17, %v11971_v61 }
0x12b2   :  { %7984 = vperm.xlu1 %9926, %v7853_v42   ;;  %7975 = vperm.xlu0 %9925, %v7850_v31  }
0x12b5   :  { %v7670_v5 = vpop.xlane.xlu0 %7669 }
0x12b6   :  { %7966 = vperm.xlu1 %9926, %v7847_v58   ;;  %7987 = vperm.xlu0 %9925, %v7854_v39   ;;  %v13181_v36 = vadd.f32 %v13113_v2, %v7670_v5 }
0x12b8   :  { %v7859_v29 = vadd.f32 %v13181_v36, %v11957_v21  ;;  %v7858_v40 = vadd.f32 %v13181_v36, %v11959_v48  ;;  %v7860_v42 = vadd.f32 %v13181_v36, %v11966_v57  ;;  %v7861_v39 = vadd.f32 %v13181_v36, %v11964_v50 }
0x12b9   :  { %v7673_v23 = vpop.xlane.xlu1 %7672  ;;  %v7862_v5 = vadd.f32 %v13181_v36, %v11971_v61 }
0x12ba   :  { %7990 = vperm.xlu1 %9926, %v7855_v20   ;;  %7978 = vperm.xlu0 %9925, %v7851_v52   ;;  %v13192_v2 = vadd.f32 %v13120_v54, %v7673_v23  ;;  %v7857_v54 = vadd.f32 %v13166_v43, %v11971_v61  ;;  %v13214_v20 = vld [vmem:[#allocation6 + $0x38] sm:$0xff]  ;;  %v14020_v23 = vld [vmem:[#allocation38_spill] sm:$0xff] }
0x12bc   :  { %v7863_v4 = vadd.f32 %v13192_v2, %v11959_v48  ;;  %v7864_v31 = vadd.f32 %v13192_v2, %v11957_v21  ;;  %v7865_v58 = vadd.f32 %v13192_v2, %v11966_v57  ;;  %v7866_v48 = vadd.f32 %v13192_v2, %v11964_v50  ;;  %v14018_v21 = vld [vmem:[#allocation50_spill] sm:$0xff] }
0x12bd   :  { %v8263_v52 = vrot.slane %v13214_v20, %v14018_v21  ;;  %v7867_v57 = vadd.f32 %v13192_v2, %v11971_v61  ;;  %v8256_v50 = vrot.slane %v13214_v20, %v14020_v23 }
0x12be   :  { %8002 = vperm.xlu1 %9926, %v7859_v29   ;;  %7999 = vperm.xlu0 %9925, %v7858_v40   ;;  %v14019_v29 = vld [vmem:[#allocation66_spill] sm:$0xff] }
0x12bf   :  { %v8270_v40 = vrot.slane %v13214_v20, %v14019_v29 }
0x12c2   :  { %7993 = vperm.xlu1 %9926, %v7856_v1   ;;  %7981 = vperm.xlu0 %9925, %v7852_v11   ;;  %v14021_v1 = vld [vmem:[#allocation68_spill] sm:$0xff] }
0x12c3   :  { %v8284_v11 = vrot.slane %v13214_v20, %v14021_v1 }
0x12c6   :  { %8014 = vperm.xlu1 %9926, %v7863_v4   ;;  %8005 = vperm.xlu0 %9925, %v7860_v42   ;;  %v14022_v4 = vld [vmem:[#allocation51_spill] sm:$0xff] }
0x12c7   :  { %v8277_v42 = vrot.slane %v13214_v20, %v14022_v4 }
0x12ca   :  { %7996 = vperm.xlu1 %9926, %v7857_v54   ;;  %8017 = vperm.xlu0 %9925, %v7864_v31   ;;  %v14023_v54 = vld [vmem:[#allocation67_spill] sm:$0xff] }
0x12cb   :  { %v8291_v61 = vrot.slane %v13214_v20, %v14023_v54 }
0x12ce   :  { %8020 = vperm.xlu1 %9926, %v7865_v58   ;;  %8008 = vperm.xlu0 %9925, %v7861_v39  }
0x12d2   :  { %8023 = vperm.xlu1 %9926, %v7866_v48   ;;  %8011 = vperm.xlu0 %9925, %v7862_v5  }
0x12d6   :  { %8265 = vbcast.lane.b32.xlu1 %v8263_v52, 256  ;;  %8026 = vperm.xlu0 %9925, %v7867_v57  }
0x12da   :  { %8272 = vbcast.lane.b32.xlu1 %v8270_v40, 256  ;;  %8258 = vbcast.lane.b32.xlu0 %v8256_v50, 256 }
0x12de   :  { %8286 = vbcast.lane.b32.xlu1 %v8284_v11, 256  ;;  %8279 = vbcast.lane.b32.xlu0 %v8277_v42, 256 }
0x12e2   :  { %8293 = vbcast.lane.b32.xlu0 %v8291_v61, 256 }
0x12f4   :  { %v13230_v31 = vpop.permute.xlu0 %7762 }
0x12f5   :  { %14024 = vst [vmem:[#allocation62_spill] sm:$0xff] %v13230_v31 }
0x12f6   :  { %v7910_v58 = vpop.permute.xlu1 %7909 }
0x12f7   :  { %v8031_v35 = vrot.slane %v7910_v58, %v13994_v12 }
0x12f8   :  { %v7913_v39 = vpop.permute.xlu0 %7912 }
0x12f9   :  { %v8035_v1 = vrot.slane %v7913_v39, %v13994_v12 }
0x12fb   :  { %v8188_v44 = vsel %vm4301_vm11, %v8035_v1, %v8031_v35 }
0x1301   :  { %v7925_v48 = vpop.permute.xlu1 %7924  ;;  %v7928_v5 = vpop.permute.xlu0 %7927 }
0x1302   :  { %v8051_v4 = vrot.slane %v7925_v48, %v13994_v12  ;;  %v8055_v42 = vrot.slane %v7928_v5, %v13994_v12 }
0x1304   :  { %v8192_v39 = vsel %vm4301_vm11, %v8055_v42, %v8051_v4 }
0x1305   :  { %v7916_v21 = vpop.permute.xlu1 %7915  ;;  %v7931_v52 = vpop.permute.xlu0 %7930 }
0x1306   :  { %v8039_v54 = vrot.slane %v7916_v21, %v13994_v12  ;;  %v8059_v31 = vrot.slane %v7931_v52, %v13994_v12 }
0x1308   :  { %v8189_v48 = vsel %vm4303_vm12, %v8039_v54, %v8188_v44  ;;  %v8193_v21 = vsel %vm4303_vm12, %v8059_v31, %v8192_v39 }
0x130a   :  { %v7940_v57 = vpop.permute.xlu1 %7939  ;;  %v7943_v29 = vpop.permute.xlu0 %7942 }
0x130b   :  { %v8071_v31 = vrot.slane %v7940_v57, %v13994_v12 }
0x130e   :  { %v7919_v40 = vpop.permute.xlu1 %7918  ;;  %v7934_v23 = vpop.permute.xlu0 %7933 }
0x130f   :  { %v8043_v16 = vrot.slane %v7919_v40, %v13994_v12  ;;  %v8063_v41 = vrot.slane %v7934_v23, %v13994_v12 }
0x1311   :  { %v8190_v52 = vsel %vm4305_vm13, %v8043_v16, %v8189_v48  ;;  %v8194_v23 = vsel %vm4305_vm13, %v8063_v41, %v8193_v21 }
0x1312   :  { %v7946_v50 = vpop.permute.xlu1 %7945 }
0x1313   :  { %v8079_v54 = vrot.slane %v7946_v50, %v13994_v12 }
0x1315   :  { %v7955_v11 = vpop.permute.xlu0 %7954 }
0x1316   :  { %v7958_v61 = vpop.permute.xlu1 %7957 }
0x1319   :  { %v7922_v26 = vpop.permute.xlu0 %7921 }
0x131a   :  { %v8047_v5 = vrot.slane %v7922_v26, %v13994_v12  ;;  %v7937_v3 = vpop.permute.xlu1 %7936 }
0x131b   :  { %v8067_v58 = vrot.slane %v7937_v3, %v13994_v12  ;;  %v8075_v3 = vrot.slane %v7943_v29, %v13994_v12  ;;  %v8091_v29 = vrot.slane %v7955_v11, %v13994_v12 }
0x131c   :  { %v8191_v40 = vsel %vm4307_vm14, %v8047_v5, %v8190_v52 }
0x131d   :  { %v8228_v35 = vsel %vm4132_vm6, %v8191_v40, -inf  ;;  %v8195_v1 = vsel %vm4307_vm14, %v8067_v58, %v8194_v23  ;;  %v7949_v26 = vpop.permute.xlu0 %7948  ;;  %v8196_v39 = vsel %vm4301_vm11, %v8075_v3, %v8071_v31  ;;  %v8095_v40 = vrot.slane %v7958_v61, %v13994_v12 }
0x131e   :  { %8229 = vmax.xlane.f32.xlu1 %v8228_v35  ;;  %v8231_v44 = vsel %vm4132_vm6, %v8195_v1, -inf  ;;  %v7961_v4 = vpop.permute.xlu1 %7960  ;;  %v8083_v41 = vrot.slane %v7949_v26, %v13994_v12  ;;  %v8197_v21 = vsel %vm4303_vm12, %v8079_v54, %v8196_v39 }
0x131f   :  { %8232 = vmax.xlane.f32.xlu0 %v8231_v44  ;;  %v8099_v1 = vrot.slane %v7961_v4, %v13994_v12  ;;  %v8200_v26 = vsel %vm4301_vm11, %v8095_v40, %v8091_v29 }
0x1320   :  { %v8198_v52 = vsel %vm4305_vm13, %v8083_v41, %v8197_v21 }
0x1321   :  { %v8201_v54 = vsel %vm4303_vm12, %v8099_v1, %v8200_v26 }
0x1329   :  { %v7973_v42 = vpop.permute.xlu1 %7972  ;;  %v7970_v16 = vpop.permute.xlu0 %7969 }
0x132a   :  { %v8115_v4 = vrot.slane %v7973_v42, %v13994_v12 }
0x132d   :  { %v7964_v48 = vpop.permute.xlu1 %7963  ;;  %v7952_v5 = vpop.permute.xlu0 %7951 }
0x132e   :  { %v8087_v58 = vrot.slane %v7952_v5, %v13994_v12  ;;  %v8103_v44 = vrot.slane %v7964_v48, %v13994_v12  ;;  %v8111_v48 = vrot.slane %v7970_v16, %v13994_v12 }
0x1330   :  { %v8199_v57 = vsel %vm4307_vm14, %v8087_v58, %v8198_v52  ;;  %v8202_v11 = vsel %vm4305_vm13, %v8103_v44, %v8201_v54  ;;  %v8204_v40 = vsel %vm4301_vm11, %v8115_v4, %v8111_v48 }
0x1331   :  { %v7985_v23 = vpop.permute.xlu1 %7984  ;;  %v7976_v50 = vpop.permute.xlu0 %7975  ;;  %v8234_v35 = vsel %vm4132_vm6, %v8199_v57, -inf }
0x1332   :  { %8235 = vmax.xlane.f32.xlu0 %v8234_v35  ;;  %v8119_v57 = vrot.slane %v7976_v50, %v13994_v12 }
0x1334   :  { %v8205_v44 = vsel %vm4303_vm12, %v8119_v57, %v8204_v40 }
0x1335   :  { %v7967_v31 = vpop.permute.xlu1 %7966  ;;  %v7988_v3 = vpop.permute.xlu0 %7987 }
0x1336   :  { %v8107_v41 = vrot.slane %v7967_v31, %v13994_v12  ;;  %v8135_v16 = vrot.slane %v7988_v3, %v13994_v12 }
0x1338   :  { %v8203_v61 = vsel %vm4307_vm14, %v8107_v41, %v8202_v11 }
0x1339   :  { %v7991_v39 = vpop.permute.xlu1 %7990  ;;  %v7979_v5 = vpop.permute.xlu0 %7978  ;;  %v8237_v21 = vsel %vm4132_vm6, %v8203_v61, -inf  ;;  %v8131_v61 = vrot.slane %v7985_v23, %v13994_v12 }
0x133a   :  { %8238 = vmax.xlane.f32.xlu1 %v8237_v21  ;;  %v8123_v29 = vrot.slane %v7979_v5, %v13994_v12  ;;  %v8139_v11 = vrot.slane %v7991_v39, %v13994_v12 }
0x133b   :  { %v8208_v21 = vsel %vm4301_vm11, %v8135_v16, %v8131_v61 }
0x133c   :  { %v8206_v31 = vsel %vm4305_vm13, %v8123_v29, %v8205_v44  ;;  %v8209_v57 = vsel %vm4303_vm12, %v8139_v11, %v8208_v21 }
0x133d   :  { %v8003_v58 = vpop.permute.xlu1 %8002  ;;  %v8000_v52 = vpop.permute.xlu0 %7999 }
0x133e   :  { %v8151_v39 = vrot.slane %v8000_v52, %v13994_v12 }
0x1341   :  { %v7994_v35 = vpop.permute.xlu1 %7993  ;;  %v7982_v1 = vpop.permute.xlu0 %7981 }
0x1342   :  { %v8127_v26 = vrot.slane %v7982_v1, %v13994_v12  ;;  %v8143_v5 = vrot.slane %v7994_v35, %v13994_v12  ;;  %v8155_v1 = vrot.slane %v8003_v58, %v13994_v12 }
0x1344   :  { %v8207_v42 = vsel %vm4307_vm14, %v8127_v26, %v8206_v31  ;;  %v8210_v3 = vsel %vm4305_vm13, %v8143_v5, %v8209_v57 }
0x1345   :  { %v8015_v54 = vpop.permute.xlu1 %8014  ;;  %v8006_v41 = vpop.permute.xlu0 %8005  ;;  %v8240_v50 = vsel %vm4132_vm6, %v8207_v42, -inf  ;;  %v8212_v42 = vsel %vm4301_vm11, %v8155_v1, %v8151_v39 }
0x1346   :  { %8241 = vmax.xlane.f32.xlu0 %v8240_v50  ;;  %v8159_v26 = vrot.slane %v8006_v41, %v13994_v12  ;;  %v8171_v5 = vrot.slane %v8015_v54, %v13994_v12 }
0x1348   :  { %v8213_v61 = vsel %vm4303_vm12, %v8159_v26, %v8212_v42 }
0x1349   :  { %v7997_v4 = vpop.permute.xlu1 %7996  ;;  %v8018_v48 = vpop.permute.xlu0 %8017 }
0x134a   :  { %v8147_v29 = vrot.slane %v7997_v4, %v13994_v12  ;;  %v8175_v16 = vrot.slane %v8018_v48, %v13994_v12 }
0x134c   :  { %v8211_v40 = vsel %vm4307_vm14, %v8147_v29, %v8210_v3  ;;  %v8216_v57 = vsel %vm4301_vm11, %v8175_v16, %v8171_v5 }
0x134d   :  { %v8021_v44 = vpop.permute.xlu1 %8020  ;;  %v8009_v23 = vpop.permute.xlu0 %8008  ;;  %v8243_v35 = vsel %vm4132_vm6, %v8211_v40, -inf }
0x134e   :  { %8244 = vmax.xlane.f32.xlu1 %v8243_v35  ;;  %v8163_v31 = vrot.slane %v8009_v23, %v13994_v12  ;;  %v8179_v58 = vrot.slane %v8021_v44, %v13994_v12  ;;  %v8298_v44 = vrot.slane %v13214_v20, %v13970_v34  ;;  %v8305_v23 = vrot.slane %v13214_v20, %v14002_v10 }
0x1350   :  { %v8214_v41 = vsel %vm4305_vm13, %v8163_v31, %v8213_v61  ;;  %v8217_v3 = vsel %vm4303_vm12, %v8179_v58, %v8216_v57 }
0x1351   :  { %v8024_v50 = vpop.permute.xlu1 %8023  ;;  %v8012_v11 = vpop.permute.xlu0 %8011 }
0x1352   :  { %v8167_v52 = vrot.slane %v8012_v11, %v13994_v12  ;;  %v8183_v21 = vrot.slane %v8024_v50, %v13994_v12 }
0x1354   :  { %v8215_v4 = vsel %vm4307_vm14, %v8167_v52, %v8214_v41  ;;  %v8218_v1 = vsel %vm4305_vm13, %v8183_v21, %v8217_v3 }
0x1355   :  { %v8027_v29 = vpop.permute.xlu0 %8026  ;;  %v8246_v48 = vsel %vm4132_vm6, %v8215_v4, -inf  ;;  %v8266_v35 = vpop.permute.xlu1 %8265 }
0x1356   :  { %v8187_v40 = vrot.slane %v8027_v29, %v13994_v12  ;;  %8247 = vmax.xlane.f32.xlu0 %v8246_v48  ;;  %v14025_v48 = vld [vmem:[#allocation20_spill] sm:$0xff] }
0x1357   :  { %v4272_v3 = vrot.slane %v14025_v48, %v13994_v12 }
0x1358   :  { %v8219_v54 = vsel %vm4307_vm14, %v8187_v40, %v8218_v1  ;;  %v14026_v40 = vld [vmem:[#allocation22_spill] sm:$0xff] }
0x1359   :  { %v8249_v39 = vsel %vm4132_vm6, %v8219_v54, -inf  ;;  %v8259_v26 = vpop.permute.xlu0 %8258  ;;  %v8273_v34 = vpop.permute.xlu1 %8272  ;;  %vm8325_vm6 = vcmp.eq.s32.totalorder %v14000_v56, 7  ;;  %v4280_v1 = vrot.slane %v14026_v40, %v13994_v12  ;;  %v14027_v54 = vld [vmem:[#allocation37_spill] sm:$0xff]  ;;  %v5496_v40 = vrot.slane %v12513_v32, %v13994_v12 }
0x135a   :  { %8250 = vmax.xlane.f32.xlu1 %v8249_v39  ;;  %v4276_v39 = vrot.slane %v14027_v54, %v13994_v12  ;;  %v5500_v54 = vrot.slane %v12509_v9, %v13994_v12  ;;  %v6062_v32 = vrot.slane %v12671_v27, %v13994_v12  ;;  %v6070_v27 = vrot.slane %v12673_v60, %v13994_v12 }
0x135b   :  { %v6078_v60 = vrot.slane %v12677_v28, %v13994_v12 }
0x135c   :  { %v4302_v56 = vsel %vm4301_vm11, %v4276_v39, %v4272_v3  ;;  %v6058_v39 = vrot.slane %v12675_v62, %v13994_v12  ;;  %v6054_v62 = vrot.slane %v12669_v47, %v13994_v12  ;;  %v6074_v47 = vrot.slane %v12681_v13, %v13994_v12 }
0x135d   :  { %v8280_v31 = vpop.permute.xlu0 %8279  ;;  %v8287_v42 = vpop.permute.xlu1 %8286 }
0x1361   :  { %v8294_v10 = vpop.permute.xlu0 %8293 }
0x136b   :  { %8300 = vbcast.lane.b32.xlu1 %v8298_v44, 256  ;;  %v14028_v44 = vld [vmem:[#allocation23_spill] sm:$0xff] }
0x136c   :  { %8307 = vbcast.lane.b32.xlu0 %v8305_v23, 256  ;;  %v4284_v23 = vrot.slane %v14028_v44, %v13994_v12  ;;  %v14035_v44 = vld [vmem:[#allocation61_spill] sm:$0xff] }
0x136d   :  { %vm5440_vm5 = vcmp.eq.s32.totalorder %v14035_v44, 1  ;;  %v14045_v44 = vld [vmem:[#allocation60_spill] sm:$0xff] }
0x136e   :  { %vm6018_vm7 = vcmp.eq.s32.totalorder %v14045_v44, 1 }
0x136f   :  { %7765 = vperm.xlu1 %9926, %v13123_v46  }
0x1370   :  { %7768 = vperm.xlu0 %9925, %v13133_v25  }
0x1373   :  { %7771 = vperm.xlu1 %9926, %v13145_v55  }
0x1377   :  { %7774 = vperm.xlu1 %9926, %v13159_v17  }
0x137b   :  { %7777 = vperm.xlu1 %9926, %v13166_v43  }
0x137f   :  { %7780 = vperm.xlu1 %9926, %v13181_v36  }
0x13ab   :  { %v8230_v20 = vpop.xlane.xlu1 %8229 }
0x13ac   :  { %v8317_v16 = vadd.f32 %v8259_v26, %v8230_v20  ;;  %v8233_v50 = vpop.xlane.xlu0 %8232  ;;  %v14029_v26 = vld [vmem:[#allocation39_spill] sm:$0xff]  ;;  %v14031_v20 = vld [vmem:[#allocation40_spill] sm:$0xff] }
0x13ad   :  { %v8318_v46 = vadd.f32 %v8266_v35, %v8233_v50 }
0x13ae   :  { %8340 = vperm.xlu1 %9926, %v8317_v16   ;;  %v4296_v16 = vrot.slane %v14031_v20, %v13994_v12  ;;  %v6636_v20 = vrot.slane %v12843_v6, %v13994_v12  ;;  %v6632_v6 = vrot.slane %v12837_v15, %v13994_v12  ;;  %v14038_v15 = vld [vmem:[#allocation43_spill] sm:$0xff] }
0x13af   :  { %8343 = vperm.xlu0 %9925, %v8318_v46   ;;  %v4902_v46 = vrot.slane %v12339_v14, %v13994_v12  ;;  %v4914_v14 = vrot.slane %v12337_v8, %v13994_v12  ;;  %v5476_v8 = vrot.slane %v12501_v53, %v13994_v12 }
0x13b0   :  { %v6661_v28 = vsel %vm4301_vm11, %v6636_v20, %v6632_v6 }
0x13b2   :  { %7783 = vperm.xlu1 %9926, %v13192_v2   ;;  %v8326_v2 = vsel %vm8325_vm6, 1, %v14001_v22  ;;  %v4304_v22 = vsel %vm4303_vm12, %v4280_v1, %v4302_v56 }
0x13bf   :  { %v8236_v25 = vpop.xlane.xlu0 %8235 }
0x13c0   :  { %v8319_v55 = vadd.f32 %v8273_v34, %v8236_v25  ;;  %v4288_v34 = vrot.slane %v14029_v26, %v13994_v12  ;;  %v14036_v26 = vld [vmem:[#allocation25_spill] sm:$0xff] }
0x13c1   :  { %v5504_v9 = vrot.slane %v14036_v26, %v13994_v12 }
0x13c2   :  { %8346 = vperm.xlu0 %9925, %v8319_v55  }
0x13c7   :  { %v8239_v17 = vpop.xlane.xlu1 %8238 }
0x13c8   :  { %v8320_v43 = vadd.f32 %v8280_v31, %v8239_v17  ;;  %v4306_v31 = vsel %vm4305_vm13, %v4284_v23, %v4304_v22  ;;  %v4906_v17 = vrot.slane %v12335_v63, %v13994_v12 }
0x13c9   :  { %v4308_v50 = vsel %vm4307_vm14, %v4288_v34, %v4306_v31  ;;  %v6066_v34 = vrot.slane %v12679_v59, %v13994_v12  ;;  %v6640_v59 = vrot.slane %v12839_v0, %v13994_v12  ;;  %v6082_v0 = vrot.slane %v12683_v18, %v13994_v12 }
0x13ca   :  { %8349 = vperm.xlu0 %9925, %v8320_v43   ;;  %v14032_v43 = vld [vmem:[#allocation41_spill] sm:$0xff] }
0x13cb   :  { %v6662_v18 = vsel %vm4303_vm12, %v6640_v59, %v6661_v28 }
0x13d3   :  { %v8242_v36 = vpop.xlane.xlu0 %8241 }
0x13d4   :  { %v8321_v11 = vadd.f32 %v8287_v42, %v8242_v36  ;;  %v14030_v42 = vld [vmem:[#allocation24_spill] sm:$0xff]  ;;  %v4300_v36 = vrot.slane %v14032_v43, %v13994_v12 }
0x13d6   :  { %8352 = vperm.xlu0 %9925, %v8321_v11   ;;  %v4898_v11 = vrot.slane %v12333_v30, %v13994_v12  ;;  %v5484_v30 = vrot.slane %v12503_v7, %v13994_v12  ;;  %v5492_v7 = vrot.slane %v12505_v49, %v13994_v12 }
0x13db   :  { %v8245_v61 = vpop.xlane.xlu1 %8244 }
0x13dc   :  { %v8322_v58 = vadd.f32 %v8294_v10, %v8245_v61  ;;  %v4292_v10 = vrot.slane %v14030_v42, %v13994_v12  ;;  %v4910_v61 = vrot.slane %v12343_v19, %v13994_v12 }
0x13de   :  { %8355 = vperm.xlu0 %9925, %v8322_v58   ;;  %v4310_v55 = vsel %vm4309_vm0, %v4292_v10, %v4308_v50  ;;  %v6083_v50 = vsel %vm4301_vm11, %v6058_v39, %v6054_v62  ;;  %v14048_v62 = vld [vmem:[#allocation54_spill] sm:$0xff] }
0x13df   :  { %v4312_v63 = vsel %vm4311_vm1, %v4296_v16, %v4310_v55  ;;  %v6084_v55 = vsel %vm4303_vm12, %v6062_v32, %v6083_v50  ;;  %v14047_v32 = vld [vmem:[#allocation27_spill] sm:$0xff]  ;;  %vm6596_vm8 = vcmp.eq.s32.totalorder %v14048_v62, 1 }
0x13e0   :  { %v6085_v13 = vsel %vm4305_vm13, %v6066_v34, %v6084_v55 }
0x13e3   :  { %v8248_v52 = vpop.xlane.xlu0 %8247 }
0x13e7   :  { %v8251_v5 = vpop.xlane.xlu1 %8250  ;;  %v8308_v21 = vpop.permute.xlu0 %8307 }
0x13e8   :  { %v8324_v41 = vadd.f32 %v8308_v21, %v8251_v5  ;;  %v4927_v5 = vsel %vm4301_vm11, %v4902_v46, %v4898_v11  ;;  %v4918_v21 = vrot.slane %v12345_v38, %v13994_v12 }
0x13e9   :  { %v4928_v19 = vsel %vm4303_vm12, %v4906_v17, %v4927_v5  ;;  %v6644_v17 = vrot.slane %v12847_v37, %v13994_v12  ;;  %v14039_v37 = vld [vmem:[#allocation29_spill] sm:$0xff] }
0x13ea   :  { %8361 = vperm.xlu1 %9926, %v8324_v41   ;;  %v4922_v41 = vrot.slane %v12341_v45, %v13994_v12  ;;  %v4929_v38 = vsel %vm4305_vm13, %v4910_v61, %v4928_v19  ;;  %v14034_v45 = vld [vmem:[#allocation33_spill] sm:$0xff] }
0x13eb   :  { %v8301_v4 = vpop.permute.xlu1 %8300  ;;  %vm4862_vm4 = vcmp.eq.s32.totalorder %v14034_v45, 1  ;;  %v4930_v53 = vsel %vm4307_vm14, %v4914_v14, %v4929_v38  ;;  %v6086_v14 = vsel %vm4307_vm14, %v6070_v27, %v6085_v13 }
0x13ec   :  { %v8323_v57 = vadd.f32 %v8301_v4, %v8248_v52  ;;  %v5480_v52 = vrot.slane %v12507_v33, %v13994_v12  ;;  %v5488_v33 = vrot.slane %v12511_v51, %v13994_v12  ;;  %v14033_v4 = vld [vmem:[#allocation16_spill] sm:$0xff]  ;;  %v4926_v51 = vrot.slane %v12347_v24, %v13994_v12 }
0x13ed   :  { %vm4236_vm3 = vcmp.eq.s32.totalorder %v14033_v4, 1  ;;  %v4931_v1 = vsel %vm4309_vm0, %v4918_v21, %v4930_v53  ;;  %v6087_v21 = vsel %vm4309_vm0, %v6074_v47, %v6086_v14  ;;  %v14041_v4 = vld [vmem:[#allocation44_spill] sm:$0xff] }
0x13ee   :  { %8358 = vperm.xlu0 %9925, %v8323_v57   ;;  %v4314_v57 = vsel %vm4313_vm2, %v4300_v36, %v4312_v63  ;;  %v5505_v3 = vsel %vm4301_vm11, %v5480_v52, %v5476_v8  ;;  %v4932_v23 = vsel %vm4311_vm1, %v4922_v41, %v4931_v1  ;;  %v14037_v36 = vld [vmem:[#allocation42_spill] sm:$0xff]  ;;  %v6652_v52 = vrot.slane %v14038_v15, %v13994_v12 }
0x13ef   :  { %v13325_v29 = vpop.permute.xlu1 %7765  ;;  %v13360_v58 = vpop.permute.xlu0 %7768  ;;  %v5506_v49 = vsel %vm4303_vm12, %v5484_v30, %v5505_v3  ;;  %v4316_v24 = vsel %vm4236_vm3, %v4314_v57, 0.0  ;;  %v4933_v42 = vsel %vm4313_vm2, %v4926_v51, %v4932_v23  ;;  %v6648_v11 = vrot.slane %v14037_v36, %v13994_v12  ;;  %v14040_v30 = vld [vmem:[#allocation28_spill] sm:$0xff]  ;;  %v14042_v51 = vld [vmem:[#allocation30_spill] sm:$0xff] }
0x13f0   :  { %v5507_v56 = vsel %vm4305_vm13, %v5488_v33, %v5506_v49  ;;  %v7214_v63 = vrot.slane %v14039_v37, %v13994_v12  ;;  %v4935_v5 = vsel %vm4862_vm4, %v4933_v42, %v4316_v24  ;;  %v7218_v19 = vrot.slane %v14040_v30, %v13994_v12  ;;  %v14046_v23 = vld [vmem:[#allocation26_spill] sm:$0xff] }
0x13f1   :  { %v5508_v22 = vsel %vm4307_vm14, %v5492_v7, %v5507_v56  ;;  %v6088_v8 = vsel %vm4311_vm1, %v6078_v60, %v6087_v21  ;;  %v6663_v33 = vsel %vm4305_vm13, %v6644_v17, %v6662_v18  ;;  %v7210_v57 = vrot.slane %v14041_v4, %v13994_v12  ;;  %v14050_v60 = vld [vmem:[#allocation46_spill] sm:$0xff] }
0x13f2   :  { %8328 = vperm.xlu0 %9925, %v8326_v2   ;;  %v5509_v10 = vsel %vm4309_vm0, %v5496_v40, %v5508_v22  ;;  %v7792_v38 = vrot.slane %v13325_v29, %v13994_v12  ;;  %v6089_v45 = vsel %vm4313_vm2, %v6082_v0, %v6088_v8  ;;  %v6664_v53 = vsel %vm4307_vm14, %v6648_v11, %v6663_v33  ;;  %v14044_v29 = vld [vmem:[#allocation62_spill] sm:$0xff] }
0x13f3   :  { %v13335_v35 = vpop.permute.xlu1 %7771  ;;  %v5510_v16 = vsel %vm4311_vm1, %v5500_v54, %v5509_v10  ;;  %v7222_v3 = vrot.slane %v14042_v51, %v13994_v12  ;;  %v6665_v1 = vsel %vm4309_vm0, %v6652_v52, %v6664_v53  ;;  %v7239_v49 = vsel %vm4301_vm11, %v7214_v63, %v7210_v57  ;;  %v14043_v54 = vld [vmem:[#allocation45_spill] sm:$0xff]  ;;  %v14052_v53 = vld [vmem:[#allocation75_spill] sm:$0xff] }
0x13f4   :  { %v5511_v43 = vsel %vm4313_vm2, %v5504_v9, %v5510_v16  ;;  %v7226_v39 = vrot.slane %v14043_v54, %v13994_v12  ;;  %v7788_v24 = vrot.slane %v14044_v29, %v13994_v12  ;;  %v6656_v56 = vrot.slane %v14046_v23, %v13994_v12  ;;  %v14049_v16 = vld [vmem:[#allocation47_spill] sm:$0xff] }
0x13f5   :  { %v5513_v7 = vsel %vm5440_vm5, %v5511_v43, %v4935_v5  ;;  %v6660_v22 = vrot.slane %v14047_v32, %v13994_v12  ;;  %v7240_v26 = vsel %vm4303_vm12, %v7218_v19, %v7239_v49  ;;  %v7796_v9 = vrot.slane %v13360_v58, %v13994_v12  ;;  %v14051_v43 = vld [vmem:[#allocation31_spill] sm:$0xff] }
0x13f6   :  { %v7817_v34 = vsel %vm4301_vm11, %v7792_v38, %v7788_v24  ;;  %v7800_v42 = vrot.slane %v13335_v35, %v13994_v12  ;;  %v7241_v20 = vsel %vm4305_vm13, %v7222_v3, %v7240_v26  ;;  %v7230_v50 = vrot.slane %v14049_v16, %v13994_v12 }
0x13f7   :  { %v13349_v25 = vpop.permute.xlu1 %7774  ;;  %v7242_v35 = vsel %vm4307_vm14, %v7226_v39, %v7241_v20  ;;  %v7234_v6 = vrot.slane %v14050_v60, %v13994_v12  ;;  %v7238_v13 = vrot.slane %v14051_v43, %v13994_v12  ;;  %v6091_v33 = vsel %vm6018_vm7, %v6089_v45, %v5513_v7  ;;  %v14054_v39 = vld [vmem:[#allocation69_spill] sm:$0xff] }
0x13f8   :  { %v7804_v58 = vrot.slane %v13349_v25, %v13994_v12  ;;  %v7818_v25 = vsel %vm4303_vm12, %v7796_v9, %v7817_v34  ;;  %v7243_v28 = vsel %vm4309_vm0, %v7230_v50, %v7242_v35  ;;  %vm7174_vm9 = vcmp.eq.s32.totalorder %v14052_v53, 1 }
0x13f9   :  { %v7819_v36 = vsel %vm4305_vm13, %v7800_v42, %v7818_v25  ;;  %v7244_v63 = vsel %vm4311_vm1, %v7234_v6, %v7243_v28 }
0x13fa   :  { %v7820_v15 = vsel %vm4307_vm14, %v7804_v58, %v7819_v36  ;;  %v7245_v30 = vsel %vm4313_vm2, %v7238_v13, %v7244_v63 }
0x13fb   :  { %v13384_v2 = vpop.permute.xlu1 %7777 }
0x13ff   :  { %v13429_v46 = vpop.permute.xlu1 %7780 }
0x1400   :  { %v7812_v0 = vrot.slane %v13429_v46, %v13994_v12 }
0x142d   :  { %v8341_v41 = vpop.permute.xlu1 %8340 }
0x142e   :  { %v13386_v48 = vpop.permute.xlu0 %8343  ;;  %v8366_v10 = vrot.slane %v8341_v41, %v13994_v12 }
0x142f   :  { %v8370_v27 = vrot.slane %v13386_v48, %v13994_v12  ;;  %v7808_v48 = vrot.slane %v13384_v2, %v13994_v12 }
0x1431   :  { %v7784_v47 = vpop.permute.xlu1 %7783  ;;  %v8395_v11 = vsel %vm4301_vm11, %v8370_v27, %v8366_v10  ;;  %v7821_v5 = vsel %vm4309_vm0, %v7808_v48, %v7820_v15 }
0x1432   :  { %v7816_v14 = vrot.slane %v7784_v47, %v13994_v12  ;;  %v7822_v19 = vsel %vm4311_vm1, %v7812_v0, %v7821_v5 }
0x1434   :  { %v7823_v4 = vsel %vm4313_vm2, %v7816_v14, %v7822_v19 }
0x1441   :  { %v13415_v31 = vpop.permute.xlu0 %8346 }
0x1442   :  { %v8374_v59 = vrot.slane %v13415_v31, %v13994_v12 }
0x1444   :  { %v8396_v52 = vsel %vm4303_vm12, %v8374_v59, %v8395_v11 }
0x1449   :  { %v8350_v61 = vpop.permute.xlu0 %8349 }
0x144a   :  { %v8378_v17 = vrot.slane %v8350_v61, %v13994_v12  ;;  %v6666_v61 = vsel %vm4311_vm1, %v6656_v56, %v6665_v1 }
0x144b   :  { %v6667_v46 = vsel %vm4313_vm2, %v6660_v22, %v6666_v61 }
0x144c   :  { %v8397_v21 = vsel %vm4305_vm13, %v8378_v17, %v8396_v52  ;;  %v6669_v51 = vsel %vm6596_vm8, %v6667_v46, %v6091_v33  ;;  %vm8412_vm13 = vcmask 7168  }
0x144d   :  { %v7247_v1 = vsel %vm7174_vm9, %v7245_v30, %v6669_v51 }
0x1455   :  { %v8353_v40 = vpop.permute.xlu0 %8352 }
0x1456   :  { %v8382_v31 = vrot.slane %v8353_v40, %v13994_v12  ;;  %v14053_v40 = vld [vmem:[#allocation48_spill] sm:$0xff] }
0x1457   :  { %vm7752_vm11 = vcmp.eq.s32.totalorder %v14053_v40, 1 }
0x1458   :  { %v8398_v41 = vsel %vm4307_vm14, %v8382_v31, %v8397_v21  ;;  %v7825_v7 = vsel %vm7752_vm11, %v7823_v4, %v7247_v1 }
0x145d   :  { %v8356_v55 = vpop.permute.xlu0 %8355 }
0x145e   :  { %v8386_v2 = vrot.slane %v8356_v55, %v13994_v12 }
0x1460   :  { %v8399_v57 = vsel %vm4309_vm0, %v8386_v2, %v8398_v41 }
0x1469   :  { %v8362_v37 = vpop.permute.xlu1 %8361 }
0x146a   :  { %v8394_v38 = vrot.slane %v8362_v37, %v13994_v12 }
0x146d   :  { %v8359_v18 = vpop.permute.xlu0 %8358 }
0x146e   :  { %v8390_v8 = vrot.slane %v8359_v18, %v13994_v12 }
0x1470   :  { %v8400_v3 = vsel %vm4311_vm1, %v8390_v8, %v8399_v57 }
0x1471   :  { %v8401_v49 = vsel %vm4313_vm2, %v8394_v38, %v8400_v3  ;;  %v8329_v54 = vpop.permute.xlu0 %8328 }
0x1472   :  { %vm8330_vm12 = vcmp.eq.s32.totalorder %v8329_v54, 1 }
0x1473   :  { %v8403_v45 = vsel %vm8330_vm12, %v8401_v49, %v7825_v7 }
0x1474   :  { %v8408_v29 = vadd.f32 %v8403_v45, %v14054_v39 }
0x1476   :  { %v8409_v12 = vsel %vm4019_vm10, %v8408_v29, -inf }
0x1477   :  { %8410 = vmax.xlane.f32.xlu1 %v8409_v12 }
0x1504   :  { %v8411_v24 = vpop.xlane.xlu1 %8410 }
0x1505   :  { %8413 = vst.msk [vmem:[%s13550_s10] sm:$0xff] %vm8412_vm13, %v8411_v24 }
0x1506   :  { %8418 = vsyncpa [#allocation8], 1 }
0x1507   :  { %8419 = vsyncpa [#allocation10], 1 }

</bundles_post_ra>
